<compile_context>
chip_gen: v5e
topology: v5e:2x2
jax: 0.10.0
libtpu: 0.0.40
codegen_flags: <defaults>
</compile_context>

<pallas_src>
import jax
import jax.numpy as jnp
from jax import lax
from jax.experimental import pallas as pl
from jax.experimental.pallas import tpu as pltpu


def _encoder_kernel(x_ref, w1_ref, b1_ref, w2_ref, w3g_ref, w3f_ref,
                    b3_ref, w4_ref, b4_ref, o_ref):
    """Process a tile of TG point groups end-to-end.

    x_ref   : VMEM (TG, N, 6)  f32 points
    w*_ref  : VMEM bf16 weights (BN already folded)
    b*_ref  : VMEM (1, C) f32 biases (b2 is pre-folded into b3)
    o_ref   : VMEM (TG, C) pooled group features (lane-dense C)
    """
    tg, n, cin = x_ref.shape
    c2 = w2_ref.shape[1]
    c3 = w3f_ref.shape[1]
    c4 = w4_ref.shape[1]
    bf16 = jnp.bfloat16

    x = x_ref[...].reshape(tg * n, cin).astype(bf16)

    # first_conv: Conv1d(6,128,1) + BN1 + ReLU  (BN folded into w1/b1)
    h1 = jnp.maximum(
        jnp.dot(x, w1_ref[...], preferred_element_type=jnp.float32) + b1_ref[...],
        0.0)

    # Conv1d(128,256,1).  b2 is folded into b3 in the wrapper (it commutes with the
    # point-max and is linear through W3), so h2 here is bias-free.
    h2 = jnp.dot(h1.astype(bf16), w2_ref[...], preferred_element_type=jnp.float32)

    # per-group max over the N points -> global feature (TG, 256)
    gmax = jnp.max(h2.reshape(tg, n, c2), axis=1)

    # second_conv layer 1 on concat([global, per-point], ch) + BN2 + ReLU.
    # The concat is fused away:  f @ W3 = g @ W3[:256] + h2 @ W3[256:]
    part_f = jnp.dot(h2.astype(bf16), w3f_ref[...],
                     preferred_element_type=jnp.float32)              # (TG*N, 512)
    pg = jnp.dot(gmax.astype(bf16), w3g_ref[...],
                 preferred_element_type=jnp.float32) + b3_ref[...]    # (TG, 512) small add
    h4 = jnp.maximum(part_f.reshape(tg, n, c3) + pg.reshape(tg, 1, c3), 0.0)

    # second_conv layer 2: Conv1d(512, C, 1), then max over points
    h5 = jnp.dot(h4.reshape(tg * n, c3).astype(bf16), w4_ref[...],
                 preferred_element_type=jnp.float32) + b4_ref[...]
    o_ref[...] = jnp.max(h5.reshape(tg, n, c4), axis=1).astype(o_ref.dtype)


def encoder_forward(point_groups: jax.Array, params: dict, *,
                    tile_groups: int = 32) -> jax.Array:
    """point_groups: (B, G, N, 6) -> (B, G, encoder_channel)."""
    B, G, N, Cin = point_groups.shape
    assert Cin == 6, "Encoder expects 6 input features per point"
    BG = B * G
    x = point_groups.reshape(BG, N, Cin).astype(jnp.float32)
    eps = params["eps"]

    # ---- fold eval-mode BatchNorm (and conv2's bias) into the convs (f32, one-time) ----
    # TODO(synk): training-mode BatchNorm (batch statistics over B*G*N) is not
    #             implemented; the kernel uses running statistics (inference semantics).
    s1 = params["bn1_gamma"] * lax.rsqrt(params["bn1_var"] + eps)
    w1 = params["conv1_w"].T * s1[None, :]                                     # (6, 128)
    b1 = (params["conv1_b"] - params["bn1_mean"]) * s1 + params["bn1_beta"]    # (128,)
    w2 = params["conv2_w"].T                                                   # (128, 256)
    b2 = params["conv2_b"]                                                     # (256,)
    s2 = params["bn2_gamma"] * lax.rsqrt(params["bn2_var"] + eps)
    w3 = params["conv3_w"].T * s2[None, :]                                     # (512, 512)
    b3 = (params["conv3_b"] - params["bn2_mean"]) * s2 + params["bn2_beta"]    # (512,)
    c2 = w2.shape[1]
    w3g, w3f = w3[:c2, :], w3[c2:, :]          # global-feature half / per-point half
    # b2 is a per-channel constant: it commutes with the point-max and is linear
    # through W3, so fold it here instead of adding it over (TG*N, 256) per step.
    b3 = b3 + b2 @ w3g + b2 @ w3f                                              # (512,)
    w4 = params["conv4_w"].T                                                   # (512, C)
    b4 = params["conv4_b"]                                                     # (C,)
    C = w4.shape[1]

    # keep the output lane-dense: pad C up to a multiple of 128 if needed
    c_pad = (-C) % 128
    if c_pad:
        w4 = jnp.pad(w4, ((0, 0), (0, c_pad)))
        b4 = jnp.pad(b4, (0, c_pad))
    Cp = C + c_pad

    # MXU operands in bf16 (accumulation stays f32 inside the kernel)
    w1, w2, w3g, w3f, w4 = (w.astype(jnp.bfloat16) for w in (w1, w2, w3g, w3f, w4))

    # ---- pick the group tile: multiple of 8, amortize per-step overhead, but keep
    # >= 2 grid steps when the workload allows it (v7x megacore shards "parallel"). ----
    tg = max(8, (min(int(tile_groups), max(BG, 8)) // 8) * 8)
    while tg > 8 and pl.cdiv(BG, tg) < 2:
        tg = max(8, ((tg // 2) // 8) * 8)

    pad = (-BG) % tg
    if pad:
        x = jnp.concatenate([x, jnp.zeros((pad, N, Cin), x.dtype)], axis=0)
    bg_pad = BG + pad

    def _wspec(shape, buffering):
        # grid-invariant weight/bias block: index_map always returns block (0, 0)
        if buffering is None:
            return pl.BlockSpec(shape, lambda i: (0, 0))
        return pl.BlockSpec(shape, lambda i: (0, 0), pipeline_mode=buffering)

    def _run(weight_buffering):
        return pl.pallas_call(
            _encoder_kernel,
            out_shape=jax.ShapeDtypeStruct((bg_pad, Cp), jnp.float32),
            grid=(bg_pad // tg,),
            in_specs=[
                pl.BlockSpec((tg, N, Cin), lambda i: (i, 0, 0)),
                _wspec(w1.shape, weight_buffering),
                _wspec((1, b1.shape[0]), weight_buffering),
                _wspec(w2.shape, weight_buffering),
                _wspec(w3g.shape, weight_buffering),
                _wspec(w3f.shape, weight_buffering),
                _wspec((1, b3.shape[0]), weight_buffering),
                _wspec(w4.shape, weight_buffering),
                _wspec((1, Cp), weight_buffering),
            ],
            out_specs=pl.BlockSpec((tg, Cp), lambda i: (i, 0)),
            compiler_params=pltpu.CompilerParams(
                dimension_semantics=("parallel",),
                # sized against the tightest generations: above v5e's 16 MiB scoped
                # default, comfortably inside v7x's 64 MiB physical VMEM.
                vmem_limit_bytes=32 * 1024 * 1024,
            ),
        )(x, w1, b1.reshape(1, -1), w2, w3g, w3f, b3.reshape(1, -1),
          w4, b4.reshape(1, -1))

    try:
        # weights/biases never change across grid steps -> one VMEM buffer is enough
        out = _run(pl.Buffered(1))
    except Exception:
        # fallback for Pallas builds that reject pipeline_mode on this path
        out = _run(None)

    return out[:BG, :C].reshape(B, G, C)


def encoder_reference(point_groups: jax.Array, params: dict) -> jax.Array:
    """Pure-JAX f32 reference mirroring the torch module (eval-mode BN)."""
    B, G, N, Cin = point_groups.shape
    eps = params["eps"]
    x = point_groups.reshape(B * G, N, Cin).astype(jnp.float32)

    h = x @ params["conv1_w"].T + params["conv1_b"]
    h = (h - params["bn1_mean"]) * lax.rsqrt(params["bn1_var"] + eps) \
        * params["bn1_gamma"] + params["bn1_beta"]
    h = jnp.maximum(h, 0.0)
    h = h @ params["conv2_w"].T + params["conv2_b"]                    # (BG, N, 256)

    g = jnp.max(h, axis=1, keepdims=True)                              # (BG, 1, 256)
    f = jnp.concatenate([jnp.broadcast_to(g, h.shape), h], axis=-1)    # (BG, N, 512)

    f = f @ params["conv3_w"].T + params["conv3_b"]
    f = (f - params["bn2_mean"]) * lax.rsqrt(params["bn2_var"] + eps) \
        * params["bn2_gamma"] + params["bn2_beta"]
    f = jnp.maximum(f, 0.0)
    f = f @ params["conv4_w"].T + params["conv4_b"]                    # (BG, N, C)

    return jnp.max(f, axis=1).reshape(B, G, -1)


def _make_params(key, encoder_channel: int):
    ks = jax.random.split(key, 12)

    def w(k, shape, fan_in):
        return jax.random.normal(k, shape, jnp.float32) / jnp.sqrt(fan_in)

    return {
        "conv1_w": w(ks[0], (128, 6), 6.0),
        "conv1_b": 0.1 * jax.random.normal(ks[1], (128,), jnp.float32),
        "bn1_gamma": 0.5 + jax.random.uniform(ks[2], (128,), jnp.float32),
        "bn1_beta": 0.1 * jax.random.normal(ks[3], (128,), jnp.float32),
        "bn1_mean": 0.1 * jax.random.normal(ks[4], (128,), jnp.float32),
        "bn1_var": 0.5 + jax.random.uniform(ks[5], (128,), jnp.float32),
        "conv2_w": w(ks[6], (256, 128), 128.0),
        "conv2_b": 0.1 * jax.random.normal(ks[7], (256,), jnp.float32),
        "conv3_w": w(ks[8], (512, 512), 512.0),
        "conv3_b": 0.1 * jax.random.normal(ks[9], (512,), jnp.float32),
        "bn2_gamma": 0.5 + jax.random.uniform(ks[10], (512,), jnp.float32),
        "bn2_beta": jnp.zeros((512,), jnp.float32),
        "bn2_mean": jnp.zeros((512,), jnp.float32),
        "bn2_var": jnp.ones((512,), jnp.float32),
        "conv4_w": w(ks[11], (encoder_channel, 512), 512.0),
        "conv4_b": jnp.zeros((encoder_channel,), jnp.float32),
        "eps": 1e-5,
    }


if __name__ == "__main__":
    B, G, N, Cin = 2, 4, 32, 6          # small: 2 batches x 4 groups x 32 points x 6 feats
    encoder_channel = 256

    key = jax.random.PRNGKey(0)
    kx, kp = jax.random.split(key)
    point_groups = jax.random.normal(kx, (B, G, N, Cin), dtype=jnp.float32)
    params = _make_params(kp, encoder_channel)

    out = encoder_forward(point_groups, params, tile_groups=32)
    out = jax.block_until_ready(out)

    ref = encoder_reference(point_groups, params)
    ref = jax.block_until_ready(ref)

    assert out.shape == (B, G, encoder_channel), out.shape
    # bf16 MXU operands (f32 accumulation) -> loosen tolerance vs. the f32 reference
    max_diff = float(jnp.max(jnp.abs(out - ref)))
    assert jnp.allclose(out, ref, atol=1e-1, rtol=1e-1), (
        "mismatch vs reference; max abs diff = %f" % max_diff)
    print("KERNEL_OK")
</pallas_src>

<mosaic_0001>
module attributes {stable_mosaic.version = 11 : i64} {
  func.func @_encoder_kernel(%arg0: i32, %arg1: memref<8x32x6xf32, #tpu.memory_space<vmem>>, %arg2: memref<6x128xbf16, #tpu.memory_space<vmem>>, %arg3: memref<1x128xf32, #tpu.memory_space<vmem>>, %arg4: memref<128x256xbf16, #tpu.memory_space<vmem>>, %arg5: memref<256x512xbf16, #tpu.memory_space<vmem>>, %arg6: memref<256x512xbf16, #tpu.memory_space<vmem>>, %arg7: memref<1x512xf32, #tpu.memory_space<vmem>>, %arg8: memref<512x256xbf16, #tpu.memory_space<vmem>>, %arg9: memref<1x256xf32, #tpu.memory_space<vmem>>, %arg10: memref<8x256xf32, #tpu.memory_space<vmem>>) attributes {dimension_semantics = [#tpu.dimension_semantics<parallel>], iteration_bounds = array<i64: 1>, scalar_prefetch = 0 : i64, scratch_operands = 0 : i64, tpu.core_type = #tpu.core_type<tc>, window_params = [{transform_indices = @transform_0, window_bounds = array<i64: 8, 32, 6>}, {pipeline_mode = #tpu.pipeline_mode<synchronous>, transform_indices = @transform_1, window_bounds = array<i64: 6, 128>}, {pipeline_mode = #tpu.pipeline_mode<synchronous>, transform_indices = @transform_2, window_bounds = array<i64: 1, 128>}, {pipeline_mode = #tpu.pipeline_mode<synchronous>, transform_indices = @transform_3, window_bounds = array<i64: 128, 256>}, {pipeline_mode = #tpu.pipeline_mode<synchronous>, transform_indices = @transform_4, window_bounds = array<i64: 256, 512>}, {pipeline_mode = #tpu.pipeline_mode<synchronous>, transform_indices = @transform_5, window_bounds = array<i64: 256, 512>}, {pipeline_mode = #tpu.pipeline_mode<synchronous>, transform_indices = @transform_6, window_bounds = array<i64: 1, 512>}, {pipeline_mode = #tpu.pipeline_mode<synchronous>, transform_indices = @transform_7, window_bounds = array<i64: 512, 256>}, {pipeline_mode = #tpu.pipeline_mode<synchronous>, transform_indices = @transform_8, window_bounds = array<i64: 1, 256>}, {transform_indices = @transform_9, window_bounds = array<i64: 8, 256>}]} {
    %c0 = arith.constant 0 : index
    %c0_0 = arith.constant 0 : index
    %c0_1 = arith.constant 0 : index
    %0 = vector.load %arg1[%c0, %c0_0, %c0_1] : memref<8x32x6xf32, #tpu.memory_space<vmem>>, vector<8x32x6xf32>
    %1 = vector.shape_cast %0 : vector<8x32x6xf32> to vector<256x6xf32>
    %2 = arith.truncf %1 : vector<256x6xf32> to vector<256x6xbf16>
    %c0_2 = arith.constant 0 : index
    %c0_3 = arith.constant 0 : index
    %3 = vector.load %arg2[%c0_2, %c0_3] : memref<6x128xbf16, #tpu.memory_space<vmem>>, vector<6x128xbf16>
    %cst = arith.constant dense<0.000000e+00> : vector<256x128xf32>
    %4 = tpu.matmul %2, %3, %cst {dimension_numbers = #tpu.dot_dimension_numbers<[1], [0], [0], [1], [0, 0, 1, 1], [], []>} : vector<256x6xbf16>, vector<6x128xbf16>, vector<256x128xf32> -> vector<256x128xf32>
    %c0_4 = arith.constant 0 : index
    %c0_5 = arith.constant 0 : index
    %5 = vector.load %arg3[%c0_4, %c0_5] : memref<1x128xf32, #tpu.memory_space<vmem>>, vector<1x128xf32>
    %6 = vector.broadcast %5 : vector<1x128xf32> to vector<256x128xf32>
    %7 = arith.addf %4, %6 : vector<256x128xf32>
    %cst_6 = arith.constant 0.000000e+00 : f32
    %8 = vector.broadcast %cst_6 : f32 to vector<256x128xf32>
    %9 = arith.maximumf %7, %8 : vector<256x128xf32>
    %10 = arith.truncf %9 : vector<256x128xf32> to vector<256x128xbf16>
    %c0_7 = arith.constant 0 : index
    %c0_8 = arith.constant 0 : index
    %11 = vector.load %arg4[%c0_7, %c0_8] : memref<128x256xbf16, #tpu.memory_space<vmem>>, vector<128x256xbf16>
    %cst_9 = arith.constant dense<0.000000e+00> : vector<256x256xf32>
    %12 = tpu.matmul %10, %11, %cst_9 {dimension_numbers = #tpu.dot_dimension_numbers<[1], [0], [0], [1], [0, 0, 1, 1], [], []>} : vector<256x128xbf16>, vector<128x256xbf16>, vector<256x256xf32> -> vector<256x256xf32>
    %13 = vector.shape_cast %12 : vector<256x256xf32> to vector<8x32x256xf32>
    %cst_10 = arith.constant dense<0xFF800000> : vector<8x256xf32>
    %14 = vector.multi_reduction <maximumf>, %13, %cst_10 [1] : vector<8x32x256xf32> to vector<8x256xf32>
    %15 = arith.truncf %12 : vector<256x256xf32> to vector<256x256xbf16>
    %c0_11 = arith.constant 0 : index
    %c0_12 = arith.constant 0 : index
    %16 = vector.load %arg6[%c0_11, %c0_12] : memref<256x512xbf16, #tpu.memory_space<vmem>>, vector<256x512xbf16>
    %cst_13 = arith.constant dense<0.000000e+00> : vector<256x512xf32>
    %17 = tpu.matmul %15, %16, %cst_13 {dimension_numbers = #tpu.dot_dimension_numbers<[1], [0], [0], [1], [0, 0, 1, 1], [], []>} : vector<256x256xbf16>, vector<256x512xbf16>, vector<256x512xf32> -> vector<256x512xf32>
    %18 = arith.truncf %14 : vector<8x256xf32> to vector<8x256xbf16>
    %c0_14 = arith.constant 0 : index
    %c0_15 = arith.constant 0 : index
    %19 = vector.load %arg5[%c0_14, %c0_15] : memref<256x512xbf16, #tpu.memory_space<vmem>>, vector<256x512xbf16>
    %cst_16 = arith.constant dense<0.000000e+00> : vector<8x512xf32>
    %20 = tpu.matmul %18, %19, %cst_16 {dimension_numbers = #tpu.dot_dimension_numbers<[1], [0], [0], [1], [0, 0, 1, 1], [], []>} : vector<8x256xbf16>, vector<256x512xbf16>, vector<8x512xf32> -> vector<8x512xf32>
    %c0_17 = arith.constant 0 : index
    %c0_18 = arith.constant 0 : index
    %21 = vector.load %arg7[%c0_17, %c0_18] : memref<1x512xf32, #tpu.memory_space<vmem>>, vector<1x512xf32>
    %22 = vector.broadcast %21 : vector<1x512xf32> to vector<8x512xf32>
    %23 = arith.addf %20, %22 : vector<8x512xf32>
    %24 = vector.shape_cast %17 : vector<256x512xf32> to vector<8x32x512xf32>
    %25 = vector.shape_cast %23 : vector<8x512xf32> to vector<8x1x512xf32>
    %26 = vector.broadcast %25 : vector<8x1x512xf32> to vector<8x32x512xf32>
    %27 = arith.addf %24, %26 : vector<8x32x512xf32>
    %cst_19 = arith.constant 0.000000e+00 : f32
    %28 = vector.broadcast %cst_19 : f32 to vector<8x32x512xf32>
    %29 = arith.maximumf %27, %28 : vector<8x32x512xf32>
    %30 = vector.shape_cast %29 : vector<8x32x512xf32> to vector<256x512xf32>
    %31 = arith.truncf %30 : vector<256x512xf32> to vector<256x512xbf16>
    %c0_20 = arith.constant 0 : index
    %c0_21 = arith.constant 0 : index
    %32 = vector.load %arg8[%c0_20, %c0_21] : memref<512x256xbf16, #tpu.memory_space<vmem>>, vector<512x256xbf16>
    %cst_22 = arith.constant dense<0.000000e+00> : vector<256x256xf32>
    %33 = tpu.matmul %31, %32, %cst_22 {dimension_numbers = #tpu.dot_dimension_numbers<[1], [0], [0], [1], [0, 0, 1, 1], [], []>} : vector<256x512xbf16>, vector<512x256xbf16>, vector<256x256xf32> -> vector<256x256xf32>
    %c0_23 = arith.constant 0 : index
    %c0_24 = arith.constant 0 : index
    %34 = vector.load %arg9[%c0_23, %c0_24] : memref<1x256xf32, #tpu.memory_space<vmem>>, vector<1x256xf32>
    %35 = vector.broadcast %34 : vector<1x256xf32> to vector<256x256xf32>
    %36 = arith.addf %33, %35 : vector<256x256xf32>
    %37 = vector.shape_cast %36 : vector<256x256xf32> to vector<8x32x256xf32>
    %cst_25 = arith.constant dense<0xFF800000> : vector<8x256xf32>
    %38 = vector.multi_reduction <maximumf>, %37, %cst_25 [1] : vector<8x32x256xf32> to vector<8x256xf32>
    %c0_26 = arith.constant 0 : index
    %c0_27 = arith.constant 0 : index
    %39 = vector.load %arg10[%c0_26, %c0_27] : memref<8x256xf32, #tpu.memory_space<vmem>>, vector<8x256xf32>
    tpu.vector_store %arg10[%c0_26, %c0_27], %38 {strides = array<i32>} : memref<8x256xf32, #tpu.memory_space<vmem>>, vector<8x256xf32>,
    return
  }
  func.func @transform_0(%arg0: i32) -> (i32, i32, i32) {
    %c0_i32 = arith.constant 0 : i32
    %c0_i32_0 = arith.constant 0 : i32
    %c0_i32_1 = arith.constant 0 : i32
    return %arg0, %c0_i32, %c0_i32_0 : i32, i32, i32
  }
  func.func @transform_1(%arg0: i32) -> (i32, i32) {
    %c0_i32 = arith.constant 0 : i32
    %c0_i32_0 = arith.constant 0 : i32
    %c0_i32_1 = arith.constant 0 : i32
    return %c0_i32, %c0_i32_0 : i32, i32
  }
  func.func @transform_2(%arg0: i32) -> (i32, i32) {
    %c0_i32 = arith.constant 0 : i32
    %c0_i32_0 = arith.constant 0 : i32
    %c0_i32_1 = arith.constant 0 : i32
    return %c0_i32, %c0_i32_0 : i32, i32
  }
  func.func @transform_3(%arg0: i32) -> (i32, i32) {
    %c0_i32 = arith.constant 0 : i32
    %c0_i32_0 = arith.constant 0 : i32
    %c0_i32_1 = arith.constant 0 : i32
    return %c0_i32, %c0_i32_0 : i32, i32
  }
  func.func @transform_4(%arg0: i32) -> (i32, i32) {
    %c0_i32 = arith.constant 0 : i32
    %c0_i32_0 = arith.constant 0 : i32
    %c0_i32_1 = arith.constant 0 : i32
    return %c0_i32, %c0_i32_0 : i32, i32
  }
  func.func @transform_5(%arg0: i32) -> (i32, i32) {
    %c0_i32 = arith.constant 0 : i32
    %c0_i32_0 = arith.constant 0 : i32
    %c0_i32_1 = arith.constant 0 : i32
    return %c0_i32, %c0_i32_0 : i32, i32
  }
  func.func @transform_6(%arg0: i32) -> (i32, i32) {
    %c0_i32 = arith.constant 0 : i32
    %c0_i32_0 = arith.constant 0 : i32
    %c0_i32_1 = arith.constant 0 : i32
    return %c0_i32, %c0_i32_0 : i32, i32
  }
  func.func @transform_7(%arg0: i32) -> (i32, i32) {
    %c0_i32 = arith.constant 0 : i32
    %c0_i32_0 = arith.constant 0 : i32
    %c0_i32_1 = arith.constant 0 : i32
    return %c0_i32, %c0_i32_0 : i32, i32
  }
  func.func @transform_8(%arg0: i32) -> (i32, i32) {
    %c0_i32 = arith.constant 0 : i32
    %c0_i32_0 = arith.constant 0 : i32
    %c0_i32_1 = arith.constant 0 : i32
    return %c0_i32, %c0_i32_0 : i32, i32
  }
  func.func @transform_9(%arg0: i32) -> (i32, i32) {
    %c0_i32 = arith.constant 0 : i32
    %c0_i32_0 = arith.constant 0 : i32
    return %arg0, %c0_i32 : i32, i32
  }
}

module attributes {stable_mosaic.version = 11 : i64} {
  func.func @_encoder_kernel(%arg0: i32, %arg1: memref<8x32x6xf32, #tpu.memory_space<vmem>>, %arg2: memref<6x128xbf16, #tpu.memory_space<vmem>>, %arg3: memref<1x128xf32, #tpu.memory_space<vmem>>, %arg4: memref<128x256xbf16, #tpu.memory_space<vmem>>, %arg5: memref<256x512xbf16, #tpu.memory_space<vmem>>, %arg6: memref<256x512xbf16, #tpu.memory_space<vmem>>, %arg7: memref<1x512xf32, #tpu.memory_space<vmem>>, %arg8: memref<512x256xbf16, #tpu.memory_space<vmem>>, %arg9: memref<1x256xf32, #tpu.memory_space<vmem>>, %arg10: memref<8x256xf32, #tpu.memory_space<vmem>>) attributes {dimension_semantics = [#tpu.dimension_semantics<parallel>], iteration_bounds = array<i64: 1>, scalar_prefetch = 0 : i64, scratch_operands = 0 : i64, tpu.core_type = #tpu.core_type<tc>, window_params = [{transform_indices = @transform_0, window_bounds = array<i64: 8, 32, 6>}, {pipeline_mode = #tpu.pipeline_mode<synchronous>, transform_indices = @transform_1, window_bounds = array<i64: 6, 128>}, {pipeline_mode = #tpu.pipeline_mode<synchronous>, transform_indices = @transform_2, window_bounds = array<i64: 1, 128>}, {pipeline_mode = #tpu.pipeline_mode<synchronous>, transform_indices = @transform_3, window_bounds = array<i64: 128, 256>}, {pipeline_mode = #tpu.pipeline_mode<synchronous>, transform_indices = @transform_4, window_bounds = array<i64: 256, 512>}, {pipeline_mode = #tpu.pipeline_mode<synchronous>, transform_indices = @transform_5, window_bounds = array<i64: 256, 512>}, {pipeline_mode = #tpu.pipeline_mode<synchronous>, transform_indices = @transform_6, window_bounds = array<i64: 1, 512>}, {pipeline_mode = #tpu.pipeline_mode<synchronous>, transform_indices = @transform_7, window_bounds = array<i64: 512, 256>}, {pipeline_mode = #tpu.pipeline_mode<synchronous>, transform_indices = @transform_8, window_bounds = array<i64: 1, 256>}, {transform_indices = @transform_9, window_bounds = array<i64: 8, 256>}]} {
    %c0 = arith.constant 0 : index
    %c0_0 = arith.constant 0 : index
    %c0_1 = arith.constant 0 : index
    %0 = vector.load %arg1[%c0, %c0_0, %c0_1] : memref<8x32x6xf32, #tpu.memory_space<vmem>>, vector<8x32x6xf32>
    %1 = vector.shape_cast %0 : vector<8x32x6xf32> to vector<256x6xf32>
    %2 = arith.truncf %1 : vector<256x6xf32> to vector<256x6xbf16>
    %c0_2 = arith.constant 0 : index
    %c0_3 = arith.constant 0 : index
    %3 = vector.load %arg2[%c0_2, %c0_3] : memref<6x128xbf16, #tpu.memory_space<vmem>>, vector<6x128xbf16>
    %cst = arith.constant dense<0.000000e+00> : vector<256x128xf32>
    %4 = tpu.matmul %2, %3, %cst {dimension_numbers = #tpu.dot_dimension_numbers<[1], [0], [0], [1], [0, 0, 1, 1], [], []>} : vector<256x6xbf16>, vector<6x128xbf16>, vector<256x128xf32> -> vector<256x128xf32>
    %c0_4 = arith.constant 0 : index
    %c0_5 = arith.constant 0 : index
    %5 = vector.load %arg3[%c0_4, %c0_5] : memref<1x128xf32, #tpu.memory_space<vmem>>, vector<1x128xf32>
    %6 = vector.broadcast %5 : vector<1x128xf32> to vector<256x128xf32>
    %7 = arith.addf %4, %6 : vector<256x128xf32>
    %cst_6 = arith.constant 0.000000e+00 : f32
    %8 = vector.broadcast %cst_6 : f32 to vector<256x128xf32>
    %9 = arith.maximumf %7, %8 : vector<256x128xf32>
    %10 = arith.truncf %9 : vector<256x128xf32> to vector<256x128xbf16>
    %c0_7 = arith.constant 0 : index
    %c0_8 = arith.constant 0 : index
    %11 = vector.load %arg4[%c0_7, %c0_8] : memref<128x256xbf16, #tpu.memory_space<vmem>>, vector<128x256xbf16>
    %cst_9 = arith.constant dense<0.000000e+00> : vector<256x256xf32>
    %12 = tpu.matmul %10, %11, %cst_9 {dimension_numbers = #tpu.dot_dimension_numbers<[1], [0], [0], [1], [0, 0, 1, 1], [], []>} : vector<256x128xbf16>, vector<128x256xbf16>, vector<256x256xf32> -> vector<256x256xf32>
    %13 = vector.shape_cast %12 : vector<256x256xf32> to vector<8x32x256xf32>
    %cst_10 = arith.constant dense<0xFF800000> : vector<8x256xf32>
    %14 = vector.multi_reduction <maximumf>, %13, %cst_10 [1] : vector<8x32x256xf32> to vector<8x256xf32>
    %15 = arith.truncf %12 : vector<256x256xf32> to vector<256x256xbf16>
    %c0_11 = arith.constant 0 : index
    %c0_12 = arith.constant 0 : index
    %16 = vector.load %arg6[%c0_11, %c0_12] : memref<256x512xbf16, #tpu.memory_space<vmem>>, vector<256x512xbf16>
    %cst_13 = arith.constant dense<0.000000e+00> : vector<256x512xf32>
    %17 = tpu.matmul %15, %16, %cst_13 {dimension_numbers = #tpu.dot_dimension_numbers<[1], [0], [0], [1], [0, 0, 1, 1], [], []>} : vector<256x256xbf16>, vector<256x512xbf16>, vector<256x512xf32> -> vector<256x512xf32>
    %18 = arith.truncf %14 : vector<8x256xf32> to vector<8x256xbf16>
    %c0_14 = arith.constant 0 : index
    %c0_15 = arith.constant 0 : index
    %19 = vector.load %arg5[%c0_14, %c0_15] : memref<256x512xbf16, #tpu.memory_space<vmem>>, vector<256x512xbf16>
    %cst_16 = arith.constant dense<0.000000e+00> : vector<8x512xf32>
    %20 = tpu.matmul %18, %19, %cst_16 {dimension_numbers = #tpu.dot_dimension_numbers<[1], [0], [0], [1], [0, 0, 1, 1], [], []>} : vector<8x256xbf16>, vector<256x512xbf16>, vector<8x512xf32> -> vector<8x512xf32>
    %c0_17 = arith.constant 0 : index
    %c0_18 = arith.constant 0 : index
    %21 = vector.load %arg7[%c0_17, %c0_18] : memref<1x512xf32, #tpu.memory_space<vmem>>, vector<1x512xf32>
    %22 = vector.broadcast %21 : vector<1x512xf32> to vector<8x512xf32>
    %23 = arith.addf %20, %22 : vector<8x512xf32>
    %24 = vector.shape_cast %17 : vector<256x512xf32> to vector<8x32x512xf32>
    %25 = vector.shape_cast %23 : vector<8x512xf32> to vector<8x1x512xf32>
    %26 = vector.broadcast %25 : vector<8x1x512xf32> to vector<8x32x512xf32>
    %27 = arith.addf %24, %26 : vector<8x32x512xf32>
    %cst_19 = arith.constant 0.000000e+00 : f32
    %28 = vector.broadcast %cst_19 : f32 to vector<8x32x512xf32>
    %29 = arith.maximumf %27, %28 : vector<8x32x512xf32>
    %30 = vector.shape_cast %29 : vector<8x32x512xf32> to vector<256x512xf32>
    %31 = arith.truncf %30 : vector<256x512xf32> to vector<256x512xbf16>
    %c0_20 = arith.constant 0 : index
    %c0_21 = arith.constant 0 : index
    %32 = vector.load %arg8[%c0_20, %c0_21] : memref<512x256xbf16, #tpu.memory_space<vmem>>, vector<512x256xbf16>
    %cst_22 = arith.constant dense<0.000000e+00> : vector<256x256xf32>
    %33 = tpu.matmul %31, %32, %cst_22 {dimension_numbers = #tpu.dot_dimension_numbers<[1], [0], [0], [1], [0, 0, 1, 1], [], []>} : vector<256x512xbf16>, vector<512x256xbf16>, vector<256x256xf32> -> vector<256x256xf32>
    %c0_23 = arith.constant 0 : index
    %c0_24 = arith.constant 0 : index
    %34 = vector.load %arg9[%c0_23, %c0_24] : memref<1x256xf32, #tpu.memory_space<vmem>>, vector<1x256xf32>
    %35 = vector.broadcast %34 : vector<1x256xf32> to vector<256x256xf32>
    %36 = arith.addf %33, %35 : vector<256x256xf32>
    %37 = vector.shape_cast %36 : vector<256x256xf32> to vector<8x32x256xf32>
    %cst_25 = arith.constant dense<0xFF800000> : vector<8x256xf32>
    %38 = vector.multi_reduction <maximumf>, %37, %cst_25 [1] : vector<8x32x256xf32> to vector<8x256xf32>
    %c0_26 = arith.constant 0 : index
    %c0_27 = arith.constant 0 : index
    %39 = vector.load %arg10[%c0_26, %c0_27] : memref<8x256xf32, #tpu.memory_space<vmem>>, vector<8x256xf32>
    tpu.vector_store %arg10[%c0_26, %c0_27], %38 {strides = array<i32>} : memref<8x256xf32, #tpu.memory_space<vmem>>, vector<8x256xf32>,
    return
  }
  func.func @transform_0(%arg0: i32) -> (i32, i32, i32) {
    %c0_i32 = arith.constant 0 : i32
    %c0_i32_0 = arith.constant 0 : i32
    %c0_i32_1 = arith.constant 0 : i32
    return %arg0, %c0_i32, %c0_i32_0 : i32, i32, i32
  }
  func.func @transform_1(%arg0: i32) -> (i32, i32) {
    %c0_i32 = arith.constant 0 : i32
    %c0_i32_0 = arith.constant 0 : i32
    %c0_i32_1 = arith.constant 0 : i32
    return %c0_i32, %c0_i32_0 : i32, i32
  }
  func.func @transform_2(%arg0: i32) -> (i32, i32) {
    %c0_i32 = arith.constant 0 : i32
    %c0_i32_0 = arith.constant 0 : i32
    %c0_i32_1 = arith.constant 0 : i32
    return %c0_i32, %c0_i32_0 : i32, i32
  }
  func.func @transform_3(%arg0: i32) -> (i32, i32) {
    %c0_i32 = arith.constant 0 : i32
    %c0_i32_0 = arith.constant 0 : i32
    %c0_i32_1 = arith.constant 0 : i32
    return %c0_i32, %c0_i32_0 : i32, i32
  }
  func.func @transform_4(%arg0: i32) -> (i32, i32) {
    %c0_i32 = arith.constant 0 : i32
    %c0_i32_0 = arith.constant 0 : i32
    %c0_i32_1 = arith.constant 0 : i32
    return %c0_i32, %c0_i32_0 : i32, i32
  }
  func.func @transform_5(%arg0: i32) -> (i32, i32) {
    %c0_i32 = arith.constant 0 : i32
    %c0_i32_0 = arith.constant 0 : i32
    %c0_i32_1 = arith.constant 0 : i32
    return %c0_i32, %c0_i32_0 : i32, i32
  }
  func.func @transform_6(%arg0: i32) -> (i32, i32) {
    %c0_i32 = arith.constant 0 : i32
    %c0_i32_0 = arith.constant 0 : i32
    %c0_i32_1 = arith.constant 0 : i32
    return %c0_i32, %c0_i32_0 : i32, i32
  }
  func.func @transform_7(%arg0: i32) -> (i32, i32) {
    %c0_i32 = arith.constant 0 : i32
    %c0_i32_0 = arith.constant 0 : i32
    %c0_i32_1 = arith.constant 0 : i32
    return %c0_i32, %c0_i32_0 : i32, i32
  }
  func.func @transform_8(%arg0: i32) -> (i32, i32) {
    %c0_i32 = arith.constant 0 : i32
    %c0_i32_0 = arith.constant 0 : i32
    %c0_i32_1 = arith.constant 0 : i32
    return %c0_i32, %c0_i32_0 : i32, i32
  }
  func.func @transform_9(%arg0: i32) -> (i32, i32) {
    %c0_i32 = arith.constant 0 : i32
    %c0_i32_0 = arith.constant 0 : i32
    return %arg0, %c0_i32 : i32, i32
  }
}

</mosaic_0001>

<bundles_post_ra>
// kernel: tpu_custom_call.1
= control target key start
LH: loop header
LB: loop body
LE: loop exit
PB: predicated region body
PF: predicated region fallthrough
CT: control target
= control target key end

     0   :  { %14 = vsyncpa [#allocation3], 0  ;;  %s6897_s0 = inlined_call_operand.vmem [shape: f32[8,32,6], index: 0, kind: input, shape index: {}]   ;;  %s6898_s1 = inlined_call_operand.vmem [shape: bf16[6,128], index: 1, kind: input, shape index: {}]   ;;  %s6899_s2 = inlined_call_operand.vmem [shape: f32[1,128], index: 2, kind: input, shape index: {}]   ;;  %s6900_s3 = inlined_call_operand.vmem [shape: bf16[128,256], index: 3, kind: input, shape index: {}]   ;;  %s6901_s4 = inlined_call_operand.hbm [shape: bf16[256,512], index: 4, kind: input, shape index: {}]   ;;  %s6902_s5 = inlined_call_operand.hbm [shape: bf16[256,512], index: 5, kind: input, shape index: {}]   ;;  %s6903_s6 = inlined_call_operand.vmem [shape: f32[1,512], index: 6, kind: input, shape index: {}]   ;;  %s6904_s7 = inlined_call_operand.hbm [shape: bf16[512,256], index: 7, kind: input, shape index: {}]   ;;  %s6905_s8 = inlined_call_operand.vmem [shape: f32[1,256], index: 8, kind: input, shape index: {}]   ;;  %s6906_s9 = inlined_call_operand.hbm [shape: f32[8,256], index: 9, kind: output, shape index: {}]  }
   0x1   :  { %15 = vsyncpa [#allocation6], 0 }
   0x2   :  { %16 = vsyncpa [#allocation4], 0  ;;  %s42_s11 = sshll.u32 %s6902_s5, 4  ;;  %s5338_s12 = smov [#allocation5]   ;;  %s43_s11 = int_to_ptr.hbm [resolvable:$true] %s42_s11 }
   0x3   :  { %s44_s13 = sshll.u32 %s5338_s12, 4  ;;  %s29_s16 = sshll.u32 %s6901_s4, 4  ;;  %s45_s13 = int_to_ptr.vmem [resolvable:$true] %s44_s13  ;;  %s30_s16 = int_to_ptr.hbm [resolvable:$true] %s29_s16 }
   0x4   :  { %s5339_s17 = smov 256   ;;  %s5340_s18 = smov 16  }
   0x5   :  { %50 = dma.hbm_to_vmem [thread:$0]  %s43_s11, 8192, %s45_s13, [#allocation6], %s5339_s17, %s5339_s17, %s5340_s18  }
   0x6   :  { %s5341_s19 = smov [#allocation2]   ;;  %s57_s23 = sshll.u32 %s6904_s7, 4  ;;  %s58_s23 = int_to_ptr.hbm [resolvable:$true] %s57_s23 }
   0x7   :  { %s31_s20 = sshll.u32 %s5341_s19, 4  ;;  %s5342_s5 = smov [#allocation7]   ;;  %s32_s20 = int_to_ptr.vmem [resolvable:$true] %s31_s20 }
   0x8   :  { %37 = dma.hbm_to_vmem [thread:$0]  %s30_s16, 8192, %s32_s20, [#allocation3], %s5339_s17, %s5339_s17, %s5340_s18  }
   0x9   :  { %s59_s24 = sshll.u32 %s5342_s5, 4  ;;  %s5343_s25 = smov 128   ;;  %s60_s24 = int_to_ptr.vmem [resolvable:$true] %s59_s24 }
   0xa   :  { %s5344_s26 = smov 8  }
   0xb   :  { %65 = dma.hbm_to_vmem [thread:$0]  %s58_s23, 8192, %s60_s24, [#allocation6], %s5343_s25, %s5343_s25, %s5344_s26  }
   0xc   :  { %5332 = dma.done.wait [#allocation3], 8192  }
   0xd   :  { %5333 = vsyncadd [#allocation3], 4294959104 }
   0xe   :  { %5334 = dma.done.wait [#allocation6], 16384  }
   0xf   :  { %5335 = vsyncadd [#allocation6], 4294950912  ;;  %vm183_vm0 = vcmask 1042432   ;;  %v129_v0 = vld [vmem:[%s6898_s1] sm:$0x7]  ;;  %v82_v2 = vld [vmem:[%s6897_s0 + $0x8] sm:$0xff] }
  0x10   :  { %v81_v1 = vld [vmem:[%s6897_s0] sm:$0xff]  ;;  %v185_v3 = vsel %vm183_vm0, %v129_v0, 0  ;;  %vm134_vm1 = vcmask 48128   ;;  %v83_v5 = vld [vmem:[%s6897_s0 + $0x10] sm:$0xff]  ;;  %v84_v6 = vld [vmem:[%s6897_s0 + $0x18] sm:$0xff]  ;;  %vm1992_vm2 = vcmask 1041409  }
  0x11   :  { %v113_v4 = vpack.c.bf16 %v82_v2, %v81_v1  ;;  %194 = vmatpush.bf16.msra.mxu0 %v185_v3  ;;  %v114_v7 = vpack.c.bf16 %v84_v6, %v83_v5  ;;  %v85_v8 = vld [vmem:[%s6897_s0 + $0x20] sm:$0xff]  ;;  %v86_v9 = vld [vmem:[%s6897_s0 + $0x28] sm:$0xff]  ;;  %v87_v11 = vld [vmem:[%s6897_s0 + $0x30] sm:$0xff]  ;;  %vm1994_vm3 = vcmask 1042434   ;;  %vm1996_vm4 = vcmask 1043459   ;;  %s4160_s12 = sshll.u32 %s6906_s9, 4  ;;  %s4161_s12 = int_to_ptr.hbm [resolvable:$true] %s4160_s12 }
  0x12   :  { %v115_v10 = vpack.c.bf16 %v86_v9, %v85_v8  ;;  %v88_v12 = vld [vmem:[%s6897_s0 + $0x38] sm:$0xff]  ;;  %v89_v14 = vld [vmem:[%s6897_s0 + $0x40] sm:$0xff]  ;;  %v90_v15 = vld [vmem:[%s6897_s0 + $0x48] sm:$0xff]  ;;  %vm1998_vm5 = vcmask 1044484   ;;  %vm2000_vm6 = vcmask 1045509   ;;  %vm2002_vm7 = vcmask 1046534  }
  0x13   :  { %v116_v13 = vpack.c.bf16 %v88_v12, %v87_v11  ;;  %v117_v16 = vpack.c.bf16 %v90_v15, %v89_v14  ;;  %v4245_v17 = vld [vmem:[%s6900_s3 + $0x70] sm:$0xf]  ;;  %v5034_v18 = vld [vmem:[%s6900_s3 + $0x74] sm:$0xf0]  ;;  %v5033_v19 = vld [vmem:[%s6900_s3 + $0x74] sm:$0xf] }
  0x14   :  { %4171 = vmatmul.msk.bf16.vlgmr.msra.gmra.mxu0 %vm134_vm1, %v113_v4  ;;  %v4246_v20 = vor.u32 %v5034_v18, %v4245_v17  ;;  %v4247_v21 = vld [vmem:[%s6900_s3 + $0x78] sm:$0xf0]  ;;  %v91_v23 = vld [vmem:[%s6897_s0 + $0x50] sm:$0xff]  ;;  %v4237_v26 = vld [vmem:[%s6900_s3 + $0x60] sm:$0xf]  ;;  %vm2004_vm8 = vcmask 1047559  }
  0x15   :  { %v4250_v22 = vor.u32 %v5033_v19, %v4247_v21  ;;  %v92_v24 = vld [vmem:[%s6897_s0 + $0x58] sm:$0xff]  ;;  %v5032_v27 = vld [vmem:[%s6900_s3 + $0x64] sm:$0xf0]  ;;  %v5031_v28 = vld [vmem:[%s6900_s3 + $0x64] sm:$0xf]  ;;  %vm2448_vm9 = vcmask 1040384  }
  0x16   :  { %420 = vmatpush.bf16.msra.mxu1 %v4246_v20  ;;  %v118_v25 = vpack.c.bf16 %v92_v24, %v91_v23  ;;  %v4238_v29 = vor.u32 %v5032_v27, %v4237_v26  ;;  %v4239_v30 = vld [vmem:[%s6900_s3 + $0x68] sm:$0xf0]  ;;  %v4229_v32 = vld [vmem:[%s6900_s3 + $0x50] sm:$0xf]  ;;  %v5030_v33 = vld [vmem:[%s6900_s3 + $0x54] sm:$0xf0] }
  0x17   :  { %509 = vmatpush.bf16.msra.mxu2 %v4250_v22  ;;  %v4242_v31 = vor.u32 %v5031_v28, %v4239_v30  ;;  %v5029_v34 = vld [vmem:[%s6900_s3 + $0x54] sm:$0xf]  ;;  %v4230_v35 = vor.u32 %v5030_v33, %v4229_v32  ;;  %v4231_v36 = vld [vmem:[%s6900_s3 + $0x58] sm:$0xf0]  ;;  %v4221_v38 = vld [vmem:[%s6900_s3 + $0x40] sm:$0xf] }
  0x18   :  { %v4234_v37 = vor.u32 %v5029_v34, %v4231_v36  ;;  %v5028_v39 = vld [vmem:[%s6900_s3 + $0x44] sm:$0xf0]  ;;  %v5027_v40 = vld [vmem:[%s6900_s3 + $0x44] sm:$0xf]  ;;  %v4223_v41 = vld [vmem:[%s6900_s3 + $0x48] sm:$0xf0] }
  0x19   :  { %v4222_v42 = vor.u32 %v5028_v39, %v4221_v38  ;;  %v4226_v43 = vor.u32 %v5027_v40, %v4223_v41  ;;  %v93_v44 = vld [vmem:[%s6897_s0 + $0x60] sm:$0xff]  ;;  %v94_v45 = vld [vmem:[%s6897_s0 + $0x68] sm:$0xff]  ;;  %v4213_v46 = vld [vmem:[%s6900_s3 + $0x30] sm:$0xf]  ;;  %vm2474_vm10 = vcmask 1046528   ;;  %vm2451_vm11 = vcmask 1041408  }
  0x1a   :  { %421 = vmatpush.bf16.msra.mxu1 %v4238_v29  ;;  %v5026_v47 = vld [vmem:[%s6900_s3 + $0x34] sm:$0xf0]  ;;  %v5025_v48 = vld [vmem:[%s6900_s3 + $0x34] sm:$0xf]  ;;  %v4215_v50 = vld [vmem:[%s6900_s3 + $0x38] sm:$0xf0]  ;;  %v119_v51 = vpack.c.bf16 %v94_v45, %v93_v44 }
  0x1b   :  { %510 = vmatpush.bf16.msra.mxu2 %v4242_v31  ;;  %v4214_v49 = vor.u32 %v5026_v47, %v4213_v46  ;;  %v4218_v52 = vor.u32 %v5025_v48, %v4215_v50  ;;  %v4205_v53 = vld [vmem:[%s6900_s3 + $0x20] sm:$0xf]  ;;  %v5024_v54 = vld [vmem:[%s6900_s3 + $0x24] sm:$0xf0]  ;;  %v5023_v55 = vld [vmem:[%s6900_s3 + $0x24] sm:$0xf] }
  0x1c   :  { %v4206_v56 = vor.u32 %v5024_v54, %v4205_v53  ;;  %v4207_v57 = vld [vmem:[%s6900_s3 + $0x28] sm:$0xf0]  ;;  %v4197_v59 = vld [vmem:[%s6900_s3 + $0x10] sm:$0xf]  ;;  %v5022_v60 = vld [vmem:[%s6900_s3 + $0x14] sm:$0xf0] }
  0x1d   :  { %v4210_v58 = vor.u32 %v5023_v55, %v4207_v57  ;;  %v5021_v61 = vld [vmem:[%s6900_s3 + $0x14] sm:$0xf]  ;;  %v4198_v62 = vor.u32 %v5022_v60, %v4197_v59  ;;  %v4199_v63 = vld [vmem:[%s6900_s3 + $0x18] sm:$0xf0]  ;;  %v4189_v1 = vld [vmem:[%s6900_s3] sm:$0xf] }
  0x1e   :  { %422 = vmatpush.bf16.msra.mxu1 %v4230_v35  ;;  %v4202_v0 = vor.u32 %v5021_v61, %v4199_v63  ;;  %v5020_v2 = vld [vmem:[%s6900_s3 + $0x4] sm:$0xf0]  ;;  %v5019_v3 = vld [vmem:[%s6900_s3 + $0x4] sm:$0xf]  ;;  %v4191_v5 = vld [vmem:[%s6900_s3 + $0x8] sm:$0xf0] }
  0x1f   :  { %511 = vmatpush.bf16.msra.mxu2 %v4234_v37  ;;  %v4190_v4 = vor.u32 %v5020_v2, %v4189_v1  ;;  %v4194_v6 = vor.u32 %v5019_v3, %v4191_v5  ;;  %v96_v8 = vld [vmem:[%s6897_s0 + $0x78] sm:$0xff]  ;;  %v98_v11 = vld [vmem:[%s6897_s0 + $0x88] sm:$0xff]  ;;  %v5569_v14 = vld [vmem:[%s6899_s2] ss:$0 sm:$0xff]  ;;  %vm2455_vm12 = vcmask 1042433   ;;  %vm2460_vm13 = vcmask 1043458  }
  0x20   :  { %v99_v20 = vld [vmem:[%s6897_s0 + $0x90] sm:$0xff]  ;;  %v100_v21 = vld [vmem:[%s6897_s0 + $0x98] sm:$0xff]  ;;  %v101_v30 = vld [vmem:[%s6897_s0 + $0xa0] sm:$0xff]  ;;  %vm2465_vm14 = vcmask 1044483   ;;  %vm2470_vm15 = vcmask 1045508   ;;  %vm2476_vm0 = vcmask 1046533  }
  0x21   :  { %v122_v23 = vpack.c.bf16 %v100_v21, %v99_v20  ;;  %v102_v31 = vld [vmem:[%s6897_s0 + $0xa8] sm:$0xff]  ;;  %v103_v40 = vld [vmem:[%s6897_s0 + $0xb0] sm:$0xff]  ;;  %v104_v41 = vld [vmem:[%s6897_s0 + $0xb8] sm:$0xff] }
  0x22   :  { %423 = vmatpush.bf16.msra.mxu1 %v4222_v42  ;;  %v123_v33 = vpack.c.bf16 %v102_v31, %v101_v30  ;;  %v105_v50 = vld [vmem:[%s6897_s0 + $0xc0] sm:$0xff]  ;;  %v107_v60 = vld [vmem:[%s6897_s0 + $0xd0] sm:$0xff]  ;;  %v108_v61 = vld [vmem:[%s6897_s0 + $0xd8] sm:$0xff] }
  0x23   :  { %512 = vmatpush.bf16.msra.mxu2 %v4226_v43  ;;  %v124_v43 = vpack.c.bf16 %v104_v41, %v103_v40  ;;  %v126_v63 = vpack.c.bf16 %v108_v61, %v107_v60  ;;  %v4365_v1 = vld [vmem:[#allocation5 + $0xe0] sm:$0xf]  ;;  %v5065_v2 = vld [vmem:[#allocation5 + $0xec] sm:$0xf0] }
  0x24   :  { %4172 = vmatmul.msk.bf16.gmra.mxu0 %vm134_vm1, %v114_v7  ;;  %v95_v7 = vld [vmem:[%s6897_s0 + $0x70] sm:$0xff]  ;;  %v4366_v3 = vor.u32 %v5065_v2, %v4365_v1  ;;  %v4461_v30 = vld [vmem:[#allocation5 + $0x1a0] sm:$0xf] }
  0x25   :  { %v120_v9 = vpack.c.bf16 %v96_v8, %v95_v7  ;;  %v4349_v7 = vld [vmem:[#allocation5 + $0xc0] sm:$0xf]  ;;  %v5061_v8 = vld [vmem:[#allocation5 + $0xcc] sm:$0xf0] }
  0x26   :  { %424 = vmatpush.bf16.msra.mxu1 %v4214_v49  ;;  %1158 = vmatpush.bf16.msra.mxu3 %v4366_v3  ;;  %v5057_v20 = vld [vmem:[#allocation5 + $0xac] sm:$0xf0]  ;;  %v4253_v61 = vld [vmem:[#allocation5] sm:$0xf] }
  0x27   :  { %513 = vmatpush.bf16.msra.mxu2 %v4218_v52  ;;  %v5089_v31 = vld [vmem:[#allocation5 + $0x1ac] sm:$0xf0] }
  0x28   :  { %v5073_v1 = vld [vmem:[#allocation5 + $0x12c] sm:$0xf0] }
  0x2a   :  { %425 = vmatpush.bf16.msra.mxu1 %v4206_v56 }
  0x2b   :  { %514 = vmatpush.bf16.msra.mxu2 %v4210_v58 }
  0x2e   :  { %426 = vmatpush.bf16.msra.mxu1 %v4198_v62 }
  0x2f   :  { %515 = vmatpush.bf16.msra.mxu2 %v4202_v0 }
  0x32   :  { %427 = vmatpush.bf16.msra.mxu1 %v4190_v4 }
  0x33   :  { %516 = vmatpush.bf16.msra.mxu2 %v4194_v6 }
  0x34   :  { %4173 = vmatmul.msk.bf16.gmra.mxu0 %vm134_vm1, %v115_v10  ;;  %v97_v10 = vld [vmem:[%s6897_s0 + $0x80] sm:$0xff] }
  0x35   :  { %v121_v12 = vpack.c.bf16 %v98_v11, %v97_v10 }
  0x44   :  { %4174 = vmatmul.msk.bf16.gmra.mxu0 %vm134_vm1, %v116_v13 }
  0x54   :  { %4175 = vmatmul.msk.bf16.gmra.mxu0 %vm134_vm1, %v117_v16 }
  0x64   :  { %4176 = vmatmul.msk.bf16.gmra.mxu0 %vm134_vm1, %v118_v25 }
  0x74   :  { %4177 = vmatmul.msk.bf16.gmra.mxu0 %vm134_vm1, %v119_v51  ;;  %v106_v51 = vld [vmem:[%s6897_s0 + $0xc8] sm:$0xff] }
  0x75   :  { %v125_v53 = vpack.c.bf16 %v106_v51, %v105_v50  ;;  %v112_v50 = vld [vmem:[%s6897_s0 + $0xf8] sm:$0xff] }
  0x84   :  { %4178 = vmatmul.msk.bf16.gmra.mxu0 %vm134_vm1, %v120_v9  ;;  %v4350_v9 = vor.u32 %v5061_v8, %v4349_v7 }
  0x86   :  { %1159 = vmatpush.bf16.msra.mxu3 %v4350_v9 }
  0x91   :  { %v196_v13 = vpop.f32.mrf.mxu0 }
  0x92   :  { %v197_v15 = vadd.f32 %v5569_v14, %v196_v13  ;;  %v5097_v13 = vld [vmem:[#allocation5 + $0x1ec] sm:$0xf0] }
  0x94   :  { %4179 = vmatmul.msk.bf16.gmra.mxu0 %vm134_vm1, %v121_v12  ;;  %v276_v18 = vmax.f32 %v197_v15, 0.0  ;;  %v4493_v12 = vld [vmem:[#allocation5 + $0x1e0] sm:$0xf] }
  0x95   :  { %v109_v15 = vld [vmem:[%s6897_s0 + $0xe0] sm:$0xff] }
  0x99   :  { %v198_v16 = vpop.f32.mrf.mxu0 }
  0x9a   :  { %v199_v17 = vadd.f32 %v5569_v14, %v198_v16  ;;  %v110_v16 = vld [vmem:[%s6897_s0 + $0xe8] sm:$0xff] }
  0x9c   :  { %v277_v19 = vmax.f32 %v199_v17, 0.0  ;;  %v4494_v17 = vor.u32 %v5097_v13, %v4493_v12 }
  0x9e   :  { %v308_v22 = vpack.c.bf16 %v277_v19, %v276_v18  ;;  %v4333_v19 = vld [vmem:[#allocation5 + $0xa0] sm:$0xf]  ;;  %1247 = vmatpush.bf16.msrb.mxu0 %v4494_v17 }
  0x9f   :  { %v4334_v21 = vor.u32 %v5057_v20, %v4333_v19 }
  0xa0   :  { %428 = vmatmul.bf16.vlgmr.msra.gmra.mxu1 %v308_v22  ;;  %517 = vmatmul.bf16.vlgmr.msra.gmra.mxu2 %v308_v22  ;;  %v127_v22 = vpack.c.bf16 %v110_v16, %v109_v15 }
  0xa1   :  { %v201_v24 = vpop.f32.mrf.mxu0  ;;  %1160 = vmatpush.bf16.msra.mxu3 %v4334_v21 }
  0xa2   :  { %v202_v25 = vadd.f32 %v5569_v14, %v201_v24  ;;  %v5093_v24 = vld [vmem:[#allocation5 + $0x1cc] sm:$0xf0] }
  0xa4   :  { %4180 = vmatmul.msk.bf16.gmra.mxu0 %vm134_vm1, %v122_v23  ;;  %v278_v28 = vmax.f32 %v202_v25, 0.0  ;;  %v4477_v23 = vld [vmem:[#allocation5 + $0x1c0] sm:$0xf] }
  0xa9   :  { %v203_v26 = vpop.f32.mrf.mxu0 }
  0xaa   :  { %v204_v27 = vadd.f32 %v5569_v14, %v203_v26  ;;  %v4478_v26 = vor.u32 %v5093_v24, %v4477_v23 }
  0xac   :  { %v279_v29 = vmax.f32 %v204_v27, 0.0  ;;  %v4317_v27 = vld [vmem:[#allocation5 + $0x80] sm:$0xf]  ;;  %1248 = vmatpush.bf16.msrb.mxu0 %v4478_v26 }
  0xae   :  { %v309_v32 = vpack.c.bf16 %v279_v29, %v278_v28  ;;  %v5053_v28 = vld [vmem:[#allocation5 + $0x8c] sm:$0xf0] }
  0xaf   :  { %v4318_v29 = vor.u32 %v5053_v28, %v4317_v27 }
  0xb0   :  { %433 = vmatmul.bf16.gmra.mxu1 %v309_v32  ;;  %522 = vmatmul.bf16.gmra.mxu2 %v309_v32  ;;  %v4462_v32 = vor.u32 %v5089_v31, %v4461_v30 }
  0xb1   :  { %v206_v34 = vpop.f32.mrf.mxu0  ;;  %1161 = vmatpush.bf16.msra.mxu3 %v4318_v29 }
  0xb2   :  { %v207_v35 = vadd.f32 %v5569_v14, %v206_v34  ;;  %v5049_v34 = vld [vmem:[#allocation5 + $0x6c] sm:$0xf0]  ;;  %1249 = vmatpush.bf16.msrb.mxu0 %v4462_v32 }
  0xb4   :  { %4181 = vmatmul.msk.bf16.gmra.mxu0 %vm134_vm1, %v123_v33  ;;  %v280_v38 = vmax.f32 %v207_v35, 0.0  ;;  %v4301_v33 = vld [vmem:[#allocation5 + $0x60] sm:$0xf] }
  0xb5   :  { %v4302_v35 = vor.u32 %v5049_v34, %v4301_v33 }
  0xb7   :  { %1162 = vmatpush.bf16.msra.mxu3 %v4302_v35 }
  0xb9   :  { %v208_v36 = vpop.f32.mrf.mxu0 }
  0xba   :  { %v209_v37 = vadd.f32 %v5569_v14, %v208_v36 }
  0xbc   :  { %v281_v39 = vmax.f32 %v209_v37, 0.0  ;;  %v4445_v37 = vld [vmem:[#allocation5 + $0x180] sm:$0xf] }
  0xbe   :  { %v310_v42 = vpack.c.bf16 %v281_v39, %v280_v38  ;;  %v5085_v38 = vld [vmem:[#allocation5 + $0x18c] sm:$0xf0] }
  0xbf   :  { %v4446_v40 = vor.u32 %v5085_v38, %v4445_v37 }
  0xc0   :  { %438 = vmatmul.bf16.gmra.mxu1 %v310_v42  ;;  %527 = vmatmul.bf16.gmra.mxu2 %v310_v42  ;;  %v4285_v42 = vld [vmem:[#allocation5 + $0x40] sm:$0xf] }
  0xc1   :  { %v211_v44 = vpop.f32.mrf.mxu0  ;;  %1250 = vmatpush.bf16.msrb.mxu0 %v4446_v40 }
  0xc2   :  { %v212_v45 = vadd.f32 %v5569_v14, %v211_v44 }
  0xc4   :  { %4182 = vmatmul.msk.bf16.gmra.mxu0 %vm134_vm1, %v124_v43  ;;  %v282_v48 = vmax.f32 %v212_v45, 0.0  ;;  %v5045_v43 = vld [vmem:[#allocation5 + $0x4c] sm:$0xf0] }
  0xc5   :  { %v4286_v44 = vor.u32 %v5045_v43, %v4285_v42 }
  0xc7   :  { %1163 = vmatpush.bf16.msra.mxu3 %v4286_v44 }
  0xc9   :  { %v213_v46 = vpop.f32.mrf.mxu0 }
  0xca   :  { %v214_v47 = vadd.f32 %v5569_v14, %v213_v46 }
  0xcc   :  { %v283_v49 = vmax.f32 %v214_v47, 0.0  ;;  %v4429_v47 = vld [vmem:[#allocation5 + $0x160] sm:$0xf] }
  0xce   :  { %v311_v52 = vpack.c.bf16 %v283_v49, %v282_v48  ;;  %v5081_v48 = vld [vmem:[#allocation5 + $0x16c] sm:$0xf0] }
  0xcf   :  { %v111_v49 = vld [vmem:[%s6897_s0 + $0xf0] sm:$0xff]  ;;  %v4430_v51 = vor.u32 %v5081_v48, %v4429_v47 }
  0xd0   :  { %443 = vmatmul.bf16.gmra.mxu1 %v311_v52  ;;  %532 = vmatmul.bf16.gmra.mxu2 %v311_v52 }
  0xd1   :  { %v216_v54 = vpop.f32.mrf.mxu0  ;;  %1251 = vmatpush.bf16.msrb.mxu0 %v4430_v51 }
  0xd2   :  { %v217_v55 = vadd.f32 %v5569_v14, %v216_v54  ;;  %v5041_v54 = vld [vmem:[#allocation5 + $0x2c] sm:$0xf0] }
  0xd4   :  { %4183 = vmatmul.msk.bf16.gmra.mxu0 %vm134_vm1, %v125_v53  ;;  %v284_v58 = vmax.f32 %v217_v55, 0.0  ;;  %v4269_v53 = vld [vmem:[#allocation5 + $0x20] sm:$0xf] }
  0xd5   :  { %v4270_v55 = vor.u32 %v5041_v54, %v4269_v53 }
  0xd7   :  { %1164 = vmatpush.bf16.msra.mxu3 %v4270_v55 }
  0xd9   :  { %v218_v56 = vpop.f32.mrf.mxu0 }
  0xda   :  { %v219_v57 = vadd.f32 %v5569_v14, %v218_v56  ;;  %v128_v56 = vpack.c.bf16 %v112_v50, %v111_v49 }
  0xdc   :  { %v285_v59 = vmax.f32 %v219_v57, 0.0  ;;  %v4413_v57 = vld [vmem:[#allocation5 + $0x140] sm:$0xf] }
  0xde   :  { %v312_v62 = vpack.c.bf16 %v285_v59, %v284_v58  ;;  %v5077_v58 = vld [vmem:[#allocation5 + $0x14c] sm:$0xf0] }
  0xdf   :  { %v4414_v60 = vor.u32 %v5077_v58, %v4413_v57 }
  0xe0   :  { %448 = vmatmul.bf16.gmra.mxu1 %v312_v62  ;;  %537 = vmatmul.bf16.gmra.mxu2 %v312_v62  ;;  %v5037_v62 = vld [vmem:[#allocation5 + $0xc] sm:$0xf0] }
  0xe1   :  { %v221_v0 = vpop.f32.mrf.mxu0  ;;  %1252 = vmatpush.bf16.msrb.mxu0 %v4414_v60 }
  0xe2   :  { %v222_v4 = vadd.f32 %v5569_v14, %v221_v0  ;;  %v4397_v0 = vld [vmem:[#allocation5 + $0x120] sm:$0xf] }
  0xe3   :  { %v4398_v2 = vor.u32 %v5073_v1, %v4397_v0 }
  0xe4   :  { %4184 = vmatmul.msk.bf16.gmra.mxu0 %vm134_vm1, %v126_v63  ;;  %v286_v10 = vmax.f32 %v222_v4, 0.0  ;;  %v4254_v63 = vor.u32 %v5037_v62, %v4253_v61  ;;  %v4381_v4 = vld [vmem:[#allocation5 + $0x100] sm:$0xf] }
  0xe5   :  { %1253 = vmatpush.bf16.msrb.mxu0 %v4398_v2 }
  0xe6   :  { %1165 = vmatpush.bf16.msra.mxu3 %v4254_v63 }
  0xe9   :  { %v223_v5 = vpop.f32.mrf.mxu0 }
  0xea   :  { %v224_v6 = vadd.f32 %v5569_v14, %v223_v5  ;;  %v5069_v5 = vld [vmem:[#allocation5 + $0x10c] sm:$0xf0] }
  0xeb   :  { %v4382_v7 = vor.u32 %v5069_v5, %v4381_v4 }
  0xec   :  { %v287_v11 = vmax.f32 %v224_v6, 0.0 }
  0xed   :  { %1254 = vmatpush.bf16.msrb.mxu0 %v4382_v7 }
  0xee   :  { %v313_v18 = vpack.c.bf16 %v287_v11, %v286_v10 }
  0xf0   :  { %453 = vmatmul.bf16.gmra.mxu1 %v313_v18  ;;  %542 = vmatmul.bf16.gmra.mxu2 %v313_v18 }
  0xf1   :  { %v226_v25 = vpop.f32.mrf.mxu0 }
  0xf2   :  { %v227_v36 = vadd.f32 %v5569_v14, %v226_v25 }
  0xf4   :  { %4185 = vmatmul.msk.bf16.gmra.mxu0 %vm134_vm1, %v127_v22  ;;  %v288_v45 = vmax.f32 %v227_v36, 0.0 }
  0xf9   :  { %v228_v39 = vpop.f32.mrf.mxu0 }
  0xfa   :  { %v229_v41 = vadd.f32 %v5569_v14, %v228_v39 }
  0xfc   :  { %v289_v46 = vmax.f32 %v229_v41, 0.0 }
  0xfe   :  { %v314_v52 = vpack.c.bf16 %v289_v46, %v288_v45 }
 0x100   :  { %458 = vmatmul.bf16.gmra.mxu1 %v314_v52  ;;  %547 = vmatmul.bf16.gmra.mxu2 %v314_v52 }
 0x101   :  { %v231_v59 = vpop.f32.mrf.mxu0 }
 0x102   :  { %v232_v3 = vadd.f32 %v5569_v14, %v231_v59 }
 0x104   :  { %4186 = vmatmul.msk.bf16.gmra.mxu0 %vm134_vm1, %v128_v56  ;;  %v290_v9 = vmax.f32 %v232_v3, 0.0  ;;  %vm2481_vm1 = vcmask 1045504  }
 0x109   :  { %v233_v6 = vpop.f32.mrf.mxu0 }
 0x10a   :  { %v234_v8 = vadd.f32 %v5569_v14, %v233_v6 }
 0x10c   :  { %v291_v10 = vmax.f32 %v234_v8, 0.0  ;;  %v4373_v8 = vld [vmem:[#allocation5 + $0xe8] sm:$0xf] }
 0x10e   :  { %v315_v11 = vpack.c.bf16 %v291_v10, %v290_v9  ;;  %v5066_v9 = vld [vmem:[#allocation5 + $0xf4] sm:$0xf0]  ;;  %v5095_v10 = vld [vmem:[#allocation5 + $0x1e4] sm:$0xf] }
 0x110   :  { %463 = vmatmul.bf16.gmra.mxu1 %v315_v11  ;;  %552 = vmatmul.bf16.gmra.mxu2 %v315_v11  ;;  %v4374_v11 = vor.u32 %v5066_v9, %v4373_v8 }
 0x111   :  { %v236_v12 = vpop.f32.mrf.mxu0 }
 0x112   :  { %v237_v13 = vadd.f32 %v5569_v14, %v236_v12  ;;  %v4495_v12 = vld [vmem:[#allocation5 + $0x1f0] sm:$0xf0]  ;;  %1514 = vmatpush.bf16.msrb.mxu3 %v4374_v11  ;;  %v5055_v11 = vld [vmem:[#allocation5 + $0xa4] sm:$0xf] }
 0x114   :  { %v292_v17 = vmax.f32 %v237_v13, 0.0  ;;  %v5063_v13 = vld [vmem:[#allocation5 + $0xe4] sm:$0xf] }
 0x119   :  { %v238_v15 = vpop.f32.mrf.mxu0 }
 0x11a   :  { %v239_v16 = vadd.f32 %v5569_v14, %v238_v15  ;;  %v4367_v15 = vld [vmem:[#allocation5 + $0xf0] sm:$0xf0] }
 0x11c   :  { %v293_v18 = vmax.f32 %v239_v16, 0.0  ;;  %v4498_v16 = vor.u32 %v5095_v10, %v4495_v12  ;;  %v4335_v12 = vld [vmem:[#allocation5 + $0xb0] sm:$0xf0] }
 0x11d   :  { %v429_v19 = vpop.f32.mrf.mxu1 }
 0x11e   :  { %v316_v20 = vpack.c.bf16 %v293_v18, %v292_v17  ;;  %v4370_v17 = vor.u32 %v5063_v13, %v4367_v15  ;;  %1425 = vmatpush.bf16.msrb.mxu2 %v4498_v16  ;;  %v4338_v16 = vor.u32 %v5055_v11, %v4335_v12 }
 0x120   :  { %468 = vmatmul.bf16.gmra.mxu1 %v316_v20  ;;  %557 = vmatmul.bf16.gmra.mxu2 %v316_v20 }
 0x121   :  { %v241_v21 = vpop.f32.mrf.mxu0  ;;  %1336 = vmatpush.bf16.msrb.mxu1 %v4370_v17  ;;  %v5087_v17 = vld [vmem:[#allocation5 + $0x1a4] sm:$0xf] }
 0x122   :  { %v242_v26 = vadd.f32 %v5569_v14, %v241_v21 }
 0x123   :  { %v518_v22 = vpop.f32.mrf.mxu2 }
 0x124   :  { %v294_v30 = vmax.f32 %v242_v26, 0.0 }
 0x125   :  { %v431_v23 = vpop.f32.mrf.mxu1 }
 0x126   :  { %v598_v24 = vmax.f32 %v429_v19, %v431_v23  ;;  %v5639_v25 = vpack.c.bf16 %v431_v23, %v429_v19 }
 0x128   :  { %1166 = vmatmul.bf16.vlgmr.msra.gmra.mxu3 %v5639_v25 }
 0x129   :  { %v243_v27 = vpop.f32.mrf.mxu0 }
 0x12a   :  { %v244_v28 = vadd.f32 %v5569_v14, %v243_v27 }
 0x12b   :  { %v520_v29 = vpop.f32.mrf.mxu2 }
 0x12c   :  { %v295_v31 = vmax.f32 %v244_v28, 0.0  ;;  %v607_v32 = vmax.f32 %v518_v22, %v520_v29  ;;  %v5644_v33 = vpack.c.bf16 %v520_v29, %v518_v22 }
 0x12d   :  { %v434_v34 = vpop.f32.mrf.mxu1 }
 0x12e   :  { %v599_v35 = vmax.f32 %v598_v24, %v434_v34  ;;  %1255 = vmatmul.bf16.vlgmr.msrb.gmra.mxu0 %v5644_v33  ;;  %v317_v36 = vpack.c.bf16 %v295_v31, %v294_v30 }
 0x130   :  { %473 = vmatmul.bf16.gmra.mxu1 %v317_v36  ;;  %562 = vmatmul.bf16.gmra.mxu2 %v317_v36 }
 0x131   :  { %v246_v37 = vpop.f32.mrf.mxu0 }
 0x132   :  { %v247_v43 = vadd.f32 %v5569_v14, %v246_v37 }
 0x133   :  { %v523_v38 = vpop.f32.mrf.mxu2 }
 0x134   :  { %v608_v39 = vmax.f32 %v607_v32, %v523_v38  ;;  %v296_v47 = vmax.f32 %v247_v43, 0.0 }
 0x135   :  { %v436_v40 = vpop.f32.mrf.mxu1 }
 0x136   :  { %v600_v41 = vmax.f32 %v599_v35, %v436_v40  ;;  %v5647_v42 = vpack.c.bf16 %v436_v40, %v434_v34 }
 0x138   :  { %1171 = vmatmul.bf16.gmra.mxu3 %v5647_v42  ;;  %v601_v59 = vrot.slane %v600_v41, 4 }
 0x139   :  { %v248_v44 = vpop.f32.mrf.mxu0 }
 0x13a   :  { %v249_v45 = vadd.f32 %v5569_v14, %v248_v44  ;;  %v602_v3 = vmax.f32 %v600_v41, %v601_v59  ;;  %v4351_v59 = vld [vmem:[#allocation5 + $0xd0] sm:$0xf0] }
 0x13b   :  { %v525_v46 = vpop.f32.mrf.mxu2 }
 0x13c   :  { %v297_v48 = vmax.f32 %v249_v45, 0.0  ;;  %v609_v49 = vmax.f32 %v608_v39, %v525_v46  ;;  %v5652_v50 = vpack.c.bf16 %v525_v46, %v523_v38  ;;  %v603_v18 = vrot.slane %v602_v3, 2 }
 0x13d   :  { %v439_v51 = vpop.f32.mrf.mxu1 }
 0x13e   :  { %1260 = vmatmul.bf16.gmra.mxu0 %v5652_v50  ;;  %v318_v52 = vpack.c.bf16 %v297_v48, %v296_v47  ;;  %v610_v4 = vrot.slane %v609_v49, 4  ;;  %v604_v23 = vmax.f32 %v602_v3, %v603_v18  ;;  %v4463_v18 = vld [vmem:[#allocation5 + $0x1b0] sm:$0xf0] }
 0x140   :  { %478 = vmatmul.bf16.gmra.mxu1 %v318_v52  ;;  %567 = vmatmul.bf16.gmra.mxu2 %v318_v52  ;;  %v611_v20 = vmax.f32 %v609_v49, %v610_v4  ;;  %v605_v31 = vrot.slane %v604_v23, 1 }
 0x141   :  { %v251_v53 = vpop.f32.mrf.mxu0 }
 0x142   :  { %v252_v58 = vadd.f32 %v5569_v14, %v251_v53  ;;  %v612_v28 = vrot.slane %v611_v20, 2  ;;  %v606_v44 = vmax.f32 %v604_v23, %v605_v31 }
 0x143   :  { %v528_v54 = vpop.f32.mrf.mxu2 }
 0x144   :  { %v298_v63 = vmax.f32 %v252_v58, 0.0  ;;  %v613_v36 = vmax.f32 %v611_v20, %v612_v28  ;;  %v1870_v53 = vpack.c.bf16 %v606_v44, %v606_v44  ;;  %v5059_v58 = vld [vmem:[#allocation5 + $0xc4] sm:$0xf]  ;;  %v4319_v28 = vld [vmem:[#allocation5 + $0x90] sm:$0xf0] }
 0x145   :  { %v441_v55 = vpop.f32.mrf.mxu1 }
 0x146   :  { %v616_v56 = vmax.f32 %v439_v51, %v441_v55  ;;  %v5655_v57 = vpack.c.bf16 %v441_v55, %v439_v51  ;;  %v614_v49 = vrot.slane %v613_v36, 1 }
 0x148   :  { %1176 = vmatmul.bf16.gmra.mxu3 %v5655_v57 }
 0x149   :  { %v253_v60 = vpop.f32.mrf.mxu0 }
 0x14a   :  { %v254_v61 = vadd.f32 %v5569_v14, %v253_v60  ;;  %v615_v60 = vmax.f32 %v613_v36, %v614_v49  ;;  %v5047_v49 = vld [vmem:[#allocation5 + $0x64] sm:$0xf] }
 0x14b   :  { %v530_v62 = vpop.f32.mrf.mxu2 }
 0x14c   :  { %v299_v0 = vmax.f32 %v254_v61, 0.0  ;;  %v625_v1 = vmax.f32 %v528_v54, %v530_v62  ;;  %v5660_v2 = vpack.c.bf16 %v530_v62, %v528_v54  ;;  %v4354_v62 = vor.u32 %v5059_v58, %v4351_v59  ;;  %v5043_v59 = vld [vmem:[#allocation5 + $0x44] sm:$0xf] }
 0x14d   :  { %v444_v5 = vpop.f32.mrf.mxu1  ;;  %v1871_v13 = vpack.c.bf16 %v615_v60, %v615_v60  ;;  %v4287_v60 = vld [vmem:[#allocation5 + $0x50] sm:$0xf0] }
 0x14e   :  { %v617_v6 = vmax.f32 %v616_v56, %v444_v5  ;;  %1265 = vmatmul.bf16.gmra.mxu0 %v5660_v2  ;;  %v319_v7 = vpack.c.bf16 %v299_v0, %v298_v63  ;;  %v5091_v63 = vld [vmem:[#allocation5 + $0x1c4] sm:$0xf]  ;;  %v4479_v0 = vld [vmem:[#allocation5 + $0x1d0] sm:$0xf0]  ;;  %1337 = vmatpush.bf16.msrb.mxu1 %v4354_v62 }
 0x14f   :  { %v4482_v4 = vor.u32 %v5091_v63, %v4479_v0  ;;  %v4290_v63 = vor.u32 %v5043_v59, %v4287_v60  ;;  %v4415_v0 = vld [vmem:[#allocation5 + $0x150] sm:$0xf0] }
 0x150   :  { %483 = vmatmul.bf16.gmra.mxu1 %v319_v7  ;;  %572 = vmatmul.bf16.gmra.mxu2 %v319_v7 }
 0x151   :  { %v256_v19 = vpop.f32.mrf.mxu0  ;;  %1426 = vmatpush.bf16.msrb.mxu2 %v4482_v4 }
 0x152   :  { %v257_v29 = vadd.f32 %v5569_v14, %v256_v19  ;;  %1338 = vmatpush.bf16.msrb.mxu1 %v4338_v16 }
 0x153   :  { %v533_v21 = vpop.f32.mrf.mxu2 }
 0x154   :  { %v626_v22 = vmax.f32 %v625_v1, %v533_v21  ;;  %v300_v37 = vmax.f32 %v257_v29, 0.0  ;;  %v5083_v29 = vld [vmem:[#allocation5 + $0x184] sm:$0xf] }
 0x155   :  { %v446_v24 = vpop.f32.mrf.mxu1 }
 0x156   :  { %v618_v26 = vmax.f32 %v617_v6, %v446_v24  ;;  %v5663_v27 = vpack.c.bf16 %v446_v24, %v444_v5  ;;  %v1976_v5 = vunpack.c.l.b16 %v1870_v53  ;;  %v5079_v53 = vld [vmem:[#allocation5 + $0x164] sm:$0xf] }
 0x158   :  { %v619_v30 = vrot.slane %v618_v26, 4  ;;  %1181 = vmatmul.bf16.gmra.mxu3 %v5663_v27 }
 0x159   :  { %v258_v32 = vpop.f32.mrf.mxu0 }
 0x15a   :  { %v620_v34 = vmax.f32 %v618_v26, %v619_v30  ;;  %v259_v35 = vadd.f32 %v5569_v14, %v258_v32  ;;  %v5051_v26 = vld [vmem:[#allocation5 + $0x84] sm:$0xf]  ;;  %v1977_v30 = vunpack.c.l.b16 %v1871_v13  ;;  %v4399_v13 = vld [vmem:[#allocation5 + $0x130] sm:$0xf0] }
 0x15b   :  { %v535_v38 = vpop.f32.mrf.mxu2 }
 0x15c   :  { %v621_v39 = vrot.slane %v620_v34, 2  ;;  %v301_v40 = vmax.f32 %v259_v35, 0.0  ;;  %v627_v41 = vmax.f32 %v626_v22, %v535_v38  ;;  %v5668_v43 = vpack.c.bf16 %v535_v38, %v533_v21  ;;  %v4447_v35 = vld [vmem:[#allocation5 + $0x190] sm:$0xf0] }
 0x15d   :  { %v5670_v45 = vpop.f32.mrf.mxu1  ;;  %v4466_v21 = vor.u32 %v5087_v17, %v4463_v18 }
 0x15e   :  { %v622_v46 = vmax.f32 %v620_v34, %v621_v39  ;;  %v628_v47 = vrot.slane %v627_v41, 4  ;;  %1270 = vmatmul.bf16.gmra.mxu0 %v5668_v43  ;;  %v320_v48 = vpack.c.bf16 %v301_v40, %v300_v37  ;;  %v4322_v34 = vor.u32 %v5051_v26, %v4319_v28 }
 0x15f   :  { %1427 = vmatpush.bf16.msrb.mxu2 %v4466_v21  ;;  %v5035_v21 = vld [vmem:[#allocation5 + $0x4] sm:$0xf] }
 0x160   :  { %v623_v51 = vrot.slane %v622_v46, 1  ;;  %v629_v52 = vmax.f32 %v627_v41, %v628_v47  ;;  %488 = vmatmul.bf16.gmra.mxu1 %v320_v48  ;;  %577 = vmatmul.bf16.gmra.mxu2 %v320_v48  ;;  %v4450_v41 = vor.u32 %v5083_v29, %v4447_v35  ;;  %v4357_v47 = vld [vmem:[#allocation5 + $0xc8] sm:$0xf]  ;;  %v5062_v48 = vld [vmem:[#allocation5 + $0xd4] sm:$0xf0] }
 0x161   :  { %v261_v54 = vpop.f32.mrf.mxu0  ;;  %1339 = vmatpush.bf16.msrb.mxu1 %v4322_v34  ;;  %v4383_v29 = vld [vmem:[#allocation5 + $0x110] sm:$0xf0] }
 0x162   :  { %v624_v55 = vmax.f32 %v622_v46, %v623_v51  ;;  %v630_v56 = vrot.slane %v629_v52, 2  ;;  %v262_v15 = vadd.f32 %v5569_v14, %v261_v54  ;;  %v4358_v51 = vor.u32 %v5062_v48, %v4357_v47  ;;  %v4431_v54 = vld [vmem:[#allocation5 + $0x170] sm:$0xf0] }
 0x163   :  { %v5673_v61 = vpop.f32.mrf.mxu2  ;;  %1428 = vmatpush.bf16.msrb.mxu2 %v4450_v41 }
 0x164   :  { %v1872_v1 = vpack.c.bf16 %v624_v55, %v624_v55  ;;  %v631_v3 = vmax.f32 %v629_v52, %v630_v56  ;;  %v302_v31 = vmax.f32 %v262_v15, 0.0  ;;  %v4303_v52 = vld [vmem:[#allocation5 + $0x70] sm:$0xf0]  ;;  %v4434_v56 = vor.u32 %v5079_v53, %v4431_v54  ;;  %1515 = vmatpush.bf16.msrb.mxu3 %v4358_v51 }
 0x165   :  { %v451_v6 = vpop.f32.mrf.mxu1  ;;  %v4306_v55 = vor.u32 %v5047_v49, %v4303_v52 }
 0x166   :  { %v1978_v7 = vunpack.c.l.b16 %v1872_v1  ;;  %v632_v8 = vrot.slane %v631_v3, 1  ;;  %v634_v9 = vmax.f32 %v5670_v45, %v451_v6  ;;  %v5677_v10 = vpack.c.bf16 %v451_v6, %v5670_v45 }
 0x167   :  { %1340 = vmatpush.bf16.msrb.mxu1 %v4306_v55  ;;  %1429 = vmatpush.bf16.msrb.mxu2 %v4434_v56 }
 0x168   :  { %v5681_v19 = vsel %vm1992_vm2, %v1978_v7, %v1976_v5  ;;  %v633_v20 = vmax.f32 %v631_v3, %v632_v8  ;;  %1186 = vmatmul.bf16.gmra.mxu3 %v5677_v10  ;;  %v5039_v7 = vld [vmem:[#allocation5 + $0x24] sm:$0xf]  ;;  %v4271_v8 = vld [vmem:[#allocation5 + $0x30] sm:$0xf0] }
 0x169   :  { %v263_v22 = vpop.f32.mrf.mxu0  ;;  %v4274_v12 = vor.u32 %v5039_v7, %v4271_v8 }
 0x16a   :  { %v1873_v23 = vpack.c.bf16 %v633_v20, %v633_v20  ;;  %v264_v24 = vadd.f32 %v5569_v14, %v263_v22  ;;  %v4255_v22 = vld [vmem:[#allocation5 + $0x10] sm:$0xf0] }
 0x16b   :  { %v540_v32 = vpop.f32.mrf.mxu2  ;;  %1341 = vmatpush.bf16.msrb.mxu1 %v4290_v63  ;;  %v4258_v28 = vor.u32 %v5035_v21, %v4255_v22 }
 0x16c   :  { %v1979_v36 = vunpack.c.l.b16 %v1873_v23  ;;  %v303_v37 = vmax.f32 %v264_v24, 0.0  ;;  %v643_v38 = vmax.f32 %v5673_v61, %v540_v32  ;;  %v5687_v39 = vpack.c.bf16 %v540_v32, %v5673_v61  ;;  %v5075_v61 = vld [vmem:[#allocation5 + $0x144] sm:$0xf] }
 0x16d   :  { %v454_v40 = vpop.f32.mrf.mxu1  ;;  %v4418_v3 = vor.u32 %v5075_v61, %v4415_v0  ;;  %v5067_v23 = vld [vmem:[#allocation5 + $0x104] sm:$0xf] }
 0x16e   :  { %v5690_v44 = vsel %vm1992_vm2, %v1979_v36, %v1977_v30  ;;  %v635_v45 = vmax.f32 %v634_v9, %v454_v40  ;;  %1275 = vmatmul.bf16.gmra.mxu0 %v5687_v39  ;;  %v321_v46 = vpack.c.bf16 %v303_v37, %v302_v31  ;;  %v5071_v9 = vld [vmem:[#allocation5 + $0x124] sm:$0xf]  ;;  %v4386_v36 = vor.u32 %v5067_v23, %v4383_v29 }
 0x16f   :  { %1430 = vmatpush.bf16.msrb.mxu2 %v4418_v3  ;;  %v4402_v16 = vor.u32 %v5071_v9, %v4399_v13  ;;  %1342 = vmatpush.bf16.msrb.mxu1 %v4274_v12  ;;  %v4341_v13 = vld [vmem:[#allocation5 + $0xa8] sm:$0xf] }
 0x170   :  { %493 = vmatmul.bf16.gmra.mxu1 %v321_v46  ;;  %582 = vmatmul.bf16.gmra.mxu2 %v321_v46 }
 0x171   :  { %v266_v58 = vpop.f32.mrf.mxu0 }
 0x172   :  { %v267_v11 = vadd.f32 %v5569_v14, %v266_v58 }
 0x173   :  { %v543_v62 = vpop.f32.mrf.mxu2  ;;  %1431 = vmatpush.bf16.msrb.mxu2 %v4402_v16  ;;  %1343 = vmatpush.bf16.msrb.mxu1 %v4258_v28 }
 0x174   :  { %v644_v1 = vmax.f32 %v643_v38, %v543_v62  ;;  %v304_v24 = vmax.f32 %v267_v11, 0.0 }
 0x175   :  { %v456_v4 = vpop.f32.mrf.mxu1 }
 0x176   :  { %v636_v5 = vmax.f32 %v635_v45, %v456_v4  ;;  %v5693_v6 = vpack.c.bf16 %v456_v4, %v454_v40 }
 0x177   :  { %1432 = vmatpush.bf16.msrb.mxu2 %v4386_v36 }
 0x178   :  { %v637_v15 = vrot.slane %v636_v5, 4  ;;  %1191 = vmatmul.bf16.gmra.mxu3 %v5693_v6 }
 0x179   :  { %v268_v17 = vpop.f32.mrf.mxu0 }
 0x17a   :  { %v638_v18 = vmax.f32 %v636_v5, %v637_v15  ;;  %v269_v20 = vadd.f32 %v5569_v14, %v268_v17  ;;  %v5058_v15 = vld [vmem:[#allocation5 + $0xb4] sm:$0xf0] }
 0x17b   :  { %v545_v26 = vpop.f32.mrf.mxu2  ;;  %v4342_v16 = vor.u32 %v5058_v15, %v4341_v13 }
 0x17c   :  { %v639_v30 = vrot.slane %v638_v18, 2  ;;  %v305_v31 = vmax.f32 %v269_v20, 0.0  ;;  %v645_v32 = vmax.f32 %v644_v1, %v545_v26  ;;  %v5698_v34 = vpack.c.bf16 %v545_v26, %v543_v62 }
 0x17d   :  { %v459_v35 = vpop.f32.mrf.mxu1  ;;  %1516 = vmatpush.bf16.msrb.mxu3 %v4342_v16 }
 0x17e   :  { %v640_v37 = vmax.f32 %v638_v18, %v639_v30  ;;  %v646_v38 = vrot.slane %v645_v32, 4  ;;  %1280 = vmatmul.bf16.gmra.mxu0 %v5698_v34  ;;  %v322_v40 = vpack.c.bf16 %v305_v31, %v304_v24 }
 0x180   :  { %v641_v41 = vrot.slane %v640_v37, 1  ;;  %v647_v45 = vmax.f32 %v645_v32, %v646_v38  ;;  %498 = vmatmul.bf16.gmra.mxu1 %v322_v40  ;;  %587 = vmatmul.bf16.gmra.mxu2 %v322_v40 }
 0x181   :  { %v271_v46 = vpop.f32.mrf.mxu0 }
 0x182   :  { %v642_v47 = vmax.f32 %v640_v37, %v641_v41  ;;  %v648_v48 = vrot.slane %v647_v45, 2  ;;  %v272_v59 = vadd.f32 %v5569_v14, %v271_v46 }
 0x183   :  { %v548_v49 = vpop.f32.mrf.mxu2 }
 0x184   :  { %v1874_v51 = vpack.c.bf16 %v642_v47, %v642_v47  ;;  %v649_v52 = vmax.f32 %v647_v45, %v648_v48  ;;  %v306_v1 = vmax.f32 %v272_v59, 0.0 }
 0x185   :  { %v461_v53 = vpop.f32.mrf.mxu1 }
 0x186   :  { %v1980_v54 = vunpack.c.l.b16 %v1874_v51  ;;  %v650_v55 = vrot.slane %v649_v52, 1  ;;  %v652_v56 = vmax.f32 %v459_v35, %v461_v53  ;;  %v5701_v58 = vpack.c.bf16 %v461_v53, %v459_v35 }
 0x188   :  { %v1995_v60 = vsel %vm1994_vm3, %v1980_v54, %v5681_v19  ;;  %v651_v61 = vmax.f32 %v649_v52, %v650_v55  ;;  %1196 = vmatmul.bf16.gmra.mxu3 %v5701_v58 }
 0x189   :  { %v273_v62 = vpop.f32.mrf.mxu0 }
 0x18a   :  { %v1875_v63 = vpack.c.bf16 %v651_v61, %v651_v61  ;;  %v274_v0 = vadd.f32 %v5569_v14, %v273_v62 }
 0x18b   :  { %v550_v3 = vpop.f32.mrf.mxu2 }
 0x18c   :  { %v1981_v4 = vunpack.c.l.b16 %v1875_v63  ;;  %v307_v5 = vmax.f32 %v274_v0, 0.0  ;;  %v661_v7 = vmax.f32 %v548_v49, %v550_v3  ;;  %v5708_v8 = vpack.c.bf16 %v550_v3, %v548_v49 }
 0x18d   :  { %v464_v9 = vpop.f32.mrf.mxu1 }
 0x18e   :  { %v2007_v11 = vsel %vm1994_vm3, %v1981_v4, %v5690_v44  ;;  %v653_v12 = vmax.f32 %v652_v56, %v464_v9  ;;  %1285 = vmatmul.bf16.gmra.mxu0 %v5708_v8  ;;  %v323_v19 = vpack.c.bf16 %v307_v5, %v306_v1  ;;  %v5054_v4 = vld [vmem:[#allocation5 + $0x94] sm:$0xf0] }
 0x190   :  { %503 = vmatmul.bf16.gmra.mxu1 %v323_v19  ;;  %592 = vmatmul.bf16.gmra.mxu2 %v323_v19 }
 0x193   :  { %v553_v14 = vpop.f32.mrf.mxu2 }
 0x194   :  { %v662_v17 = vmax.f32 %v661_v7, %v553_v14 }
 0x195   :  { %v466_v18 = vpop.f32.mrf.mxu1 }
 0x196   :  { %v654_v20 = vmax.f32 %v653_v12, %v466_v18  ;;  %v5713_v21 = vpack.c.bf16 %v466_v18, %v464_v9 }
 0x198   :  { %v655_v22 = vrot.slane %v654_v20, 4  ;;  %1201 = vmatmul.bf16.gmra.mxu3 %v5713_v21 }
 0x19a   :  { %v656_v44 = vmax.f32 %v654_v20, %v655_v22 }
 0x19b   :  { %v555_v23 = vpop.f32.mrf.mxu2 }
 0x19c   :  { %v657_v24 = vrot.slane %v656_v44, 2  ;;  %v663_v26 = vmax.f32 %v662_v17, %v555_v23  ;;  %v5716_v28 = vpack.c.bf16 %v555_v23, %v553_v14 }
 0x19d   :  { %v469_v29 = vpop.f32.mrf.mxu1 }
 0x19e   :  { %v658_v30 = vmax.f32 %v656_v44, %v657_v24  ;;  %v664_v31 = vrot.slane %v663_v26, 4  ;;  %1290 = vmatmul.bf16.gmra.mxu0 %v5716_v28 }
 0x1a0   :  { %v659_v32 = vrot.slane %v658_v30, 1  ;;  %v665_v35 = vmax.f32 %v663_v26, %v664_v31  ;;  %1344 = vmatmul.bf16.vlgmr.msrb.gmra.mxu1 %v5639_v25  ;;  %1433 = vmatmul.bf16.vlgmr.msrb.gmra.mxu2 %v5644_v33 }
 0x1a2   :  { %v660_v36 = vmax.f32 %v658_v30, %v659_v32  ;;  %v666_v37 = vrot.slane %v665_v35, 2 }
 0x1a3   :  { %v558_v38 = vpop.f32.mrf.mxu2 }
 0x1a4   :  { %v1876_v40 = vpack.c.bf16 %v660_v36, %v660_v36  ;;  %v667_v41 = vmax.f32 %v665_v35, %v666_v37 }
 0x1a5   :  { %v471_v45 = vpop.f32.mrf.mxu1 }
 0x1a6   :  { %v1982_v46 = vunpack.c.l.b16 %v1876_v40  ;;  %v668_v47 = vrot.slane %v667_v41, 1  ;;  %v670_v48 = vmax.f32 %v469_v29, %v471_v45  ;;  %v5721_v49 = vpack.c.bf16 %v471_v45, %v469_v29 }
 0x1a8   :  { %v1997_v51 = vsel %vm1996_vm4, %v1982_v46, %v1995_v60  ;;  %v669_v52 = vmax.f32 %v667_v41, %v668_v47  ;;  %1206 = vmatmul.bf16.gmra.mxu3 %v5721_v49  ;;  %v4325_v60 = vld [vmem:[#allocation5 + $0x88] sm:$0xf] }
 0x1a9   :  { %v4326_v5 = vor.u32 %v5054_v4, %v4325_v60 }
 0x1aa   :  { %v1877_v53 = vpack.c.bf16 %v669_v52, %v669_v52 }
 0x1ab   :  { %v560_v54 = vpop.f32.mrf.mxu2  ;;  %v1167_v55 = vpop.f32.mrf.mxu3  ;;  %1517 = vmatpush.bf16.msrb.mxu3 %v4326_v5 }
 0x1ac   :  { %v1983_v56 = vunpack.c.l.b16 %v1877_v53  ;;  %v679_v59 = vmax.f32 %v558_v38, %v560_v54  ;;  %v5725_v61 = vpack.c.bf16 %v560_v54, %v558_v38  ;;  %v1256_v62 = vpop.f32.mrf.mxu0 }
 0x1ad   :  { %v5727_v63 = vadd.f32 %v1256_v62, %v1167_v55  ;;  %v474_v0 = vpop.f32.mrf.mxu1 }
 0x1ae   :  { %v2008_v1 = vsel %vm1996_vm4, %v1983_v56, %v2007_v11  ;;  %v671_v3 = vmax.f32 %v670_v48, %v474_v0  ;;  %1295 = vmatmul.bf16.gmra.mxu0 %v5725_v61 }
 0x1b0   :  { %1349 = vmatmul.bf16.gmra.mxu1 %v5647_v42  ;;  %1438 = vmatmul.bf16.gmra.mxu2 %v5652_v50 }
 0x1b3   :  { %v563_v7 = vpop.f32.mrf.mxu2  ;;  %v1169_v9 = vpop.f32.mrf.mxu3 }
 0x1b4   :  { %v680_v12 = vmax.f32 %v679_v59, %v563_v7  ;;  %v1258_v19 = vpop.f32.mrf.mxu0 }
 0x1b5   :  { %v5733_v13 = vadd.f32 %v1258_v19, %v1169_v9  ;;  %v476_v15 = vpop.f32.mrf.mxu1 }
 0x1b6   :  { %v672_v16 = vmax.f32 %v671_v3, %v476_v15  ;;  %v5735_v11 = vpack.c.bf16 %v476_v15, %v474_v0 }
 0x1b7   :  { %6935 = vst [vmem:[#allocation12_spill] sm:$0xff] %v5733_v13 }
 0x1b8   :  { %v673_v14 = vrot.slane %v672_v16, 4  ;;  %1211 = vmatmul.bf16.gmra.mxu3 %v5735_v11 }
 0x1ba   :  { %v674_v17 = vmax.f32 %v672_v16, %v673_v14  ;;  %v5050_v16 = vld [vmem:[#allocation5 + $0x74] sm:$0xf0] }
 0x1bb   :  { %v565_v18 = vpop.f32.mrf.mxu2  ;;  %v1172_v20 = vpop.f32.mrf.mxu3 }
 0x1bc   :  { %v675_v22 = vrot.slane %v674_v17, 2  ;;  %v681_v44 = vmax.f32 %v680_v12, %v565_v18  ;;  %v5738_v23 = vpack.c.bf16 %v565_v18, %v563_v7  ;;  %v1261_v24 = vpop.f32.mrf.mxu0 }
 0x1bd   :  { %v5740_v26 = vadd.f32 %v1261_v24, %v1172_v20  ;;  %v479_v29 = vpop.f32.mrf.mxu1 }
 0x1be   :  { %v676_v30 = vmax.f32 %v674_v17, %v675_v22  ;;  %v682_v31 = vrot.slane %v681_v44, 4  ;;  %1300 = vmatmul.bf16.gmra.mxu0 %v5738_v23 }
 0x1bf   :  { %6936 = vst [vmem:[#allocation13_spill] sm:$0xff] %v5740_v26  ;;  %v5186_v26 = vld [vmem:[#allocation7 + $0xb4] sm:$0xf0] }
 0x1c0   :  { %v677_v32 = vrot.slane %v676_v30, 1  ;;  %v683_v35 = vmax.f32 %v681_v44, %v682_v31  ;;  %1354 = vmatmul.bf16.gmra.mxu1 %v5655_v57  ;;  %1443 = vmatmul.bf16.gmra.mxu2 %v5660_v2 }
 0x1c2   :  { %v678_v36 = vmax.f32 %v676_v30, %v677_v32  ;;  %v684_v37 = vrot.slane %v683_v35, 2 }
 0x1c3   :  { %v568_v38 = vpop.f32.mrf.mxu2  ;;  %v1174_v40 = vpop.f32.mrf.mxu3 }
 0x1c4   :  { %v1878_v41 = vpack.c.bf16 %v678_v36, %v678_v36  ;;  %v685_v45 = vmax.f32 %v683_v35, %v684_v37  ;;  %v1263_v46 = vpop.f32.mrf.mxu0 }
 0x1c5   :  { %v5745_v47 = vadd.f32 %v1263_v46, %v1174_v40  ;;  %v481_v48 = vpop.f32.mrf.mxu1 }
 0x1c6   :  { %v1984_v52 = vunpack.c.l.b16 %v1878_v41  ;;  %v686_v53 = vrot.slane %v685_v45, 1  ;;  %v688_v54 = vmax.f32 %v479_v29, %v481_v48  ;;  %v5747_v55 = vpack.c.bf16 %v481_v48, %v479_v29 }
 0x1c7   :  { %6937 = vst [vmem:[#allocation14_spill] sm:$0xff] %v5745_v47  ;;  %v5170_v47 = vld [vmem:[#allocation7 + $0x34] sm:$0xf0] }
 0x1c8   :  { %v1999_v56 = vsel %vm1998_vm5, %v1984_v52, %v1997_v51  ;;  %v687_v59 = vmax.f32 %v685_v45, %v686_v53  ;;  %1216 = vmatmul.bf16.gmra.mxu3 %v5747_v55  ;;  %v4309_v51 = vld [vmem:[#allocation5 + $0x68] sm:$0xf] }
 0x1c9   :  { %v4310_v14 = vor.u32 %v5050_v16, %v4309_v51 }
 0x1ca   :  { %v1879_v62 = vpack.c.bf16 %v687_v59, %v687_v59 }
 0x1cb   :  { %v570_v0 = vpop.f32.mrf.mxu2  ;;  %v1177_v3 = vpop.f32.mrf.mxu3  ;;  %1518 = vmatpush.bf16.msrb.mxu3 %v4310_v14 }
 0x1cc   :  { %v1985_v60 = vunpack.c.l.b16 %v1879_v62  ;;  %v697_v4 = vmax.f32 %v568_v38, %v570_v0  ;;  %v5751_v5 = vpack.c.bf16 %v570_v0, %v568_v38  ;;  %v1266_v7 = vpop.f32.mrf.mxu0 }
 0x1cd   :  { %v5753_v9 = vadd.f32 %v1266_v7, %v1177_v3  ;;  %v484_v12 = vpop.f32.mrf.mxu1 }
 0x1ce   :  { %v5756_v19 = vsel %vm1998_vm5, %v1985_v60, %v2008_v1  ;;  %v689_v15 = vmax.f32 %v688_v54, %v484_v12  ;;  %1305 = vmatmul.bf16.gmra.mxu0 %v5751_v5 }
 0x1cf   :  { %6938 = vst [vmem:[#allocation15_spill] sm:$0xff] %v5753_v9  ;;  %v5190_v9 = vld [vmem:[#allocation7 + $0xd4] sm:$0xf0] }
 0x1d0   :  { %1359 = vmatmul.bf16.gmra.mxu1 %v5663_v27  ;;  %1448 = vmatmul.bf16.gmra.mxu2 %v5668_v43 }
 0x1d3   :  { %v573_v17 = vpop.f32.mrf.mxu2  ;;  %v1179_v18 = vpop.f32.mrf.mxu3 }
 0x1d4   :  { %v698_v20 = vmax.f32 %v697_v4, %v573_v17  ;;  %v1268_v22 = vpop.f32.mrf.mxu0 }
 0x1d5   :  { %v5761_v44 = vadd.f32 %v1268_v22, %v1179_v18  ;;  %v486_v24 = vpop.f32.mrf.mxu1 }
 0x1d6   :  { %v690_v1 = vmax.f32 %v689_v15, %v486_v24  ;;  %v5763_v29 = vpack.c.bf16 %v486_v24, %v484_v12 }
 0x1d7   :  { %6939 = vst [vmem:[#allocation16_spill] sm:$0xff] %v5761_v44 }
 0x1d8   :  { %v691_v30 = vrot.slane %v690_v1, 4  ;;  %1221 = vmatmul.bf16.gmra.mxu3 %v5763_v29 }
 0x1da   :  { %v692_v31 = vmax.f32 %v690_v1, %v691_v30 }
 0x1db   :  { %v575_v32 = vpop.f32.mrf.mxu2  ;;  %v1182_v35 = vpop.f32.mrf.mxu3 }
 0x1dc   :  { %v693_v36 = vrot.slane %v692_v31, 2  ;;  %v699_v37 = vmax.f32 %v698_v20, %v575_v32  ;;  %v5766_v38 = vpack.c.bf16 %v575_v32, %v573_v17  ;;  %v1271_v40 = vpop.f32.mrf.mxu0 }
 0x1dd   :  { %v5768_v41 = vadd.f32 %v1271_v40, %v1182_v35  ;;  %v489_v45 = vpop.f32.mrf.mxu1  ;;  %v4293_v35 = vld [vmem:[#allocation5 + $0x48] sm:$0xf] }
 0x1de   :  { %v694_v46 = vmax.f32 %v692_v31, %v693_v36  ;;  %v700_v48 = vrot.slane %v699_v37, 4  ;;  %1310 = vmatmul.bf16.gmra.mxu0 %v5766_v38  ;;  %v5046_v36 = vld [vmem:[#allocation5 + $0x54] sm:$0xf0] }
 0x1df   :  { %6940 = vst [vmem:[#allocation17_spill] sm:$0xff] %v5768_v41  ;;  %v5125_v41 = vld [vmem:[#allocation2 + $0xcc] sm:$0xf0] }
 0x1e0   :  { %v695_v52 = vrot.slane %v694_v46, 1  ;;  %v701_v53 = vmax.f32 %v699_v37, %v700_v48  ;;  %1364 = vmatmul.bf16.gmra.mxu1 %v5677_v10  ;;  %1453 = vmatmul.bf16.gmra.mxu2 %v5687_v39 }
 0x1e2   :  { %v696_v54 = vmax.f32 %v694_v46, %v695_v52  ;;  %v702_v59 = vrot.slane %v701_v53, 2  ;;  %v4501_v46 = vld [vmem:[#allocation5 + $0x1e8] sm:$0xf] }
 0x1e3   :  { %v578_v62 = vpop.f32.mrf.mxu2  ;;  %v1184_v0 = vpop.f32.mrf.mxu3 }
 0x1e4   :  { %v1880_v3 = vpack.c.bf16 %v696_v54, %v696_v54  ;;  %v703_v60 = vmax.f32 %v701_v53, %v702_v59  ;;  %v1273_v4 = vpop.f32.mrf.mxu0  ;;  %v4485_v54 = vld [vmem:[#allocation5 + $0x1c8] sm:$0xf]  ;;  %v5094_v59 = vld [vmem:[#allocation5 + $0x1d4] sm:$0xf0] }
 0x1e5   :  { %v5773_v7 = vadd.f32 %v1273_v4, %v1184_v0  ;;  %v491_v12 = vpop.f32.mrf.mxu1 }
 0x1e6   :  { %v1986_v15 = vunpack.c.l.b16 %v1880_v3  ;;  %v704_v51 = vrot.slane %v703_v60, 1  ;;  %v706_v16 = vmax.f32 %v489_v45, %v491_v12  ;;  %v5775_v14 = vpack.c.bf16 %v491_v12, %v489_v45 }
 0x1e7   :  { %6941 = vst [vmem:[#allocation18_spill] sm:$0xff] %v5773_v7  ;;  %v4294_v45 = vor.u32 %v5046_v36, %v4293_v35  ;;  %v4605_v7 = vld [vmem:[#allocation2 + $0xc0] sm:$0xf] }
 0x1e8   :  { %v5778_v17 = vsel %vm2000_vm6, %v1986_v15, %v1999_v56  ;;  %v705_v18 = vmax.f32 %v703_v60, %v704_v51  ;;  %1226 = vmatmul.bf16.gmra.mxu3 %v5775_v14  ;;  %v5098_v56 = vld [vmem:[#allocation5 + $0x1f4] sm:$0xf0]  ;;  %v4469_v15 = vld [vmem:[#allocation5 + $0x1a8] sm:$0xf]  ;;  %v4606_v44 = vor.u32 %v5125_v41, %v4605_v7  ;;  %v5048_v41 = vld [vmem:[#allocation5 + $0x6c] sm:$0xf] }
 0x1e9   :  { %v4502_v53 = vor.u32 %v5098_v56, %v4501_v46  ;;  %1519 = vmatpush.bf16.msrb.mxu3 %v4294_v45  ;;  %v5090_v51 = vld [vmem:[#allocation5 + $0x1b4] sm:$0xf0]  ;;  %v4311_v7 = vld [vmem:[#allocation5 + $0x78] sm:$0xf0] }
 0x1ea   :  { %v1881_v20 = vpack.c.bf16 %v705_v18, %v705_v18 }
 0x1eb   :  { %v580_v22 = vpop.f32.mrf.mxu2  ;;  %v1187_v24 = vpop.f32.mrf.mxu3  ;;  %1603 = vmatpush.bf16.msra.mxu0 %v4502_v53 }
 0x1ec   :  { %v1987_v1 = vunpack.c.l.b16 %v1881_v20  ;;  %v715_v30 = vmax.f32 %v578_v62, %v580_v22  ;;  %v5781_v31 = vpack.c.bf16 %v580_v22, %v578_v62  ;;  %v1276_v32 = vpop.f32.mrf.mxu0  ;;  %v4486_v62 = vor.u32 %v5094_v59, %v4485_v54  ;;  %v5082_v59 = vld [vmem:[#allocation5 + $0x174] sm:$0xf0] }
 0x1ed   :  { %v5783_v37 = vadd.f32 %v1276_v32, %v1187_v24  ;;  %v494_v40 = vpop.f32.mrf.mxu1  ;;  %v4470_v20 = vor.u32 %v5090_v51, %v4469_v15  ;;  %v4453_v24 = vld [vmem:[#allocation5 + $0x188] sm:$0xf]  ;;  %v5042_v15 = vld [vmem:[#allocation5 + $0x34] sm:$0xf0] }
 0x1ee   :  { %v5787_v48 = vsel %vm2000_vm6, %v1987_v1, %v5756_v19  ;;  %v707_v52 = vmax.f32 %v706_v16, %v494_v40  ;;  %1315 = vmatmul.bf16.gmra.mxu0 %v5781_v31  ;;  %v5086_v1 = vld [vmem:[#allocation5 + $0x194] sm:$0xf0] }
 0x1ef   :  { %6942 = vst [vmem:[#allocation19_spill] sm:$0xff] %v5783_v37  ;;  %1604 = vmatpush.bf16.msra.mxu0 %v4486_v62  ;;  %v4454_v35 = vor.u32 %v5086_v1, %v4453_v24 }
 0x1f0   :  { %1369 = vmatmul.bf16.gmra.mxu1 %v5693_v6  ;;  %1458 = vmatmul.bf16.gmra.mxu2 %v5698_v34 }
 0x1f3   :  { %v583_v0 = vpop.f32.mrf.mxu2  ;;  %v1189_v3 = vpop.f32.mrf.mxu3  ;;  %1605 = vmatpush.bf16.msra.mxu0 %v4470_v20  ;;  %v5078_v20 = vld [vmem:[#allocation5 + $0x154] sm:$0xf0] }
 0x1f4   :  { %v716_v60 = vmax.f32 %v715_v30, %v583_v0  ;;  %v1278_v4 = vpop.f32.mrf.mxu0 }
 0x1f5   :  { %v5792_v12 = vadd.f32 %v1278_v4, %v1189_v3  ;;  %v496_v19 = vpop.f32.mrf.mxu1 }
 0x1f6   :  { %v708_v16 = vmax.f32 %v707_v52, %v496_v19  ;;  %v5794_v18 = vpack.c.bf16 %v496_v19, %v494_v40  ;;  %v4437_v52 = vld [vmem:[#allocation5 + $0x168] sm:$0xf] }
 0x1f7   :  { %6943 = vst [vmem:[#allocation20_spill] sm:$0xff] %v5792_v12  ;;  %1606 = vmatpush.bf16.msra.mxu0 %v4454_v35  ;;  %v4438_v4 = vor.u32 %v5082_v59, %v4437_v52  ;;  %v4277_v19 = vld [vmem:[#allocation5 + $0x28] sm:$0xf] }
 0x1f8   :  { %v709_v22 = vrot.slane %v708_v16, 4  ;;  %1231 = vmatmul.bf16.gmra.mxu3 %v5794_v18 }
 0x1fa   :  { %v710_v32 = vmax.f32 %v708_v16, %v709_v22 }
 0x1fb   :  { %v585_v30 = vpop.f32.mrf.mxu2  ;;  %v1192_v36 = vpop.f32.mrf.mxu3  ;;  %1607 = vmatpush.bf16.msra.mxu0 %v4438_v4  ;;  %v5074_v4 = vld [vmem:[#allocation5 + $0x134] sm:$0xf0] }
 0x1fc   :  { %v711_v45 = vrot.slane %v710_v32, 2  ;;  %v717_v46 = vmax.f32 %v716_v60, %v585_v30  ;;  %v5797_v56 = vpack.c.bf16 %v585_v30, %v583_v0  ;;  %v1281_v53 = vpop.f32.mrf.mxu0  ;;  %v4278_v0 = vor.u32 %v5042_v15, %v4277_v19  ;;  %v4421_v60 = vld [vmem:[#allocation5 + $0x148] sm:$0xf] }
 0x1fd   :  { %v5799_v54 = vadd.f32 %v1281_v53, %v1192_v36  ;;  %v499_v40 = vpop.f32.mrf.mxu1  ;;  %v4422_v1 = vor.u32 %v5078_v20, %v4421_v60  ;;  %v4261_v30 = vld [vmem:[#allocation5 + $0x8] sm:$0xf]  ;;  %v5038_v36 = vld [vmem:[#allocation5 + $0x14] sm:$0xf0] }
 0x1fe   :  { %v712_v62 = vmax.f32 %v710_v32, %v711_v45  ;;  %v718_v3 = vrot.slane %v717_v46, 4  ;;  %1320 = vmatmul.bf16.gmra.mxu0 %v5797_v56  ;;  %1520 = vmatpush.bf16.msrb.mxu3 %v4278_v0  ;;  %v4405_v19 = vld [vmem:[#allocation5 + $0x128] sm:$0xf] }
 0x1ff   :  { %6944 = vst [vmem:[#allocation21_spill] sm:$0xff] %v5799_v54  ;;  %1608 = vmatpush.bf16.msra.mxu0 %v4422_v1  ;;  %v4406_v60 = vor.u32 %v5074_v4, %v4405_v19 }
 0x200   :  { %v713_v51 = vrot.slane %v712_v62, 1  ;;  %v719_v16 = vmax.f32 %v717_v46, %v718_v3  ;;  %1374 = vmatmul.bf16.gmra.mxu1 %v5701_v58  ;;  %1463 = vmatmul.bf16.gmra.mxu2 %v5708_v8  ;;  %v4262_v46 = vor.u32 %v5038_v36, %v4261_v30 }
 0x202   :  { %v714_v22 = vmax.f32 %v712_v62, %v713_v51  ;;  %v720_v24 = vrot.slane %v719_v16, 2  ;;  %1521 = vmatpush.bf16.msrb.mxu3 %v4262_v46 }
 0x203   :  { %v588_v32 = vpop.f32.mrf.mxu2  ;;  %v1194_v35 = vpop.f32.mrf.mxu3  ;;  %1609 = vmatpush.bf16.msra.mxu0 %v4406_v60 }
 0x204   :  { %v1882_v45 = vpack.c.bf16 %v714_v22, %v714_v22  ;;  %v721_v53 = vmax.f32 %v719_v16, %v720_v24  ;;  %v1283_v52 = vpop.f32.mrf.mxu0  ;;  %v4389_v22 = vld [vmem:[#allocation5 + $0x108] sm:$0xf]  ;;  %v5070_v24 = vld [vmem:[#allocation5 + $0x114] sm:$0xf0] }
 0x205   :  { %v5804_v59 = vadd.f32 %v1283_v52, %v1194_v35  ;;  %v501_v3 = vpop.f32.mrf.mxu1  ;;  %v4390_v35 = vor.u32 %v5070_v24, %v4389_v22 }
 0x206   :  { %v1988_v15 = vunpack.c.l.b16 %v1882_v45  ;;  %v722_v62 = vrot.slane %v721_v53, 1  ;;  %v724_v51 = vmax.f32 %v499_v40, %v501_v3  ;;  %v5806_v0 = vpack.c.bf16 %v501_v3, %v499_v40 }
 0x207   :  { %6945 = vst [vmem:[#allocation22_spill] sm:$0xff] %v5804_v59  ;;  %1610 = vmatpush.bf16.msra.mxu0 %v4390_v35 }
 0x208   :  { %v723_v20 = vmax.f32 %v721_v53, %v722_v62  ;;  %1236 = vmatmul.bf16.gmra.mxu3 %v5806_v0  ;;  %v2003_v16 = vsel %vm2002_vm7, %v1988_v15, %v5778_v17 }
 0x20a   :  { %v1883_v1 = vpack.c.bf16 %v723_v20, %v723_v20 }
 0x20b   :  { %v590_v30 = vpop.f32.mrf.mxu2  ;;  %v1197_v36 = vpop.f32.mrf.mxu3 }
 0x20c   :  { %v1989_v45 = vunpack.c.l.b16 %v1883_v1  ;;  %v733_v52 = vmax.f32 %v588_v32, %v590_v30  ;;  %v5811_v59 = vpack.c.bf16 %v590_v30, %v588_v32  ;;  %v1286_v40 = vpop.f32.mrf.mxu0 }
 0x20d   :  { %v5813_v46 = vadd.f32 %v1286_v40, %v1197_v36  ;;  %v504_v53 = vpop.f32.mrf.mxu1 }
 0x20e   :  { %v725_v3 = vmax.f32 %v724_v51, %v504_v53  ;;  %1325 = vmatmul.bf16.gmra.mxu0 %v5811_v59  ;;  %v2011_v17 = vsel %vm2002_vm7, %v1989_v45, %v5787_v48 }
 0x20f   :  { %6946 = vst [vmem:[#allocation23_spill] sm:$0xff] %v5813_v46 }
 0x210   :  { %1379 = vmatmul.bf16.gmra.mxu1 %v5713_v21  ;;  %1468 = vmatmul.bf16.gmra.mxu2 %v5716_v28 }
 0x213   :  { %v593_v19 = vpop.f32.mrf.mxu2  ;;  %v1199_v4 = vpop.f32.mrf.mxu3 }
 0x214   :  { %v734_v15 = vmax.f32 %v733_v52, %v593_v19  ;;  %v1288_v32 = vpop.f32.mrf.mxu0 }
 0x215   :  { %v5820_v62 = vadd.f32 %v1288_v32, %v1199_v4  ;;  %v506_v60 = vpop.f32.mrf.mxu1 }
 0x216   :  { %v726_v20 = vmax.f32 %v725_v3, %v506_v60  ;;  %v5822_v22 = vpack.c.bf16 %v506_v60, %v504_v53 }
 0x217   :  { %6947 = vst [vmem:[#allocation24_spill] sm:$0xff] %v5820_v62 }
 0x218   :  { %v727_v51 = vrot.slane %v726_v20, 4  ;;  %1241 = vmatmul.bf16.gmra.mxu3 %v5822_v22 }
 0x21a   :  { %v728_v24 = vmax.f32 %v726_v20, %v727_v51 }
 0x21b   :  { %v595_v1 = vpop.f32.mrf.mxu2  ;;  %v1202_v48 = vpop.f32.mrf.mxu3 }
 0x21c   :  { %v729_v35 = vrot.slane %v728_v24, 2  ;;  %v735_v30 = vmax.f32 %v734_v15, %v595_v1  ;;  %v5825_v36 = vpack.c.bf16 %v595_v1, %v593_v19  ;;  %v1291_v45 = vpop.f32.mrf.mxu0 }
 0x21d   :  { %v5827_v40 = vadd.f32 %v1291_v45, %v1202_v48  ;;  %v1345_v52 = vpop.f32.mrf.mxu1 }
 0x21e   :  { %v730_v4 = vmax.f32 %v728_v24, %v729_v35  ;;  %v736_v32 = vrot.slane %v735_v30, 4  ;;  %1330 = vmatmul.bf16.gmra.mxu0 %v5825_v36 }
 0x21f   :  { %6948 = vst [vmem:[#allocation25_spill] sm:$0xff] %v5827_v40 }
 0x220   :  { %v731_v53 = vrot.slane %v730_v4, 1  ;;  %v737_v3 = vmax.f32 %v735_v30, %v736_v32  ;;  %1384 = vmatmul.bf16.gmra.mxu1 %v5721_v49  ;;  %1473 = vmatmul.bf16.gmra.mxu2 %v5725_v61 }
 0x222   :  { %v732_v60 = vmax.f32 %v730_v4, %v731_v53  ;;  %v738_v20 = vrot.slane %v737_v3, 2 }
 0x223   :  { %v1204_v51 = vpop.f32.mrf.mxu3  ;;  %v1434_v15 = vpop.f32.mrf.mxu2 }
 0x224   :  { %v1884_v19 = vpack.c.bf16 %v732_v60, %v732_v60  ;;  %v739_v1 = vmax.f32 %v737_v3, %v738_v20  ;;  %v1293_v62 = vpop.f32.mrf.mxu0  ;;  %v5832_v48 = vadd.f32 %v1434_v15, %v1345_v52 }
 0x225   :  { %v5834_v45 = vadd.f32 %v1293_v62, %v1204_v51  ;;  %v1347_v24 = vpop.f32.mrf.mxu1 }
 0x226   :  { %6949 = vst [vmem:[#allocation26_spill] sm:$0xff] %v5832_v48  ;;  %v1990_v35 = vunpack.c.l.b16 %v1884_v19  ;;  %v740_v40 = vrot.slane %v739_v1, 1  ;;  %v5220_v48 = vld [vmem:[#allocation7 + $0x1c4] sm:$0xf0] }
 0x227   :  { %6950 = vst [vmem:[#allocation27_spill] sm:$0xff] %v5834_v45 }
 0x228   :  { %v741_v30 = vmax.f32 %v739_v1, %v740_v40  ;;  %1522 = vmatmul.bf16.vlgmr.msrb.gmra.mxu3 %v5639_v25  ;;  %v5838_v32 = vsel %vm2004_vm8, %v1990_v35, %v2003_v16 }
 0x22a   :  { %v1885_v4 = vpack.c.bf16 %v741_v30, %v741_v30 }
 0x22b   :  { %v1207_v53 = vpop.f32.mrf.mxu3  ;;  %v1436_v46 = vpop.f32.mrf.mxu2 }
 0x22c   :  { %v1991_v60 = vunpack.c.l.b16 %v1885_v4  ;;  %v1296_v3 = vpop.f32.mrf.mxu0  ;;  %v5840_v20 = vadd.f32 %v1436_v46, %v1347_v24 }
 0x22d   :  { %v5842_v52 = vadd.f32 %v1296_v3, %v1207_v53  ;;  %v1350_v62 = vpop.f32.mrf.mxu1 }
 0x22e   :  { %6951 = vst [vmem:[#allocation28_spill] sm:$0xff] %v5840_v20  ;;  %1611 = vmatmul.bf16.vlgmr.msra.gmra.mxu0 %v5644_v33  ;;  %v5846_v51 = vsel %vm2004_vm8, %v1991_v60, %v2011_v17  ;;  %v5224_v20 = vld [vmem:[#allocation7 + $0x1e4] sm:$0xf0] }
 0x22f   :  { %6952 = vst [vmem:[#allocation29_spill] sm:$0xff] %v5842_v52 }
 0x230   :  { %1389 = vmatmul.bf16.gmra.mxu1 %v5735_v11  ;;  %1478 = vmatmul.bf16.gmra.mxu2 %v5738_v23 }
 0x233   :  { %v1209_v16 = vpop.f32.mrf.mxu3  ;;  %v1439_v40 = vpop.f32.mrf.mxu2 }
 0x234   :  { %v1298_v15 = vpop.f32.mrf.mxu0  ;;  %v5850_v19 = vadd.f32 %v1439_v40, %v1350_v62 }
 0x235   :  { %v5852_v1 = vadd.f32 %v1298_v15, %v1209_v16  ;;  %v1352_v46 = vpop.f32.mrf.mxu1 }
 0x236   :  { %6953 = vst [vmem:[#allocation30_spill] sm:$0xff] %v5850_v19  ;;  %v4727_v19 = vld [vmem:[#allocation2 + $0x1b8] sm:$0xf0] }
 0x237   :  { %6954 = vst [vmem:[#allocation31_spill] sm:$0xff] %v5852_v1 }
 0x238   :  { %1527 = vmatmul.bf16.gmra.mxu3 %v5647_v42 }
 0x23b   :  { %v1212_v24 = vpop.f32.mrf.mxu3  ;;  %v1441_v35 = vpop.f32.mrf.mxu2 }
 0x23c   :  { %v1301_v30 = vpop.f32.mrf.mxu0  ;;  %v5855_v4 = vadd.f32 %v1441_v35, %v1352_v46  ;;  %v4621_v46 = vld [vmem:[#allocation2 + $0xe0] sm:$0xf]  ;;  %v5096_v35 = vld [vmem:[#allocation5 + $0x1ec] sm:$0xf] }
 0x23d   :  { %v5857_v17 = vadd.f32 %v1301_v30, %v1212_v24  ;;  %v1355_v53 = vpop.f32.mrf.mxu1  ;;  %v5129_v24 = vld [vmem:[#allocation2 + $0xec] sm:$0xf0] }
 0x23e   :  { %6955 = vst [vmem:[#allocation32_spill] sm:$0xff] %v5855_v4  ;;  %1616 = vmatmul.bf16.gmra.mxu0 %v5652_v50  ;;  %v4622_v30 = vor.u32 %v5129_v24, %v4621_v46  ;;  %v5152_v4 = vld [vmem:[#allocation2 + $0x1ac] sm:$0xf] }
 0x23f   :  { %6956 = vst [vmem:[#allocation33_spill] sm:$0xff] %v5857_v17  ;;  %v4503_v17 = vld [vmem:[#allocation5 + $0x1f8] sm:$0xf0] }
 0x240   :  { %1394 = vmatmul.bf16.gmra.mxu1 %v5747_v55  ;;  %1483 = vmatmul.bf16.gmra.mxu2 %v5751_v5  ;;  %v4506_v1 = vor.u32 %v5096_v35, %v4503_v17 }
 0x241   :  { %2337 = vmatpush.bf16.msra.mxu3 %v4622_v30 }
 0x242   :  { %1781 = vmatpush.bf16.msra.mxu2 %v4506_v1 }
 0x243   :  { %v1214_v60 = vpop.f32.mrf.mxu3  ;;  %v1444_v3 = vpop.f32.mrf.mxu2 }
 0x244   :  { %v1303_v62 = vpop.f32.mrf.mxu0  ;;  %v5862_v16 = vadd.f32 %v1444_v3, %v1355_v53  ;;  %v5064_v3 = vld [vmem:[#allocation5 + $0xec] sm:$0xf] }
 0x245   :  { %v5864_v40 = vadd.f32 %v1303_v62, %v1214_v60  ;;  %v1357_v15 = vpop.f32.mrf.mxu1  ;;  %v4375_v62 = vld [vmem:[#allocation5 + $0xf8] sm:$0xf0]  ;;  %2338 = vmatpush.bf16.msra.mxu3 %v4606_v44  ;;  %v5080_v44 = vld [vmem:[#allocation5 + $0x16c] sm:$0xf] }
 0x246   :  { %6957 = vst [vmem:[#allocation34_spill] sm:$0xff] %v5862_v16  ;;  %v4471_v16 = vld [vmem:[#allocation5 + $0x1b8] sm:$0xf0] }
 0x247   :  { %6958 = vst [vmem:[#allocation35_spill] sm:$0xff] %v5864_v40  ;;  %v4378_v40 = vor.u32 %v5064_v3, %v4375_v62 }
 0x248   :  { %1532 = vmatmul.bf16.gmra.mxu3 %v5655_v57 }
 0x249   :  { %1692 = vmatpush.bf16.msra.mxu1 %v4378_v40 }
 0x24b   :  { %v1217_v52 = vpop.f32.mrf.mxu3  ;;  %v1446_v45 = vpop.f32.mrf.mxu2 }
 0x24c   :  { %v1306_v54 = vpop.f32.mrf.mxu0  ;;  %v5867_v12 = vadd.f32 %v1446_v45, %v1357_v15 }
 0x24d   :  { %v5869_v53 = vadd.f32 %v1306_v54, %v1217_v52  ;;  %v1360_v60 = vpop.f32.mrf.mxu1 }
 0x24e   :  { %6959 = vst [vmem:[#allocation36_spill] sm:$0xff] %v5867_v12  ;;  %1621 = vmatmul.bf16.gmra.mxu0 %v5660_v2 }
 0x24f   :  { %6960 = vst [vmem:[#allocation37_spill] sm:$0xff] %v5869_v53 }
 0x250   :  { %1399 = vmatmul.bf16.gmra.mxu1 %v5763_v29  ;;  %1488 = vmatmul.bf16.gmra.mxu2 %v5766_v38 }
 0x253   :  { %v1219_v17 = vpop.f32.mrf.mxu3  ;;  %v1449_v46 = vpop.f32.mrf.mxu2 }
 0x254   :  { %v1308_v24 = vpop.f32.mrf.mxu0  ;;  %v5874_v35 = vadd.f32 %v1449_v46, %v1360_v60  ;;  %v4359_v46 = vld [vmem:[#allocation5 + $0xd8] sm:$0xf0] }
 0x255   :  { %v5876_v45 = vadd.f32 %v1308_v24, %v1219_v17  ;;  %v1362_v54 = vpop.f32.mrf.mxu1  ;;  %v5060_v17 = vld [vmem:[#allocation5 + $0xcc] sm:$0xf] }
 0x256   :  { %6961 = vst [vmem:[#allocation38_spill] sm:$0xff] %v5874_v35  ;;  %v5092_v24 = vld [vmem:[#allocation5 + $0x1cc] sm:$0xf]  ;;  %v4362_v37 = vor.u32 %v5060_v17, %v4359_v46 }
 0x257   :  { %6962 = vst [vmem:[#allocation39_spill] sm:$0xff] %v5876_v45  ;;  %v5088_v35 = vld [vmem:[#allocation5 + $0x1ac] sm:$0xf] }
 0x258   :  { %1537 = vmatmul.bf16.gmra.mxu3 %v5663_v27  ;;  %1693 = vmatpush.bf16.msra.mxu1 %v4362_v37  ;;  %v5084_v37 = vld [vmem:[#allocation5 + $0x18c] sm:$0xf] }
 0x25b   :  { %v1222_v52 = vpop.f32.mrf.mxu3  ;;  %v1451_v1 = vpop.f32.mrf.mxu2 }
 0x25c   :  { %v1311_v15 = vpop.f32.mrf.mxu0  ;;  %v5879_v30 = vadd.f32 %v1451_v1, %v1362_v54  ;;  %v4487_v54 = vld [vmem:[#allocation5 + $0x1d8] sm:$0xf0] }
 0x25d   :  { %v5881_v3 = vadd.f32 %v1311_v15, %v1222_v52  ;;  %v1365_v62 = vpop.f32.mrf.mxu1  ;;  %v4490_v15 = vor.u32 %v5092_v24, %v4487_v54 }
 0x25e   :  { %6963 = vst [vmem:[#allocation40_spill] sm:$0xff] %v5879_v30  ;;  %1626 = vmatmul.bf16.gmra.mxu0 %v5668_v43  ;;  %v4343_v30 = vld [vmem:[#allocation5 + $0xb8] sm:$0xf0] }
 0x25f   :  { %6964 = vst [vmem:[#allocation41_spill] sm:$0xff] %v5881_v3  ;;  %1782 = vmatpush.bf16.msra.mxu2 %v4490_v15  ;;  %v5056_v3 = vld [vmem:[#allocation5 + $0xac] sm:$0xf]  ;;  %v4455_v15 = vld [vmem:[#allocation5 + $0x198] sm:$0xf0] }
 0x260   :  { %1404 = vmatmul.bf16.gmra.mxu1 %v5775_v14  ;;  %1493 = vmatmul.bf16.gmra.mxu2 %v5781_v31  ;;  %v4346_v12 = vor.u32 %v5056_v3, %v4343_v30  ;;  %v4458_v30 = vor.u32 %v5084_v37, %v4455_v15 }
 0x262   :  { %1694 = vmatpush.bf16.msra.mxu1 %v4346_v12  ;;  %v4314_v12 = vor.u32 %v5048_v41, %v4311_v7  ;;  %v5040_v41 = vld [vmem:[#allocation5 + $0x2c] sm:$0xf]  ;;  %v4279_v7 = vld [vmem:[#allocation5 + $0x38] sm:$0xf0] }
 0x263   :  { %v1224_v40 = vpop.f32.mrf.mxu3  ;;  %v1454_v60 = vpop.f32.mrf.mxu2 }
 0x264   :  { %v1313_v45 = vpop.f32.mrf.mxu0  ;;  %v5886_v53 = vadd.f32 %v1454_v60, %v1365_v62  ;;  %v4474_v62 = vor.u32 %v5088_v35, %v4471_v16  ;;  %v4439_v16 = vld [vmem:[#allocation5 + $0x178] sm:$0xf0] }
 0x265   :  { %v5888_v1 = vadd.f32 %v1313_v45, %v1224_v40  ;;  %v1367_v52 = vpop.f32.mrf.mxu1  ;;  %v5052_v45 = vld [vmem:[#allocation5 + $0x8c] sm:$0xf]  ;;  %v4327_v40 = vld [vmem:[#allocation5 + $0x98] sm:$0xf0]  ;;  %v4442_v35 = vor.u32 %v5080_v44, %v4439_v16 }
 0x266   :  { %6965 = vst [vmem:[#allocation42_spill] sm:$0xff] %v5886_v53  ;;  %1783 = vmatpush.bf16.msra.mxu2 %v4474_v62  ;;  %v4330_v54 = vor.u32 %v5052_v45, %v4327_v40  ;;  %v5044_v62 = vld [vmem:[#allocation5 + $0x4c] sm:$0xf]  ;;  %v4407_v16 = vld [vmem:[#allocation5 + $0x138] sm:$0xf0] }
 0x267   :  { %6966 = vst [vmem:[#allocation43_spill] sm:$0xff] %v5888_v1  ;;  %v5072_v44 = vld [vmem:[#allocation5 + $0x12c] sm:$0xf] }
 0x268   :  { %1542 = vmatmul.bf16.gmra.mxu3 %v5677_v10  ;;  %1695 = vmatpush.bf16.msra.mxu1 %v4330_v54 }
 0x26a   :  { %1784 = vmatpush.bf16.msra.mxu2 %v4458_v30 }
 0x26b   :  { %v1227_v60 = vpop.f32.mrf.mxu3  ;;  %v1456_v17 = vpop.f32.mrf.mxu2 }
 0x26c   :  { %v1316_v46 = vpop.f32.mrf.mxu0  ;;  %v5891_v24 = vadd.f32 %v1456_v17, %v1367_v52  ;;  %1696 = vmatpush.bf16.msra.mxu1 %v4314_v12  ;;  %v5076_v17 = vld [vmem:[#allocation5 + $0x14c] sm:$0xf]  ;;  %v4282_v12 = vor.u32 %v5040_v41, %v4279_v7 }
 0x26d   :  { %v5893_v1 = vadd.f32 %v1316_v46, %v1227_v60  ;;  %v1370_v53 = vpop.f32.mrf.mxu1  ;;  %v4295_v60 = vld [vmem:[#allocation5 + $0x58] sm:$0xf0] }
 0x26e   :  { %6967 = vst [vmem:[#allocation44_spill] sm:$0xff] %v5891_v24  ;;  %1631 = vmatmul.bf16.gmra.mxu0 %v5687_v39  ;;  %1785 = vmatpush.bf16.msra.mxu2 %v4442_v35  ;;  %v4298_v37 = vor.u32 %v5044_v62, %v4295_v60  ;;  %v4423_v46 = vld [vmem:[#allocation5 + $0x158] sm:$0xf0]  ;;  %v4410_v35 = vor.u32 %v5072_v44, %v4407_v16 }
 0x26f   :  { %6968 = vst [vmem:[#allocation45_spill] sm:$0xff] %v5893_v1  ;;  %v4426_v30 = vor.u32 %v5076_v17, %v4423_v46  ;;  %v4263_v62 = vld [vmem:[#allocation5 + $0x18] sm:$0xf0] }
 0x270   :  { %1409 = vmatmul.bf16.gmra.mxu1 %v5794_v18  ;;  %1498 = vmatmul.bf16.gmra.mxu2 %v5797_v56 }
 0x271   :  { %1697 = vmatpush.bf16.msra.mxu1 %v4298_v37  ;;  %v4391_v37 = vld [vmem:[#allocation5 + $0x118] sm:$0xf0] }
 0x272   :  { %1786 = vmatpush.bf16.msra.mxu2 %v4426_v30 }
 0x273   :  { %v1229_v3 = vpop.f32.mrf.mxu3  ;;  %v1459_v52 = vpop.f32.mrf.mxu2 }
 0x274   :  { %v1318_v45 = vpop.f32.mrf.mxu0  ;;  %v5898_v40 = vadd.f32 %v1459_v52, %v1370_v53  ;;  %v5036_v52 = vld [vmem:[#allocation5 + $0xc] sm:$0xf] }
 0x275   :  { %v5900_v54 = vadd.f32 %v1318_v45, %v1229_v3  ;;  %v1372_v15 = vpop.f32.mrf.mxu1  ;;  %1698 = vmatpush.bf16.msra.mxu1 %v4282_v12  ;;  %v5068_v3 = vld [vmem:[#allocation5 + $0x10c] sm:$0xf]  ;;  %v4266_v17 = vor.u32 %v5036_v52, %v4263_v62 }
 0x276   :  { %6969 = vst [vmem:[#allocation46_spill] sm:$0xff] %v5898_v40  ;;  %1787 = vmatpush.bf16.msra.mxu2 %v4410_v35  ;;  %v5121_v35 = vld [vmem:[#allocation2 + $0xac] sm:$0xf0]  ;;  %v4751_v40 = vld [vmem:[#allocation2 + $0x1f0] sm:$0xf0] }
 0x277   :  { %6970 = vst [vmem:[#allocation47_spill] sm:$0xff] %v5900_v54  ;;  %v4394_v54 = vor.u32 %v5068_v3, %v4391_v37 }
 0x278   :  { %1547 = vmatmul.bf16.gmra.mxu3 %v5693_v6 }
 0x279   :  { %1699 = vmatpush.bf16.msra.mxu1 %v4266_v17 }
 0x27a   :  { %1788 = vmatpush.bf16.msra.mxu2 %v4394_v54 }
 0x27b   :  { %v1232_v1 = vpop.f32.mrf.mxu3  ;;  %v1461_v53 = vpop.f32.mrf.mxu2 }
 0x27c   :  { %v1321_v60 = vpop.f32.mrf.mxu0  ;;  %v5903_v45 = vadd.f32 %v1461_v53, %v1372_v15 }
 0x27d   :  { %v5905_v46 = vadd.f32 %v1321_v60, %v1232_v1  ;;  %v1375_v30 = vpop.f32.mrf.mxu1  ;;  %v4589_v1 = vld [vmem:[#allocation2 + $0xa0] sm:$0xf] }
 0x27e   :  { %6971 = vst [vmem:[#allocation48_spill] sm:$0xff] %v5903_v45  ;;  %1636 = vmatmul.bf16.gmra.mxu0 %v5698_v34  ;;  %v4590_v53 = vor.u32 %v5121_v35, %v4589_v1  ;;  %v5159_v45 = vld [vmem:[#allocation2 + $0x1e4] sm:$0xf] }
 0x27f   :  { %6972 = vst [vmem:[#allocation49_spill] sm:$0xff] %v5905_v46 }
 0x280   :  { %1414 = vmatmul.bf16.gmra.mxu1 %v5806_v0  ;;  %1503 = vmatmul.bf16.gmra.mxu2 %v5811_v59 }
 0x281   :  { %2339 = vmatpush.bf16.msra.mxu3 %v4590_v53 }
 0x283   :  { %v1234_v41 = vpop.f32.mrf.mxu3  ;;  %v1464_v7 = vpop.f32.mrf.mxu2 }
 0x284   :  { %v1323_v44 = vpop.f32.mrf.mxu0  ;;  %v5910_v12 = vadd.f32 %v1464_v7, %v1375_v30 }
 0x285   :  { %v5912_v15 = vadd.f32 %v1323_v44, %v1234_v41  ;;  %v1377_v16 = vpop.f32.mrf.mxu1 }
 0x286   :  { %6973 = vst [vmem:[#allocation50_spill] sm:$0xff] %v5910_v12 }
 0x287   :  { %6974 = vst [vmem:[#allocation51_spill] sm:$0xff] %v5912_v15 }
 0x288   :  { %1552 = vmatmul.bf16.gmra.mxu3 %v5701_v58 }
 0x28b   :  { %v1237_v52 = vpop.f32.mrf.mxu3  ;;  %v1466_v62 = vpop.f32.mrf.mxu2 }
 0x28c   :  { %v1326_v54 = vpop.f32.mrf.mxu0  ;;  %v5915_v3 = vadd.f32 %v1466_v62, %v1377_v16 }
 0x28d   :  { %v5917_v60 = vadd.f32 %v1326_v54, %v1237_v52  ;;  %v1380_v17 = vpop.f32.mrf.mxu1 }
 0x28e   :  { %6975 = vst [vmem:[#allocation52_spill] sm:$0xff] %v5915_v3  ;;  %1641 = vmatmul.bf16.gmra.mxu0 %v5708_v8 }
 0x28f   :  { %6976 = vst [vmem:[#allocation53_spill] sm:$0xff] %v5917_v60 }
 0x290   :  { %1419 = vmatmul.bf16.gmra.mxu1 %v5822_v22  ;;  %1508 = vmatmul.bf16.gmra.mxu2 %v5825_v36 }
 0x293   :  { %v1239_v37 = vpop.f32.mrf.mxu3  ;;  %v1469_v30 = vpop.f32.mrf.mxu2 }
 0x294   :  { %v1328_v41 = vpop.f32.mrf.mxu0  ;;  %v5922_v7 = vadd.f32 %v1469_v30, %v1380_v17 }
 0x295   :  { %v5924_v44 = vadd.f32 %v1328_v41, %v1239_v37  ;;  %v1382_v1 = vpop.f32.mrf.mxu1 }
 0x296   :  { %6977 = vst [vmem:[#allocation54_spill] sm:$0xff] %v5922_v7 }
 0x297   :  { %6978 = vst [vmem:[#allocation55_spill] sm:$0xff] %v5924_v44 }
 0x298   :  { %1557 = vmatmul.bf16.gmra.mxu3 %v5713_v21 }
 0x29b   :  { %v1242_v16 = vpop.f32.mrf.mxu3  ;;  %v1471_v35 = vpop.f32.mrf.mxu2 }
 0x29c   :  { %v1331_v53 = vpop.f32.mrf.mxu0  ;;  %v5927_v52 = vadd.f32 %v1471_v35, %v1382_v1  ;;  %v4573_v1 = vld [vmem:[#allocation2 + $0x80] sm:$0xf] }
 0x29d   :  { %v5929_v62 = vadd.f32 %v1331_v53, %v1242_v16  ;;  %v1385_v54 = vpop.f32.mrf.mxu1  ;;  %v5117_v16 = vld [vmem:[#allocation2 + $0x8c] sm:$0xf0] }
 0x29e   :  { %6979 = vst [vmem:[#allocation56_spill] sm:$0xff] %v5927_v52  ;;  %1646 = vmatmul.bf16.gmra.mxu0 %v5716_v28  ;;  %v4574_v35 = vor.u32 %v5117_v16, %v4573_v1 }
 0x29f   :  { %6980 = vst [vmem:[#allocation57_spill] sm:$0xff] %v5929_v62 }
 0x2a0   :  { %1700 = vmatmul.bf16.vlgmr.msra.gmra.mxu1 %v5639_v25  ;;  %1789 = vmatmul.bf16.vlgmr.msra.gmra.mxu2 %v5644_v33 }
 0x2a1   :  { %2340 = vmatpush.bf16.msra.mxu3 %v4574_v35 }
 0x2a3   :  { %v1244_v17 = vpop.f32.mrf.mxu3  ;;  %v1474_v37 = vpop.f32.mrf.mxu2 }
 0x2a4   :  { %v1333_v30 = vpop.f32.mrf.mxu0  ;;  %v5934_v41 = vadd.f32 %v1474_v37, %v1385_v54 }
 0x2a5   :  { %v5936_v44 = vadd.f32 %v1333_v30, %v1244_v17  ;;  %v1387_v60 = vpop.f32.mrf.mxu1 }
 0x2a6   :  { %6981 = vst [vmem:[#allocation58_spill] sm:$0xff] %v5934_v41  ;;  %v4749_v41 = vld [vmem:[#allocation2 + $0x1e0] sm:$0xf] }
 0x2a7   :  { %6982 = vst [vmem:[#allocation59_spill] sm:$0xff] %v5936_v44 }
 0x2a8   :  { %1562 = vmatmul.bf16.gmra.mxu3 %v5721_v49 }
 0x2ab   :  { %v1476_v53 = vpop.f32.mrf.mxu2  ;;  %v1523_v62 = vpop.f32.mrf.mxu3 }
 0x2ac   :  { %v5939_v15 = vadd.f32 %v1476_v53, %v1387_v60  ;;  %v1612_v25 = vpop.f32.mrf.mxu0 }
 0x2ad   :  { %v5941_v33 = vadd.f32 %v1612_v25, %v1523_v62  ;;  %v1390_v46 = vpop.f32.mrf.mxu1 }
 0x2ae   :  { %6983 = vst [vmem:[#allocation60_spill] sm:$0xff] %v5939_v15  ;;  %1651 = vmatmul.bf16.gmra.mxu0 %v5725_v61 }
 0x2af   :  { %6984 = vst [vmem:[#allocation61_spill] sm:$0xff] %v5941_v33 }
 0x2b0   :  { %1705 = vmatmul.bf16.gmra.mxu1 %v5647_v42  ;;  %1794 = vmatmul.bf16.gmra.mxu2 %v5652_v50 }
 0x2b3   :  { %v1479_v54 = vpop.f32.mrf.mxu2  ;;  %v1525_v17 = vpop.f32.mrf.mxu3 }
 0x2b4   :  { %v5946_v37 = vadd.f32 %v1479_v54, %v1390_v46  ;;  %v1614_v30 = vpop.f32.mrf.mxu0 }
 0x2b5   :  { %v5948_v1 = vadd.f32 %v1614_v30, %v1525_v17  ;;  %v1392_v16 = vpop.f32.mrf.mxu1 }
 0x2b6   :  { %6985 = vst [vmem:[#allocation62_spill] sm:$0xff] %v5946_v37 }
 0x2b7   :  { %6986 = vst [vmem:[#allocation63_spill] sm:$0xff] %v5948_v1 }
 0x2b8   :  { %1567 = vmatmul.bf16.gmra.mxu3 %v5735_v11 }
 0x2bb   :  { %v1481_v60 = vpop.f32.mrf.mxu2  ;;  %v1528_v62 = vpop.f32.mrf.mxu3 }
 0x2bc   :  { %v5951_v35 = vadd.f32 %v1481_v60, %v1392_v16  ;;  %v1617_v53 = vpop.f32.mrf.mxu0  ;;  %v4557_v16 = vld [vmem:[#allocation2 + $0x60] sm:$0xf]  ;;  %v5113_v60 = vld [vmem:[#allocation2 + $0x6c] sm:$0xf0] }
 0x2bd   :  { %v5953_v25 = vadd.f32 %v1617_v53, %v1528_v62  ;;  %v1395_v42 = vpop.f32.mrf.mxu1  ;;  %v4558_v62 = vor.u32 %v5113_v60, %v4557_v16 }
 0x2be   :  { %6987 = vst [vmem:[#allocation64_spill] sm:$0xff] %v5951_v35  ;;  %1656 = vmatmul.bf16.gmra.mxu0 %v5738_v23 }
 0x2bf   :  { %6988 = vst [vmem:[#allocation65_spill] sm:$0xff] %v5953_v25  ;;  %2341 = vmatpush.bf16.msra.mxu3 %v4558_v62  ;;  %v4519_v25 = vld [vmem:[#allocation2 + $0x18] sm:$0xf0] }
 0x2c0   :  { %1710 = vmatmul.bf16.gmra.mxu1 %v5655_v57  ;;  %1799 = vmatmul.bf16.gmra.mxu2 %v5660_v2 }
 0x2c3   :  { %v1484_v50 = vpop.f32.mrf.mxu2  ;;  %v1530_v46 = vpop.f32.mrf.mxu3 }
 0x2c4   :  { %v5958_v54 = vadd.f32 %v1484_v50, %v1395_v42  ;;  %v1619_v17 = vpop.f32.mrf.mxu0 }
 0x2c5   :  { %v5960_v30 = vadd.f32 %v1619_v17, %v1530_v46  ;;  %v1397_v44 = vpop.f32.mrf.mxu1 }
 0x2c6   :  { %6989 = vst [vmem:[#allocation66_spill] sm:$0xff] %v5958_v54 }
 0x2c7   :  { %6990 = vst [vmem:[#allocation67_spill] sm:$0xff] %v5960_v30  ;;  %v5100_v30 = vld [vmem:[#allocation2 + $0xc] sm:$0xf] }
 0x2c8   :  { %1572 = vmatmul.bf16.gmra.mxu3 %v5747_v55 }
 0x2cb   :  { %v1486_v53 = vpop.f32.mrf.mxu2  ;;  %v1533_v35 = vpop.f32.mrf.mxu3 }
 0x2cc   :  { %v5963_v37 = vadd.f32 %v1486_v53, %v1397_v44  ;;  %v1622_v57 = vpop.f32.mrf.mxu0 }
 0x2cd   :  { %v5965_v2 = vadd.f32 %v1622_v57, %v1533_v35  ;;  %v1400_v15 = vpop.f32.mrf.mxu1 }
 0x2ce   :  { %6991 = vst [vmem:[#allocation68_spill] sm:$0xff] %v5963_v37  ;;  %1661 = vmatmul.bf16.gmra.mxu0 %v5751_v5 }
 0x2cf   :  { %6992 = vst [vmem:[#allocation69_spill] sm:$0xff] %v5965_v2 }
 0x2d0   :  { %1715 = vmatmul.bf16.gmra.mxu1 %v5663_v27  ;;  %1804 = vmatmul.bf16.gmra.mxu2 %v5668_v43  ;;  %v4541_v43 = vld [vmem:[#allocation2 + $0x40] sm:$0xf] }
 0x2d3   :  { %v1489_v42 = vpop.f32.mrf.mxu2  ;;  %v1535_v50 = vpop.f32.mrf.mxu3 }
 0x2d4   :  { %v5970_v46 = vadd.f32 %v1489_v42, %v1400_v15  ;;  %v1624_v17 = vpop.f32.mrf.mxu0  ;;  %v5109_v15 = vld [vmem:[#allocation2 + $0x4c] sm:$0xf0] }
 0x2d5   :  { %v5972_v16 = vadd.f32 %v1624_v17, %v1535_v50  ;;  %v1402_v60 = vpop.f32.mrf.mxu1  ;;  %v4542_v42 = vor.u32 %v5109_v15, %v4541_v43  ;;  %v5161_v43 = vld [vmem:[#allocation2 + $0x1ec] sm:$0xf0] }
 0x2d6   :  { %6993 = vst [vmem:[#allocation70_spill] sm:$0xff] %v5970_v46  ;;  %v4750_v15 = vor.u32 %v5161_v43, %v4749_v41  ;;  %v4717_v41 = vld [vmem:[#allocation2 + $0x1a0] sm:$0xf] }
 0x2d7   :  { %6994 = vst [vmem:[#allocation71_spill] sm:$0xff] %v5972_v16  ;;  %2342 = vmatpush.bf16.msra.mxu3 %v4542_v42 }
 0x2d8   :  { %1577 = vmatmul.bf16.gmra.mxu3 %v5763_v29 }
 0x2db   :  { %v1491_v44 = vpop.f32.mrf.mxu2  ;;  %v1538_v35 = vpop.f32.mrf.mxu3 }
 0x2dc   :  { %v5975_v62 = vadd.f32 %v1491_v44, %v1402_v60  ;;  %v1627_v53 = vpop.f32.mrf.mxu0  ;;  %v4525_v44 = vld [vmem:[#allocation2 + $0x20] sm:$0xf] }
 0x2dd   :  { %v5977_v57 = vadd.f32 %v1627_v53, %v1538_v35  ;;  %v1405_v27 = vpop.f32.mrf.mxu1 }
 0x2de   :  { %6995 = vst [vmem:[#allocation72_spill] sm:$0xff] %v5975_v62  ;;  %1666 = vmatmul.bf16.gmra.mxu0 %v5766_v38  ;;  %v5105_v62 = vld [vmem:[#allocation2 + $0x2c] sm:$0xf0] }
 0x2df   :  { %6996 = vst [vmem:[#allocation73_spill] sm:$0xff] %v5977_v57  ;;  %v4526_v37 = vor.u32 %v5105_v62, %v4525_v44  ;;  %v4733_v62 = vld [vmem:[#allocation2 + $0x1c0] sm:$0xf]  ;;  %v5143_v57 = vld [vmem:[#allocation2 + $0x164] sm:$0xf] }
 0x2e0   :  { %1720 = vmatmul.bf16.gmra.mxu1 %v5677_v10  ;;  %1809 = vmatmul.bf16.gmra.mxu2 %v5687_v39  ;;  %v4509_v10 = vld [vmem:[#allocation2] sm:$0xf]  ;;  %v5101_v39 = vld [vmem:[#allocation2 + $0xc] sm:$0xf0] }
 0x2e1   :  { %2343 = vmatpush.bf16.msra.mxu3 %v4526_v37  ;;  %v4510_v54 = vor.u32 %v5101_v39, %v4509_v10  ;;  %v5157_v37 = vld [vmem:[#allocation2 + $0x1cc] sm:$0xf0] }
 0x2e2   :  { %v4734_v44 = vor.u32 %v5157_v37, %v4733_v62  ;;  %v5153_v10 = vld [vmem:[#allocation2 + $0x1ac] sm:$0xf0] }
 0x2e3   :  { %v1494_v50 = vpop.f32.mrf.mxu2  ;;  %v1540_v17 = vpop.f32.mrf.mxu3 }
 0x2e4   :  { %v5982_v46 = vadd.f32 %v1494_v50, %v1405_v27  ;;  %v1629_v60 = vpop.f32.mrf.mxu0 }
 0x2e5   :  { %v5984_v35 = vadd.f32 %v1629_v60, %v1540_v17  ;;  %v1407_v53 = vpop.f32.mrf.mxu1  ;;  %2344 = vmatpush.bf16.msra.mxu3 %v4510_v54  ;;  %v4718_v54 = vor.u32 %v5153_v10, %v4717_v41 }
 0x2e6   :  { %6997 = vst [vmem:[#allocation74_spill] sm:$0xff] %v5982_v46  ;;  %v4591_v46 = vld [vmem:[#allocation2 + $0xb0] sm:$0xf0] }
 0x2e7   :  { %6998 = vst [vmem:[#allocation75_spill] sm:$0xff] %v5984_v35 }
 0x2e8   :  { %1582 = vmatmul.bf16.gmra.mxu3 %v5775_v14 }
 0x2e9   :  { %2350 = vmatpush.bf16.msrb.mxu3 %v4750_v15 }
 0x2eb   :  { %v1496_v52 = vpop.f32.mrf.mxu2  ;;  %v1543_v42 = vpop.f32.mrf.mxu3 }
 0x2ec   :  { %v5987_v27 = vadd.f32 %v1496_v52, %v1407_v53  ;;  %v1632_v50 = vpop.f32.mrf.mxu0 }
 0x2ed   :  { %v5989_v17 = vadd.f32 %v1632_v50, %v1543_v42  ;;  %v1410_v60 = vpop.f32.mrf.mxu1  ;;  %2351 = vmatpush.bf16.msrb.mxu3 %v4734_v44  ;;  %v4701_v42 = vld [vmem:[#allocation2 + $0x180] sm:$0xf]  ;;  %v5149_v50 = vld [vmem:[#allocation2 + $0x18c] sm:$0xf0] }
 0x2ee   :  { %6999 = vst [vmem:[#allocation76_spill] sm:$0xff] %v5987_v27  ;;  %1671 = vmatmul.bf16.gmra.mxu0 %v5781_v31  ;;  %v4702_v62 = vor.u32 %v5149_v50, %v4701_v42  ;;  %v4653_v50 = vld [vmem:[#allocation2 + $0x120] sm:$0xf] }
 0x2ef   :  { %7000 = vst [vmem:[#allocation77_spill] sm:$0xff] %v5989_v17  ;;  %v5210_v17 = vld [vmem:[#allocation7 + $0x174] sm:$0xf0] }
 0x2f0   :  { %1725 = vmatmul.bf16.gmra.mxu1 %v5693_v6  ;;  %1814 = vmatmul.bf16.gmra.mxu2 %v5698_v34  ;;  %v4685_v6 = vld [vmem:[#allocation2 + $0x160] sm:$0xf]  ;;  %v5145_v34 = vld [vmem:[#allocation2 + $0x16c] sm:$0xf0] }
 0x2f1   :  { %2352 = vmatpush.bf16.msrb.mxu3 %v4718_v54  ;;  %v4686_v37 = vor.u32 %v5145_v34, %v4685_v6  ;;  %v5141_v54 = vld [vmem:[#allocation2 + $0x14c] sm:$0xf0] }
 0x2f3   :  { %v1499_v52 = vpop.f32.mrf.mxu2  ;;  %v5994_v53 = vpop.f32.mrf.mxu3 }
 0x2f4   :  { %v5996_v39 = vadd.f32 %v1499_v52, %v1410_v60  ;;  %v5998_v43 = vpop.f32.mrf.mxu0 }
 0x2f5   :  { %v1412_v15 = vpop.f32.mrf.mxu1  ;;  %2353 = vmatpush.bf16.msrb.mxu3 %v4702_v62  ;;  %v5137_v62 = vld [vmem:[#allocation2 + $0x12c] sm:$0xf0] }
 0x2f6   :  { %7001 = vst [vmem:[#allocation78_spill] sm:$0xff] %v5996_v39  ;;  %v4669_v39 = vld [vmem:[#allocation2 + $0x140] sm:$0xf]  ;;  %v4654_v6 = vor.u32 %v5137_v62, %v4653_v50 }
 0x2f7   :  { %v4670_v42 = vor.u32 %v5141_v54, %v4669_v39 }
 0x2f8   :  { %1587 = vmatmul.bf16.gmra.mxu3 %v5794_v18 }
 0x2f9   :  { %2354 = vmatpush.bf16.msrb.mxu3 %v4686_v37 }
 0x2fb   :  { %v1501_v44 = vpop.f32.mrf.mxu2  ;;  %v1548_v41 = vpop.f32.mrf.mxu3 }
 0x2fc   :  { %v6001_v10 = vadd.f32 %v1501_v44, %v1412_v15  ;;  %v1637_v27 = vpop.f32.mrf.mxu0 }
 0x2fd   :  { %v6003_v60 = vadd.f32 %v1637_v27, %v1548_v41  ;;  %v1415_v52 = vpop.f32.mrf.mxu1  ;;  %2355 = vmatpush.bf16.msrb.mxu3 %v4670_v42  ;;  %v4637_v41 = vld [vmem:[#allocation2 + $0x100] sm:$0xf] }
 0x2fe   :  { %7002 = vst [vmem:[#allocation79_spill] sm:$0xff] %v6001_v10  ;;  %1676 = vmatmul.bf16.gmra.mxu0 %v5797_v56  ;;  %v5133_v10 = vld [vmem:[#allocation2 + $0x10c] sm:$0xf0] }
 0x2ff   :  { %7003 = vst [vmem:[#allocation80_spill] sm:$0xff] %v6003_v60  ;;  %v4638_v39 = vor.u32 %v5133_v10, %v4637_v41 }
 0x300   :  { %1730 = vmatmul.bf16.gmra.mxu1 %v5701_v58  ;;  %1819 = vmatmul.bf16.gmra.mxu2 %v5708_v8 }
 0x301   :  { %2356 = vmatpush.bf16.msrb.mxu3 %v4654_v6 }
 0x303   :  { %v1504_v15 = vpop.f32.mrf.mxu2  ;;  %v6008_v34 = vpop.f32.mrf.mxu3 }
 0x304   :  { %v6010_v27 = vadd.f32 %v1504_v15, %v1415_v52  ;;  %v6012_v44 = vpop.f32.mrf.mxu0 }
 0x305   :  { %v1417_v37 = vpop.f32.mrf.mxu1  ;;  %2357 = vmatpush.bf16.msrb.mxu3 %v4638_v39 }
 0x306   :  { %7004 = vst [vmem:[#allocation81_spill] sm:$0xff] %v6010_v27 }
 0x308   :  { %1592 = vmatmul.bf16.gmra.mxu3 %v5806_v0 }
 0x30b   :  { %v1506_v58 = vpop.f32.mrf.mxu2  ;;  %v1553_v8 = vpop.f32.mrf.mxu3 }
 0x30c   :  { %v6015_v54 = vadd.f32 %v1506_v58, %v1417_v37  ;;  %v1642_v42 = vpop.f32.mrf.mxu0 }
 0x30d   :  { %v6017_v50 = vadd.f32 %v1642_v42, %v1553_v8  ;;  %v1420_v62 = vpop.f32.mrf.mxu1 }
 0x30e   :  { %7005 = vst [vmem:[#allocation82_spill] sm:$0xff] %v6015_v54  ;;  %1681 = vmatmul.bf16.gmra.mxu0 %v5811_v59 }
 0x30f   :  { %7006 = vst [vmem:[#allocation83_spill] sm:$0xff] %v6017_v50 }
 0x310   :  { %1735 = vmatmul.bf16.gmra.mxu1 %v5713_v21  ;;  %1824 = vmatmul.bf16.gmra.mxu2 %v5716_v28  ;;  %v5127_v28 = vld [vmem:[#allocation2 + $0xe4] sm:$0xf] }
 0x313   :  { %v1509_v52 = vpop.f32.mrf.mxu2  ;;  %v6022_v6 = vpop.f32.mrf.mxu3 }
 0x314   :  { %v6024_v10 = vadd.f32 %v1509_v52, %v1420_v62  ;;  %v6026_v15 = vpop.f32.mrf.mxu0  ;;  %v4623_v62 = vld [vmem:[#allocation2 + $0xf0] sm:$0xf0] }
 0x315   :  { %v1422_v41 = vpop.f32.mrf.mxu1 }
 0x316   :  { %7007 = vst [vmem:[#allocation84_spill] sm:$0xff] %v6024_v10 }
 0x318   :  { %1597 = vmatmul.bf16.gmra.mxu3 %v5822_v22 }
 0x31b   :  { %v1511_v37 = vpop.f32.mrf.mxu2  ;;  %v1558_v39 = vpop.f32.mrf.mxu3 }
 0x31c   :  { %v6029_v58 = vadd.f32 %v1511_v37, %v1422_v41  ;;  %v1647_v8 = vpop.f32.mrf.mxu0  ;;  %v4626_v37 = vor.u32 %v5127_v28, %v4623_v62  ;;  %v4575_v62 = vld [vmem:[#allocation2 + $0x90] sm:$0xf0] }
 0x31d   :  { %v6031_v42 = vadd.f32 %v1647_v8, %v1558_v39  ;;  %v1701_v21 = vpop.f32.mrf.mxu1  ;;  %v6044_v39 = vpack.c.b16 %v5838_v32, %v5838_v32  ;;  %v5123_v8 = vld [vmem:[#allocation2 + $0xc4] sm:$0xf] }
 0x31e   :  { %7008 = vst [vmem:[#allocation85_spill] sm:$0xff] %v6029_v58  ;;  %1686 = vmatmul.bf16.gmra.mxu0 %v5825_v36  ;;  %v4607_v58 = vld [vmem:[#allocation2 + $0xd0] sm:$0xf0]  ;;  %v5115_v32 = vld [vmem:[#allocation2 + $0x84] sm:$0xf] }
 0x31f   :  { %7009 = vst [vmem:[#allocation86_spill] sm:$0xff] %v6031_v42 }
 0x320   :  { %1740 = vmatmul.bf16.gmra.mxu1 %v5721_v49  ;;  %1829 = vmatmul.bf16.gmra.mxu2 %v5725_v61  ;;  %v4610_v49 = vor.u32 %v5123_v8, %v4607_v58  ;;  %v5119_v61 = vld [vmem:[#allocation2 + $0xa4] sm:$0xf]  ;;  %v4578_v58 = vor.u32 %v5115_v32, %v4575_v62  ;;  %v4559_v8 = vld [vmem:[#allocation2 + $0x70] sm:$0xf0] }
 0x321   :  { %v4594_v28 = vor.u32 %v5119_v61, %v4591_v46  ;;  %v5103_v61 = vld [vmem:[#allocation2 + $0x24] sm:$0xf] }
 0x323   :  { %v6036_v52 = vpop.f32.mrf.mxu3  ;;  %v1790_v10 = vpop.f32.mrf.mxu2 }
 0x324   :  { %v6038_v54 = vpop.f32.mrf.mxu0  ;;  %v6040_v27 = vadd.f32 %v1790_v10, %v1701_v21 }
 0x325   :  { %v1703_v41 = vpop.f32.mrf.mxu1 }
 0x326   :  { %7010 = vst [vmem:[#allocation87_spill] sm:$0xff] %v6040_v27 }
 0x328   :  { %2345 = vmatmul.bf16.vlgmr.msra.gmra.mxu3 %v6044_v39 }
 0x329   :  { %2363 = vmatpush.bf16.msra.mxu3 %v4626_v37  ;;  %v5111_v37 = vld [vmem:[#allocation2 + $0x64] sm:$0xf] }
 0x32a   :  { %v4562_v46 = vor.u32 %v5111_v37, %v4559_v8  ;;  %v4511_v8 = vld [vmem:[#allocation2 + $0x10] sm:$0xf0] }
 0x32b   :  { %v1563_v42 = vpop.f32.mrf.mxu3  ;;  %v1792_v7 = vpop.f32.mrf.mxu2 }
 0x32c   :  { %v1652_v50 = vpop.f32.mrf.mxu0  ;;  %v6047_v3 = vadd.f32 %v1792_v7, %v1703_v41  ;;  %v6061_v41 = vpack.c.b16 %v5846_v51, %v5846_v51  ;;  %v5099_v51 = vld [vmem:[#allocation2 + $0x4] sm:$0xf] }
 0x32d   :  { %v6049_v10 = vadd.f32 %v1652_v50, %v1563_v42  ;;  %2364 = vmatpush.bf16.msra.mxu3 %v4610_v49  ;;  %v1706_v21 = vpop.f32.mrf.mxu1 }
 0x32e   :  { %7011 = vst [vmem:[#allocation88_spill] sm:$0xff] %v6047_v3 }
 0x32f   :  { %7012 = vst [vmem:[#allocation89_spill] sm:$0xff] %v6049_v10 }
 0x330   :  { %1745 = vmatmul.bf16.gmra.mxu1 %v5735_v11  ;;  %1834 = vmatmul.bf16.gmra.mxu2 %v5738_v23  ;;  %v5107_v11 = vld [vmem:[#allocation2 + $0x44] sm:$0xf]  ;;  %v4543_v23 = vld [vmem:[#allocation2 + $0x50] sm:$0xf0] }
 0x331   :  { %2365 = vmatpush.bf16.msra.mxu3 %v4594_v28  ;;  %v4546_v49 = vor.u32 %v5107_v11, %v4543_v23  ;;  %v4527_v28 = vld [vmem:[#allocation2 + $0x30] sm:$0xf0]  ;;  %v4754_v11 = vor.u32 %v5159_v45, %v4751_v40  ;;  %v5147_v40 = vld [vmem:[#allocation2 + $0x184] sm:$0xf] }
 0x332   :  { %v4530_v37 = vor.u32 %v5103_v61, %v4527_v28 }
 0x333   :  { %v6053_v12 = vpop.f32.mrf.mxu3  ;;  %v1795_v60 = vpop.f32.mrf.mxu2 }
 0x334   :  { %v6055_v7 = vpop.f32.mrf.mxu0  ;;  %v6057_v50 = vadd.f32 %v1795_v60, %v1706_v21 }
 0x335   :  { %2366 = vmatpush.bf16.msra.mxu3 %v4578_v58  ;;  %v1708_v42 = vpop.f32.mrf.mxu1 }
 0x336   :  { %7013 = vst [vmem:[#allocation90_spill] sm:$0xff] %v6057_v50  ;;  %v5172_v50 = vld [vmem:[#allocation7 + $0x44] sm:$0xf0] }
 0x338   :  { %2358 = vmatmul.bf16.vlgmr.msrb.gmra.mxu3 %v6061_v41 }
 0x339   :  { %2367 = vmatpush.bf16.msra.mxu3 %v4562_v46  ;;  %v4514_v46 = vor.u32 %v5099_v51, %v4511_v8  ;;  %v4703_v51 = vld [vmem:[#allocation2 + $0x190] sm:$0xf0]  ;;  %v4949_v8 = vld [vmem:[#allocation7 + $0x170] sm:$0xf] }
 0x33b   :  { %v1568_v32 = vpop.f32.mrf.mxu3  ;;  %v1797_v62 = vpop.f32.mrf.mxu2 }
 0x33c   :  { %v1657_v10 = vpop.f32.mrf.mxu0  ;;  %v6064_v60 = vadd.f32 %v1797_v62, %v1708_v42  ;;  %v5155_v62 = vld [vmem:[#allocation2 + $0x1c4] sm:$0xf] }
 0x33d   :  { %v6066_v21 = vadd.f32 %v1657_v10, %v1568_v32  ;;  %2368 = vmatpush.bf16.msra.mxu3 %v4546_v49  ;;  %v1711_v58 = vpop.f32.mrf.mxu1  ;;  %v4735_v10 = vld [vmem:[#allocation2 + $0x1d0] sm:$0xf0] }
 0x33e   :  { %7014 = vst [vmem:[#allocation91_spill] sm:$0xff] %v6064_v60  ;;  %v4738_v28 = vor.u32 %v5155_v62, %v4735_v10  ;;  %v5178_v62 = vld [vmem:[#allocation7 + $0x74] sm:$0xf0]  ;;  %v4706_v10 = vor.u32 %v5147_v40, %v4703_v51  ;;  %v4671_v40 = vld [vmem:[#allocation2 + $0x150] sm:$0xf0] }
 0x33f   :  { %7015 = vst [vmem:[#allocation92_spill] sm:$0xff] %v6066_v21  ;;  %v5151_v21 = vld [vmem:[#allocation2 + $0x1a4] sm:$0xf] }
 0x340   :  { %1750 = vmatmul.bf16.gmra.mxu1 %v5747_v55  ;;  %1839 = vmatmul.bf16.gmra.mxu2 %v5751_v5  ;;  %v4719_v55 = vld [vmem:[#allocation2 + $0x1b0] sm:$0xf0] }
 0x341   :  { %2369 = vmatpush.bf16.msra.mxu3 %v4530_v37  ;;  %v4722_v5 = vor.u32 %v5151_v21, %v4719_v55  ;;  %v4885_v55 = vld [vmem:[#allocation7 + $0xf0] sm:$0xf] }
 0x343   :  { %v6070_v23 = vpop.f32.mrf.mxu3  ;;  %v1800_v42 = vpop.f32.mrf.mxu2 }
 0x344   :  { %v6072_v32 = vpop.f32.mrf.mxu0  ;;  %v6074_v49 = vadd.f32 %v1800_v42, %v1711_v58  ;;  %v4950_v58 = vor.u32 %v5210_v17, %v4949_v8  ;;  %v4821_v42 = vld [vmem:[#allocation7 + $0x70] sm:$0xf] }
 0x345   :  { %2370 = vmatpush.bf16.msra.mxu3 %v4514_v46  ;;  %v1713_v61 = vpop.f32.mrf.mxu1  ;;  %v4822_v21 = vor.u32 %v5178_v62, %v4821_v42  ;;  %v4655_v42 = vld [vmem:[#allocation2 + $0x130] sm:$0xf0] }
 0x346   :  { %7016 = vst [vmem:[#allocation93_spill] sm:$0xff] %v6074_v49  ;;  %3441 = vmatpush.bf16.msrb.mxu2 %v4950_v58  ;;  %v5194_v49 = vld [vmem:[#allocation7 + $0xf4] sm:$0xf0] }
 0x347   :  { %3263 = vmatpush.bf16.msrb.mxu0 %v4822_v21 }
 0x348   :  { %2371 = vmatmul.bf16.vlgmr.msra.gmra.mxu3 %v6044_v39 }
 0x349   :  { %2376 = vmatpush.bf16.msrb.mxu3 %v4754_v11 }
 0x34b   :  { %v1573_v45 = vpop.f32.mrf.mxu3  ;;  %v1802_v37 = vpop.f32.mrf.mxu2 }
 0x34c   :  { %v1662_v24 = vpop.f32.mrf.mxu0  ;;  %v6077_v35 = vadd.f32 %v1802_v37, %v1713_v61  ;;  %v4886_v61 = vor.u32 %v5194_v49, %v4885_v55  ;;  %v4629_v55 = vld [vmem:[#allocation2 + $0xe8] sm:$0xf] }
 0x34d   :  { %2377 = vmatpush.bf16.msrb.mxu3 %v4738_v28  ;;  %v6079_v46 = vadd.f32 %v1662_v24, %v1573_v45  ;;  %v1716_v11 = vpop.f32.mrf.mxu1  ;;  %v4687_v28 = vld [vmem:[#allocation2 + $0x170] sm:$0xf0] }
 0x34e   :  { %7017 = vst [vmem:[#allocation94_spill] sm:$0xff] %v6077_v35  ;;  %v4690_v24 = vor.u32 %v5143_v57, %v4687_v28  ;;  %3352 = vmatpush.bf16.msrb.mxu1 %v4886_v61  ;;  %v5131_v57 = vld [vmem:[#allocation2 + $0x104] sm:$0xf]  ;;  %v5130_v61 = vld [vmem:[#allocation2 + $0xf4] sm:$0xf0] }
 0x34f   :  { %7018 = vst [vmem:[#allocation95_spill] sm:$0xff] %v6079_v46 }
 0x350   :  { %1755 = vmatmul.bf16.gmra.mxu1 %v5763_v29  ;;  %1844 = vmatmul.bf16.gmra.mxu2 %v5766_v38  ;;  %v5135_v29 = vld [vmem:[#allocation2 + $0x124] sm:$0xf] }
 0x351   :  { %2378 = vmatpush.bf16.msrb.mxu3 %v4722_v5  ;;  %v5139_v5 = vld [vmem:[#allocation2 + $0x144] sm:$0xf]  ;;  %v4658_v38 = vor.u32 %v5135_v29, %v4655_v42 }
 0x352   :  { %v4674_v58 = vor.u32 %v5139_v5, %v4671_v40  ;;  %v4613_v5 = vld [vmem:[#allocation2 + $0xc8] sm:$0xf]  ;;  %v5126_v40 = vld [vmem:[#allocation2 + $0xd4] sm:$0xf0] }
 0x353   :  { %v6083_v17 = vpop.f32.mrf.mxu3  ;;  %v1805_v45 = vpop.f32.mrf.mxu2  ;;  %v4614_v29 = vor.u32 %v5126_v40, %v4613_v5  ;;  %v4565_v40 = vld [vmem:[#allocation2 + $0x68] sm:$0xf] }
 0x354   :  { %v6085_v37 = vpop.f32.mrf.mxu0  ;;  %v6087_v51 = vadd.f32 %v1805_v45, %v1716_v11 }
 0x355   :  { %2379 = vmatpush.bf16.msrb.mxu3 %v4706_v10  ;;  %v1718_v8 = vpop.f32.mrf.mxu1  ;;  %v4639_v10 = vld [vmem:[#allocation2 + $0x110] sm:$0xf0] }
 0x356   :  { %7019 = vst [vmem:[#allocation96_spill] sm:$0xff] %v6087_v51  ;;  %v4642_v45 = vor.u32 %v5131_v57, %v4639_v10  ;;  %v5118_v10 = vld [vmem:[#allocation2 + $0x94] sm:$0xf0]  ;;  %v5192_v51 = vld [vmem:[#allocation7 + $0xe4] sm:$0xf0] }
 0x359   :  { %2380 = vmatpush.bf16.msrb.mxu3 %v4690_v24  ;;  %v4630_v24 = vor.u32 %v5130_v61, %v4629_v55  ;;  %v5208_v55 = vld [vmem:[#allocation7 + $0x164] sm:$0xf0] }
 0x35b   :  { %v1578_v49 = vpop.f32.mrf.mxu3  ;;  %v1807_v62 = vpop.f32.mrf.mxu2 }
 0x35c   :  { %v1667_v21 = vpop.f32.mrf.mxu0  ;;  %v6089_v28 = vadd.f32 %v1807_v62, %v1718_v8  ;;  %v4597_v62 = vld [vmem:[#allocation2 + $0xa8] sm:$0xf] }
 0x35d   :  { %2381 = vmatpush.bf16.msrb.mxu3 %v4674_v58  ;;  %v6091_v46 = vadd.f32 %v1667_v21, %v1578_v49  ;;  %v1721_v11 = vpop.f32.mrf.mxu1  ;;  %v4941_v21 = vld [vmem:[#allocation7 + $0x160] sm:$0xf] }
 0x35e   :  { %7020 = vst [vmem:[#allocation97_spill] sm:$0xff] %v6089_v28  ;;  %v4942_v61 = vor.u32 %v5208_v55, %v4941_v21  ;;  %v4813_v28 = vld [vmem:[#allocation7 + $0x60] sm:$0xf] }
 0x35f   :  { %7021 = vst [vmem:[#allocation98_spill] sm:$0xff] %v6091_v46 }
 0x360   :  { %1760 = vmatmul.bf16.gmra.mxu1 %v5775_v14  ;;  %1849 = vmatmul.bf16.gmra.mxu2 %v5781_v31  ;;  %v4581_v31 = vld [vmem:[#allocation2 + $0x88] sm:$0xf] }
 0x361   :  { %2382 = vmatpush.bf16.msrb.mxu3 %v4658_v38  ;;  %v5122_v38 = vld [vmem:[#allocation2 + $0xb4] sm:$0xf0]  ;;  %v4582_v5 = vor.u32 %v5118_v10, %v4581_v31  ;;  %3442 = vmatpush.bf16.msrb.mxu2 %v4942_v61 }
 0x362   :  { %v4598_v14 = vor.u32 %v5122_v38, %v4597_v62  ;;  %v4877_v62 = vld [vmem:[#allocation7 + $0xe0] sm:$0xf]  ;;  %v5110_v31 = vld [vmem:[#allocation2 + $0x54] sm:$0xf0] }
 0x363   :  { %v6095_v58 = vpop.f32.mrf.mxu3  ;;  %v1810_v8 = vpop.f32.mrf.mxu2  ;;  %v4878_v21 = vor.u32 %v5192_v51, %v4877_v62 }
 0x364   :  { %v6097_v42 = vpop.f32.mrf.mxu0  ;;  %v6099_v49 = vadd.f32 %v1810_v8, %v1721_v11  ;;  %v5114_v8 = vld [vmem:[#allocation2 + $0x74] sm:$0xf0] }
 0x365   :  { %2383 = vmatpush.bf16.msrb.mxu3 %v4642_v45  ;;  %v6102_v57 = vpop.f32.mrf.mxu1  ;;  %v4566_v35 = vor.u32 %v5114_v8, %v4565_v40  ;;  %3353 = vmatpush.bf16.msrb.mxu1 %v4878_v21  ;;  %v5102_v40 = vld [vmem:[#allocation2 + $0x14] sm:$0xf0]  ;;  %v4757_v8 = vld [vmem:[#allocation2 + $0x1e8] sm:$0xf] }
 0x366   :  { %7022 = vst [vmem:[#allocation99_spill] sm:$0xff] %v6099_v49 }
 0x368   :  { %2384 = vmatmul.bf16.vlgmr.msrb.gmra.mxu3 %v6061_v41 }
 0x369   :  { %2389 = vmatpush.bf16.msra.mxu3 %v4630_v24 }
 0x36b   :  { %v1583_v45 = vpop.f32.mrf.mxu3  ;;  %v6104_v24 = vpop.f32.mrf.mxu2 }
 0x36c   :  { %v1672_v11 = vpop.f32.mrf.mxu0 }
 0x36d   :  { %2390 = vmatpush.bf16.msra.mxu3 %v4614_v29  ;;  %v6106_v46 = vadd.f32 %v1672_v11, %v1583_v45  ;;  %v1726_v49 = vpop.f32.mrf.mxu1  ;;  %v5176_v29 = vld [vmem:[#allocation7 + $0x64] sm:$0xf0]  ;;  %v5106_v11 = vld [vmem:[#allocation2 + $0x34] sm:$0xf0] }
 0x36e   :  { %v4814_v38 = vor.u32 %v5176_v29, %v4813_v28  ;;  %v5162_v29 = vld [vmem:[#allocation2 + $0x1f4] sm:$0xf0] }
 0x36f   :  { %7023 = vst [vmem:[#allocation100_spill] sm:$0xff] %v6106_v46  ;;  %v5158_v46 = vld [vmem:[#allocation2 + $0x1d4] sm:$0xf0] }
 0x370   :  { %1765 = vmatmul.bf16.gmra.mxu1 %v5794_v18  ;;  %1854 = vmatmul.bf16.gmra.mxu2 %v5797_v56  ;;  %v4517_v56 = vld [vmem:[#allocation2 + $0x8] sm:$0xf] }
 0x371   :  { %2391 = vmatpush.bf16.msra.mxu3 %v4598_v14  ;;  %v4549_v14 = vld [vmem:[#allocation2 + $0x48] sm:$0xf]  ;;  %3264 = vmatpush.bf16.msrb.mxu0 %v4814_v38  ;;  %v4518_v38 = vor.u32 %v5102_v40, %v4517_v56 }
 0x372   :  { %v4550_v61 = vor.u32 %v5110_v31, %v4549_v14  ;;  %v4758_v14 = vor.u32 %v5162_v29, %v4757_v8 }
 0x373   :  { %v6110_v10 = vpop.f32.mrf.mxu3  ;;  %v1815_v55 = vpop.f32.mrf.mxu2 }
 0x374   :  { %v6112_v45 = vpop.f32.mrf.mxu0  ;;  %v6114_v28 = vadd.f32 %v1815_v55, %v1726_v49  ;;  %v4741_v55 = vld [vmem:[#allocation2 + $0x1c8] sm:$0xf] }
 0x375   :  { %2392 = vmatpush.bf16.msra.mxu3 %v4582_v5  ;;  %v4533_v5 = vld [vmem:[#allocation2 + $0x28] sm:$0xf]  ;;  %v6116_v51 = vpop.f32.mrf.mxu1 }
 0x376   :  { %7024 = vst [vmem:[#allocation101_spill] sm:$0xff] %v6114_v28  ;;  %v4534_v18 = vor.u32 %v5106_v11, %v4533_v5  ;;  %v4725_v5 = vld [vmem:[#allocation2 + $0x1a8] sm:$0xf]  ;;  %v5154_v11 = vld [vmem:[#allocation2 + $0x1b4] sm:$0xf0] }
 0x377   :  { %v4726_v29 = vor.u32 %v5154_v11, %v4725_v5 }
 0x379   :  { %2393 = vmatpush.bf16.msra.mxu3 %v4566_v35 }
 0x37b   :  { %v1588_v35 = vpop.f32.mrf.mxu3  ;;  %v6118_v62 = vpop.f32.mrf.mxu2 }
 0x37c   :  { %v1677_v21 = vpop.f32.mrf.mxu0 }
 0x37d   :  { %2394 = vmatpush.bf16.msra.mxu3 %v4550_v61  ;;  %v6120_v31 = vadd.f32 %v1677_v21, %v1588_v35  ;;  %v1731_v49 = vpop.f32.mrf.mxu1  ;;  %v4742_v61 = vor.u32 %v5158_v46, %v4741_v55  ;;  %v5146_v21 = vld [vmem:[#allocation2 + $0x174] sm:$0xf0] }
 0x37e   :  { %v5206_v55 = vld [vmem:[#allocation7 + $0x154] sm:$0xf0] }
 0x37f   :  { %7025 = vst [vmem:[#allocation102_spill] sm:$0xff] %v6120_v31 }
 0x380   :  { %1770 = vmatmul.bf16.gmra.mxu1 %v5806_v0  ;;  %1859 = vmatmul.bf16.gmra.mxu2 %v5811_v59  ;;  %v5150_v0 = vld [vmem:[#allocation2 + $0x194] sm:$0xf0]  ;;  %v4693_v59 = vld [vmem:[#allocation2 + $0x168] sm:$0xf] }
 0x381   :  { %2395 = vmatpush.bf16.msra.mxu3 %v4534_v18 }
 0x383   :  { %v6125_v18 = vpop.f32.mrf.mxu3  ;;  %v1820_v56 = vpop.f32.mrf.mxu2 }
 0x384   :  { %v6127_v40 = vpop.f32.mrf.mxu0  ;;  %v6129_v8 = vadd.f32 %v1820_v56, %v1731_v49  ;;  %v4694_v49 = vor.u32 %v5146_v21, %v4693_v59  ;;  %v4677_v56 = vld [vmem:[#allocation2 + $0x148] sm:$0xf]  ;;  %v5138_v59 = vld [vmem:[#allocation2 + $0x134] sm:$0xf0] }
 0x385   :  { %2396 = vmatpush.bf16.msra.mxu3 %v4518_v38  ;;  %v6131_v35 = vpop.f32.mrf.mxu1  ;;  %v4709_v38 = vld [vmem:[#allocation2 + $0x188] sm:$0xf] }
 0x386   :  { %7026 = vst [vmem:[#allocation103_spill] sm:$0xff] %v6129_v8  ;;  %v4710_v46 = vor.u32 %v5150_v0, %v4709_v38  ;;  %v4805_v8 = vld [vmem:[#allocation7 + $0x50] sm:$0xf] }
 0x387   :  { %v4869_v38 = vld [vmem:[#allocation7 + $0xd0] sm:$0xf] }
 0x388   :  { %2397 = vmatmul.bf16.vlgmr.msra.gmra.mxu3 %v6044_v39  ;;  %v4870_v60 = vor.u32 %v5190_v9, %v4869_v38 }
 0x389   :  { %2402 = vmatpush.bf16.msrb.mxu3 %v4758_v14  ;;  %v4933_v14 = vld [vmem:[#allocation7 + $0x150] sm:$0xf] }
 0x38a   :  { %v4934_v31 = vor.u32 %v5206_v55, %v4933_v14  ;;  %3354 = vmatpush.bf16.msrb.mxu1 %v4870_v60  ;;  %v4645_v55 = vld [vmem:[#allocation2 + $0x108] sm:$0xf]  ;;  %v4615_v60 = vld [vmem:[#allocation2 + $0xd8] sm:$0xf0] }
 0x38b   :  { %v1593_v28 = vpop.f32.mrf.mxu3  ;;  %v6133_v16 = vpop.f32.mrf.mxu2 }
 0x38c   :  { %v1682_v2 = vpop.f32.mrf.mxu0  ;;  %3443 = vmatpush.bf16.msrb.mxu2 %v4934_v31 }
 0x38d   :  { %2403 = vmatpush.bf16.msrb.mxu3 %v4742_v61  ;;  %v5142_v61 = vld [vmem:[#allocation2 + $0x154] sm:$0xf0]  ;;  %v6135_v5 = vadd.f32 %v1682_v2, %v1593_v28  ;;  %v1736_v11 = vpop.f32.mrf.mxu1 }
 0x38e   :  { %v4678_v14 = vor.u32 %v5142_v61, %v4677_v56  ;;  %v4631_v56 = vld [vmem:[#allocation2 + $0xf8] sm:$0xf0] }
 0x38f   :  { %7027 = vst [vmem:[#allocation104_spill] sm:$0xff] %v6135_v5 }
 0x390   :  { %1775 = vmatmul.bf16.gmra.mxu1 %v5822_v22  ;;  %1864 = vmatmul.bf16.gmra.mxu2 %v5825_v36  ;;  %v5134_v22 = vld [vmem:[#allocation2 + $0x114] sm:$0xf0] }
 0x391   :  { %2404 = vmatpush.bf16.msrb.mxu3 %v4726_v29  ;;  %v5174_v29 = vld [vmem:[#allocation7 + $0x54] sm:$0xf0]  ;;  %v4646_v36 = vor.u32 %v5134_v22, %v4645_v55  ;;  %v5116_v55 = vld [vmem:[#allocation2 + $0x8c] sm:$0xf]  ;;  %v4583_v22 = vld [vmem:[#allocation2 + $0x98] sm:$0xf0] }
 0x392   :  { %v4806_v0 = vor.u32 %v5174_v29, %v4805_v8  ;;  %v5124_v29 = vld [vmem:[#allocation2 + $0xcc] sm:$0xf] }
 0x393   :  { %v6139_v31 = vpop.f32.mrf.mxu3  ;;  %v1825_v2 = vpop.f32.mrf.mxu2 }
 0x394   :  { %3265 = vmatpush.bf16.msrb.mxu0 %v4806_v0  ;;  %7028 = vst [vmem:[#allocation105_spill] sm:$0xff] %v6139_v31  ;;  %v6141_v28 = vpop.f32.mrf.mxu0  ;;  %v6143_v21 = vadd.f32 %v1825_v2, %v1736_v11  ;;  %v4599_v2 = vld [vmem:[#allocation2 + $0xb8] sm:$0xf0]  ;;  %v4925_v31 = vld [vmem:[#allocation7 + $0x140] sm:$0xf] }
 0x395   :  { %2405 = vmatpush.bf16.msrb.mxu3 %v4710_v46  ;;  %v4661_v46 = vld [vmem:[#allocation2 + $0x128] sm:$0xf]  ;;  %7029 = vst [vmem:[#allocation106_spill] sm:$0xff] %v6141_v28  ;;  %v6145_v9 = vpop.f32.mrf.mxu1 }
 0x396   :  { %7030 = vst [vmem:[#allocation107_spill] sm:$0xff] %v6143_v21  ;;  %v4662_v8 = vor.u32 %v5138_v59, %v4661_v46  ;;  %v4618_v46 = vor.u32 %v5124_v29, %v4615_v60  ;;  %v5120_v59 = vld [vmem:[#allocation2 + $0xac] sm:$0xf] }
 0x397   :  { %v5108_v60 = vld [vmem:[#allocation2 + $0x4c] sm:$0xf] }
 0x399   :  { %2406 = vmatpush.bf16.msrb.mxu3 %v4694_v49  ;;  %v5128_v49 = vld [vmem:[#allocation2 + $0xec] sm:$0xf] }
 0x39a   :  { %v4634_v61 = vor.u32 %v5128_v49, %v4631_v56 }
 0x39b   :  { %v1598_v38 = vpop.f32.mrf.mxu3  ;;  %v6147_v0 = vpop.f32.mrf.mxu2 }
 0x39c   :  { %v1687_v5 = vpop.f32.mrf.mxu0 }
 0x39d   :  { %2407 = vmatpush.bf16.msrb.mxu3 %v4678_v14  ;;  %v6149_v11 = vadd.f32 %v1687_v5, %v1598_v38  ;;  %v1741_v14 = vpop.f32.mrf.mxu1  ;;  %v4586_v5 = vor.u32 %v5116_v55, %v4583_v22  ;;  %v4567_v38 = vld [vmem:[#allocation2 + $0x78] sm:$0xf0] }
 0x39e   :  { %v4535_v22 = vld [vmem:[#allocation2 + $0x38] sm:$0xf0] }
 0x39f   :  { %7031 = vst [vmem:[#allocation108_spill] sm:$0xff] %v6149_v11  ;;  %v4551_v11 = vld [vmem:[#allocation2 + $0x58] sm:$0xf0] }
 0x3a1   :  { %2408 = vmatpush.bf16.msrb.mxu3 %v4662_v8  ;;  %v4602_v8 = vor.u32 %v5120_v59, %v4599_v2 }
 0x3a3   :  { %v6152_v49 = vpop.f32.mrf.mxu3  ;;  %v1830_v56 = vpop.f32.mrf.mxu2 }
 0x3a4   :  { %7032 = vst [vmem:[#allocation109_spill] sm:$0xff] %v6152_v49  ;;  %v6154_v28 = vadd.f32 %v1830_v56, %v1741_v14  ;;  %v4797_v49 = vld [vmem:[#allocation7 + $0x40] sm:$0xf]  ;;  %v5104_v56 = vld [vmem:[#allocation2 + $0x2c] sm:$0xf] }
 0x3a5   :  { %2409 = vmatpush.bf16.msrb.mxu3 %v4646_v36  ;;  %v6156_v36 = vpop.f32.mrf.mxu1  ;;  %v4798_v55 = vor.u32 %v5172_v50, %v4797_v49 }
 0x3a6   :  { %7033 = vst [vmem:[#allocation110_spill] sm:$0xff] %v6154_v28  ;;  %v4861_v28 = vld [vmem:[#allocation7 + $0xc0] sm:$0xf] }
 0x3a7   :  { %3266 = vmatpush.bf16.msrb.mxu0 %v4798_v55  ;;  %v4743_v55 = vld [vmem:[#allocation2 + $0x1d8] sm:$0xf0] }
 0x3a8   :  { %2410 = vmatmul.bf16.vlgmr.msrb.gmra.mxu3 %v6061_v41 }
 0x3a9   :  { %2415 = vmatpush.bf16.msra.mxu3 %v4634_v61  ;;  %v5112_v61 = vld [vmem:[#allocation2 + $0x6c] sm:$0xf] }
 0x3aa   :  { %v4570_v29 = vor.u32 %v5112_v61, %v4567_v38  ;;  %v4538_v38 = vor.u32 %v5104_v56, %v4535_v22  ;;  %v5156_v56 = vld [vmem:[#allocation2 + $0x1cc] sm:$0xf] }
 0x3ab   :  { %v6158_v59 = vpop.f32.mrf.mxu2  ;;  %v2346_v2 = vpop.f32.mrf.mxu3 }
 0x3ad   :  { %2416 = vmatpush.bf16.msra.mxu3 %v4618_v46  ;;  %v5204_v46 = vld [vmem:[#allocation7 + $0x144] sm:$0xf0]  ;;  %v1746_v14 = vpop.f32.mrf.mxu1 }
 0x3ae   :  { %v4926_v21 = vor.u32 %v5204_v46, %v4925_v31  ;;  %v6163_v31 = vld [vmem:[%s6903_s6] sm:$0xf] }
 0x3af   :  { %v1952_v46 = vperm.slane %v6163_v31, 0 }
 0x3b0   :  { %3444 = vmatpush.bf16.msrb.mxu2 %v4926_v21  ;;  %v4759_v21 = vld [vmem:[#allocation2 + $0x1f8] sm:$0xf0] }
 0x3b1   :  { %2417 = vmatpush.bf16.msra.mxu3 %v4602_v8  ;;  %v4554_v8 = vor.u32 %v5108_v60, %v4551_v11  ;;  %v5160_v60 = vld [vmem:[#allocation2 + $0x1ec] sm:$0xf]  ;;  %v2347_v22 = vadd.f32 %v2346_v2, %v1952_v46  ;;  %v4695_v46 = vld [vmem:[#allocation2 + $0x178] sm:$0xf0] }
 0x3b3   :  { %v2348_v11 = vpop.f32.mrf.mxu3 }
 0x3b5   :  { %2418 = vmatpush.bf16.msra.mxu3 %v4586_v5  ;;  %v5188_v5 = vld [vmem:[#allocation7 + $0xc4] sm:$0xf0]  ;;  %v6167_v49 = vpop.f32.mrf.mxu1 }
 0x3b6   :  { %v4862_v61 = vor.u32 %v5188_v5, %v4861_v28  ;;  %v4522_v28 = vor.u32 %v5100_v30, %v4519_v25  ;;  %v4746_v5 = vor.u32 %v5156_v56, %v4743_v55  ;;  %v4730_v25 = vor.u32 %v5152_v4, %v4727_v19  ;;  %v5148_v30 = vld [vmem:[#allocation2 + $0x18c] sm:$0xf] }
 0x3b8   :  { %3355 = vmatpush.bf16.msrb.mxu1 %v4862_v61 }
 0x3b9   :  { %2419 = vmatpush.bf16.msra.mxu3 %v4570_v29  ;;  %v1835_v29 = vpop.f32.mrf.mxu2 }
 0x3ba   :  { %v6165_v50 = vadd.f32 %v1835_v29, %v1746_v14  ;;  %v4711_v29 = vld [vmem:[#allocation2 + $0x198] sm:$0xf0] }
 0x3bb   :  { %v2359_v11 = vpop.f32.mrf.mxu3 }
 0x3bc   :  { %7034 = vst [vmem:[#allocation111_spill] sm:$0xff] %v6165_v50  ;;  %v6172_v14 = vadd.f32 %v2359_v11, %v2347_v22  ;;  %v5140_v22 = vld [vmem:[#allocation2 + $0x14c] sm:$0xf]  ;;  %v4679_v11 = vld [vmem:[#allocation2 + $0x158] sm:$0xf0] }
 0x3bd   :  { %2420 = vmatpush.bf16.msra.mxu3 %v4554_v8  ;;  %v4762_v8 = vor.u32 %v5160_v60, %v4759_v21  ;;  %v4714_v60 = vor.u32 %v5148_v30, %v4711_v29  ;;  %v4917_v30 = vld [vmem:[#allocation7 + $0x130] sm:$0xf]  ;;  %v5202_v29 = vld [vmem:[#allocation7 + $0x134] sm:$0xf0] }
 0x3be   :  { %v4789_v50 = vld [vmem:[#allocation7 + $0x30] sm:$0xf] }
 0x3c1   :  { %2421 = vmatpush.bf16.msra.mxu3 %v4538_v38  ;;  %v6170_v61 = vpop.f32.mrf.mxu2  ;;  %v1751_v38 = vpop.f32.mrf.mxu1 }
 0x3c3   :  { %v2361_v2 = vpop.f32.mrf.mxu3 }
 0x3c4   :  { %v4918_v2 = vor.u32 %v5202_v29, %v4917_v30  ;;  %v5200_v29 = vld [vmem:[#allocation7 + $0x124] sm:$0xf0] }
 0x3c5   :  { %2422 = vmatpush.bf16.msra.mxu3 %v4522_v28  ;;  %v5144_v28 = vld [vmem:[#allocation2 + $0x16c] sm:$0xf] }
 0x3c6   :  { %v4698_v55 = vor.u32 %v5144_v28, %v4695_v46  ;;  %3445 = vmatpush.bf16.msrb.mxu2 %v4918_v2  ;;  %v5132_v46 = vld [vmem:[#allocation2 + $0x10c] sm:$0xf] }
 0x3c8   :  { %2423 = vmatmul.bf16.vlgmr.msra.gmra.mxu3 %v6044_v39  ;;  %v4682_v39 = vor.u32 %v5140_v22, %v4679_v11 }
 0x3c9   :  { %2428 = vmatpush.bf16.msrb.mxu3 %v4762_v8  ;;  %v1840_v21 = vpop.f32.mrf.mxu2  ;;  %v6177_v56 = vpop.f32.mrf.mxu1 }
 0x3ca   :  { %v6175_v8 = vadd.f32 %v1840_v21, %v1751_v38  ;;  %v4790_v21 = vor.u32 %v5170_v47, %v4789_v50 }
 0x3cb   :  { %v2372_v4 = vpop.f32.mrf.mxu3 }
 0x3cc   :  { %7035 = vst [vmem:[#allocation112_spill] sm:$0xff] %v6175_v8  ;;  %v4853_v8 = vld [vmem:[#allocation7 + $0xb0] sm:$0xf]  ;;  %3267 = vmatpush.bf16.msrb.mxu0 %v4790_v21 }
 0x3cd   :  { %2429 = vmatpush.bf16.msrb.mxu3 %v4746_v5  ;;  %v5136_v5 = vld [vmem:[#allocation2 + $0x12c] sm:$0xf]  ;;  %v4854_v28 = vor.u32 %v5186_v26, %v4853_v8  ;;  %v1953_v26 = vperm.slane %v6163_v31, 1 }
 0x3cf   :  { %3356 = vmatpush.bf16.msrb.mxu1 %v4854_v28 }
 0x3d1   :  { %2430 = vmatpush.bf16.msrb.mxu3 %v4730_v25  ;;  %v6179_v19 = vpop.f32.mrf.mxu2  ;;  %v4663_v25 = vld [vmem:[#allocation2 + $0x138] sm:$0xf0]  ;;  %v1756_v38 = vpop.f32.mrf.mxu1 }
 0x3d3   :  { %v2374_v3 = vpop.f32.mrf.mxu3 }
 0x3d4   :  { %v2373_v3 = vadd.f32 %v2372_v4, %v1953_v26 }
 0x3d5   :  { %2431 = vmatpush.bf16.msrb.mxu3 %v4714_v60  ;;  %v4666_v60 = vor.u32 %v5136_v5, %v4663_v25  ;;  %v4909_v25 = vld [vmem:[#allocation7 + $0x120] sm:$0xf] }
 0x3d6   :  { %v4910_v2 = vor.u32 %v5200_v29, %v4909_v25  ;;  %v5184_v25 = vld [vmem:[#allocation7 + $0xa4] sm:$0xf0] }
 0x3d8   :  { %3446 = vmatpush.bf16.msrb.mxu2 %v4910_v2 }
 0x3d9   :  { %2432 = vmatpush.bf16.msrb.mxu3 %v4698_v55  ;;  %v4647_v55 = vld [vmem:[#allocation2 + $0x118] sm:$0xf0]  ;;  %v1845_v11 = vpop.f32.mrf.mxu2  ;;  %v6183_v30 = vpop.f32.mrf.mxu1 }
 0x3da   :  { %v4650_v22 = vor.u32 %v5132_v46, %v4647_v55  ;;  %v6181_v27 = vadd.f32 %v1845_v11, %v1756_v38  ;;  %v4781_v46 = vld [vmem:[#allocation7 + $0x20] sm:$0xf]  ;;  %v5168_v55 = vld [vmem:[#allocation7 + $0x24] sm:$0xf0] }
 0x3dc   :  { %7036 = vst [vmem:[#allocation113_spill] sm:$0xff] %v6181_v27 }
 0x3dd   :  { %2433 = vmatpush.bf16.msrb.mxu3 %v4682_v39 }
 0x3e1   :  { %2434 = vmatpush.bf16.msrb.mxu3 %v4666_v60  ;;  %v6186_v47 = vpop.f32.mrf.mxu2  ;;  %v1761_v50 = vpop.f32.mrf.mxu1 }
 0x3e5   :  { %2435 = vmatpush.bf16.msrb.mxu3 %v4650_v22  ;;  %v4845_v22 = vld [vmem:[#allocation7 + $0xa0] sm:$0xf] }
 0x3e6   :  { %v4846_v29 = vor.u32 %v5184_v25, %v4845_v22  ;;  %v5198_v25 = vld [vmem:[#allocation7 + $0x114] sm:$0xf0] }
 0x3e8   :  { %2436 = vmatmul.bf16.vlgmr.msrb.gmra.mxu3 %v6061_v41  ;;  %3357 = vmatpush.bf16.msrb.mxu1 %v4846_v29  ;;  %v4773_v29 = vld [vmem:[#allocation7 + $0x10] sm:$0xf] }
 0x3e9   :  { %v1850_v8 = vpop.f32.mrf.mxu2  ;;  %v6191_v5 = vpop.f32.mrf.mxu1 }
 0x3ea   :  { %v6189_v39 = vadd.f32 %v1850_v8, %v1761_v50  ;;  %7038 = vst [vmem:[#allocation115_spill] sm:$0xff] %v6191_v5  ;;  %v4782_v8 = vor.u32 %v5168_v55, %v4781_v46 }
 0x3eb   :  { %v2385_v38 = vpop.f32.mrf.mxu3 }
 0x3ec   :  { %7037 = vst [vmem:[#allocation114_spill] sm:$0xff] %v6189_v39  ;;  %v2386_v21 = vadd.f32 %v2385_v38, %v2373_v3  ;;  %3268 = vmatpush.bf16.msrb.mxu0 %v4782_v8  ;;  %v4901_v8 = vld [vmem:[#allocation7 + $0x110] sm:$0xf] }
 0x3ee   :  { %v2445_v60 = vrot.slane %v2386_v21, 7 }
 0x3f0   :  { %v6197_v11 = vsel %vm2448_vm9, %v6172_v14, %v2445_v60  ;;  %v6201_v50 = vsel %vm1992_vm2, %v6172_v14, %v2445_v60  ;;  %v6205_v4 = vsel %vm1994_vm3, %v6172_v14, %v2445_v60  ;;  %v6209_v26 = vsel %vm1996_vm4, %v6172_v14, %v2445_v60 }
 0x3f1   :  { %v6193_v41 = vpop.f32.mrf.mxu2  ;;  %v1766_v28 = vpop.f32.mrf.mxu1  ;;  %v6217_v39 = vsel %vm1998_vm5, %v6172_v14, %v2445_v60  ;;  %v6223_v46 = vsel %vm2000_vm6, %v6172_v14, %v2445_v60 }
 0x3f2   :  { %7039 = vst [vmem:[#allocation116_spill] sm:$0xff] %v6193_v41 }
 0x3f3   :  { %v2387_v3 = vpop.f32.mrf.mxu3  ;;  %7042 = vst [vmem:[#allocation119_spill] sm:$0xff] %v6217_v39 }
 0x3f4   :  { %7044 = vst [vmem:[#allocation121_spill] sm:$0xff] %v6223_v46  ;;  %v4902_v3 = vor.u32 %v5198_v25, %v4901_v8  ;;  %v6241_v8 = vsel %vm2474_vm10, %v2445_v60, %v6172_v14  ;;  %v5180_v46 = vld [vmem:[#allocation7 + $0x84] sm:$0xf0] }
 0x3f5   :  { %7050 = vst [vmem:[#allocation127_spill] sm:$0xff] %v6241_v8  ;;  %v5222_v8 = vld [vmem:[#allocation7 + $0x1d4] sm:$0xf0] }
 0x3f6   :  { %3447 = vmatpush.bf16.msrb.mxu2 %v4902_v3  ;;  %v5164_v3 = vld [vmem:[#allocation7 + $0x4] sm:$0xf0] }
 0x3f9   :  { %v1855_v2 = vpop.f32.mrf.mxu2  ;;  %v6213_v21 = vpop.f32.mrf.mxu1 }
 0x3fa   :  { %v6211_v38 = vadd.f32 %v1855_v2, %v1766_v28  ;;  %7041 = vst [vmem:[#allocation118_spill] sm:$0xff] %v6213_v21  ;;  %v5166_v2 = vld [vmem:[#allocation7 + $0x14] sm:$0xf0] }
 0x3fb   :  { %v5182_v21 = vld [vmem:[#allocation7 + $0x94] sm:$0xf0]  ;;  %v4774_v39 = vor.u32 %v5166_v2, %v4773_v29  ;;  %v4765_v29 = vld [vmem:[#allocation7] sm:$0xf] }
 0x3fc   :  { %7040 = vst [vmem:[#allocation117_spill] sm:$0xff] %v6211_v38  ;;  %v4837_v38 = vld [vmem:[#allocation7 + $0x90] sm:$0xf] }
 0x3fd   :  { %v4838_v1 = vor.u32 %v5182_v21, %v4837_v38  ;;  %3269 = vmatpush.bf16.msrb.mxu0 %v4774_v39  ;;  %v4893_v38 = vld [vmem:[#allocation7 + $0x100] sm:$0xf]  ;;  %v5013_v21 = vld [vmem:[#allocation7 + $0x1f0] sm:$0xf] }
 0x3ff   :  { %3358 = vmatpush.bf16.msrb.mxu1 %v4838_v1  ;;  %v5226_v1 = vld [vmem:[#allocation7 + $0x1f4] sm:$0xf0] }
 0x400   :  { %v5014_v2 = vor.u32 %v5226_v1, %v5013_v21  ;;  %v4981_v1 = vld [vmem:[#allocation7 + $0x1b0] sm:$0xf] }
 0x401   :  { %v6219_v27 = vpop.f32.mrf.mxu2  ;;  %v1771_v41 = vpop.f32.mrf.mxu1 }
 0x402   :  { %7043 = vst [vmem:[#allocation120_spill] sm:$0xff] %v6219_v27  ;;  %3530 = vmatpush.bf16.msra.mxu3 %v5014_v2 }
 0x409   :  { %v1860_v5 = vpop.f32.mrf.mxu2  ;;  %v6229_v28 = vpop.f32.mrf.mxu1 }
 0x40a   :  { %v6225_v55 = vadd.f32 %v1860_v5, %v1771_v41  ;;  %7046 = vst [vmem:[#allocation123_spill] sm:$0xff] %v6229_v28  ;;  %v6235_v5 = vsel %vm2002_vm7, %v6172_v14, %v2445_v60  ;;  %v4997_v60 = vld [vmem:[#allocation7 + $0x1d0] sm:$0xf] }
 0x40b   :  { %v6227_v22 = vpop.f32.mrf.mxu3  ;;  %7048 = vst [vmem:[#allocation125_spill] sm:$0xff] %v6235_v5  ;;  %v4829_v5 = vld [vmem:[#allocation7 + $0x80] sm:$0xf] }
 0x40c   :  { %7045 = vst [vmem:[#allocation122_spill] sm:$0xff] %v6225_v55 }
 0x411   :  { %v6231_v27 = vpop.f32.mrf.mxu2  ;;  %v1776_v41 = vpop.f32.mrf.mxu1 }
 0x412   :  { %7047 = vst [vmem:[#allocation124_spill] sm:$0xff] %v6231_v27  ;;  %v4766_v27 = vor.u32 %v5164_v3, %v4765_v29  ;;  %v5218_v29 = vld [vmem:[#allocation7 + $0x1b4] sm:$0xf0] }
 0x413   :  { %v2400_v33 = vpop.f32.mrf.mxu3  ;;  %v4982_v3 = vor.u32 %v5218_v29, %v4981_v1  ;;  %v5225_v1 = vld [vmem:[#allocation7 + $0x1f4] sm:$0xf]  ;;  %v5015_v29 = vld [vmem:[#allocation7 + $0x1f8] sm:$0xf0] }
 0x414   :  { %v5196_v33 = vld [vmem:[#allocation7 + $0x104] sm:$0xf0]  ;;  %3270 = vmatpush.bf16.msrb.mxu0 %v4766_v27  ;;  %v5214_v27 = vld [vmem:[#allocation7 + $0x194] sm:$0xf0] }
 0x415   :  { %v4894_v39 = vor.u32 %v5196_v33, %v4893_v38  ;;  %v4998_v38 = vor.u32 %v5222_v8, %v4997_v60  ;;  %v4989_v33 = vld [vmem:[#allocation7 + $0x1c0] sm:$0xf]  ;;  %v5212_v8 = vld [vmem:[#allocation7 + $0x184] sm:$0xf0]  ;;  %v4951_v60 = vld [vmem:[#allocation7 + $0x178] sm:$0xf0] }
 0x416   :  { %v4990_v21 = vor.u32 %v5220_v48, %v4989_v33  ;;  %v5209_v48 = vld [vmem:[#allocation7 + $0x174] sm:$0xf] }
 0x417   :  { %3448 = vmatpush.bf16.msrb.mxu2 %v4894_v39  ;;  %v4973_v39 = vld [vmem:[#allocation7 + $0x1a0] sm:$0xf]  ;;  %v4954_v33 = vor.u32 %v5209_v48, %v4951_v60  ;;  %v7054_v48 = vld [vmem:[#allocation61_spill] sm:$0xff] }
 0x419   :  { %v1865_v55 = vpop.f32.mrf.mxu2 }
 0x41a   :  { %v6237_v28 = vadd.f32 %v1865_v55, %v1776_v41  ;;  %v5005_v55 = vld [vmem:[#allocation7 + $0x1e0] sm:$0xf] }
 0x41b   :  { %v5006_v14 = vor.u32 %v5224_v20, %v5005_v55  ;;  %v4965_v20 = vld [vmem:[#allocation7 + $0x190] sm:$0xf]  ;;  %v4957_v55 = vld [vmem:[#allocation7 + $0x180] sm:$0xf]  ;;  %3797 = vmatpush.bf16.msra.mxu2 %v4954_v33 }
 0x41c   :  { %7049 = vst [vmem:[#allocation126_spill] sm:$0xff] %v6237_v28  ;;  %v4830_v28 = vor.u32 %v5180_v46, %v4829_v5  ;;  %v5216_v46 = vld [vmem:[#allocation7 + $0x1a4] sm:$0xf0] }
 0x41d   :  { %3531 = vmatpush.bf16.msra.mxu3 %v5006_v14  ;;  %v4974_v5 = vor.u32 %v5216_v46, %v4973_v39  ;;  %v5018_v39 = vor.u32 %v5225_v1, %v5015_v29  ;;  %v5193_v46 = vld [vmem:[#allocation7 + $0xf4] sm:$0xf] }
 0x41e   :  { %3359 = vmatpush.bf16.msrb.mxu1 %v4830_v28  ;;  %v4966_v28 = vor.u32 %v5214_v27, %v4965_v20  ;;  %v1954_v20 = vperm.slane %v6163_v31, 2  ;;  %v1955_v27 = vperm.slane %v6163_v31, 3 }
 0x421   :  { %3532 = vmatpush.bf16.msra.mxu3 %v4998_v38  ;;  %v5177_v38 = vld [vmem:[#allocation7 + $0x74] sm:$0xf] }
 0x425   :  { %3533 = vmatpush.bf16.msra.mxu3 %v4990_v21  ;;  %v4823_v21 = vld [vmem:[#allocation7 + $0x78] sm:$0xf0] }
 0x429   :  { %3534 = vmatpush.bf16.msra.mxu3 %v4982_v3  ;;  %v4826_v3 = vor.u32 %v5177_v38, %v4823_v21  ;;  %v7055_v38 = vld [vmem:[#allocation63_spill] sm:$0xff]  ;;  %v7057_v21 = vld [vmem:[#allocation88_spill] sm:$0xff] }
 0x42b   :  { %v6243_v25 = vpop.f32.mrf.mxu3  ;;  %3619 = vmatpush.bf16.msra.mxu0 %v4826_v3 }
 0x42d   :  { %3535 = vmatpush.bf16.msra.mxu3 %v4974_v5  ;;  %v4887_v5 = vld [vmem:[#allocation7 + $0xf8] sm:$0xf0] }
 0x42e   :  { %v4890_v13 = vor.u32 %v5193_v46, %v4887_v5 }
 0x430   :  { %3708 = vmatpush.bf16.msra.mxu1 %v4890_v13  ;;  %v6263_v13 = vadd.f32 %v6038_v54, %v6036_v52  ;;  %v6283_v54 = vadd.f32 %v6104_v24, %v6102_v57  ;;  %v6295_v52 = vadd.f32 %v6127_v40, %v6125_v18 }
 0x431   :  { %3536 = vmatpush.bf16.msra.mxu3 %v4966_v28  ;;  %v2399_v28 = vadd.f32 %v6227_v22, %v1954_v20  ;;  %v6267_v22 = vadd.f32 %v6055_v7, %v6053_v12  ;;  %v6287_v12 = vadd.f32 %v6112_v45, %v6110_v10  ;;  %v6299_v7 = vadd.f32 %v6133_v16, %v6131_v35 }
 0x432   :  { %v6315_v16 = vadd.f32 %v6170_v61, %v6167_v49 }
 0x433   :  { %v2413_v41 = vpop.f32.mrf.mxu3 }
 0x434   :  { %v4958_v41 = vor.u32 %v5212_v8, %v4957_v55  ;;  %v6250_v55 = vadd.f32 %v5998_v43, %v5994_v53  ;;  %v2412_v8 = vadd.f32 %v6243_v25, %v2399_v28  ;;  %v6271_v53 = vadd.f32 %v6072_v32, %v6070_v23  ;;  %v7053_v25 = vld [vmem:[#allocation28_spill] sm:$0xff] }
 0x435   :  { %v6275_v43 = vadd.f32 %v6085_v37, %v6083_v17  ;;  %v6307_v17 = vadd.f32 %v6147_v0, %v6145_v9  ;;  %v6311_v37 = vadd.f32 %v6158_v59, %v6156_v36  ;;  %v6339_v36 = vadd.f32 %v6186_v47, %v6183_v30  ;;  %v7056_v30 = vld [vmem:[#allocation87_spill] sm:$0xff] }
 0x436   :  { %3537 = vmatpush.bf16.msra.mxu3 %v4958_v41  ;;  %v6255_v41 = vadd.f32 %v6012_v44, %v6008_v34  ;;  %v6279_v34 = vadd.f32 %v6097_v42, %v6095_v58  ;;  %v6301_v23 = vrot.slane %v2412_v8, 6  ;;  %v6319_v58 = vadd.f32 %v6179_v19, %v6177_v56 }
 0x43a   :  { %3886 = vmatpush.bf16.msrb.mxu3 %v5018_v39 }
 0x44b   :  { %v2424_v2 = vpop.f32.mrf.mxu3 }
 0x44c   :  { %v2425_v31 = vadd.f32 %v2424_v2, %v1955_v27 }
 0x453   :  { %v2426_v14 = vpop.f32.mrf.mxu3 }
 0x454   :  { %v6259_v14 = vadd.f32 %v6026_v15, %v6022_v6  ;;  %v6291_v6 = vadd.f32 %v6118_v62, %v6116_v51 }
 0x46b   :  { %v2437_v44 = vpop.f32.mrf.mxu3 }
 0x46c   :  { %v2438_v15 = vadd.f32 %v2437_v44, %v2425_v31  ;;  %v7060_v31 = vld [vmem:[#allocation13_spill] sm:$0xff] }
 0x46e   :  { %v6303_v32 = vrot.slane %v2438_v15, 5  ;;  %v7061_v15 = vld [vmem:[#allocation14_spill] sm:$0xff] }
 0x470   :  { %v2450_v42 = vsel %vm1994_vm3, %v6301_v23, %v6303_v32  ;;  %v2454_v57 = vsel %vm1996_vm4, %v6301_v23, %v6303_v32  ;;  %v2459_v24 = vsel %vm1998_vm5, %v6301_v23, %v6303_v32  ;;  %v2464_v10 = vsel %vm2000_vm6, %v6301_v23, %v6303_v32 }
 0x471   :  { %v2452_v45 = vsel %vm2451_vm11, %v6197_v11, %v2450_v42  ;;  %v2456_v51 = vsel %vm2455_vm12, %v6201_v50, %v2454_v57  ;;  %v2461_v62 = vsel %vm2460_vm13, %v6205_v4, %v2459_v24  ;;  %v2466_v18 = vsel %vm2465_vm14, %v6209_v26, %v2464_v10  ;;  %v7051_v11 = vld [vmem:[#allocation12_spill] sm:$0xff]  ;;  %v7052_v4 = vld [vmem:[#allocation26_spill] sm:$0xff] }
 0x472   :  { %v2489_v40 = vperm.slane %v2452_v45, 0  ;;  %v2490_v35 = vperm.slane %v2452_v45, 1  ;;  %v2491_v9 = vperm.slane %v2452_v45, 2  ;;  %v2492_v0 = vperm.slane %v2452_v45, 3  ;;  %v7064_v10 = vld [vmem:[#allocation30_spill] sm:$0xff] }
 0x473   :  { %v2439_v59 = vpop.f32.mrf.mxu3  ;;  %v2457_v49 = vrot.slane %v2456_v51, 1  ;;  %v6341_v61 = vrot.slane %v2461_v62, 2  ;;  %v6343_v56 = vrot.slane %v2466_v18, 3  ;;  %v7065_v51 = vld [vmem:[#allocation32_spill] sm:$0xff] }
 0x474   :  { %v2553_v19 = vadd.f32 %v2489_v40, %v5727_v63  ;;  %v2557_v50 = vadd.f32 %v2489_v40, %v7051_v11  ;;  %v2554_v26 = vadd.f32 %v2490_v35, %v7052_v4  ;;  %v2558_v2 = vadd.f32 %v2490_v35, %v7053_v25  ;;  %v7068_v25 = vld [vmem:[#allocation90_spill] sm:$0xff] }
 0x475   :  { %v2555_v60 = vadd.f32 %v2491_v9, %v7054_v48  ;;  %v2559_v33 = vadd.f32 %v2491_v9, %v7055_v38  ;;  %v2556_v47 = vadd.f32 %v2492_v0, %v7056_v30  ;;  %v2560_v1 = vadd.f32 %v2492_v0, %v7057_v21  ;;  %v7069_v48 = vld [vmem:[#allocation91_spill] sm:$0xff] }
 0x476   :  { %v2681_v29 = vmax.f32 %v2553_v19, 0.0  ;;  %v2685_v3 = vmax.f32 %v2557_v50, 0.0  ;;  %v2682_v39 = vmax.f32 %v2554_v26, 0.0  ;;  %v2686_v46 = vmax.f32 %v2558_v2, 0.0  ;;  %v7066_v19 = vld [vmem:[#allocation65_spill] sm:$0xff]  ;;  %v7067_v50 = vld [vmem:[#allocation67_spill] sm:$0xff] }
 0x477   :  { %v2683_v5 = vmax.f32 %v2555_v60, 0.0  ;;  %v2687_v63 = vmax.f32 %v2559_v33, 0.0  ;;  %v2684_v20 = vmax.f32 %v2556_v47, 0.0  ;;  %v2688_v27 = vmax.f32 %v2560_v1, 0.0 }
 0x478   :  { %v6353_v28 = vpack.c.bf16 %v2685_v3, %v2681_v29  ;;  %v6355_v8 = vpack.c.bf16 %v2686_v46, %v2682_v39  ;;  %v2561_v44 = vadd.f32 %v2489_v40, %v7060_v31  ;;  %v2565_v42 = vadd.f32 %v2489_v40, %v7061_v15  ;;  %v7073_v3 = vld [vmem:[#allocation15_spill] sm:$0xff]  ;;  %v7074_v46 = vld [vmem:[#allocation16_spill] sm:$0xff]  ;;  %v7076_v31 = vld [vmem:[#allocation34_spill] sm:$0xff] }
 0x479   :  { %v6359_v57 = vpack.c.bf16 %v2687_v63, %v2683_v5  ;;  %v6361_v24 = vpack.c.bf16 %v2688_v27, %v2684_v20  ;;  %v2562_v45 = vadd.f32 %v2490_v35, %v7064_v10  ;;  %v2566_v62 = vadd.f32 %v2490_v35, %v7065_v51  ;;  %v5207_v20 = vld [vmem:[#allocation7 + $0x164] sm:$0xf]  ;;  %v4943_v27 = vld [vmem:[#allocation7 + $0x168] sm:$0xf0]  ;;  %v7077_v15 = vld [vmem:[#allocation36_spill] sm:$0xff] }
 0x47a   :  { %7058 = vst [vmem:[#allocation12_spill] sm:$0xff] %v6353_v28  ;;  %3271 = vmatmul.bf16.vlgmr.msrb.gmra.mxu0 %v6353_v28  ;;  %3360 = vmatmul.bf16.vlgmr.msrb.gmra.mxu1 %v6355_v8  ;;  %v2689_v18 = vmax.f32 %v2561_v44, 0.0  ;;  %v2693_v59 = vmax.f32 %v2565_v42, 0.0  ;;  %v2563_v11 = vadd.f32 %v2491_v9, %v7066_v19  ;;  %v2567_v4 = vadd.f32 %v2491_v9, %v7067_v50  ;;  %v4815_v51 = vld [vmem:[#allocation7 + $0x68] sm:$0xf0] }
 0x47b   :  { %7059 = vst [vmem:[#allocation26_spill] sm:$0xff] %v6355_v8  ;;  %3449 = vmatmul.bf16.vlgmr.msrb.gmra.mxu2 %v6359_v57  ;;  %3538 = vmatmul.bf16.vlgmr.msra.gmra.mxu3 %v6361_v24  ;;  %v2690_v40 = vmax.f32 %v2562_v45, 0.0  ;;  %v2694_v26 = vmax.f32 %v2566_v62, 0.0  ;;  %v2564_v2 = vadd.f32 %v2492_v0, %v7068_v25  ;;  %v2568_v35 = vadd.f32 %v2492_v0, %v7069_v48  ;;  %v5175_v45 = vld [vmem:[#allocation7 + $0x64] sm:$0xf] }
 0x47c   :  { %7062 = vst [vmem:[#allocation28_spill] sm:$0xff] %v6359_v57  ;;  %v6373_v60 = vpack.c.bf16 %v2693_v59, %v2689_v18  ;;  %v2691_v38 = vmax.f32 %v2563_v11, 0.0  ;;  %v2695_v33 = vmax.f32 %v2567_v4, 0.0  ;;  %v2493_v30 = vperm.slane %v2457_v49, 0  ;;  %v7078_v59 = vld [vmem:[#allocation69_spill] sm:$0xff]  ;;  %v7079_v11 = vld [vmem:[#allocation71_spill] sm:$0xff] }
 0x47d   :  { %7063 = vst [vmem:[#allocation61_spill] sm:$0xff] %v6361_v24  ;;  %v6375_v47 = vpack.c.bf16 %v2694_v26, %v2690_v40  ;;  %v2692_v21 = vmax.f32 %v2564_v2, 0.0  ;;  %v2696_v1 = vmax.f32 %v2568_v35, 0.0  ;;  %v2494_v9 = vperm.slane %v2457_v49, 1  ;;  %v5223_v4 = vld [vmem:[#allocation7 + $0x1e4] sm:$0xf] }
 0x47e   :  { %7070 = vst [vmem:[#allocation63_spill] sm:$0xff] %v6373_v60  ;;  %v6377_v29 = vpack.c.bf16 %v2695_v33, %v2691_v38  ;;  %v2569_v39 = vadd.f32 %v2493_v30, %v7073_v3  ;;  %v2573_v5 = vadd.f32 %v2493_v30, %v7074_v46  ;;  %v2495_v63 = vperm.slane %v2457_v49, 2  ;;  %v5007_v40 = vld [vmem:[#allocation7 + $0x1e8] sm:$0xf0]  ;;  %v7080_v2 = vld [vmem:[#allocation93_spill] sm:$0xff]  ;;  %v7081_v35 = vld [vmem:[#allocation94_spill] sm:$0xff] }
 0x47f   :  { %7071 = vst [vmem:[#allocation87_spill] sm:$0xff] %v6375_v47  ;;  %v6381_v0 = vpack.c.bf16 %v2696_v1, %v2692_v21  ;;  %v2570_v44 = vadd.f32 %v2494_v9, %v7076_v31  ;;  %v2574_v42 = vadd.f32 %v2494_v9, %v7077_v15  ;;  %v2496_v10 = vperm.slane %v2457_v49, 3  ;;  %v5191_v33 = vld [vmem:[#allocation7 + $0xe4] sm:$0xf]  ;;  %v4879_v21 = vld [vmem:[#allocation7 + $0xe8] sm:$0xf0] }
 0x480   :  { %7072 = vst [vmem:[#allocation88_spill] sm:$0xff] %v6377_v29  ;;  %v2697_v62 = vmax.f32 %v2569_v39, 0.0  ;;  %v2701_v18 = vmax.f32 %v2573_v5, 0.0  ;;  %v2571_v19 = vadd.f32 %v2495_v63, %v7078_v59  ;;  %v2575_v50 = vadd.f32 %v2495_v63, %v7079_v11  ;;  %v7085_v11 = vld [vmem:[#allocation17_spill] sm:$0xff]  ;;  %v7158_v24 = vld [vmem:[#allocation72_spill] sm:$0xff] }
 0x481   :  { %7075 = vst [vmem:[#allocation13_spill] sm:$0xff] %v6381_v0  ;;  %v2698_v26 = vmax.f32 %v2570_v44, 0.0  ;;  %v2702_v25 = vmax.f32 %v2574_v42, 0.0  ;;  %v2572_v48 = vadd.f32 %v2496_v10, %v7080_v2  ;;  %v2576_v38 = vadd.f32 %v2496_v10, %v7081_v35 }
 0x482   :  { %v6389_v1 = vpack.c.bf16 %v2701_v18, %v2697_v62  ;;  %v2699_v49 = vmax.f32 %v2571_v19, 0.0  ;;  %v2703_v3 = vmax.f32 %v2575_v50, 0.0  ;;  %v4946_v39 = vor.u32 %v5207_v20, %v4943_v27  ;;  %v7087_v62 = vld [vmem:[#allocation18_spill] sm:$0xff]  ;;  %v7089_v20 = vld [vmem:[#allocation40_spill] sm:$0xff] }
 0x483   :  { %v6391_v46 = vpack.c.bf16 %v2702_v25, %v2698_v26  ;;  %v2700_v5 = vmax.f32 %v2572_v48, 0.0  ;;  %v2704_v31 = vmax.f32 %v2576_v38, 0.0  ;;  %v4818_v15 = vor.u32 %v5175_v45, %v4815_v51  ;;  %v7088_v19 = vld [vmem:[#allocation38_spill] sm:$0xff]  ;;  %v7090_v45 = vld [vmem:[#allocation73_spill] sm:$0xff]  ;;  %v7091_v25 = vld [vmem:[#allocation75_spill] sm:$0xff] }
 0x484   :  { %7082 = vst [vmem:[#allocation14_spill] sm:$0xff] %v6389_v1  ;;  %v6393_v59 = vpack.c.bf16 %v2703_v3, %v2699_v49  ;;  %3798 = vmatpush.bf16.msra.mxu2 %v4946_v39  ;;  %v5010_v44 = vor.u32 %v5223_v4, %v5007_v40  ;;  %v4882_v42 = vor.u32 %v5191_v33, %v4879_v21  ;;  %v7092_v4 = vld [vmem:[#allocation96_spill] sm:$0xff]  ;;  %v7093_v49 = vld [vmem:[#allocation97_spill] sm:$0xff] }
 0x485   :  { %7083 = vst [vmem:[#allocation30_spill] sm:$0xff] %v6391_v46  ;;  %v2577_v2 = vadd.f32 %v2493_v30, %v7085_v11  ;;  %v6396_v35 = vpack.c.bf16 %v2704_v31, %v2700_v5  ;;  %3620 = vmatpush.bf16.msra.mxu0 %v4818_v15  ;;  %v2581_v18 = vadd.f32 %v2493_v30, %v7087_v62  ;;  %v2497_v31 = vperm.slane %v6341_v61, 0  ;;  %v7097_v11 = vld [vmem:[#allocation19_spill] sm:$0xff] }
 0x486   :  { %7084 = vst [vmem:[#allocation32_spill] sm:$0xff] %v6393_v59  ;;  %v2578_v50 = vadd.f32 %v2494_v9, %v7088_v19  ;;  %v2582_v27 = vadd.f32 %v2494_v9, %v7089_v20  ;;  %3887 = vmatpush.bf16.msrb.mxu3 %v5010_v44  ;;  %3709 = vmatpush.bf16.msra.mxu1 %v4882_v42  ;;  %v2498_v42 = vperm.slane %v6341_v61, 1 }
 0x487   :  { %7086 = vst [vmem:[#allocation65_spill] sm:$0xff] %v6396_v35  ;;  %v2705_v26 = vmax.f32 %v2577_v2, 0.0  ;;  %v2579_v51 = vadd.f32 %v2495_v63, %v7090_v45  ;;  %v2583_v48 = vadd.f32 %v2495_v63, %v7091_v25  ;;  %v2580_v40 = vadd.f32 %v2496_v10, %v7092_v4  ;;  %v7098_v2 = vld [vmem:[#allocation20_spill] sm:$0xff] }
 0x488   :  { %v2709_v38 = vmax.f32 %v2581_v18, 0.0  ;;  %v2706_v33 = vmax.f32 %v2578_v50, 0.0  ;;  %v2710_v21 = vmax.f32 %v2582_v27, 0.0  ;;  %v2584_v3 = vadd.f32 %v2496_v10, %v7093_v49  ;;  %v7100_v50 = vld [vmem:[#allocation42_spill] sm:$0xff]  ;;  %v7101_v27 = vld [vmem:[#allocation44_spill] sm:$0xff] }
 0x489   :  { %v2707_v39 = vmax.f32 %v2579_v51, 0.0  ;;  %v2711_v30 = vmax.f32 %v2583_v48, 0.0  ;;  %v2708_v5 = vmax.f32 %v2580_v40, 0.0  ;;  %v2585_v10 = vadd.f32 %v2497_v31, %v7097_v11  ;;  %v7102_v48 = vld [vmem:[#allocation77_spill] sm:$0xff] }
 0x48a   :  { %v6406_v9 = vpack.c.bf16 %v2709_v38, %v2705_v26  ;;  %v6408_v15 = vpack.c.bf16 %v2710_v21, %v2706_v33  ;;  %v2712_v44 = vmax.f32 %v2584_v3, 0.0  ;;  %3276 = vmatmul.bf16.gmra.mxu0 %v6373_v60  ;;  %3365 = vmatmul.bf16.gmra.mxu1 %v6375_v47  ;;  %v2589_v62 = vadd.f32 %v2497_v31, %v7098_v2  ;;  %v7103_v21 = vld [vmem:[#allocation99_spill] sm:$0xff]  ;;  %v7157_v60 = vld [vmem:[#allocation70_spill] sm:$0xff] }
 0x48b   :  { %v6413_v63 = vpack.c.bf16 %v2711_v30, %v2707_v39  ;;  %v2499_v18 = vperm.slane %v6341_v61, 2  ;;  %3454 = vmatmul.bf16.gmra.mxu2 %v6377_v29  ;;  %3543 = vmatmul.bf16.gmra.mxu3 %v6381_v0  ;;  %v2586_v20 = vadd.f32 %v2498_v42, %v7100_v50  ;;  %v2590_v26 = vadd.f32 %v2498_v42, %v7101_v27  ;;  %v4871_v0 = vld [vmem:[#allocation7 + $0xd8] sm:$0xf0] }
 0x48c   :  { %7094 = vst [vmem:[#allocation67_spill] sm:$0xff] %v6406_v9  ;;  %v6420_v19 = vpack.c.bf16 %v2712_v44, %v2708_v5  ;;  %v2500_v45 = vperm.slane %v6341_v61, 3  ;;  %v2713_v51 = vmax.f32 %v2585_v10, 0.0  ;;  %v2717_v25 = vmax.f32 %v2589_v62, 0.0  ;;  %v7105_v44 = vld [vmem:[#allocation21_spill] sm:$0xff]  ;;  %v7107_v62 = vld [vmem:[#allocation22_spill] sm:$0xff] }
 0x48d   :  { %7095 = vst [vmem:[#allocation90_spill] sm:$0xff] %v6408_v15  ;;  %v2587_v4 = vadd.f32 %v2499_v18, %v7102_v48  ;;  %v2591_v40 = vadd.f32 %v2499_v18, %v6250_v55  ;;  %v2714_v38 = vmax.f32 %v2586_v20, 0.0  ;;  %v2718_v33 = vmax.f32 %v2590_v26, 0.0  ;;  %v7109_v20 = vld [vmem:[#allocation46_spill] sm:$0xff]  ;;  %v7110_v48 = vld [vmem:[#allocation48_spill] sm:$0xff] }
 0x48e   :  { %7096 = vst [vmem:[#allocation91_spill] sm:$0xff] %v6413_v63  ;;  %v2588_v49 = vadd.f32 %v2500_v45, %v7103_v21  ;;  %v2592_v3 = vadd.f32 %v2500_v45, %v6283_v54  ;;  %v6429_v39 = vpack.c.bf16 %v2717_v25, %v2713_v51  ;;  %v2593_v11 = vadd.f32 %v2497_v31, %v7105_v44  ;;  %v7112_v25 = vld [vmem:[#allocation80_spill] sm:$0xff] }
 0x48f   :  { %7099 = vst [vmem:[#allocation15_spill] sm:$0xff] %v6420_v19  ;;  %v2715_v30 = vmax.f32 %v2587_v4, 0.0  ;;  %v2719_v5 = vmax.f32 %v2591_v40, 0.0  ;;  %v6432_v2 = vpack.c.bf16 %v2718_v33, %v2714_v38  ;;  %v2597_v50 = vadd.f32 %v2497_v31, %v7107_v62 }
 0x490   :  { %7104 = vst [vmem:[#allocation16_spill] sm:$0xff] %v6429_v39  ;;  %v2716_v61 = vmax.f32 %v2588_v49, 0.0  ;;  %v2720_v10 = vmax.f32 %v2592_v3, 0.0  ;;  %v2721_v55 = vmax.f32 %v2593_v11, 0.0  ;;  %v2594_v26 = vadd.f32 %v2498_v42, %v7109_v20  ;;  %v7113_v49 = vld [vmem:[#allocation101_spill] sm:$0xff]  ;;  %v7118_v20 = vld [vmem:[#allocation24_spill] sm:$0xff] }
 0x491   :  { %7106 = vst [vmem:[#allocation34_spill] sm:$0xff] %v6432_v2  ;;  %v6435_v27 = vpack.c.bf16 %v2719_v5, %v2715_v30  ;;  %v2598_v21 = vadd.f32 %v2498_v42, %v7110_v48  ;;  %v2725_v51 = vmax.f32 %v2597_v50, 0.0  ;;  %v2595_v4 = vadd.f32 %v2499_v18, %v7112_v25 }
 0x492   :  { %v6439_v54 = vpack.c.bf16 %v2720_v10, %v2716_v61  ;;  %v2599_v40 = vadd.f32 %v2499_v18, %v6255_v41  ;;  %v2722_v38 = vmax.f32 %v2594_v26, 0.0  ;;  %v2596_v3 = vadd.f32 %v2500_v45, %v7113_v49  ;;  %v7117_v41 = vld [vmem:[#allocation23_spill] sm:$0xff] }
 0x493   :  { %7108 = vst [vmem:[#allocation36_spill] sm:$0xff] %v6435_v27  ;;  %v2726_v33 = vmax.f32 %v2598_v21, 0.0  ;;  %v2600_v31 = vadd.f32 %v2500_v45, %v6291_v6  ;;  %v6445_v30 = vpack.c.bf16 %v2725_v51, %v2721_v55  ;;  %v2723_v5 = vmax.f32 %v2595_v4, 0.0  ;;  %v7120_v55 = vld [vmem:[#allocation50_spill] sm:$0xff]  ;;  %v7121_v21 = vld [vmem:[#allocation52_spill] sm:$0xff] }
 0x494   :  { %7111 = vst [vmem:[#allocation69_spill] sm:$0xff] %v6439_v54  ;;  %v2727_v44 = vmax.f32 %v2599_v40, 0.0  ;;  %v2501_v11 = vperm.slane %v6343_v56, 0  ;;  %v2724_v61 = vmax.f32 %v2596_v3, 0.0  ;;  %v2502_v62 = vperm.slane %v6343_v56, 1 }
 0x495   :  { %7114 = vst [vmem:[#allocation71_spill] sm:$0xff] %v6445_v30  ;;  %v6448_v42 = vpack.c.bf16 %v2726_v33, %v2722_v38  ;;  %v2728_v10 = vmax.f32 %v2600_v31, 0.0  ;;  %v2503_v6 = vperm.slane %v6343_v56, 2  ;;  %v2504_v25 = vperm.slane %v6343_v56, 3  ;;  %v7122_v38 = vld [vmem:[#allocation83_spill] sm:$0xff] }
 0x496   :  { %v6451_v50 = vpack.c.bf16 %v2727_v44, %v2723_v5  ;;  %v2601_v18 = vadd.f32 %v2501_v11, %v7117_v41  ;;  %v2605_v26 = vadd.f32 %v2501_v11, %v7118_v20  ;;  %v2602_v48 = vadd.f32 %v2502_v62, %v7120_v55  ;;  %v7123_v5 = vld [vmem:[#allocation103_spill] sm:$0xff]  ;;  %v7124_v55 = vld [vmem:[#allocation25_spill] sm:$0xff] }
 0x497   :  { %7115 = vst [vmem:[#allocation93_spill] sm:$0xff] %v6448_v42  ;;  %v6456_v45 = vpack.c.bf16 %v2728_v10, %v2724_v61  ;;  %v2606_v51 = vadd.f32 %v2502_v62, %v7121_v21  ;;  %v2603_v33 = vadd.f32 %v2503_v6, %v7122_v38  ;;  %v2607_v49 = vadd.f32 %v2503_v6, %v6259_v14  ;;  %v7126_v38 = vld [vmem:[#allocation54_spill] sm:$0xff] }
 0x498   :  { %7116 = vst [vmem:[#allocation94_spill] sm:$0xff] %v6451_v50  ;;  %v2729_v4 = vmax.f32 %v2601_v18, 0.0  ;;  %v2733_v40 = vmax.f32 %v2605_v26, 0.0  ;;  %v2730_v3 = vmax.f32 %v2602_v48, 0.0  ;;  %v2604_v44 = vadd.f32 %v2504_v25, %v7123_v5  ;;  %v7125_v26 = vld [vmem:[#allocation27_spill] sm:$0xff] }
 0x499   :  { %7119 = vst [vmem:[#allocation17_spill] sm:$0xff] %v6456_v45  ;;  %v2734_v31 = vmax.f32 %v2606_v51, 0.0  ;;  %v2608_v41 = vadd.f32 %v2504_v25, %v6299_v7  ;;  %v2731_v10 = vmax.f32 %v2603_v33, 0.0  ;;  %v2735_v20 = vmax.f32 %v2607_v49, 0.0  ;;  %v5205_v7 = vld [vmem:[#allocation7 + $0x154] sm:$0xf] }
 0x49a   :  { %v6465_v61 = vpack.c.bf16 %v2733_v40, %v2729_v4  ;;  %v2609_v21 = vadd.f32 %v2501_v11, %v7124_v55  ;;  %3281 = vmatmul.bf16.gmra.mxu0 %v6389_v1  ;;  %3370 = vmatmul.bf16.gmra.mxu1 %v6391_v46  ;;  %v2732_v18 = vmax.f32 %v2604_v44, 0.0  ;;  %v2613_v48 = vadd.f32 %v2501_v11, %v7125_v26  ;;  %v4935_v51 = vld [vmem:[#allocation7 + $0x158] sm:$0xf0]  ;;  %v5173_v4 = vld [vmem:[#allocation7 + $0x54] sm:$0xf]  ;;  %v7128_v11 = vld [vmem:[#allocation86_spill] sm:$0xff] }
 0x49b   :  { %v6470_v56 = vpack.c.bf16 %v2734_v31, %v2730_v3  ;;  %v2736_v14 = vmax.f32 %v2608_v41, 0.0  ;;  %3459 = vmatmul.bf16.gmra.mxu2 %v6393_v59  ;;  %3548 = vmatmul.bf16.gmra.mxu3 %v6396_v35  ;;  %v6475_v40 = vpack.c.bf16 %v2735_v20, %v2731_v10  ;;  %v2610_v33 = vadd.f32 %v2502_v62, %v7126_v38  ;;  %v7127_v49 = vld [vmem:[#allocation56_spill] sm:$0xff]  ;;  %v4807_v3 = vld [vmem:[#allocation7 + $0x58] sm:$0xf0] }
 0x49c   :  { %v2614_v5 = vadd.f32 %v2502_v62, %v7127_v49  ;;  %v4938_v55 = vor.u32 %v5205_v7, %v4935_v51  ;;  %v5221_v31 = vld [vmem:[#allocation7 + $0x1d4] sm:$0xf]  ;;  %v4999_v44 = vld [vmem:[#allocation7 + $0x1d8] sm:$0xf0]  ;;  %v2611_v26 = vadd.f32 %v2503_v6, %v7128_v11  ;;  %v2615_v59 = vadd.f32 %v2503_v6, %v6263_v13 }
 0x49d   :  { %v6479_v41 = vpack.c.bf16 %v2736_v14, %v2732_v18  ;;  %v4810_v35 = vor.u32 %v5173_v4, %v4807_v3  ;;  %v5002_v46 = vor.u32 %v5221_v31, %v4999_v44  ;;  %v5189_v1 = vld [vmem:[#allocation7 + $0xd4] sm:$0xf]  ;;  %v2737_v10 = vmax.f32 %v2609_v21, 0.0  ;;  %v7129_v14 = vld [vmem:[#allocation107_spill] sm:$0xff] }
 0x49e   :  { %v2741_v20 = vmax.f32 %v2613_v48, 0.0  ;;  %3799 = vmatpush.bf16.msra.mxu2 %v4938_v55  ;;  %v4874_v38 = vor.u32 %v5189_v1, %v4871_v0  ;;  %v2738_v29 = vmax.f32 %v2610_v33, 0.0  ;;  %v2742_v62 = vmax.f32 %v2614_v5, 0.0  ;;  %v7132_v5 = vld [vmem:[#allocation125_spill] sm:$0xff] }
 0x49f   :  { %v2739_v7 = vmax.f32 %v2611_v26, 0.0  ;;  %3621 = vmatpush.bf16.msra.mxu0 %v4810_v35  ;;  %3888 = vmatpush.bf16.msrb.mxu3 %v5002_v46  ;;  %v2743_v18 = vmax.f32 %v2615_v59, 0.0  ;;  %v2612_v49 = vadd.f32 %v2504_v25, %v7129_v14  ;;  %v2616_v13 = vadd.f32 %v2504_v25, %v6307_v17  ;;  %v7130_v35 = vld [vmem:[#allocation119_spill] sm:$0xff]  ;;  %v7131_v25 = vld [vmem:[#allocation121_spill] sm:$0xff] }
 0x4a0   :  { %v6483_v51 = vpack.c.bf16 %v2741_v20, %v2737_v10  ;;  %3710 = vmatpush.bf16.msra.mxu1 %v4874_v38  ;;  %v6487_v6 = vpack.c.bf16 %v2742_v62, %v2738_v29  ;;  %v2469_v21 = vsel %vm2002_vm7, %v6301_v23, %v6303_v32  ;;  %v2475_v0 = vsel %vm2474_vm10, %v6303_v32, %v6301_v23  ;;  %v7133_v10 = vld [vmem:[#allocation115_spill] sm:$0xff]  ;;  %v7134_v20 = vld [vmem:[#allocation116_spill] sm:$0xff]  ;;  %v7135_v62 = vld [vmem:[#allocation118_spill] sm:$0xff] }
 0x4a1   :  { %v6495_v1 = vpack.c.bf16 %v2743_v18, %v2739_v7  ;;  %v2740_v46 = vmax.f32 %v2612_v49, 0.0  ;;  %v2744_v59 = vmax.f32 %v2616_v13, 0.0  ;;  %v2471_v48 = vsel %vm2470_vm15, %v7130_v35, %v2469_v21  ;;  %v7136_v7 = vld [vmem:[#allocation120_spill] sm:$0xff]  ;;  %v7137_v13 = vld [vmem:[#allocation29_spill] sm:$0xff] }
 0x4a2   :  { %v2472_v4 = vrot.slane %v2471_v48, 4  ;;  %v2480_v17 = vsel %vm2448_vm9, %v6301_v23, %v6303_v32  ;;  %v2477_v33 = vsel %vm2476_vm0, %v7131_v25, %v2475_v0  ;;  %v6508_v3 = vsel %vm1992_vm2, %v6301_v23, %v6303_v32  ;;  %v7138_v0 = vld [vmem:[#allocation31_spill] sm:$0xff]  ;;  %v7139_v32 = vld [vmem:[#allocation58_spill] sm:$0xff]  ;;  %v7141_v48 = vld [vmem:[#allocation89_spill] sm:$0xff] }
 0x4a3   :  { %v6501_v29 = vpack.c.bf16 %v2744_v59, %v2740_v46  ;;  %v2482_v55 = vsel %vm2481_vm1, %v2480_v17, %v7132_v5  ;;  %v6512_v38 = vadd.f32 %v7134_v20, %v7133_v10  ;;  %v6516_v18 = vadd.f32 %v7136_v7, %v7135_v62  ;;  %v7140_v59 = vld [vmem:[#allocation60_spill] sm:$0xff]  ;;  %v7142_v25 = vld [vmem:[#allocation110_spill] sm:$0xff] }
 0x4a4   :  { %v2505_v31 = vperm.slane %v2472_v4, 0  ;;  %v2506_v44 = vperm.slane %v2472_v4, 1  ;;  %v2507_v11 = vperm.slane %v2472_v4, 2  ;;  %v2508_v26 = vperm.slane %v2472_v4, 3 }
 0x4a5   :  { %v2478_v14 = vrot.slane %v2477_v33, 5  ;;  %v6518_v49 = vrot.slane %v2482_v55, 6  ;;  %vm2486_vm9 = vcmask 1046529  }
 0x4a6   :  { %v2617_v21 = vadd.f32 %v2505_v31, %v7137_v13  ;;  %v2621_v23 = vadd.f32 %v2505_v31, %v7138_v0  ;;  %v2618_v46 = vadd.f32 %v2506_v44, %v7139_v32  ;;  %v2622_v35 = vadd.f32 %v2506_v44, %v7140_v59 }
 0x4a7   :  { %v2619_v4 = vadd.f32 %v2507_v11, %v7141_v48  ;;  %v2623_v17 = vadd.f32 %v2507_v11, %v6267_v22  ;;  %v2620_v5 = vadd.f32 %v2508_v26, %v7142_v25  ;;  %v2624_v10 = vadd.f32 %v2508_v26, %v6311_v37  ;;  %v7143_v22 = vld [vmem:[#allocation33_spill] sm:$0xff] }
 0x4a8   :  { %v2745_v20 = vmax.f32 %v2617_v21, 0.0  ;;  %v2749_v33 = vmax.f32 %v2621_v23, 0.0  ;;  %v2746_v55 = vmax.f32 %v2618_v46, 0.0  ;;  %v2750_v62 = vmax.f32 %v2622_v35, 0.0  ;;  %v7144_v23 = vld [vmem:[#allocation35_spill] sm:$0xff] }
 0x4a9   :  { %v2747_v7 = vmax.f32 %v2619_v4, 0.0  ;;  %v2751_v13 = vmax.f32 %v2623_v17, 0.0  ;;  %v2748_v47 = vmax.f32 %v2620_v5, 0.0  ;;  %v2752_v0 = vmax.f32 %v2624_v10, 0.0  ;;  %v7145_v17 = vld [vmem:[#allocation62_spill] sm:$0xff]  ;;  %v7146_v10 = vld [vmem:[#allocation64_spill] sm:$0xff] }
 0x4aa   :  { %3286 = vmatmul.bf16.gmra.mxu0 %v6406_v9  ;;  %3375 = vmatmul.bf16.gmra.mxu1 %v6408_v15  ;;  %v6530_v32 = vpack.c.bf16 %v2749_v33, %v2745_v20  ;;  %v6532_v59 = vpack.c.bf16 %v2750_v62, %v2746_v55  ;;  %v2625_v48 = vadd.f32 %v2505_v31, %v7143_v22  ;;  %v2509_v25 = vperm.slane %v2478_v14, 0  ;;  %v7147_v33 = vld [vmem:[#allocation92_spill] sm:$0xff] }
 0x4ab   :  { %3464 = vmatmul.bf16.gmra.mxu2 %v6413_v63  ;;  %3553 = vmatmul.bf16.gmra.mxu3 %v6420_v19  ;;  %v6537_v37 = vpack.c.bf16 %v2751_v13, %v2747_v7  ;;  %v6539_v21 = vpack.c.bf16 %v2752_v0, %v2748_v47  ;;  %v2629_v46 = vadd.f32 %v2505_v31, %v7144_v23  ;;  %v2510_v35 = vperm.slane %v2478_v14, 1  ;;  %v7148_v63 = vld [vmem:[#allocation111_spill] sm:$0xff]  ;;  %v7149_v19 = vld [vmem:[#allocation37_spill] sm:$0xff] }
 0x4ac   :  { %v2753_v4 = vmax.f32 %v2625_v48, 0.0  ;;  %v2626_v5 = vadd.f32 %v2506_v44, %v7145_v17  ;;  %v2630_v20 = vadd.f32 %v2506_v44, %v7146_v10  ;;  %v2627_v55 = vadd.f32 %v2507_v11, %v7147_v33  ;;  %v7150_v10 = vld [vmem:[#allocation39_spill] sm:$0xff] }
 0x4ad   :  { %v2757_v62 = vmax.f32 %v2629_v46, 0.0  ;;  %v2631_v22 = vadd.f32 %v2507_v11, %v6271_v53  ;;  %v2628_v15 = vadd.f32 %v2508_v26, %v7148_v63  ;;  %v2632_v7 = vadd.f32 %v2508_v26, %v6315_v16  ;;  %v7151_v53 = vld [vmem:[#allocation66_spill] sm:$0xff]  ;;  %v7152_v26 = vld [vmem:[#allocation68_spill] sm:$0xff] }
 0x4ae   :  { %v2754_v13 = vmax.f32 %v2626_v5, 0.0  ;;  %v2758_v47 = vmax.f32 %v2630_v20, 0.0  ;;  %v2755_v0 = vmax.f32 %v2627_v55, 0.0  ;;  %v2633_v31 = vadd.f32 %v2509_v25, %v7149_v19 }
 0x4af   :  { %v6549_v23 = vpack.c.bf16 %v2757_v62, %v2753_v4  ;;  %v2759_v48 = vmax.f32 %v2631_v22, 0.0  ;;  %v2756_v17 = vmax.f32 %v2628_v15, 0.0  ;;  %v2760_v9 = vmax.f32 %v2632_v7, 0.0  ;;  %v7153_v62 = vld [vmem:[#allocation41_spill] sm:$0xff]  ;;  %v7154_v7 = vld [vmem:[#allocation95_spill] sm:$0xff] }
 0x4b0   :  { %v6551_v44 = vpack.c.bf16 %v2758_v47, %v2754_v13  ;;  %v2637_v46 = vadd.f32 %v2509_v25, %v7150_v10  ;;  %v2761_v33 = vmax.f32 %v2633_v31, 0.0  ;;  %v2634_v11 = vadd.f32 %v2510_v35, %v7151_v53  ;;  %v7155_v31 = vld [vmem:[#allocation43_spill] sm:$0xff] }
 0x4b1   :  { %v6555_v63 = vpack.c.bf16 %v2759_v48, %v2755_v0  ;;  %v6557_v16 = vpack.c.bf16 %v2760_v9, %v2756_v17  ;;  %v2638_v5 = vadd.f32 %v2510_v35, %v7152_v26  ;;  %v2511_v20 = vperm.slane %v2478_v14, 2  ;;  %v7156_v0 = vld [vmem:[#allocation112_spill] sm:$0xff] }
 0x4b2   :  { %v2765_v19 = vmax.f32 %v2637_v46, 0.0  ;;  %v2762_v4 = vmax.f32 %v2634_v11, 0.0  ;;  %v2512_v55 = vperm.slane %v2478_v14, 3  ;;  %v2641_v15 = vadd.f32 %v2509_v25, %v7153_v62 }
 0x4b3   :  { %v2766_v22 = vmax.f32 %v2638_v5, 0.0  ;;  %v2635_v13 = vadd.f32 %v2511_v20, %v7154_v7  ;;  %v2639_v47 = vadd.f32 %v2511_v20, %v6275_v43  ;;  %v2645_v10 = vadd.f32 %v2509_v25, %v7155_v31 }
 0x4b4   :  { %v6564_v53 = vpack.c.bf16 %v2765_v19, %v2761_v33  ;;  %v2636_v9 = vadd.f32 %v2512_v55, %v7156_v0  ;;  %v2640_v48 = vadd.f32 %v2512_v55, %v6319_v58  ;;  %v2769_v17 = vmax.f32 %v2641_v15, 0.0  ;;  %v7159_v33 = vld [vmem:[#allocation98_spill] sm:$0xff] }
 0x4b5   :  { %v6568_v26 = vpack.c.bf16 %v2766_v22, %v2762_v4  ;;  %v2763_v46 = vmax.f32 %v2635_v13, 0.0  ;;  %v2767_v14 = vmax.f32 %v2639_v47, 0.0  ;;  %v2773_v11 = vmax.f32 %v2645_v10, 0.0  ;;  %v7160_v13 = vld [vmem:[#allocation113_spill] sm:$0xff] }
 0x4b6   :  { %v2764_v62 = vmax.f32 %v2636_v9, 0.0  ;;  %v2768_v5 = vmax.f32 %v2640_v48, 0.0  ;;  %v2642_v7 = vadd.f32 %v2510_v35, %v7157_v60  ;;  %v2646_v43 = vadd.f32 %v2510_v35, %v7158_v24  ;;  %v5203_v9 = vld [vmem:[#allocation7 + $0x144] sm:$0xf] }
 0x4b7   :  { %v6572_v57 = vpack.c.bf16 %v2767_v14, %v2763_v46  ;;  %v6574_v25 = vpack.c.bf16 %v2773_v11, %v2769_v17  ;;  %v2643_v19 = vadd.f32 %v2511_v20, %v7159_v33  ;;  %v2647_v58 = vadd.f32 %v2511_v20, %v6279_v34  ;;  %v7161_v17 = vld [vmem:[#allocation45_spill] sm:$0xff]  ;;  %v7162_v14 = vld [vmem:[#allocation47_spill] sm:$0xff]  ;;  %v7163_v33 = vld [vmem:[#allocation74_spill] sm:$0xff] }
 0x4b8   :  { %v6578_v15 = vpack.c.bf16 %v2768_v5, %v2764_v62  ;;  %v2770_v4 = vmax.f32 %v2642_v7, 0.0  ;;  %v2774_v22 = vmax.f32 %v2646_v43, 0.0  ;;  %v2644_v47 = vadd.f32 %v2512_v55, %v7160_v13  ;;  %v4799_v5 = vld [vmem:[#allocation7 + $0x48] sm:$0xf0]  ;;  %v5219_v7 = vld [vmem:[#allocation7 + $0x1c4] sm:$0xf] }
 0x4b9   :  { %v2771_v31 = vmax.f32 %v2643_v19, 0.0  ;;  %v2775_v10 = vmax.f32 %v2647_v58, 0.0  ;;  %v2648_v60 = vadd.f32 %v2512_v55, %v6339_v36  ;;  %v2513_v24 = vperm.slane %v6518_v49, 0  ;;  %v4927_v36 = vld [vmem:[#allocation7 + $0x148] sm:$0xf0]  ;;  %v7164_v58 = vld [vmem:[#allocation76_spill] sm:$0xff] }
 0x4ba   :  { %3291 = vmatmul.bf16.gmra.mxu0 %v6429_v39  ;;  %3380 = vmatmul.bf16.gmra.mxu1 %v6432_v2  ;;  %v6585_v35 = vpack.c.bf16 %v2774_v22, %v2770_v4  ;;  %v2772_v0 = vmax.f32 %v2644_v47, 0.0  ;;  %v2514_v34 = vperm.slane %v6518_v49, 1  ;;  %v2515_v20 = vperm.slane %v6518_v49, 2  ;;  %v5171_v55 = vld [vmem:[#allocation7 + $0x44] sm:$0xf]  ;;  %v7165_v22 = vld [vmem:[#allocation100_spill] sm:$0xff] }
 0x4bb   :  { %3469 = vmatmul.bf16.gmra.mxu2 %v6435_v27  ;;  %3558 = vmatmul.bf16.gmra.mxu3 %v6439_v54  ;;  %v6591_v48 = vpack.c.bf16 %v2775_v10, %v2771_v31  ;;  %v2649_v46 = vadd.f32 %v2513_v24, %v7161_v17  ;;  %v2653_v11 = vadd.f32 %v2513_v24, %v7162_v14  ;;  %v4991_v43 = vld [vmem:[#allocation7 + $0x1c8] sm:$0xf0]  ;;  %v5187_v27 = vld [vmem:[#allocation7 + $0xc4] sm:$0xf]  ;;  %v2776_v31 = vmax.f32 %v2648_v60, 0.0  ;;  %v7167_v60 = vld [vmem:[#allocation49_spill] sm:$0xff] }
 0x4bc   :  { %v4930_v62 = vor.u32 %v5203_v9, %v4927_v36  ;;  %v2650_v19 = vadd.f32 %v2514_v34, %v7163_v33  ;;  %v2654_v4 = vadd.f32 %v2514_v34, %v7164_v58  ;;  %v2651_v13 = vadd.f32 %v2515_v20, %v7165_v22  ;;  %v4863_v2 = vld [vmem:[#allocation7 + $0xc8] sm:$0xf0] }
 0x4bd   :  { %v4802_v47 = vor.u32 %v5171_v55, %v4799_v5  ;;  %v4994_v54 = vor.u32 %v5219_v7, %v4991_v43  ;;  %v2777_v10 = vmax.f32 %v2649_v46, 0.0  ;;  %v4866_v17 = vor.u32 %v5187_v27, %v4863_v2  ;;  %v7168_v2 = vld [vmem:[#allocation51_spill] sm:$0xff] }
 0x4be   :  { %3800 = vmatpush.bf16.msra.mxu2 %v4930_v62  ;;  %v2781_v39 = vmax.f32 %v2653_v11, 0.0  ;;  %v2778_v14 = vmax.f32 %v2650_v19, 0.0  ;;  %v2782_v9 = vmax.f32 %v2654_v4, 0.0  ;;  %v6598_v36 = vpack.c.bf16 %v2776_v31, %v2772_v0  ;;  %v7169_v62 = vld [vmem:[#allocation114_spill] sm:$0xff]  ;;  %v7171_v4 = vld [vmem:[#allocation79_spill] sm:$0xff] }
 0x4bf   :  { %3622 = vmatpush.bf16.msra.mxu0 %v4802_v47  ;;  %3889 = vmatpush.bf16.msrb.mxu3 %v4994_v54  ;;  %v2655_v33 = vadd.f32 %v2515_v20, %v6287_v12  ;;  %v2779_v58 = vmax.f32 %v2651_v13, 0.0  ;;  %v2516_v22 = vperm.slane %v6518_v49, 3  ;;  %v2657_v46 = vadd.f32 %v2513_v24, %v7167_v60  ;;  %v7170_v0 = vld [vmem:[#allocation78_spill] sm:$0xff]  ;;  %v7175_v60 = vld [vmem:[#allocation117_spill] sm:$0xff] }
 0x4c0   :  { %3711 = vmatpush.bf16.msra.mxu1 %v4866_v17  ;;  %v6602_v55 = vpack.c.bf16 %v2781_v39, %v2777_v10  ;;  %v6604_v5 = vpack.c.bf16 %v2782_v9, %v2778_v14  ;;  %v2661_v27 = vadd.f32 %v2513_v24, %v7168_v2  ;;  %v2658_v43 = vadd.f32 %v2514_v34, %v7170_v0  ;;  %v7172_v13 = vld [vmem:[#allocation102_spill] sm:$0xff] }
 0x4c1   :  { %v2783_v11 = vmax.f32 %v2655_v33, 0.0  ;;  %v2652_v7 = vadd.f32 %v2516_v22, %v7169_v62  ;;  %v2656_v54 = vadd.f32 %v2516_v22, %v6512_v38  ;;  %v2785_v12 = vmax.f32 %v2657_v46, 0.0  ;;  %v7178_v0 = vld [vmem:[#allocation106_spill] sm:$0xff] }
 0x4c2   :  { %7166 = vst [vmem:[#allocation18_spill] sm:$0xff] %v6604_v5  ;;  %v2789_v19 = vmax.f32 %v2661_v27, 0.0  ;;  %v2662_v49 = vadd.f32 %v2514_v34, %v7171_v4  ;;  %v2659_v39 = vadd.f32 %v2515_v20, %v7172_v13  ;;  %v2786_v17 = vmax.f32 %v2658_v43, 0.0  ;;  %v7176_v34 = vld [vmem:[#allocation127_spill] sm:$0xff]  ;;  %v1689_v27 = vpop.f32.mrf.mxu0 }
 0x4c3   :  { %v6613_v47 = vpack.c.bf16 %v2783_v11, %v2779_v58  ;;  %v2780_v31 = vmax.f32 %v2652_v7, 0.0  ;;  %v2784_v10 = vmax.f32 %v2656_v54, 0.0  ;;  %v2663_v9 = vadd.f32 %v2515_v20, %v6295_v52  ;;  %v7177_v54 = vld [vmem:[#allocation105_spill] sm:$0xff]  ;;  %v7180_v13 = vld [vmem:[#allocation123_spill] sm:$0xff] }
 0x4c4   :  { %v6615_v14 = vpack.c.bf16 %v2789_v19, %v2785_v12  ;;  %v2790_v24 = vmax.f32 %v2662_v49, 0.0  ;;  %v2787_v33 = vmax.f32 %v2659_v39, 0.0  ;;  %v2660_v46 = vadd.f32 %v2516_v22, %v7175_v60  ;;  %v7181_v39 = vld [vmem:[#allocation124_spill] sm:$0xff] }
 0x4c5   :  { %7173 = vst [vmem:[#allocation38_spill] sm:$0xff] %v6613_v47  ;;  %v6618_v38 = vpack.c.bf16 %v2784_v10, %v2780_v31  ;;  %v2664_v2 = vadd.f32 %v2516_v22, %v6516_v18  ;;  %v2487_v58 = vsel %vm2486_vm9, %v6508_v3, %v7176_v34  ;;  %v2791_v62 = vmax.f32 %v2663_v9, 0.0  ;;  %v7179_v18 = vld [vmem:[#allocation109_spill] sm:$0xff]  ;;  %v1867_v31 = vpop.f32.mrf.mxu2  ;;  %v1778_v34 = vpop.f32.mrf.mxu1 }
 0x4c6   :  { %v6625_v11 = vpack.c.bf16 %v2790_v24, %v2786_v17  ;;  %v2488_v7 = vrot.slane %v2487_v58, 7  ;;  %v1685_v43 = vadd.f32 %v7178_v0, %v7177_v54  ;;  %v2788_v52 = vmax.f32 %v2660_v46, 0.0  ;;  %v7182_v24 = vld [vmem:[#allocation53_spill] sm:$0xff]  ;;  %v7185_v58 = vld [vmem:[#allocation82_spill] sm:$0xff] }
 0x4c7   :  { %7174 = vst [vmem:[#allocation40_spill] sm:$0xff] %v6618_v38  ;;  %v2792_v20 = vmax.f32 %v2664_v2, 0.0  ;;  %v6629_v12 = vpack.c.bf16 %v2791_v62, %v2787_v33  ;;  %v1690_v22 = vadd.f32 %v1689_v27, %v7179_v18  ;;  %v1863_v3 = vadd.f32 %v7181_v39, %v7180_v13  ;;  %v7183_v33 = vld [vmem:[#allocation55_spill] sm:$0xff]  ;;  %v7184_v46 = vld [vmem:[#allocation81_spill] sm:$0xff]  ;;  %v7186_v62 = vld [vmem:[#allocation104_spill] sm:$0xff] }
 0x4c8   :  { %v2517_v19 = vperm.slane %v2488_v7, 0  ;;  %v2518_v4 = vperm.slane %v2488_v7, 1  ;;  %v2519_v49 = vperm.slane %v2488_v7, 2  ;;  %v2520_v17 = vperm.slane %v2488_v7, 3 }
 0x4c9   :  { %v6634_v10 = vpack.c.bf16 %v2792_v20, %v2788_v52  ;;  %v1868_v0 = vadd.f32 %v1867_v31, %v1778_v34  ;;  %v7191_v31 = vld [vmem:[#allocation84_spill] sm:$0xff] }
 0x4ca   :  { %3296 = vmatmul.bf16.gmra.mxu0 %v6445_v30  ;;  %3385 = vmatmul.bf16.gmra.mxu1 %v6448_v42  ;;  %v2665_v9 = vadd.f32 %v2517_v19, %v7182_v24  ;;  %v2669_v60 = vadd.f32 %v2517_v19, %v7183_v33  ;;  %v2666_v2 = vadd.f32 %v2518_v4, %v7184_v46  ;;  %v7187_v33 = vld [vmem:[#allocation122_spill] sm:$0xff] }
 0x4cb   :  { %3474 = vmatmul.bf16.gmra.mxu2 %v6451_v50  ;;  %3563 = vmatmul.bf16.gmra.mxu3 %v6456_v45  ;;  %v2670_v27 = vadd.f32 %v2518_v4, %v7185_v58  ;;  %v2667_v54 = vadd.f32 %v2519_v49, %v7186_v62  ;;  %v2671_v7 = vadd.f32 %v2519_v49, %v1685_v43  ;;  %v7189_v50 = vld [vmem:[#allocation57_spill] sm:$0xff]  ;;  %v7190_v45 = vld [vmem:[#allocation59_spill] sm:$0xff] }
 0x4cc   :  { %v2793_v52 = vmax.f32 %v2665_v9, 0.0  ;;  %v2797_v20 = vmax.f32 %v2669_v60, 0.0  ;;  %v2794_v18 = vmax.f32 %v2666_v2, 0.0  ;;  %v2668_v42 = vadd.f32 %v2520_v17, %v7187_v33  ;;  %v7194_v33 = vld [vmem:[#allocation126_spill] sm:$0xff] }
 0x4cd   :  { %v2798_v13 = vmax.f32 %v2670_v27, 0.0  ;;  %v2795_v39 = vmax.f32 %v2667_v54, 0.0  ;;  %v2799_v24 = vmax.f32 %v2671_v7, 0.0  ;;  %v2672_v30 = vadd.f32 %v2520_v17, %v1863_v3  ;;  %v7192_v27 = vld [vmem:[#allocation85_spill] sm:$0xff] }
 0x4ce   :  { %v6646_v46 = vpack.c.bf16 %v2797_v20, %v2793_v52  ;;  %v2673_v8 = vadd.f32 %v2517_v19, %v7189_v50  ;;  %v2677_v28 = vadd.f32 %v2517_v19, %v7190_v45  ;;  %v2796_v43 = vmax.f32 %v2668_v42, 0.0  ;;  %v7193_v52 = vld [vmem:[#allocation108_spill] sm:$0xff] }
 0x4cf   :  { %v6650_v58 = vpack.c.bf16 %v2798_v13, %v2794_v18  ;;  %v6652_v62 = vpack.c.bf16 %v2799_v24, %v2795_v39  ;;  %v2674_v9 = vadd.f32 %v2518_v4, %v7191_v31  ;;  %v2800_v60 = vmax.f32 %v2672_v30, 0.0  ;;  %v4791_v24 = vld [vmem:[#allocation7 + $0x38] sm:$0xf0] }
 0x4d0   :  { %7188 = vst [vmem:[#allocation73_spill] sm:$0xff] %v6646_v46  ;;  %v2801_v2 = vmax.f32 %v2673_v8, 0.0  ;;  %v2805_v34 = vmax.f32 %v2677_v28, 0.0  ;;  %v2678_v54 = vadd.f32 %v2518_v4, %v7192_v27  ;;  %v2675_v20 = vadd.f32 %v2519_v49, %v7193_v52  ;;  %v4983_v31 = vld [vmem:[#allocation7 + $0x1b8] sm:$0xf0] }
 0x4d1   :  { %v2802_v7 = vmax.f32 %v2674_v9, 0.0  ;;  %v2679_v3 = vadd.f32 %v2519_v49, %v1690_v22  ;;  %v2676_v50 = vadd.f32 %v2520_v17, %v7194_v33  ;;  %v6658_v46 = vpack.c.bf16 %v2800_v60, %v2796_v43  ;;  %v5201_v49 = vld [vmem:[#allocation7 + $0x134] sm:$0xf]  ;;  %v4919_v22 = vld [vmem:[#allocation7 + $0x138] sm:$0xf0] }
 0x4d2   :  { %v6660_v45 = vpack.c.bf16 %v2805_v34, %v2801_v2  ;;  %v2806_v19 = vmax.f32 %v2678_v54, 0.0  ;;  %v2680_v18 = vadd.f32 %v2520_v17, %v1868_v0  ;;  %v2803_v42 = vmax.f32 %v2675_v20, 0.0  ;;  %v5169_v17 = vld [vmem:[#allocation7 + $0x34] sm:$0xf]  ;;  %v4855_v34 = vld [vmem:[#allocation7 + $0xb8] sm:$0xf0] }
 0x4d3   :  { %v2807_v13 = vmax.f32 %v2679_v3, 0.0  ;;  %v2804_v39 = vmax.f32 %v2676_v50, 0.0  ;;  %v4922_v0 = vor.u32 %v5201_v49, %v4919_v22  ;;  %v5217_v43 = vld [vmem:[#allocation7 + $0x1b4] sm:$0xf]  ;;  %v4794_v9 = vor.u32 %v5169_v17, %v4791_v24  ;;  %v6679_v54 = vld [vmem:[%s6905_s8] sm:$0x3] }
 0x4d4   :  { %v6662_v30 = vpack.c.bf16 %v2806_v19, %v2802_v7  ;;  %v2808_v28 = vmax.f32 %v2680_v18, 0.0  ;;  %v4986_v60 = vor.u32 %v5217_v43, %v4983_v31  ;;  %v5185_v2 = vld [vmem:[#allocation7 + $0xb4] sm:$0xf]  ;;  %v6682_v7 = vperm.slane %v6679_v54, 0  ;;  %v5199_v31 = vld [vmem:[#allocation7 + $0x124] sm:$0xf] }
 0x4d5   :  { %v6664_v8 = vpack.c.bf16 %v2807_v13, %v2803_v42  ;;  %3801 = vmatpush.bf16.msra.mxu2 %v4922_v0  ;;  %3623 = vmatpush.bf16.msra.mxu0 %v4794_v9  ;;  %v4858_v27 = vor.u32 %v5185_v2, %v4855_v34  ;;  %v4911_v9 = vld [vmem:[#allocation7 + $0x128] sm:$0xf0]  ;;  %s5345_s8 = smov [#allocation8]  }
 0x4d6   :  { %v6666_v4 = vpack.c.bf16 %v2808_v28, %v2804_v39  ;;  %3890 = vmatpush.bf16.msrb.mxu3 %v4986_v60  ;;  %v5167_v60 = vld [vmem:[#allocation7 + $0x24] sm:$0xf]  ;;  %v4914_v34 = vor.u32 %v5199_v31, %v4911_v9  ;;  %s4158_s10 = sshll.u32 %s5345_s8, 4  ;;  %s4159_s10 = int_to_ptr.vmem [resolvable:$true] %s4158_s10 }
 0x4d7   :  { %3712 = vmatpush.bf16.msra.mxu1 %v4858_v27  ;;  %v4783_v27 = vld [vmem:[#allocation7 + $0x28] sm:$0xf0] }
 0x4d9   :  { %3802 = vmatpush.bf16.msra.mxu2 %v4914_v34 }
 0x4da   :  { %3301 = vmatmul.bf16.gmra.mxu0 %v6465_v61  ;;  %3390 = vmatmul.bf16.gmra.mxu1 %v6470_v56 }
 0x4db   :  { %3479 = vmatmul.bf16.gmra.mxu2 %v6475_v40  ;;  %3568 = vmatmul.bf16.gmra.mxu3 %v6479_v41 }
 0x4ea   :  { %3306 = vmatmul.bf16.gmra.mxu0 %v6483_v51  ;;  %3395 = vmatmul.bf16.gmra.mxu1 %v6487_v6 }
 0x4eb   :  { %3484 = vmatmul.bf16.gmra.mxu2 %v6495_v1  ;;  %3573 = vmatmul.bf16.gmra.mxu3 %v6501_v29 }
 0x4f7   :  { %v3272_v52 = vpop.f32.mrf.mxu0  ;;  %v3361_v20 = vpop.f32.mrf.mxu1 }
 0x4f8   :  { %v3273_v3 = vadd.f32 %v3272_v52, %v6682_v7  ;;  %v5215_v52 = vld [vmem:[#allocation7 + $0x1a4] sm:$0xf] }
 0x4fa   :  { %v3362_v33 = vadd.f32 %v3361_v20, %v3273_v3  ;;  %3311 = vmatmul.bf16.gmra.mxu0 %v6530_v32  ;;  %3400 = vmatmul.bf16.gmra.mxu1 %v6532_v59  ;;  %v4975_v20 = vld [vmem:[#allocation7 + $0x1a8] sm:$0xf0] }
 0x4fb   :  { %3489 = vmatmul.bf16.gmra.mxu2 %v6537_v37  ;;  %3578 = vmatmul.bf16.gmra.mxu3 %v6539_v21 }
 0x4fe   :  { %v3450_v50 = vpop.f32.mrf.mxu2  ;;  %v3539_v19 = vpop.f32.mrf.mxu3 }
 0x4ff   :  { %v3451_v18 = vadd.f32 %v3450_v50, %v3362_v33  ;;  %v3274_v42 = vpop.f32.mrf.mxu0  ;;  %v3363_v13 = vpop.f32.mrf.mxu1  ;;  %v4786_v33 = vor.u32 %v5167_v60, %v4783_v27  ;;  %v4978_v50 = vor.u32 %v5215_v52, %v4975_v20 }
 0x500   :  { %v3275_v39 = vadd.f32 %v3274_v42, %v6682_v7  ;;  %v5183_v42 = vld [vmem:[#allocation7 + $0xa4] sm:$0xf] }
 0x501   :  { %v3540_v28 = vadd.f32 %v3539_v19, %v3451_v18  ;;  %v4847_v19 = vld [vmem:[#allocation7 + $0xa8] sm:$0xf0]  ;;  %3624 = vmatpush.bf16.msra.mxu0 %v4786_v33  ;;  %3891 = vmatpush.bf16.msrb.mxu3 %v4978_v50 }
 0x502   :  { %v3364_v49 = vadd.f32 %v3363_v13, %v3275_v39  ;;  %v4850_v13 = vor.u32 %v5183_v42, %v4847_v19 }
 0x504   :  { %3713 = vmatpush.bf16.msra.mxu1 %v4850_v13 }
 0x506   :  { %v3452_v22 = vpop.f32.mrf.mxu2  ;;  %v3541_v17 = vpop.f32.mrf.mxu3 }
 0x507   :  { %v3453_v0 = vadd.f32 %v3452_v22, %v3364_v49  ;;  %v3277_v24 = vpop.f32.mrf.mxu0  ;;  %v3366_v43 = vpop.f32.mrf.mxu1 }
 0x508   :  { %v3278_v2 = vadd.f32 %v3277_v24, %v6682_v7 }
 0x509   :  { %v3542_v3 = vadd.f32 %v3541_v17, %v3453_v0 }
 0x50a   :  { %v3367_v18 = vadd.f32 %v3366_v43, %v3278_v2  ;;  %3316 = vmatmul.bf16.gmra.mxu0 %v6549_v23  ;;  %3405 = vmatmul.bf16.gmra.mxu1 %v6551_v44 }
 0x50b   :  { %v3975_v39 = vmax.f32 %v3540_v28, %v3542_v3  ;;  %3494 = vmatmul.bf16.gmra.mxu2 %v6555_v63  ;;  %3583 = vmatmul.bf16.gmra.mxu3 %v6557_v16 }
 0x50e   :  { %v3455_v49 = vpop.f32.mrf.mxu2  ;;  %v3544_v22 = vpop.f32.mrf.mxu3 }
 0x50f   :  { %v3456_v17 = vadd.f32 %v3455_v49, %v3367_v18  ;;  %v3279_v0 = vpop.f32.mrf.mxu0  ;;  %v3368_v24 = vpop.f32.mrf.mxu1 }
 0x510   :  { %v3280_v43 = vadd.f32 %v3279_v0, %v6682_v7 }
 0x511   :  { %v3545_v31 = vadd.f32 %v3544_v22, %v3456_v17 }
 0x512   :  { %v3369_v9 = vadd.f32 %v3368_v24, %v3280_v43 }
 0x513   :  { %v3976_v60 = vmax.f32 %v3975_v39, %v3545_v31 }
 0x516   :  { %v3457_v2 = vpop.f32.mrf.mxu2  ;;  %v3546_v28 = vpop.f32.mrf.mxu3 }
 0x517   :  { %v3458_v27 = vadd.f32 %v3457_v2, %v3369_v9  ;;  %v3282_v52 = vpop.f32.mrf.mxu0  ;;  %v3371_v20 = vpop.f32.mrf.mxu1 }
 0x518   :  { %v3283_v34 = vadd.f32 %v3282_v52, %v6682_v7  ;;  %v5165_v52 = vld [vmem:[#allocation7 + $0x14] sm:$0xf] }
 0x519   :  { %v3547_v3 = vadd.f32 %v3546_v28, %v3458_v27  ;;  %v5197_v28 = vld [vmem:[#allocation7 + $0x114] sm:$0xf]  ;;  %v4903_v27 = vld [vmem:[#allocation7 + $0x118] sm:$0xf0] }
 0x51a   :  { %v3372_v33 = vadd.f32 %v3371_v20, %v3283_v34  ;;  %3321 = vmatmul.bf16.gmra.mxu0 %v6564_v53  ;;  %3410 = vmatmul.bf16.gmra.mxu1 %v6568_v26  ;;  %v4906_v34 = vor.u32 %v5197_v28, %v4903_v27 }
 0x51b   :  { %v3977_v50 = vmax.f32 %v3976_v60, %v3547_v3  ;;  %3499 = vmatmul.bf16.gmra.mxu2 %v6572_v57  ;;  %3588 = vmatmul.bf16.gmra.mxu3 %v6578_v15  ;;  %v4775_v3 = vld [vmem:[#allocation7 + $0x18] sm:$0xf0] }
 0x51c   :  { %3803 = vmatpush.bf16.msra.mxu2 %v4906_v34 }
 0x51d   :  { %v3978_v28 = vrot.slane %v3977_v50, 4 }
 0x51e   :  { %v3460_v42 = vpop.f32.mrf.mxu2  ;;  %v3549_v19 = vpop.f32.mrf.mxu3 }
 0x51f   :  { %v3461_v18 = vadd.f32 %v3460_v42, %v3372_v33  ;;  %v3284_v13 = vpop.f32.mrf.mxu0  ;;  %v3373_v39 = vpop.f32.mrf.mxu1  ;;  %v5213_v33 = vld [vmem:[#allocation7 + $0x194] sm:$0xf]  ;;  %v4967_v42 = vld [vmem:[#allocation7 + $0x198] sm:$0xf0] }
 0x520   :  { %v3285_v49 = vadd.f32 %v3284_v13, %v6682_v7  ;;  %v4970_v13 = vor.u32 %v5213_v33, %v4967_v42  ;;  %v3979_v33 = vmax.f32 %v3977_v50, %v3978_v28 }
 0x521   :  { %v3550_v22 = vadd.f32 %v3549_v19, %v3461_v18  ;;  %v4778_v18 = vor.u32 %v5165_v52, %v4775_v3 }
 0x522   :  { %v3374_v17 = vadd.f32 %v3373_v39, %v3285_v49  ;;  %v5181_v39 = vld [vmem:[#allocation7 + $0x94] sm:$0xf]  ;;  %v4839_v49 = vld [vmem:[#allocation7 + $0x98] sm:$0xf0]  ;;  %3892 = vmatpush.bf16.msrb.mxu3 %v4970_v13 }
 0x523   :  { %3625 = vmatpush.bf16.msra.mxu0 %v4778_v18 }
 0x526   :  { %v3462_v0 = vpop.f32.mrf.mxu2  ;;  %v3551_v24 = vpop.f32.mrf.mxu3 }
 0x527   :  { %v3463_v43 = vadd.f32 %v3462_v0, %v3374_v17  ;;  %v3287_v31 = vpop.f32.mrf.mxu0  ;;  %v3376_v9 = vpop.f32.mrf.mxu1  ;;  %v4842_v17 = vor.u32 %v5181_v39, %v4839_v49 }
 0x528   :  { %v3288_v60 = vadd.f32 %v3287_v31, %v6682_v7 }
 0x529   :  { %v3552_v2 = vadd.f32 %v3551_v24, %v3463_v43  ;;  %3714 = vmatpush.bf16.msra.mxu1 %v4842_v17 }
 0x52a   :  { %v3377_v20 = vadd.f32 %v3376_v9, %v3288_v60  ;;  %3326 = vmatmul.bf16.gmra.mxu0 %v6574_v25  ;;  %3415 = vmatmul.bf16.gmra.mxu1 %v6585_v35 }
 0x52b   :  { %v3993_v19 = vmax.f32 %v3550_v22, %v3552_v2  ;;  %3504 = vmatmul.bf16.gmra.mxu2 %v6591_v48  ;;  %3593 = vmatmul.bf16.gmra.mxu3 %v6598_v36 }
 0x52e   :  { %v3465_v0 = vpop.f32.mrf.mxu2  ;;  %v3554_v24 = vpop.f32.mrf.mxu3 }
 0x52f   :  { %v3466_v43 = vadd.f32 %v3465_v0, %v3377_v20  ;;  %v3289_v31 = vpop.f32.mrf.mxu0  ;;  %v3378_v9 = vpop.f32.mrf.mxu1  ;;  %v3980_v20 = vrot.slane %v3979_v33, 2 }
 0x530   :  { %v3290_v22 = vadd.f32 %v3289_v31, %v6682_v7 }
 0x531   :  { %v3555_v60 = vadd.f32 %v3554_v24, %v3466_v43  ;;  %v3981_v24 = vmax.f32 %v3979_v33, %v3980_v20 }
 0x532   :  { %v3379_v2 = vadd.f32 %v3378_v9, %v3290_v22 }
 0x533   :  { %v3994_v27 = vmax.f32 %v3993_v19, %v3555_v60 }
 0x536   :  { %v3467_v52 = vpop.f32.mrf.mxu2  ;;  %v3556_v3 = vpop.f32.mrf.mxu3 }
 0x537   :  { %v3468_v42 = vadd.f32 %v3467_v52, %v3379_v2  ;;  %v3292_v34 = vpop.f32.mrf.mxu0  ;;  %v3381_v39 = vpop.f32.mrf.mxu1 }
 0x538   :  { %v3293_v18 = vadd.f32 %v3292_v34, %v6682_v7 }
 0x539   :  { %v3557_v13 = vadd.f32 %v3556_v3, %v3468_v42  ;;  %v3982_v3 = vrot.slane %v3981_v24, 1 }
 0x53a   :  { %v3382_v49 = vadd.f32 %v3381_v39, %v3293_v18  ;;  %3331 = vmatmul.bf16.gmra.mxu0 %v6602_v55  ;;  %3420 = vmatmul.bf16.gmra.mxu1 %v6604_v5 }
 0x53b   :  { %v3995_v17 = vmax.f32 %v3994_v27, %v3557_v13  ;;  %3509 = vmatmul.bf16.gmra.mxu2 %v6613_v47  ;;  %3598 = vmatmul.bf16.gmra.mxu3 %v6618_v38  ;;  %v3983_v18 = vmax.f32 %v3981_v24, %v3982_v3  ;;  %v4767_v24 = vld [vmem:[#allocation7 + $0x8] sm:$0xf0] }
 0x53d   :  { %v3996_v19 = vrot.slane %v3995_v17, 4 }
 0x53e   :  { %v3470_v0 = vpop.f32.mrf.mxu2  ;;  %v3559_v50 = vpop.f32.mrf.mxu3 }
 0x53f   :  { %v3997_v43 = vmax.f32 %v3995_v17, %v3996_v19  ;;  %v3471_v31 = vadd.f32 %v3470_v0, %v3382_v49  ;;  %v3294_v9 = vpop.f32.mrf.mxu0  ;;  %v3383_v22 = vpop.f32.mrf.mxu1  ;;  %v5195_v17 = vld [vmem:[#allocation7 + $0x104] sm:$0xf]  ;;  %v4895_v19 = vld [vmem:[#allocation7 + $0x108] sm:$0xf0] }
 0x540   :  { %v3295_v60 = vadd.f32 %v3294_v9, %v6682_v7  ;;  %v5163_v0 = vld [vmem:[#allocation7 + $0x4] sm:$0xf]  ;;  %v4959_v9 = vld [vmem:[#allocation7 + $0x188] sm:$0xf0] }
 0x541   :  { %v3998_v2 = vrot.slane %v3997_v43, 2  ;;  %v3560_v28 = vadd.f32 %v3559_v50, %v3471_v31  ;;  %v5211_v31 = vld [vmem:[#allocation7 + $0x184] sm:$0xf] }
 0x542   :  { %v3384_v52 = vadd.f32 %v3383_v22, %v3295_v60  ;;  %v4962_v60 = vor.u32 %v5211_v31, %v4959_v9  ;;  %v7195_v9 = vld [vmem:[#allocation73_spill] sm:$0xff] }
 0x543   :  { %v3999_v42 = vmax.f32 %v3997_v43, %v3998_v2  ;;  %v4898_v43 = vor.u32 %v5195_v17, %v4895_v19  ;;  %v4831_v2 = vld [vmem:[#allocation7 + $0x88] sm:$0xf0] }
 0x544   :  { %3893 = vmatpush.bf16.msrb.mxu3 %v4962_v60 }
 0x545   :  { %v4000_v27 = vrot.slane %v3999_v42, 1  ;;  %3804 = vmatpush.bf16.msra.mxu2 %v4898_v43 }
 0x546   :  { %v3472_v34 = vpop.f32.mrf.mxu2  ;;  %v3561_v39 = vpop.f32.mrf.mxu3 }
 0x547   :  { %v4001_v13 = vmax.f32 %v3999_v42, %v4000_v27  ;;  %v3473_v38 = vadd.f32 %v3472_v34, %v3384_v52  ;;  %v3297_v47 = vpop.f32.mrf.mxu0  ;;  %v3386_v5 = vpop.f32.mrf.mxu1 }
 0x548   :  { %v3298_v33 = vadd.f32 %v3297_v47, %v6682_v7  ;;  %v4770_v47 = vor.u32 %v5163_v0, %v4767_v24 }
 0x549   :  { %v6716_v49 = vsel %vm1992_vm2, %v4001_v13, %v3983_v18  ;;  %v3562_v20 = vadd.f32 %v3561_v39, %v3473_v38  ;;  %v5179_v38 = vld [vmem:[#allocation7 + $0x84] sm:$0xf] }
 0x54a   :  { %v3387_v50 = vadd.f32 %v3386_v5, %v3298_v33  ;;  %3336 = vmatmul.bf16.gmra.mxu0 %v6615_v14  ;;  %3425 = vmatmul.bf16.gmra.mxu1 %v6625_v11  ;;  %v4834_v52 = vor.u32 %v5179_v38, %v4831_v2 }
 0x54b   :  { %v4011_v22 = vmax.f32 %v3560_v28, %v3562_v20  ;;  %3514 = vmatmul.bf16.gmra.mxu2 %v6629_v12  ;;  %3603 = vmatmul.bf16.gmra.mxu3 %v6634_v10 }
 0x54c   :  { %3626 = vmatpush.bf16.msra.mxu0 %v4770_v47  ;;  %3715 = vmatpush.bf16.msra.mxu1 %v4834_v52 }
 0x54e   :  { %v3475_v5 = vpop.f32.mrf.mxu2  ;;  %v3564_v3 = vpop.f32.mrf.mxu3 }
 0x54f   :  { %v3476_v42 = vadd.f32 %v3475_v5, %v3387_v50  ;;  %v3299_v27 = vpop.f32.mrf.mxu0  ;;  %v3388_v34 = vpop.f32.mrf.mxu1 }
 0x550   :  { %v3300_v28 = vadd.f32 %v3299_v27, %v6682_v7 }
 0x551   :  { %v3565_v39 = vadd.f32 %v3564_v3, %v3476_v42 }
 0x552   :  { %v3389_v18 = vadd.f32 %v3388_v34, %v3300_v28 }
 0x553   :  { %v4012_v13 = vmax.f32 %v4011_v22, %v3565_v39 }
 0x556   :  { %v3477_v33 = vpop.f32.mrf.mxu2  ;;  %v3566_v20 = vpop.f32.mrf.mxu3 }
 0x557   :  { %v3478_v17 = vadd.f32 %v3477_v33, %v3389_v18  ;;  %v3302_v19 = vpop.f32.mrf.mxu0  ;;  %v3391_v0 = vpop.f32.mrf.mxu1 }
 0x558   :  { %v3303_v43 = vadd.f32 %v3302_v19, %v6682_v7 }
 0x559   :  { %v3567_v24 = vadd.f32 %v3566_v20, %v3478_v17 }
 0x55a   :  { %v3392_v31 = vadd.f32 %v3391_v0, %v3303_v43  ;;  %3341 = vmatmul.bf16.gmra.mxu0 %v7195_v9  ;;  %3430 = vmatmul.bf16.gmra.mxu1 %v6650_v58 }
 0x55b   :  { %v4013_v50 = vmax.f32 %v4012_v13, %v3567_v24  ;;  %3519 = vmatmul.bf16.gmra.mxu2 %v6652_v62  ;;  %3608 = vmatmul.bf16.gmra.mxu3 %v6658_v46 }
 0x55d   :  { %v4014_v47 = vrot.slane %v4013_v50, 4 }
 0x55e   :  { %v3480_v22 = vpop.f32.mrf.mxu2  ;;  %v3569_v60 = vpop.f32.mrf.mxu3 }
 0x55f   :  { %v4015_v38 = vmax.f32 %v4013_v50, %v4014_v47  ;;  %v3481_v2 = vadd.f32 %v3480_v22, %v3392_v31  ;;  %v3304_v52 = vpop.f32.mrf.mxu0  ;;  %v3393_v5 = vpop.f32.mrf.mxu1 }
 0x560   :  { %v3305_v3 = vadd.f32 %v3304_v52, %v6682_v7 }
 0x561   :  { %v4016_v42 = vrot.slane %v4015_v38, 2  ;;  %v3570_v27 = vadd.f32 %v3569_v60, %v3481_v2 }
 0x562   :  { %v3394_v34 = vadd.f32 %v3393_v5, %v3305_v3 }
 0x563   :  { %v4017_v28 = vmax.f32 %v4015_v38, %v4016_v42 }
 0x565   :  { %v4018_v39 = vrot.slane %v4017_v28, 1 }
 0x566   :  { %v3482_v18 = vpop.f32.mrf.mxu2  ;;  %v3571_v13 = vpop.f32.mrf.mxu3 }
 0x567   :  { %v4019_v33 = vmax.f32 %v4017_v28, %v4018_v39  ;;  %v3483_v20 = vadd.f32 %v3482_v18, %v3394_v34  ;;  %v3307_v17 = vpop.f32.mrf.mxu0  ;;  %v3396_v19 = vpop.f32.mrf.mxu1 }
 0x568   :  { %v3308_v0 = vadd.f32 %v3307_v17, %v6682_v7  ;;  %v7197_v17 = vld [vmem:[#allocation26_spill] sm:$0xff] }
 0x569   :  { %v4136_v43 = vsel %vm1994_vm3, %v4019_v33, %v6716_v49  ;;  %v3572_v24 = vadd.f32 %v3571_v13, %v3483_v20  ;;  %v7196_v20 = vld [vmem:[#allocation12_spill] sm:$0xff] }
 0x56a   :  { %v3397_v31 = vadd.f32 %v3396_v19, %v3308_v0  ;;  %3346 = vmatmul.bf16.gmra.mxu0 %v6660_v45  ;;  %3435 = vmatmul.bf16.gmra.mxu1 %v6662_v30  ;;  %v7198_v0 = vld [vmem:[#allocation28_spill] sm:$0xff] }
 0x56b   :  { %v4029_v50 = vmax.f32 %v3570_v27, %v3572_v24  ;;  %3524 = vmatmul.bf16.gmra.mxu2 %v6664_v8  ;;  %3613 = vmatmul.bf16.gmra.mxu3 %v6666_v4  ;;  %v7199_v24 = vld [vmem:[#allocation61_spill] sm:$0xff] }
 0x56e   :  { %v3485_v47 = vpop.f32.mrf.mxu2  ;;  %v3574_v22 = vpop.f32.mrf.mxu3 }
 0x56f   :  { %v3486_v60 = vadd.f32 %v3485_v47, %v3397_v31  ;;  %v3309_v38 = vpop.f32.mrf.mxu0  ;;  %v3398_v2 = vpop.f32.mrf.mxu1 }
 0x570   :  { %v3310_v52 = vadd.f32 %v3309_v38, %v6682_v7 }
 0x571   :  { %v3575_v5 = vadd.f32 %v3574_v22, %v3486_v60 }
 0x572   :  { %v3399_v49 = vadd.f32 %v3398_v2, %v3310_v52 }
 0x573   :  { %v4030_v3 = vmax.f32 %v4029_v50, %v3575_v5 }
 0x576   :  { %v3487_v42 = vpop.f32.mrf.mxu2  ;;  %v3576_v34 = vpop.f32.mrf.mxu3 }
 0x577   :  { %v3488_v28 = vadd.f32 %v3487_v42, %v3399_v49  ;;  %v3312_v39 = vpop.f32.mrf.mxu0  ;;  %v3401_v18 = vpop.f32.mrf.mxu1 }
 0x578   :  { %v3313_v27 = vadd.f32 %v3312_v39, %v6682_v7 }
 0x579   :  { %v3577_v13 = vadd.f32 %v3576_v34, %v3488_v28 }
 0x57a   :  { %v3402_v33 = vadd.f32 %v3401_v18, %v3313_v27  ;;  %3627 = vmatmul.bf16.vlgmr.msra.gmra.mxu0 %v7196_v20  ;;  %3716 = vmatmul.bf16.vlgmr.msra.gmra.mxu1 %v7197_v17 }
 0x57b   :  { %v4031_v19 = vmax.f32 %v4030_v3, %v3577_v13  ;;  %3805 = vmatmul.bf16.vlgmr.msra.gmra.mxu2 %v7198_v0  ;;  %3894 = vmatmul.bf16.vlgmr.msrb.gmra.mxu3 %v7199_v24  ;;  %v7200_v24 = vld [vmem:[#allocation63_spill] sm:$0xff] }
 0x57d   :  { %v4032_v31 = vrot.slane %v4031_v19, 4 }
 0x57e   :  { %v3490_v50 = vpop.f32.mrf.mxu2  ;;  %v3579_v47 = vpop.f32.mrf.mxu3 }
 0x57f   :  { %v4033_v22 = vmax.f32 %v4031_v19, %v4032_v31  ;;  %v3491_v60 = vadd.f32 %v3490_v50, %v3402_v33  ;;  %v3314_v38 = vpop.f32.mrf.mxu0  ;;  %v3403_v2 = vpop.f32.mrf.mxu1  ;;  %v7201_v31 = vld [vmem:[#allocation87_spill] sm:$0xff] }
 0x580   :  { %v3315_v52 = vadd.f32 %v3314_v38, %v6682_v7 }
 0x581   :  { %v4034_v5 = vrot.slane %v4033_v22, 2  ;;  %v3580_v49 = vadd.f32 %v3579_v47, %v3491_v60  ;;  %v7202_v47 = vld [vmem:[#allocation88_spill] sm:$0xff] }
 0x582   :  { %v3404_v42 = vadd.f32 %v3403_v2, %v3315_v52 }
 0x583   :  { %v4035_v34 = vmax.f32 %v4033_v22, %v4034_v5  ;;  %v7203_v22 = vld [vmem:[#allocation13_spill] sm:$0xff] }
 0x585   :  { %v4036_v28 = vrot.slane %v4035_v34, 1 }
 0x586   :  { %v3492_v39 = vpop.f32.mrf.mxu2  ;;  %v3581_v3 = vpop.f32.mrf.mxu3 }
 0x587   :  { %v4037_v18 = vmax.f32 %v4035_v34, %v4036_v28  ;;  %v3493_v27 = vadd.f32 %v3492_v39, %v3404_v42  ;;  %v3317_v13 = vpop.f32.mrf.mxu0  ;;  %v3406_v20 = vpop.f32.mrf.mxu1 }
 0x588   :  { %v3318_v17 = vadd.f32 %v3317_v13, %v6682_v7 }
 0x589   :  { %v6745_v19 = vsel %vm1996_vm4, %v4037_v18, %v4136_v43  ;;  %v3582_v33 = vadd.f32 %v3581_v3, %v3493_v27 }
 0x58a   :  { %v3407_v0 = vadd.f32 %v3406_v20, %v3318_v17  ;;  %3632 = vmatmul.bf16.gmra.mxu0 %v7200_v24  ;;  %3721 = vmatmul.bf16.gmra.mxu1 %v7201_v31  ;;  %v7205_v24 = vld [vmem:[#allocation30_spill] sm:$0xff]  ;;  %v7206_v31 = vld [vmem:[#allocation32_spill] sm:$0xff] }
 0x58b   :  { %v4047_v50 = vmax.f32 %v3580_v49, %v3582_v33  ;;  %3810 = vmatmul.bf16.gmra.mxu2 %v7202_v47  ;;  %3899 = vmatmul.bf16.gmra.mxu3 %v7203_v22  ;;  %v7204_v33 = vld [vmem:[#allocation14_spill] sm:$0xff]  ;;  %v7207_v47 = vld [vmem:[#allocation65_spill] sm:$0xff] }
 0x58e   :  { %v3495_v60 = vpop.f32.mrf.mxu2  ;;  %v3584_v38 = vpop.f32.mrf.mxu3 }
 0x58f   :  { %v3496_v2 = vadd.f32 %v3495_v60, %v3407_v0  ;;  %v3319_v52 = vpop.f32.mrf.mxu0  ;;  %v3408_v5 = vpop.f32.mrf.mxu1 }
 0x590   :  { %v3320_v42 = vadd.f32 %v3319_v52, %v6682_v7 }
 0x591   :  { %v3585_v43 = vadd.f32 %v3584_v38, %v3496_v2 }
 0x592   :  { %v3409_v34 = vadd.f32 %v3408_v5, %v3320_v42 }
 0x593   :  { %v4048_v28 = vmax.f32 %v4047_v50, %v3585_v43 }
 0x596   :  { %v3497_v39 = vpop.f32.mrf.mxu2  ;;  %v3586_v3 = vpop.f32.mrf.mxu3 }
 0x597   :  { %v3498_v18 = vadd.f32 %v3497_v39, %v3409_v34  ;;  %v3322_v27 = vpop.f32.mrf.mxu0  ;;  %v3411_v13 = vpop.f32.mrf.mxu1 }
 0x598   :  { %v3323_v49 = vadd.f32 %v3322_v27, %v6682_v7 }
 0x599   :  { %v3587_v20 = vadd.f32 %v3586_v3, %v3498_v18 }
 0x59a   :  { %v3412_v17 = vadd.f32 %v3411_v13, %v3323_v49  ;;  %3637 = vmatmul.bf16.gmra.mxu0 %v7204_v33  ;;  %3726 = vmatmul.bf16.gmra.mxu1 %v7205_v24  ;;  %v7208_v49 = vld [vmem:[#allocation67_spill] sm:$0xff] }
 0x59b   :  { %v6755_v0 = vmax.f32 %v4048_v28, %v3587_v20  ;;  %3815 = vmatmul.bf16.gmra.mxu2 %v7206_v31  ;;  %3904 = vmatmul.bf16.gmra.mxu3 %v7207_v47  ;;  %v7209_v20 = vld [vmem:[#allocation90_spill] sm:$0xff]  ;;  %v7210_v33 = vld [vmem:[#allocation91_spill] sm:$0xff] }
 0x59c   :  { %v7211_v24 = vld [vmem:[#allocation15_spill] sm:$0xff] }
 0x59e   :  { %v3500_v50 = vpop.f32.mrf.mxu2  ;;  %v3589_v22 = vpop.f32.mrf.mxu3 }
 0x59f   :  { %v3501_v60 = vadd.f32 %v3500_v50, %v3412_v17  ;;  %v3324_v38 = vpop.f32.mrf.mxu0  ;;  %v3413_v2 = vpop.f32.mrf.mxu1 }
 0x5a0   :  { %v3325_v52 = vadd.f32 %v3324_v38, %v6682_v7 }
 0x5a1   :  { %v3590_v5 = vadd.f32 %v3589_v22, %v3501_v60 }
 0x5a2   :  { %v3414_v42 = vadd.f32 %v3413_v2, %v3325_v52 }
 0x5a6   :  { %v3502_v43 = vpop.f32.mrf.mxu2  ;;  %v3591_v34 = vpop.f32.mrf.mxu3 }
 0x5a7   :  { %v3503_v39 = vadd.f32 %v3502_v43, %v3414_v42  ;;  %v3327_v3 = vpop.f32.mrf.mxu0  ;;  %v3416_v18 = vpop.f32.mrf.mxu1 }
 0x5a8   :  { %v3328_v28 = vadd.f32 %v3327_v3, %v6682_v7 }
 0x5a9   :  { %v3592_v27 = vadd.f32 %v3591_v34, %v3503_v39 }
 0x5aa   :  { %v3417_v13 = vadd.f32 %v3416_v18, %v3328_v28  ;;  %3642 = vmatmul.bf16.gmra.mxu0 %v7208_v49  ;;  %3731 = vmatmul.bf16.gmra.mxu1 %v7209_v20  ;;  %v7212_v49 = vld [vmem:[#allocation16_spill] sm:$0xff]  ;;  %v7213_v20 = vld [vmem:[#allocation34_spill] sm:$0xff] }
 0x5ab   :  { %v4065_v17 = vmax.f32 %v3590_v5, %v3592_v27  ;;  %3820 = vmatmul.bf16.gmra.mxu2 %v7210_v33  ;;  %3909 = vmatmul.bf16.gmra.mxu3 %v7211_v24  ;;  %v7214_v33 = vld [vmem:[#allocation36_spill] sm:$0xff]  ;;  %v7215_v24 = vld [vmem:[#allocation69_spill] sm:$0xff] }
 0x5ae   :  { %v3505_v31 = vpop.f32.mrf.mxu2  ;;  %v3594_v47 = vpop.f32.mrf.mxu3 }
 0x5af   :  { %v3506_v50 = vadd.f32 %v3505_v31, %v3417_v13  ;;  %v3329_v22 = vpop.f32.mrf.mxu0  ;;  %v3418_v60 = vpop.f32.mrf.mxu1 }
 0x5b0   :  { %v3330_v38 = vadd.f32 %v3329_v22, %v6682_v7 }
 0x5b1   :  { %v3595_v2 = vadd.f32 %v3594_v47, %v3506_v50 }
 0x5b2   :  { %v3419_v52 = vadd.f32 %v3418_v60, %v3330_v38 }
 0x5b3   :  { %v4066_v42 = vmax.f32 %v4065_v17, %v3595_v2 }
 0x5b6   :  { %v3507_v43 = vpop.f32.mrf.mxu2  ;;  %v3596_v34 = vpop.f32.mrf.mxu3 }
 0x5b7   :  { %v3508_v39 = vadd.f32 %v3507_v43, %v3419_v52  ;;  %v3332_v3 = vpop.f32.mrf.mxu0  ;;  %v3421_v18 = vpop.f32.mrf.mxu1 }
 0x5b8   :  { %v3333_v5 = vadd.f32 %v3332_v3, %v6682_v7 }
 0x5b9   :  { %v3597_v28 = vadd.f32 %v3596_v34, %v3508_v39 }
 0x5ba   :  { %v3422_v27 = vadd.f32 %v3421_v18, %v3333_v5  ;;  %3647 = vmatmul.bf16.gmra.mxu0 %v7212_v49  ;;  %3736 = vmatmul.bf16.gmra.mxu1 %v7213_v20  ;;  %v7217_v49 = vld [vmem:[#allocation93_spill] sm:$0xff]  ;;  %v7218_v20 = vld [vmem:[#allocation94_spill] sm:$0xff] }
 0x5bb   :  { %v6769_v13 = vmax.f32 %v4066_v42, %v3597_v28  ;;  %3825 = vmatmul.bf16.gmra.mxu2 %v7214_v33  ;;  %3914 = vmatmul.bf16.gmra.mxu3 %v7215_v24  ;;  %v7216_v28 = vld [vmem:[#allocation71_spill] sm:$0xff]  ;;  %v7219_v33 = vld [vmem:[#allocation17_spill] sm:$0xff]  ;;  %v4050_v24 = vrot.slane %v6755_v0, 4 }
 0x5be   :  { %v3510_v17 = vpop.f32.mrf.mxu2  ;;  %v3599_v31 = vpop.f32.mrf.mxu3 }
 0x5bf   :  { %v3511_v47 = vadd.f32 %v3510_v17, %v3422_v27  ;;  %v3334_v50 = vpop.f32.mrf.mxu0  ;;  %v3423_v22 = vpop.f32.mrf.mxu1 }
 0x5c0   :  { %v3335_v60 = vadd.f32 %v3334_v50, %v6682_v7 }
 0x5c1   :  { %v3600_v38 = vadd.f32 %v3599_v31, %v3511_v47 }
 0x5c2   :  { %v3424_v2 = vadd.f32 %v3423_v22, %v3335_v60  ;;  %v4051_v60 = vmax.f32 %v6755_v0, %v4050_v24 }
 0x5c6   :  { %v3512_v52 = vpop.f32.mrf.mxu2  ;;  %v3601_v43 = vpop.f32.mrf.mxu3 }
 0x5c7   :  { %v3513_v34 = vadd.f32 %v3512_v52, %v3424_v2  ;;  %v3337_v39 = vpop.f32.mrf.mxu0  ;;  %v3426_v3 = vpop.f32.mrf.mxu1 }
 0x5c8   :  { %v3338_v42 = vadd.f32 %v3337_v39, %v6682_v7  ;;  %v4052_v39 = vrot.slane %v4051_v60, 2 }
 0x5c9   :  { %v3602_v18 = vadd.f32 %v3601_v43, %v3513_v34 }
 0x5ca   :  { %v3427_v5 = vadd.f32 %v3426_v3, %v3338_v42  ;;  %3652 = vmatmul.bf16.gmra.mxu0 %v7216_v28  ;;  %3741 = vmatmul.bf16.gmra.mxu1 %v7217_v49  ;;  %v4053_v49 = vmax.f32 %v4051_v60, %v4052_v39 }
 0x5cb   :  { %v4083_v27 = vmax.f32 %v3600_v38, %v3602_v18  ;;  %3830 = vmatmul.bf16.gmra.mxu2 %v7218_v20  ;;  %3919 = vmatmul.bf16.gmra.mxu3 %v7219_v33 }
 0x5ce   :  { %v3515_v17 = vpop.f32.mrf.mxu2  ;;  %v3604_v31 = vpop.f32.mrf.mxu3 }
 0x5cf   :  { %v3516_v47 = vadd.f32 %v3515_v17, %v3427_v5  ;;  %v3339_v50 = vpop.f32.mrf.mxu0  ;;  %v3428_v22 = vpop.f32.mrf.mxu1 }
 0x5d0   :  { %v3340_v2 = vadd.f32 %v3339_v50, %v6682_v7 }
 0x5d1   :  { %v3605_v52 = vadd.f32 %v3604_v31, %v3516_v47 }
 0x5d2   :  { %v3429_v43 = vadd.f32 %v3428_v22, %v3340_v2 }
 0x5d3   :  { %v4084_v34 = vmax.f32 %v4083_v27, %v3605_v52  ;;  %v4054_v27 = vrot.slane %v4053_v49, 1 }
 0x5d5   :  { %v4055_v22 = vmax.f32 %v4053_v49, %v4054_v27 }
 0x5d6   :  { %v3517_v38 = vpop.f32.mrf.mxu2  ;;  %v3606_v3 = vpop.f32.mrf.mxu3 }
 0x5d7   :  { %v3518_v42 = vadd.f32 %v3517_v38, %v3429_v43  ;;  %v3342_v18 = vpop.f32.mrf.mxu0  ;;  %v3431_v28 = vpop.f32.mrf.mxu1 }
 0x5d8   :  { %v3343_v20 = vadd.f32 %v3342_v18, %v6682_v7 }
 0x5d9   :  { %v3607_v33 = vadd.f32 %v3606_v3, %v3518_v42 }
 0x5da   :  { %v3432_v5 = vadd.f32 %v3431_v28, %v3343_v20  ;;  %3657 = vmatmul.bf16.gmra.mxu0 %v6465_v61  ;;  %3746 = vmatmul.bf16.gmra.mxu1 %v6470_v56  ;;  %v4138_v61 = vsel %vm1998_vm5, %v4055_v22, %v6745_v19  ;;  %v4068_v19 = vrot.slane %v6769_v13, 4 }
 0x5db   :  { %v6785_v0 = vmax.f32 %v4084_v34, %v3607_v33  ;;  %3835 = vmatmul.bf16.gmra.mxu2 %v6475_v40  ;;  %3924 = vmatmul.bf16.gmra.mxu3 %v6479_v41 }
 0x5de   :  { %v3520_v24 = vpop.f32.mrf.mxu2  ;;  %v3609_v17 = vpop.f32.mrf.mxu3 }
 0x5df   :  { %v3521_v31 = vadd.f32 %v3520_v24, %v3432_v5  ;;  %v3344_v47 = vpop.f32.mrf.mxu0  ;;  %v3433_v50 = vpop.f32.mrf.mxu1  ;;  %v4069_v5 = vmax.f32 %v6769_v13, %v4068_v19 }
 0x5e0   :  { %v3345_v60 = vadd.f32 %v3344_v47, %v6682_v7 }
 0x5e1   :  { %v3610_v2 = vadd.f32 %v3609_v17, %v3521_v31 }
 0x5e2   :  { %v3434_v52 = vadd.f32 %v3433_v50, %v3345_v60 }
 0x5e6   :  { %v3522_v56 = vpop.f32.mrf.mxu2  ;;  %v3611_v43 = vpop.f32.mrf.mxu3 }
 0x5e7   :  { %v3523_v34 = vadd.f32 %v3522_v56, %v3434_v52  ;;  %v3347_v40 = vpop.f32.mrf.mxu0  ;;  %v3436_v39 = vpop.f32.mrf.mxu1 }
 0x5e8   :  { %v3348_v41 = vadd.f32 %v3347_v40, %v6682_v7 }
 0x5e9   :  { %v3612_v38 = vadd.f32 %v3611_v43, %v3523_v34 }
 0x5ea   :  { %v3437_v3 = vadd.f32 %v3436_v39, %v3348_v41  ;;  %3662 = vmatmul.bf16.gmra.mxu0 %v6483_v51  ;;  %3751 = vmatmul.bf16.gmra.mxu1 %v6487_v6  ;;  %v4070_v51 = vrot.slane %v4069_v5, 2  ;;  %v6804_v6 = vperm.slane %v6679_v54, 1 }
 0x5eb   :  { %v4101_v42 = vmax.f32 %v3610_v2, %v3612_v38  ;;  %3840 = vmatmul.bf16.gmra.mxu2 %v6495_v1  ;;  %3929 = vmatmul.bf16.gmra.mxu3 %v6501_v29 }
 0x5ec   :  { %v4071_v47 = vmax.f32 %v4069_v5, %v4070_v51 }
 0x5ee   :  { %v3525_v18 = vpop.f32.mrf.mxu2  ;;  %v3614_v28 = vpop.f32.mrf.mxu3  ;;  %v4072_v54 = vrot.slane %v4071_v47, 1 }
 0x5ef   :  { %v3526_v49 = vadd.f32 %v3525_v18, %v3437_v3  ;;  %v3349_v20 = vpop.f32.mrf.mxu0  ;;  %v6798_v33 = vpop.f32.mrf.mxu1 }
 0x5f0   :  { %v4073_v43 = vmax.f32 %v4071_v47, %v4072_v54 }
 0x5f1   :  { %v3615_v27 = vadd.f32 %v3614_v28, %v3526_v49 }
 0x5f2   :  { %v4139_v41 = vsel %vm2000_vm6, %v4073_v43, %v4138_v61  ;;  %v4086_v61 = vrot.slane %v6785_v0, 4 }
 0x5f3   :  { %v6801_v24 = vmax.f32 %v4101_v42, %v3615_v27 }
 0x5f6   :  { %v6806_v1 = vpop.f32.mrf.mxu2  ;;  %v6808_v29 = vpop.f32.mrf.mxu3 }
 0x5f7   :  { %v3628_v17 = vpop.f32.mrf.mxu0  ;;  %v3717_v31 = vpop.f32.mrf.mxu1 }
 0x5f8   :  { %v3629_v50 = vadd.f32 %v3628_v17, %v6804_v6  ;;  %v4087_v17 = vmax.f32 %v6785_v0, %v4086_v61 }
 0x5fa   :  { %v3718_v22 = vadd.f32 %v3717_v31, %v3629_v50  ;;  %3667 = vmatmul.bf16.gmra.mxu0 %v6530_v32  ;;  %3756 = vmatmul.bf16.gmra.mxu1 %v6532_v59 }
 0x5fb   :  { %3845 = vmatmul.bf16.gmra.mxu2 %v6537_v37  ;;  %3934 = vmatmul.bf16.gmra.mxu3 %v6539_v21 }
 0x5fe   :  { %v3806_v13 = vpop.f32.mrf.mxu2  ;;  %v3895_v60 = vpop.f32.mrf.mxu3 }
 0x5ff   :  { %v3807_v2 = vadd.f32 %v3806_v13, %v3718_v22  ;;  %v3630_v52 = vpop.f32.mrf.mxu0  ;;  %v3719_v56 = vpop.f32.mrf.mxu1 }
 0x600   :  { %v3631_v34 = vadd.f32 %v3630_v52, %v6804_v6 }
 0x601   :  { %v3896_v40 = vadd.f32 %v3895_v60, %v3807_v2 }
 0x602   :  { %v3720_v39 = vadd.f32 %v3719_v56, %v3631_v34  ;;  %v3350_v56 = vadd.f32 %v3349_v20, %v6682_v7 }
 0x606   :  { %v3808_v32 = vpop.f32.mrf.mxu2  ;;  %v3897_v38 = vpop.f32.mrf.mxu3 }
 0x607   :  { %v3809_v59 = vadd.f32 %v3808_v32, %v3720_v39  ;;  %v3633_v3 = vpop.f32.mrf.mxu0  ;;  %v3722_v37 = vpop.f32.mrf.mxu1 }
 0x608   :  { %v3634_v21 = vadd.f32 %v3633_v3, %v6804_v6 }
 0x609   :  { %v3898_v42 = vadd.f32 %v3897_v38, %v3809_v59 }
 0x60a   :  { %v3723_v19 = vadd.f32 %v3722_v37, %v3634_v21  ;;  %3672 = vmatmul.bf16.gmra.mxu0 %v6549_v23  ;;  %3761 = vmatmul.bf16.gmra.mxu1 %v6551_v44  ;;  %v4088_v44 = vrot.slane %v4087_v17, 2 }
 0x60b   :  { %v3984_v18 = vmax.f32 %v3896_v40, %v3898_v42  ;;  %3850 = vmatmul.bf16.gmra.mxu2 %v6555_v63  ;;  %3939 = vmatmul.bf16.gmra.mxu3 %v6557_v16  ;;  %v3439_v40 = vadd.f32 %v6798_v33, %v3350_v56  ;;  %v7220_v56 = vld [vmem:[#allocation18_spill] sm:$0xff] }
 0x60c   :  { %v4089_v60 = vmax.f32 %v4087_v17, %v4088_v44 }
 0x60d   :  { %v3528_v7 = vadd.f32 %v6806_v1, %v3439_v40  ;;  %v7221_v40 = vld [vmem:[#allocation38_spill] sm:$0xff] }
 0x60e   :  { %v3811_v28 = vpop.f32.mrf.mxu2  ;;  %v3900_v49 = vpop.f32.mrf.mxu3  ;;  %v4090_v34 = vrot.slane %v4089_v60, 1 }
 0x60f   :  { %v3812_v5 = vadd.f32 %v3811_v28, %v3723_v19  ;;  %v3635_v27 = vpop.f32.mrf.mxu0  ;;  %v3724_v51 = vpop.f32.mrf.mxu1  ;;  %v3617_v21 = vadd.f32 %v6808_v29, %v3528_v7 }
 0x610   :  { %v3636_v31 = vadd.f32 %v3635_v27, %v6804_v6  ;;  %v4091_v37 = vmax.f32 %v4089_v60, %v4090_v34 }
 0x611   :  { %v3901_v47 = vadd.f32 %v3900_v49, %v3812_v5  ;;  %v4103_v61 = vmax.f32 %v6801_v24, %v3617_v21 }
 0x612   :  { %v3725_v23 = vadd.f32 %v3724_v51, %v3636_v31 }
 0x613   :  { %v3985_v50 = vmax.f32 %v3984_v18, %v3901_v47  ;;  %v4104_v29 = vrot.slane %v4103_v61, 4 }
 0x615   :  { %v4105_v24 = vmax.f32 %v4103_v61, %v4104_v29 }
 0x616   :  { %v3813_v22 = vpop.f32.mrf.mxu2  ;;  %v3902_v54 = vpop.f32.mrf.mxu3 }
 0x617   :  { %v3814_v63 = vadd.f32 %v3813_v22, %v3725_v23  ;;  %v3638_v13 = vpop.f32.mrf.mxu0  ;;  %v3727_v16 = vpop.f32.mrf.mxu1  ;;  %v4106_v22 = vrot.slane %v4105_v24, 2 }
 0x618   :  { %v3639_v2 = vadd.f32 %v3638_v13, %v6804_v6 }
 0x619   :  { %v3903_v52 = vadd.f32 %v3902_v54, %v3814_v63 }
 0x61a   :  { %v3728_v43 = vadd.f32 %v3727_v16, %v3639_v2  ;;  %3677 = vmatmul.bf16.gmra.mxu0 %v6564_v53  ;;  %3766 = vmatmul.bf16.gmra.mxu1 %v6568_v26  ;;  %v4107_v16 = vmax.f32 %v4105_v24, %v4106_v22 }
 0x61b   :  { %v3986_v0 = vmax.f32 %v3985_v50, %v3903_v52  ;;  %3855 = vmatmul.bf16.gmra.mxu2 %v6572_v57  ;;  %3944 = vmatmul.bf16.gmra.mxu3 %v6578_v15  ;;  %v4140_v57 = vsel %vm2002_vm7, %v4091_v37, %v4139_v41 }
 0x61d   :  { %v3987_v44 = vrot.slane %v3986_v0, 4 }
 0x61e   :  { %v3816_v39 = vpop.f32.mrf.mxu2  ;;  %v3905_v32 = vpop.f32.mrf.mxu3 }
 0x61f   :  { %v3817_v38 = vadd.f32 %v3816_v39, %v3728_v43  ;;  %v3640_v59 = vpop.f32.mrf.mxu0  ;;  %v3729_v3 = vpop.f32.mrf.mxu1  ;;  %v3988_v63 = vmax.f32 %v3986_v0, %v3987_v44  ;;  %v7222_v39 = vld [vmem:[#allocation40_spill] sm:$0xff] }
 0x620   :  { %v3641_v53 = vadd.f32 %v3640_v59, %v6804_v6 }
 0x621   :  { %v3906_v20 = vadd.f32 %v3905_v32, %v3817_v38  ;;  %v3989_v43 = vrot.slane %v3988_v63, 2  ;;  %v4108_v32 = vrot.slane %v4107_v16, 1 }
 0x622   :  { %v3730_v26 = vadd.f32 %v3729_v3, %v3641_v53 }
 0x623   :  { %v3990_v3 = vmax.f32 %v3988_v63, %v3989_v43 }
 0x626   :  { %v3818_v15 = vpop.f32.mrf.mxu2  ;;  %v3907_v42 = vpop.f32.mrf.mxu3 }
 0x627   :  { %v3819_v19 = vadd.f32 %v3818_v15, %v3730_v26  ;;  %v3643_v33 = vpop.f32.mrf.mxu0  ;;  %v3732_v18 = vpop.f32.mrf.mxu1  ;;  %v4109_v26 = vmax.f32 %v4107_v16, %v4108_v32 }
 0x628   :  { %v3644_v28 = vadd.f32 %v3643_v33, %v6804_v6 }
 0x629   :  { %v3908_v49 = vadd.f32 %v3907_v42, %v3819_v19  ;;  %v3991_v19 = vrot.slane %v3990_v3, 1 }
 0x62a   :  { %v3733_v5 = vadd.f32 %v3732_v18, %v3644_v28  ;;  %3682 = vmatmul.bf16.gmra.mxu0 %v6574_v25  ;;  %3771 = vmatmul.bf16.gmra.mxu1 %v6585_v35  ;;  %v4141_v18 = vsel %vm2004_vm8, %v4109_v26, %v4140_v57 }
 0x62b   :  { %v4002_v1 = vmax.f32 %v3906_v20, %v3908_v49  ;;  %3860 = vmatmul.bf16.gmra.mxu2 %v6591_v48  ;;  %3949 = vmatmul.bf16.gmra.mxu3 %v6598_v36  ;;  %4151 = vst [vmem:[#allocation8] sm:$0xff] %v4141_v18 }
 0x62e   :  { %v3821_v41 = vpop.f32.mrf.mxu2  ;;  %v3910_v27 = vpop.f32.mrf.mxu3 }
 0x62f   :  { %v3822_v51 = vadd.f32 %v3821_v41, %v3733_v5  ;;  %v3645_v17 = vpop.f32.mrf.mxu0  ;;  %v3734_v31 = vpop.f32.mrf.mxu1  ;;  %v3992_v5 = vmax.f32 %v3990_v3, %v3991_v19 }
 0x630   :  { %v3646_v47 = vadd.f32 %v3645_v17, %v6804_v6 }
 0x631   :  { %v3911_v23 = vadd.f32 %v3910_v27, %v3822_v51 }
 0x632   :  { %v3735_v50 = vadd.f32 %v3734_v31, %v3646_v47 }
 0x633   :  { %v4003_v25 = vmax.f32 %v4002_v1, %v3911_v23 }
 0x636   :  { %v3823_v35 = vpop.f32.mrf.mxu2  ;;  %v3912_v54 = vpop.f32.mrf.mxu3 }
 0x637   :  { %v3824_v48 = vadd.f32 %v3823_v35, %v3735_v50  ;;  %v3648_v13 = vpop.f32.mrf.mxu0  ;;  %v3737_v36 = vpop.f32.mrf.mxu1 }
 0x638   :  { %v3649_v60 = vadd.f32 %v3648_v13, %v6804_v6 }
 0x639   :  { %v3913_v2 = vadd.f32 %v3912_v54, %v3824_v48 }
 0x63a   :  { %v3738_v52 = vadd.f32 %v3737_v36, %v3649_v60  ;;  %3687 = vmatmul.bf16.gmra.mxu0 %v6602_v55  ;;  %3776 = vmatmul.bf16.gmra.mxu1 %v7220_v56 }
 0x63b   :  { %v4004_v34 = vmax.f32 %v4003_v25, %v3913_v2  ;;  %3865 = vmatmul.bf16.gmra.mxu2 %v7221_v40  ;;  %3954 = vmatmul.bf16.gmra.mxu3 %v7222_v39 }
 0x63d   :  { %v4005_v0 = vrot.slane %v4004_v34, 4 }
 0x63e   :  { %v3826_v38 = vpop.f32.mrf.mxu2  ;;  %v3915_v59 = vpop.f32.mrf.mxu3 }
 0x63f   :  { %v4006_v37 = vmax.f32 %v4004_v34, %v4005_v0  ;;  %v3827_v7 = vadd.f32 %v3826_v38, %v3738_v52  ;;  %v3650_v53 = vpop.f32.mrf.mxu0  ;;  %v3739_v20 = vpop.f32.mrf.mxu1 }
 0x640   :  { %v3651_v55 = vadd.f32 %v3650_v53, %v6804_v6 }
 0x641   :  { %v4007_v21 = vrot.slane %v4006_v37, 2  ;;  %v3916_v15 = vadd.f32 %v3915_v59, %v3827_v7 }
 0x642   :  { %v3740_v42 = vadd.f32 %v3739_v20, %v3651_v55 }
 0x643   :  { %v4008_v33 = vmax.f32 %v4006_v37, %v4007_v21 }
 0x645   :  { %v4009_v61 = vrot.slane %v4008_v33, 1 }
 0x646   :  { %v3828_v28 = vpop.f32.mrf.mxu2  ;;  %v3917_v49 = vpop.f32.mrf.mxu3 }
 0x647   :  { %v4010_v1 = vmax.f32 %v4008_v33, %v4009_v61  ;;  %v3829_v29 = vadd.f32 %v3828_v28, %v3740_v42  ;;  %v3653_v41 = vpop.f32.mrf.mxu0  ;;  %v3742_v27 = vpop.f32.mrf.mxu1 }
 0x648   :  { %v3654_v51 = vadd.f32 %v3653_v41, %v6804_v6 }
 0x649   :  { %v4142_v17 = vsel %vm1992_vm2, %v4010_v1, %v3992_v5  ;;  %v3918_v31 = vadd.f32 %v3917_v49, %v3829_v29 }
 0x64a   :  { %v3743_v24 = vadd.f32 %v3742_v27, %v3654_v51  ;;  %3692 = vmatmul.bf16.gmra.mxu0 %v6615_v14  ;;  %3781 = vmatmul.bf16.gmra.mxu1 %v6625_v11 }
 0x64b   :  { %v4020_v57 = vmax.f32 %v3916_v15, %v3918_v31  ;;  %3870 = vmatmul.bf16.gmra.mxu2 %v6629_v12  ;;  %3959 = vmatmul.bf16.gmra.mxu3 %v6634_v10 }
 0x64e   :  { %v3831_v47 = vpop.f32.mrf.mxu2  ;;  %v3920_v23 = vpop.f32.mrf.mxu3 }
 0x64f   :  { %v3832_v50 = vadd.f32 %v3831_v47, %v3743_v24  ;;  %v3655_v44 = vpop.f32.mrf.mxu0  ;;  %v3744_v25 = vpop.f32.mrf.mxu1 }
 0x650   :  { %v3656_v22 = vadd.f32 %v3655_v44, %v6804_v6 }
 0x651   :  { %v3921_v35 = vadd.f32 %v3920_v23, %v3832_v50 }
 0x652   :  { %v3745_v54 = vadd.f32 %v3744_v25, %v3656_v22 }
 0x653   :  { %v4021_v63 = vmax.f32 %v4020_v57, %v3921_v35 }
 0x656   :  { %v3833_v48 = vpop.f32.mrf.mxu2  ;;  %v3922_v13 = vpop.f32.mrf.mxu3 }
 0x657   :  { %v3834_v14 = vadd.f32 %v3833_v48, %v3745_v54  ;;  %v3658_v36 = vpop.f32.mrf.mxu0  ;;  %v3747_v11 = vpop.f32.mrf.mxu1 }
 0x658   :  { %v3659_v16 = vadd.f32 %v3658_v36, %v6804_v6 }
 0x659   :  { %v3923_v12 = vadd.f32 %v3922_v13, %v3834_v14 }
 0x65a   :  { %v3748_v60 = vadd.f32 %v3747_v11, %v3659_v16  ;;  %3697 = vmatmul.bf16.gmra.mxu0 %v7195_v9  ;;  %3786 = vmatmul.bf16.gmra.mxu1 %v6650_v58 }
 0x65b   :  { %v4022_v10 = vmax.f32 %v4021_v63, %v3923_v12  ;;  %3875 = vmatmul.bf16.gmra.mxu2 %v6652_v62  ;;  %3964 = vmatmul.bf16.gmra.mxu3 %v6658_v46 }
 0x65d   :  { %v4023_v2 = vrot.slane %v4022_v10, 4 }
 0x65e   :  { %v3836_v52 = vpop.f32.mrf.mxu2  ;;  %v3925_v56 = vpop.f32.mrf.mxu3 }
 0x65f   :  { %v4024_v43 = vmax.f32 %v4022_v10, %v4023_v2  ;;  %v3837_v34 = vadd.f32 %v3836_v52, %v3748_v60  ;;  %v3660_v40 = vpop.f32.mrf.mxu0  ;;  %v3749_v39 = vpop.f32.mrf.mxu1 }
 0x660   :  { %v3661_v32 = vadd.f32 %v3660_v40, %v6804_v6 }
 0x661   :  { %v4025_v0 = vrot.slane %v4024_v43, 2  ;;  %v3926_v38 = vadd.f32 %v3925_v56, %v3837_v34 }
 0x662   :  { %v3750_v59 = vadd.f32 %v3749_v39, %v3661_v32 }
 0x663   :  { %v4026_v9 = vmax.f32 %v4024_v43, %v4025_v0 }
 0x665   :  { %v4027_v3 = vrot.slane %v4026_v9, 1 }
 0x666   :  { %v3838_v58 = vpop.f32.mrf.mxu2  ;;  %v3927_v37 = vpop.f32.mrf.mxu3 }
 0x667   :  { %v4028_v7 = vmax.f32 %v4026_v9, %v4027_v3  ;;  %v3839_v62 = vadd.f32 %v3838_v58, %v3750_v59  ;;  %v3663_v53 = vpop.f32.mrf.mxu0  ;;  %v3752_v46 = vpop.f32.mrf.mxu1 }
 0x668   :  { %v3664_v20 = vadd.f32 %v3663_v53, %v6804_v6 }
 0x669   :  { %v4143_v26 = vsel %vm1994_vm3, %v4028_v7, %v4142_v17  ;;  %v3928_v55 = vadd.f32 %v3927_v37, %v3839_v62 }
 0x66a   :  { %v3753_v21 = vadd.f32 %v3752_v46, %v3664_v20  ;;  %3702 = vmatmul.bf16.gmra.mxu0 %v6660_v45  ;;  %3791 = vmatmul.bf16.gmra.mxu1 %v6662_v30 }
 0x66b   :  { %v4038_v15 = vmax.f32 %v3926_v38, %v3928_v55  ;;  %3880 = vmatmul.bf16.gmra.mxu2 %v6664_v8  ;;  %3969 = vmatmul.bf16.gmra.mxu3 %v6666_v4 }
 0x66e   :  { %v3841_v42 = vpop.f32.mrf.mxu2  ;;  %v3930_v19 = vpop.f32.mrf.mxu3 }
 0x66f   :  { %v3842_v33 = vadd.f32 %v3841_v42, %v3753_v21  ;;  %v3665_v18 = vpop.f32.mrf.mxu0  ;;  %v3754_v61 = vpop.f32.mrf.mxu1 }
 0x670   :  { %v3666_v28 = vadd.f32 %v3665_v18, %v6804_v6 }
 0x671   :  { %v3931_v49 = vadd.f32 %v3930_v19, %v3842_v33 }
 0x672   :  { %v3755_v5 = vadd.f32 %v3754_v61, %v3666_v28 }
 0x673   :  { %v4039_v1 = vmax.f32 %v4038_v15, %v3931_v49 }
 0x676   :  { %v3843_v29 = vpop.f32.mrf.mxu2  ;;  %v3932_v41 = vpop.f32.mrf.mxu3 }
 0x677   :  { %v3844_v45 = vadd.f32 %v3843_v29, %v3755_v5  ;;  %v3668_v27 = vpop.f32.mrf.mxu0  ;;  %v3757_v30 = vpop.f32.mrf.mxu1 }
 0x678   :  { %v3669_v51 = vadd.f32 %v3668_v27, %v6804_v6 }
 0x679   :  { %v3933_v8 = vadd.f32 %v3932_v41, %v3844_v45 }
 0x67a   :  { %v3758_v17 = vadd.f32 %v3757_v30, %v3669_v51 }
 0x67b   :  { %v4040_v4 = vmax.f32 %v4039_v1, %v3933_v8 }
 0x67d   :  { %v4041_v31 = vrot.slane %v4040_v4, 4 }
 0x67e   :  { %v3846_v24 = vpop.f32.mrf.mxu2  ;;  %v3935_v57 = vpop.f32.mrf.mxu3 }
 0x67f   :  { %v4042_v47 = vmax.f32 %v4040_v4, %v4041_v31  ;;  %v3847_v23 = vadd.f32 %v3846_v24, %v3758_v17  ;;  %v3670_v50 = vpop.f32.mrf.mxu0  ;;  %v3759_v44 = vpop.f32.mrf.mxu1 }
 0x680   :  { %v3671_v25 = vadd.f32 %v3670_v50, %v6804_v6 }
 0x681   :  { %v4043_v22 = vrot.slane %v4042_v47, 2  ;;  %v3936_v35 = vadd.f32 %v3935_v57, %v3847_v23 }
 0x682   :  { %v3760_v54 = vadd.f32 %v3759_v44, %v3671_v25 }
 0x683   :  { %v4044_v63 = vmax.f32 %v4042_v47, %v4043_v22 }
 0x685   :  { %v4045_v48 = vrot.slane %v4044_v63, 1 }
 0x686   :  { %v3848_v13 = vpop.f32.mrf.mxu2  ;;  %v3937_v14 = vpop.f32.mrf.mxu3 }
 0x687   :  { %v4046_v36 = vmax.f32 %v4044_v63, %v4045_v48  ;;  %v3849_v11 = vadd.f32 %v3848_v13, %v3760_v54  ;;  %v3673_v16 = vpop.f32.mrf.mxu0  ;;  %v3762_v12 = vpop.f32.mrf.mxu1 }
 0x688   :  { %v3674_v60 = vadd.f32 %v3673_v16, %v6804_v6 }
 0x689   :  { %v4144_v10 = vsel %vm1996_vm4, %v4046_v36, %v4143_v26  ;;  %v3938_v2 = vadd.f32 %v3937_v14, %v3849_v11 }
 0x68a   :  { %v3763_v52 = vadd.f32 %v3762_v12, %v3674_v60 }
 0x68b   :  { %v4056_v56 = vmax.f32 %v3936_v35, %v3938_v2 }
 0x68e   :  { %v3851_v43 = vpop.f32.mrf.mxu2  ;;  %v3940_v34 = vpop.f32.mrf.mxu3 }
 0x68f   :  { %v3852_v40 = vadd.f32 %v3851_v43, %v3763_v52  ;;  %v3675_v39 = vpop.f32.mrf.mxu0  ;;  %v3764_v32 = vpop.f32.mrf.mxu1 }
 0x690   :  { %v3676_v0 = vadd.f32 %v3675_v39, %v6804_v6 }
 0x691   :  { %v3941_v38 = vadd.f32 %v3940_v34, %v3852_v40 }
 0x692   :  { %v3765_v59 = vadd.f32 %v3764_v32, %v3676_v0 }
 0x693   :  { %v4057_v9 = vmax.f32 %v4056_v56, %v3941_v38 }
 0x696   :  { %v3853_v3 = vpop.f32.mrf.mxu2  ;;  %v3942_v58 = vpop.f32.mrf.mxu3 }
 0x697   :  { %v3854_v37 = vadd.f32 %v3853_v3, %v3765_v59  ;;  %v3678_v7 = vpop.f32.mrf.mxu0  ;;  %v3767_v62 = vpop.f32.mrf.mxu1 }
 0x698   :  { %v3679_v53 = vadd.f32 %v3678_v7, %v6804_v6 }
 0x699   :  { %v3943_v46 = vadd.f32 %v3942_v58, %v3854_v37 }
 0x69a   :  { %v3768_v20 = vadd.f32 %v3767_v62, %v3679_v53 }
 0x69b   :  { %v4058_v26 = vmax.f32 %v4057_v9, %v3943_v46 }
 0x69d   :  { %v4059_v55 = vrot.slane %v4058_v26, 4 }
 0x69e   :  { %v3856_v21 = vpop.f32.mrf.mxu2  ;;  %v3945_v15 = vpop.f32.mrf.mxu3 }
 0x69f   :  { %v4060_v42 = vmax.f32 %v4058_v26, %v4059_v55  ;;  %v3857_v19 = vadd.f32 %v3856_v21, %v3768_v20  ;;  %v3680_v33 = vpop.f32.mrf.mxu0  ;;  %v3769_v18 = vpop.f32.mrf.mxu1 }
 0x6a0   :  { %v3681_v61 = vadd.f32 %v3680_v33, %v6804_v6 }
 0x6a1   :  { %v4061_v28 = vrot.slane %v4060_v42, 2  ;;  %v3946_v49 = vadd.f32 %v3945_v15, %v3857_v19 }
 0x6a2   :  { %v3770_v5 = vadd.f32 %v3769_v18, %v3681_v61 }
 0x6a3   :  { %v4062_v1 = vmax.f32 %v4060_v42, %v4061_v28 }
 0x6a5   :  { %v4063_v29 = vrot.slane %v4062_v1, 1 }
 0x6a6   :  { %v3858_v41 = vpop.f32.mrf.mxu2  ;;  %v3947_v45 = vpop.f32.mrf.mxu3 }
 0x6a7   :  { %v4064_v27 = vmax.f32 %v4062_v1, %v4063_v29  ;;  %v3859_v30 = vadd.f32 %v3858_v41, %v3770_v5  ;;  %v3683_v51 = vpop.f32.mrf.mxu0  ;;  %v3772_v8 = vpop.f32.mrf.mxu1 }
 0x6a8   :  { %v3684_v17 = vadd.f32 %v3683_v51, %v6804_v6 }
 0x6a9   :  { %v6879_v4 = vsel %vm1998_vm5, %v4064_v27, %v4144_v10  ;;  %v3948_v31 = vadd.f32 %v3947_v45, %v3859_v30 }
 0x6aa   :  { %v3773_v24 = vadd.f32 %v3772_v8, %v3684_v17 }
 0x6ab   :  { %v4074_v57 = vmax.f32 %v3946_v49, %v3948_v31 }
 0x6ae   :  { %v3861_v47 = vpop.f32.mrf.mxu2  ;;  %v3950_v23 = vpop.f32.mrf.mxu3 }
 0x6af   :  { %v3862_v50 = vadd.f32 %v3861_v47, %v3773_v24  ;;  %v3685_v44 = vpop.f32.mrf.mxu0  ;;  %v3774_v25 = vpop.f32.mrf.mxu1 }
 0x6b0   :  { %v3686_v14 = vadd.f32 %v3685_v44, %v6804_v6 }
 0x6b1   :  { %v3951_v22 = vadd.f32 %v3950_v23, %v3862_v50 }
 0x6b2   :  { %v3775_v60 = vadd.f32 %v3774_v25, %v3686_v14 }
 0x6b3   :  { %v4075_v35 = vmax.f32 %v4074_v57, %v3951_v22 }
 0x6b6   :  { %v3863_v54 = vpop.f32.mrf.mxu2  ;;  %v3952_v63 = vpop.f32.mrf.mxu3 }
 0x6b7   :  { %v3688_v48 = vpop.f32.mrf.mxu0  ;;  %v3777_v13 = vpop.f32.mrf.mxu1  ;;  %v3864_v10 = vadd.f32 %v3863_v54, %v3775_v60 }
 0x6b8   :  { %v3689_v20 = vadd.f32 %v3688_v48, %v6804_v6 }
 0x6b9   :  { %v3953_v56 = vadd.f32 %v3952_v63, %v3864_v10 }
 0x6ba   :  { %v3778_v18 = vadd.f32 %v3777_v13, %v3689_v20 }
 0x6bb   :  { %v4076_v40 = vmax.f32 %v4075_v35, %v3953_v56 }
 0x6bd   :  { %v4077_v0 = vrot.slane %v4076_v40, 4 }
 0x6be   :  { %v3866_v36 = vpop.f32.mrf.mxu2  ;;  %v3955_v11 = vpop.f32.mrf.mxu3 }
 0x6bf   :  { %v3690_v16 = vpop.f32.mrf.mxu0  ;;  %v3779_v12 = vpop.f32.mrf.mxu1  ;;  %v4078_v9 = vmax.f32 %v4076_v40, %v4077_v0  ;;  %v3867_v5 = vadd.f32 %v3866_v36, %v3778_v18 }
 0x6c0   :  { %v3691_v53 = vadd.f32 %v3690_v16, %v6804_v6 }
 0x6c1   :  { %v4079_v37 = vrot.slane %v4078_v9, 2  ;;  %v3956_v30 = vadd.f32 %v3955_v11, %v3867_v5 }
 0x6c2   :  { %v3780_v55 = vadd.f32 %v3779_v12, %v3691_v53 }
 0x6c3   :  { %v4080_v46 = vmax.f32 %v4078_v9, %v4079_v37 }
 0x6c5   :  { %v4081_v19 = vrot.slane %v4080_v46, 1 }
 0x6c6   :  { %v3868_v2 = vpop.f32.mrf.mxu2  ;;  %v3957_v52 = vpop.f32.mrf.mxu3 }
 0x6c7   :  { %v3693_v43 = vpop.f32.mrf.mxu0  ;;  %v3782_v34 = vpop.f32.mrf.mxu1  ;;  %v3869_v61 = vadd.f32 %v3868_v2, %v3780_v55  ;;  %v4082_v41 = vmax.f32 %v4080_v46, %v4081_v19 }
 0x6c8   :  { %v3694_v26 = vadd.f32 %v3693_v43, %v6804_v6 }
 0x6c9   :  { %v3958_v45 = vadd.f32 %v3957_v52, %v3869_v61  ;;  %v4146_v24 = vsel %vm2000_vm6, %v4082_v41, %v6879_v4 }
 0x6ca   :  { %v3783_v28 = vadd.f32 %v3782_v34, %v3694_v26 }
 0x6cb   :  { %v4092_v57 = vmax.f32 %v3956_v30, %v3958_v45 }
 0x6ce   :  { %v3871_v39 = vpop.f32.mrf.mxu2  ;;  %v3960_v32 = vpop.f32.mrf.mxu3 }
 0x6cf   :  { %v3695_v38 = vpop.f32.mrf.mxu0  ;;  %v3784_v59 = vpop.f32.mrf.mxu1  ;;  %v3872_v1 = vadd.f32 %v3871_v39, %v3783_v28 }
 0x6d0   :  { %v3696_v21 = vadd.f32 %v3695_v38, %v6804_v6 }
 0x6d1   :  { %v3961_v51 = vadd.f32 %v3960_v32, %v3872_v1 }
 0x6d2   :  { %v3785_v29 = vadd.f32 %v3784_v59, %v3696_v21 }
 0x6d3   :  { %v4093_v50 = vmax.f32 %v4092_v57, %v3961_v51 }
 0x6d6   :  { %v3873_v3 = vpop.f32.mrf.mxu2  ;;  %v3962_v58 = vpop.f32.mrf.mxu3 }
 0x6d7   :  { %v3698_v7 = vpop.f32.mrf.mxu0  ;;  %v3787_v62 = vpop.f32.mrf.mxu1  ;;  %v3874_v27 = vadd.f32 %v3873_v3, %v3785_v29 }
 0x6d8   :  { %v3699_v25 = vadd.f32 %v3698_v7, %v6804_v6 }
 0x6d9   :  { %v3963_v47 = vadd.f32 %v3962_v58, %v3874_v27 }
 0x6da   :  { %v3788_v13 = vadd.f32 %v3787_v62, %v3699_v25 }
 0x6db   :  { %v4094_v35 = vmax.f32 %v4093_v50, %v3963_v47 }
 0x6dd   :  { %v4095_v16 = vrot.slane %v4094_v35, 4 }
 0x6de   :  { %v3876_v15 = vpop.f32.mrf.mxu2  ;;  %v3965_v42 = vpop.f32.mrf.mxu3 }
 0x6df   :  { %v3700_v33 = vpop.f32.mrf.mxu0  ;;  %v3789_v49 = vpop.f32.mrf.mxu1  ;;  %v3877_v4 = vadd.f32 %v3876_v15, %v3788_v13  ;;  %v4096_v2 = vmax.f32 %v4094_v35, %v4095_v16 }
 0x6e0   :  { %v3701_v23 = vadd.f32 %v3700_v33, %v6804_v6 }
 0x6e1   :  { %v3966_v56 = vadd.f32 %v3965_v42, %v3877_v4  ;;  %v4097_v0 = vrot.slane %v4096_v2, 2 }
 0x6e2   :  { %v3790_v54 = vadd.f32 %v3789_v49, %v3701_v23 }
 0x6e3   :  { %v4098_v58 = vmax.f32 %v4096_v2, %v4097_v0 }
 0x6e5   :  { %v4099_v62 = vrot.slane %v4098_v58, 1 }
 0x6e6   :  { %v3878_v8 = vpop.f32.mrf.mxu2  ;;  %v3967_v17 = vpop.f32.mrf.mxu3 }
 0x6e7   :  { %v3703_v31 = vpop.f32.mrf.mxu0  ;;  %v3792_v44 = vpop.f32.mrf.mxu1  ;;  %v3879_v14 = vadd.f32 %v3878_v8, %v3790_v54  ;;  %v4100_v46 = vmax.f32 %v4098_v58, %v4099_v62 }
 0x6e8   :  { %v3704_v22 = vadd.f32 %v3703_v31, %v6804_v6 }
 0x6e9   :  { %v3968_v10 = vadd.f32 %v3967_v17, %v3879_v14  ;;  %v4147_v55 = vsel %vm2002_vm7, %v4100_v46, %v4146_v24 }
 0x6ea   :  { %v3793_v36 = vadd.f32 %v3792_v44, %v3704_v22 }
 0x6eb   :  { %v4110_v39 = vmax.f32 %v3966_v56, %v3968_v10 }
 0x6ee   :  { %v3881_v63 = vpop.f32.mrf.mxu2  ;;  %v3970_v48 = vpop.f32.mrf.mxu3 }
 0x6ef   :  { %v3705_v11 = vpop.f32.mrf.mxu0  ;;  %v3882_v12 = vadd.f32 %v3881_v63, %v3793_v36  ;;  %v3794_v52 = vpop.f32.mrf.mxu1 }
 0x6f0   :  { %v3706_v60 = vadd.f32 %v3705_v11, %v6804_v6 }
 0x6f1   :  { %v3971_v43 = vadd.f32 %v3970_v48, %v3882_v12 }
 0x6f2   :  { %v3795_v34 = vadd.f32 %v3794_v52, %v3706_v60 }
 0x6f3   :  { %v4111_v59 = vmax.f32 %v4110_v39, %v3971_v43 }
 0x6f6   :  { %v3883_v40 = vpop.f32.mrf.mxu2  ;;  %v3972_v38 = vpop.f32.mrf.mxu3 }
 0x6f7   :  { %v3884_v32 = vadd.f32 %v3883_v40, %v3795_v34 }
 0x6f9   :  { %v3973_v9 = vadd.f32 %v3972_v38, %v3884_v32 }
 0x6fb   :  { %v4112_v3 = vmax.f32 %v4111_v59, %v3973_v9 }
 0x6fd   :  { %v4113_v37 = vrot.slane %v4112_v3, 4 }
 0x6ff   :  { %v4114_v7 = vmax.f32 %v4112_v3, %v4113_v37 }
 0x701   :  { %v4115_v53 = vrot.slane %v4114_v7, 2 }
 0x703   :  { %v4116_v6 = vmax.f32 %v4114_v7, %v4115_v53 }
 0x705   :  { %v4117_v20 = vrot.slane %v4116_v6, 1 }
 0x707   :  { %v4118_v26 = vmax.f32 %v4116_v6, %v4117_v20 }
 0x709   :  { %v4148_v21 = vsel %vm2004_vm8, %v4118_v26, %v4147_v55 }
 0x70a   :  { %4152 = vst [vmem:[#allocation8 + $0x8] sm:$0xff] %v4148_v21 }
 0x70b   :  { %4163 = dma.vmem_to_hbm [thread:$0]  %s4159_s10, 256, %s4161_s12, [#allocation4]  }
 0x70c   :  { %5336 = dma.done.wait [#allocation4], 256  }
 0x70d   :  { %5337 = vsyncadd [#allocation4], 4294967040 }
 0x70e   :  { %4168 = vsyncpa [#allocation3], 1 }
 0x70f   :  { %4169 = vsyncpa [#allocation6], 1 }
 0x710   :  { %4170 = vsyncpa [#allocation4], 1 }

// kernel: tpu_custom_call.1
= control target key start
LH: loop header
LB: loop body
LE: loop exit
PB: predicated region body
PF: predicated region fallthrough
CT: control target
= control target key end

     0   :  { %14 = vsyncpa [#allocation3], 0  ;;  %s6897_s0 = inlined_call_operand.vmem [shape: f32[8,32,6], index: 0, kind: input, shape index: {}]   ;;  %s6898_s1 = inlined_call_operand.vmem [shape: bf16[6,128], index: 1, kind: input, shape index: {}]   ;;  %s6899_s2 = inlined_call_operand.vmem [shape: f32[1,128], index: 2, kind: input, shape index: {}]   ;;  %s6900_s3 = inlined_call_operand.vmem [shape: bf16[128,256], index: 3, kind: input, shape index: {}]   ;;  %s6901_s4 = inlined_call_operand.hbm [shape: bf16[256,512], index: 4, kind: input, shape index: {}]   ;;  %s6902_s5 = inlined_call_operand.hbm [shape: bf16[256,512], index: 5, kind: input, shape index: {}]   ;;  %s6903_s6 = inlined_call_operand.vmem [shape: f32[1,512], index: 6, kind: input, shape index: {}]   ;;  %s6904_s7 = inlined_call_operand.hbm [shape: bf16[512,256], index: 7, kind: input, shape index: {}]   ;;  %s6905_s8 = inlined_call_operand.vmem [shape: f32[1,256], index: 8, kind: input, shape index: {}]   ;;  %s6906_s9 = inlined_call_operand.hbm [shape: f32[8,256], index: 9, kind: output, shape index: {}]  }
   0x1   :  { %15 = vsyncpa [#allocation6], 0 }
   0x2   :  { %16 = vsyncpa [#allocation4], 0  ;;  %s42_s11 = sshll.u32 %s6902_s5, 4  ;;  %s5338_s12 = smov [#allocation5]   ;;  %s43_s11 = int_to_ptr.hbm [resolvable:$true] %s42_s11 }
   0x3   :  { %s44_s13 = sshll.u32 %s5338_s12, 4  ;;  %s29_s16 = sshll.u32 %s6901_s4, 4  ;;  %s45_s13 = int_to_ptr.vmem [resolvable:$true] %s44_s13  ;;  %s30_s16 = int_to_ptr.hbm [resolvable:$true] %s29_s16 }
   0x4   :  { %s5339_s17 = smov 256   ;;  %s5340_s18 = smov 16  }
   0x5   :  { %50 = dma.hbm_to_vmem [thread:$0]  %s43_s11, 8192, %s45_s13, [#allocation6], %s5339_s17, %s5339_s17, %s5340_s18  }
   0x6   :  { %s5341_s19 = smov [#allocation2]   ;;  %s57_s23 = sshll.u32 %s6904_s7, 4  ;;  %s58_s23 = int_to_ptr.hbm [resolvable:$true] %s57_s23 }
   0x7   :  { %s31_s20 = sshll.u32 %s5341_s19, 4  ;;  %s5342_s5 = smov [#allocation7]   ;;  %s32_s20 = int_to_ptr.vmem [resolvable:$true] %s31_s20 }
   0x8   :  { %37 = dma.hbm_to_vmem [thread:$0]  %s30_s16, 8192, %s32_s20, [#allocation3], %s5339_s17, %s5339_s17, %s5340_s18  }
   0x9   :  { %s59_s24 = sshll.u32 %s5342_s5, 4  ;;  %s5343_s25 = smov 128   ;;  %s60_s24 = int_to_ptr.vmem [resolvable:$true] %s59_s24 }
   0xa   :  { %s5344_s26 = smov 8  }
   0xb   :  { %65 = dma.hbm_to_vmem [thread:$0]  %s58_s23, 8192, %s60_s24, [#allocation6], %s5343_s25, %s5343_s25, %s5344_s26  }
   0xc   :  { %5332 = dma.done.wait [#allocation3], 8192  }
   0xd   :  { %5333 = vsyncadd [#allocation3], 4294959104 }
   0xe   :  { %5334 = dma.done.wait [#allocation6], 16384  }
   0xf   :  { %5335 = vsyncadd [#allocation6], 4294950912  ;;  %vm183_vm0 = vcmask 1042432   ;;  %v129_v0 = vld [vmem:[%s6898_s1] sm:$0x7]  ;;  %v82_v2 = vld [vmem:[%s6897_s0 + $0x8] sm:$0xff] }
  0x10   :  { %v81_v1 = vld [vmem:[%s6897_s0] sm:$0xff]  ;;  %v185_v3 = vsel %vm183_vm0, %v129_v0, 0  ;;  %vm134_vm1 = vcmask 48128   ;;  %v83_v5 = vld [vmem:[%s6897_s0 + $0x10] sm:$0xff]  ;;  %v84_v6 = vld [vmem:[%s6897_s0 + $0x18] sm:$0xff]  ;;  %vm1992_vm2 = vcmask 1041409  }
  0x11   :  { %v113_v4 = vpack.c.bf16 %v82_v2, %v81_v1  ;;  %194 = vmatpush.bf16.msra.mxu0 %v185_v3  ;;  %v114_v7 = vpack.c.bf16 %v84_v6, %v83_v5  ;;  %v85_v8 = vld [vmem:[%s6897_s0 + $0x20] sm:$0xff]  ;;  %v86_v9 = vld [vmem:[%s6897_s0 + $0x28] sm:$0xff]  ;;  %v87_v11 = vld [vmem:[%s6897_s0 + $0x30] sm:$0xff]  ;;  %vm1994_vm3 = vcmask 1042434   ;;  %vm1996_vm4 = vcmask 1043459   ;;  %s4160_s12 = sshll.u32 %s6906_s9, 4  ;;  %s4161_s12 = int_to_ptr.hbm [resolvable:$true] %s4160_s12 }
  0x12   :  { %v115_v10 = vpack.c.bf16 %v86_v9, %v85_v8  ;;  %v88_v12 = vld [vmem:[%s6897_s0 + $0x38] sm:$0xff]  ;;  %v89_v14 = vld [vmem:[%s6897_s0 + $0x40] sm:$0xff]  ;;  %v90_v15 = vld [vmem:[%s6897_s0 + $0x48] sm:$0xff]  ;;  %vm1998_vm5 = vcmask 1044484   ;;  %vm2000_vm6 = vcmask 1045509   ;;  %vm2002_vm7 = vcmask 1046534  }
  0x13   :  { %v116_v13 = vpack.c.bf16 %v88_v12, %v87_v11  ;;  %v117_v16 = vpack.c.bf16 %v90_v15, %v89_v14  ;;  %v4245_v17 = vld [vmem:[%s6900_s3 + $0x70] sm:$0xf]  ;;  %v5034_v18 = vld [vmem:[%s6900_s3 + $0x74] sm:$0xf0]  ;;  %v5033_v19 = vld [vmem:[%s6900_s3 + $0x74] sm:$0xf] }
  0x14   :  { %4171 = vmatmul.msk.bf16.vlgmr.msra.gmra.mxu0 %vm134_vm1, %v113_v4  ;;  %v4246_v20 = vor.u32 %v5034_v18, %v4245_v17  ;;  %v4247_v21 = vld [vmem:[%s6900_s3 + $0x78] sm:$0xf0]  ;;  %v91_v23 = vld [vmem:[%s6897_s0 + $0x50] sm:$0xff]  ;;  %v4237_v26 = vld [vmem:[%s6900_s3 + $0x60] sm:$0xf]  ;;  %vm2004_vm8 = vcmask 1047559  }
  0x15   :  { %v4250_v22 = vor.u32 %v5033_v19, %v4247_v21  ;;  %v92_v24 = vld [vmem:[%s6897_s0 + $0x58] sm:$0xff]  ;;  %v5032_v27 = vld [vmem:[%s6900_s3 + $0x64] sm:$0xf0]  ;;  %v5031_v28 = vld [vmem:[%s6900_s3 + $0x64] sm:$0xf]  ;;  %vm2448_vm9 = vcmask 1040384  }
  0x16   :  { %420 = vmatpush.bf16.msra.mxu1 %v4246_v20  ;;  %v118_v25 = vpack.c.bf16 %v92_v24, %v91_v23  ;;  %v4238_v29 = vor.u32 %v5032_v27, %v4237_v26  ;;  %v4239_v30 = vld [vmem:[%s6900_s3 + $0x68] sm:$0xf0]  ;;  %v4229_v32 = vld [vmem:[%s6900_s3 + $0x50] sm:$0xf]  ;;  %v5030_v33 = vld [vmem:[%s6900_s3 + $0x54] sm:$0xf0] }
  0x17   :  { %509 = vmatpush.bf16.msra.mxu2 %v4250_v22  ;;  %v4242_v31 = vor.u32 %v5031_v28, %v4239_v30  ;;  %v5029_v34 = vld [vmem:[%s6900_s3 + $0x54] sm:$0xf]  ;;  %v4230_v35 = vor.u32 %v5030_v33, %v4229_v32  ;;  %v4231_v36 = vld [vmem:[%s6900_s3 + $0x58] sm:$0xf0]  ;;  %v4221_v38 = vld [vmem:[%s6900_s3 + $0x40] sm:$0xf] }
  0x18   :  { %v4234_v37 = vor.u32 %v5029_v34, %v4231_v36  ;;  %v5028_v39 = vld [vmem:[%s6900_s3 + $0x44] sm:$0xf0]  ;;  %v5027_v40 = vld [vmem:[%s6900_s3 + $0x44] sm:$0xf]  ;;  %v4223_v41 = vld [vmem:[%s6900_s3 + $0x48] sm:$0xf0] }
  0x19   :  { %v4222_v42 = vor.u32 %v5028_v39, %v4221_v38  ;;  %v4226_v43 = vor.u32 %v5027_v40, %v4223_v41  ;;  %v93_v44 = vld [vmem:[%s6897_s0 + $0x60] sm:$0xff]  ;;  %v94_v45 = vld [vmem:[%s6897_s0 + $0x68] sm:$0xff]  ;;  %v4213_v46 = vld [vmem:[%s6900_s3 + $0x30] sm:$0xf]  ;;  %vm2474_vm10 = vcmask 1046528   ;;  %vm2451_vm11 = vcmask 1041408  }
  0x1a   :  { %421 = vmatpush.bf16.msra.mxu1 %v4238_v29  ;;  %v5026_v47 = vld [vmem:[%s6900_s3 + $0x34] sm:$0xf0]  ;;  %v5025_v48 = vld [vmem:[%s6900_s3 + $0x34] sm:$0xf]  ;;  %v4215_v50 = vld [vmem:[%s6900_s3 + $0x38] sm:$0xf0]  ;;  %v119_v51 = vpack.c.bf16 %v94_v45, %v93_v44 }
  0x1b   :  { %510 = vmatpush.bf16.msra.mxu2 %v4242_v31  ;;  %v4214_v49 = vor.u32 %v5026_v47, %v4213_v46  ;;  %v4218_v52 = vor.u32 %v5025_v48, %v4215_v50  ;;  %v4205_v53 = vld [vmem:[%s6900_s3 + $0x20] sm:$0xf]  ;;  %v5024_v54 = vld [vmem:[%s6900_s3 + $0x24] sm:$0xf0]  ;;  %v5023_v55 = vld [vmem:[%s6900_s3 + $0x24] sm:$0xf] }
  0x1c   :  { %v4206_v56 = vor.u32 %v5024_v54, %v4205_v53  ;;  %v4207_v57 = vld [vmem:[%s6900_s3 + $0x28] sm:$0xf0]  ;;  %v4197_v59 = vld [vmem:[%s6900_s3 + $0x10] sm:$0xf]  ;;  %v5022_v60 = vld [vmem:[%s6900_s3 + $0x14] sm:$0xf0] }
  0x1d   :  { %v4210_v58 = vor.u32 %v5023_v55, %v4207_v57  ;;  %v5021_v61 = vld [vmem:[%s6900_s3 + $0x14] sm:$0xf]  ;;  %v4198_v62 = vor.u32 %v5022_v60, %v4197_v59  ;;  %v4199_v63 = vld [vmem:[%s6900_s3 + $0x18] sm:$0xf0]  ;;  %v4189_v1 = vld [vmem:[%s6900_s3] sm:$0xf] }
  0x1e   :  { %422 = vmatpush.bf16.msra.mxu1 %v4230_v35  ;;  %v4202_v0 = vor.u32 %v5021_v61, %v4199_v63  ;;  %v5020_v2 = vld [vmem:[%s6900_s3 + $0x4] sm:$0xf0]  ;;  %v5019_v3 = vld [vmem:[%s6900_s3 + $0x4] sm:$0xf]  ;;  %v4191_v5 = vld [vmem:[%s6900_s3 + $0x8] sm:$0xf0] }
  0x1f   :  { %511 = vmatpush.bf16.msra.mxu2 %v4234_v37  ;;  %v4190_v4 = vor.u32 %v5020_v2, %v4189_v1  ;;  %v4194_v6 = vor.u32 %v5019_v3, %v4191_v5  ;;  %v96_v8 = vld [vmem:[%s6897_s0 + $0x78] sm:$0xff]  ;;  %v98_v11 = vld [vmem:[%s6897_s0 + $0x88] sm:$0xff]  ;;  %v5569_v14 = vld [vmem:[%s6899_s2] ss:$0 sm:$0xff]  ;;  %vm2455_vm12 = vcmask 1042433   ;;  %vm2460_vm13 = vcmask 1043458  }
  0x20   :  { %v99_v20 = vld [vmem:[%s6897_s0 + $0x90] sm:$0xff]  ;;  %v100_v21 = vld [vmem:[%s6897_s0 + $0x98] sm:$0xff]  ;;  %v101_v30 = vld [vmem:[%s6897_s0 + $0xa0] sm:$0xff]  ;;  %vm2465_vm14 = vcmask 1044483   ;;  %vm2470_vm15 = vcmask 1045508   ;;  %vm2476_vm0 = vcmask 1046533  }
  0x21   :  { %v122_v23 = vpack.c.bf16 %v100_v21, %v99_v20  ;;  %v102_v31 = vld [vmem:[%s6897_s0 + $0xa8] sm:$0xff]  ;;  %v103_v40 = vld [vmem:[%s6897_s0 + $0xb0] sm:$0xff]  ;;  %v104_v41 = vld [vmem:[%s6897_s0 + $0xb8] sm:$0xff] }
  0x22   :  { %423 = vmatpush.bf16.msra.mxu1 %v4222_v42  ;;  %v123_v33 = vpack.c.bf16 %v102_v31, %v101_v30  ;;  %v105_v50 = vld [vmem:[%s6897_s0 + $0xc0] sm:$0xff]  ;;  %v107_v60 = vld [vmem:[%s6897_s0 + $0xd0] sm:$0xff]  ;;  %v108_v61 = vld [vmem:[%s6897_s0 + $0xd8] sm:$0xff] }
  0x23   :  { %512 = vmatpush.bf16.msra.mxu2 %v4226_v43  ;;  %v124_v43 = vpack.c.bf16 %v104_v41, %v103_v40  ;;  %v126_v63 = vpack.c.bf16 %v108_v61, %v107_v60  ;;  %v4365_v1 = vld [vmem:[#allocation5 + $0xe0] sm:$0xf]  ;;  %v5065_v2 = vld [vmem:[#allocation5 + $0xec] sm:$0xf0] }
  0x24   :  { %4172 = vmatmul.msk.bf16.gmra.mxu0 %vm134_vm1, %v114_v7  ;;  %v95_v7 = vld [vmem:[%s6897_s0 + $0x70] sm:$0xff]  ;;  %v4366_v3 = vor.u32 %v5065_v2, %v4365_v1  ;;  %v4461_v30 = vld [vmem:[#allocation5 + $0x1a0] sm:$0xf] }
  0x25   :  { %v120_v9 = vpack.c.bf16 %v96_v8, %v95_v7  ;;  %v4349_v7 = vld [vmem:[#allocation5 + $0xc0] sm:$0xf]  ;;  %v5061_v8 = vld [vmem:[#allocation5 + $0xcc] sm:$0xf0] }
  0x26   :  { %424 = vmatpush.bf16.msra.mxu1 %v4214_v49  ;;  %1158 = vmatpush.bf16.msra.mxu3 %v4366_v3  ;;  %v5057_v20 = vld [vmem:[#allocation5 + $0xac] sm:$0xf0]  ;;  %v4253_v61 = vld [vmem:[#allocation5] sm:$0xf] }
  0x27   :  { %513 = vmatpush.bf16.msra.mxu2 %v4218_v52  ;;  %v5089_v31 = vld [vmem:[#allocation5 + $0x1ac] sm:$0xf0] }
  0x28   :  { %v5073_v1 = vld [vmem:[#allocation5 + $0x12c] sm:$0xf0] }
  0x2a   :  { %425 = vmatpush.bf16.msra.mxu1 %v4206_v56 }
  0x2b   :  { %514 = vmatpush.bf16.msra.mxu2 %v4210_v58 }
  0x2e   :  { %426 = vmatpush.bf16.msra.mxu1 %v4198_v62 }
  0x2f   :  { %515 = vmatpush.bf16.msra.mxu2 %v4202_v0 }
  0x32   :  { %427 = vmatpush.bf16.msra.mxu1 %v4190_v4 }
  0x33   :  { %516 = vmatpush.bf16.msra.mxu2 %v4194_v6 }
  0x34   :  { %4173 = vmatmul.msk.bf16.gmra.mxu0 %vm134_vm1, %v115_v10  ;;  %v97_v10 = vld [vmem:[%s6897_s0 + $0x80] sm:$0xff] }
  0x35   :  { %v121_v12 = vpack.c.bf16 %v98_v11, %v97_v10 }
  0x44   :  { %4174 = vmatmul.msk.bf16.gmra.mxu0 %vm134_vm1, %v116_v13 }
  0x54   :  { %4175 = vmatmul.msk.bf16.gmra.mxu0 %vm134_vm1, %v117_v16 }
  0x64   :  { %4176 = vmatmul.msk.bf16.gmra.mxu0 %vm134_vm1, %v118_v25 }
  0x74   :  { %4177 = vmatmul.msk.bf16.gmra.mxu0 %vm134_vm1, %v119_v51  ;;  %v106_v51 = vld [vmem:[%s6897_s0 + $0xc8] sm:$0xff] }
  0x75   :  { %v125_v53 = vpack.c.bf16 %v106_v51, %v105_v50  ;;  %v112_v50 = vld [vmem:[%s6897_s0 + $0xf8] sm:$0xff] }
  0x84   :  { %4178 = vmatmul.msk.bf16.gmra.mxu0 %vm134_vm1, %v120_v9  ;;  %v4350_v9 = vor.u32 %v5061_v8, %v4349_v7 }
  0x86   :  { %1159 = vmatpush.bf16.msra.mxu3 %v4350_v9 }
  0x91   :  { %v196_v13 = vpop.f32.mrf.mxu0 }
  0x92   :  { %v197_v15 = vadd.f32 %v5569_v14, %v196_v13  ;;  %v5097_v13 = vld [vmem:[#allocation5 + $0x1ec] sm:$0xf0] }
  0x94   :  { %4179 = vmatmul.msk.bf16.gmra.mxu0 %vm134_vm1, %v121_v12  ;;  %v276_v18 = vmax.f32 %v197_v15, 0.0  ;;  %v4493_v12 = vld [vmem:[#allocation5 + $0x1e0] sm:$0xf] }
  0x95   :  { %v109_v15 = vld [vmem:[%s6897_s0 + $0xe0] sm:$0xff] }
  0x99   :  { %v198_v16 = vpop.f32.mrf.mxu0 }
  0x9a   :  { %v199_v17 = vadd.f32 %v5569_v14, %v198_v16  ;;  %v110_v16 = vld [vmem:[%s6897_s0 + $0xe8] sm:$0xff] }
  0x9c   :  { %v277_v19 = vmax.f32 %v199_v17, 0.0  ;;  %v4494_v17 = vor.u32 %v5097_v13, %v4493_v12 }
  0x9e   :  { %v308_v22 = vpack.c.bf16 %v277_v19, %v276_v18  ;;  %v4333_v19 = vld [vmem:[#allocation5 + $0xa0] sm:$0xf]  ;;  %1247 = vmatpush.bf16.msrb.mxu0 %v4494_v17 }
  0x9f   :  { %v4334_v21 = vor.u32 %v5057_v20, %v4333_v19 }
  0xa0   :  { %428 = vmatmul.bf16.vlgmr.msra.gmra.mxu1 %v308_v22  ;;  %517 = vmatmul.bf16.vlgmr.msra.gmra.mxu2 %v308_v22  ;;  %v127_v22 = vpack.c.bf16 %v110_v16, %v109_v15 }
  0xa1   :  { %v201_v24 = vpop.f32.mrf.mxu0  ;;  %1160 = vmatpush.bf16.msra.mxu3 %v4334_v21 }
  0xa2   :  { %v202_v25 = vadd.f32 %v5569_v14, %v201_v24  ;;  %v5093_v24 = vld [vmem:[#allocation5 + $0x1cc] sm:$0xf0] }
  0xa4   :  { %4180 = vmatmul.msk.bf16.gmra.mxu0 %vm134_vm1, %v122_v23  ;;  %v278_v28 = vmax.f32 %v202_v25, 0.0  ;;  %v4477_v23 = vld [vmem:[#allocation5 + $0x1c0] sm:$0xf] }
  0xa9   :  { %v203_v26 = vpop.f32.mrf.mxu0 }
  0xaa   :  { %v204_v27 = vadd.f32 %v5569_v14, %v203_v26  ;;  %v4478_v26 = vor.u32 %v5093_v24, %v4477_v23 }
  0xac   :  { %v279_v29 = vmax.f32 %v204_v27, 0.0  ;;  %v4317_v27 = vld [vmem:[#allocation5 + $0x80] sm:$0xf]  ;;  %1248 = vmatpush.bf16.msrb.mxu0 %v4478_v26 }
  0xae   :  { %v309_v32 = vpack.c.bf16 %v279_v29, %v278_v28  ;;  %v5053_v28 = vld [vmem:[#allocation5 + $0x8c] sm:$0xf0] }
  0xaf   :  { %v4318_v29 = vor.u32 %v5053_v28, %v4317_v27 }
  0xb0   :  { %433 = vmatmul.bf16.gmra.mxu1 %v309_v32  ;;  %522 = vmatmul.bf16.gmra.mxu2 %v309_v32  ;;  %v4462_v32 = vor.u32 %v5089_v31, %v4461_v30 }
  0xb1   :  { %v206_v34 = vpop.f32.mrf.mxu0  ;;  %1161 = vmatpush.bf16.msra.mxu3 %v4318_v29 }
  0xb2   :  { %v207_v35 = vadd.f32 %v5569_v14, %v206_v34  ;;  %v5049_v34 = vld [vmem:[#allocation5 + $0x6c] sm:$0xf0]  ;;  %1249 = vmatpush.bf16.msrb.mxu0 %v4462_v32 }
  0xb4   :  { %4181 = vmatmul.msk.bf16.gmra.mxu0 %vm134_vm1, %v123_v33  ;;  %v280_v38 = vmax.f32 %v207_v35, 0.0  ;;  %v4301_v33 = vld [vmem:[#allocation5 + $0x60] sm:$0xf] }
  0xb5   :  { %v4302_v35 = vor.u32 %v5049_v34, %v4301_v33 }
  0xb7   :  { %1162 = vmatpush.bf16.msra.mxu3 %v4302_v35 }
  0xb9   :  { %v208_v36 = vpop.f32.mrf.mxu0 }
  0xba   :  { %v209_v37 = vadd.f32 %v5569_v14, %v208_v36 }
  0xbc   :  { %v281_v39 = vmax.f32 %v209_v37, 0.0  ;;  %v4445_v37 = vld [vmem:[#allocation5 + $0x180] sm:$0xf] }
  0xbe   :  { %v310_v42 = vpack.c.bf16 %v281_v39, %v280_v38  ;;  %v5085_v38 = vld [vmem:[#allocation5 + $0x18c] sm:$0xf0] }
  0xbf   :  { %v4446_v40 = vor.u32 %v5085_v38, %v4445_v37 }
  0xc0   :  { %438 = vmatmul.bf16.gmra.mxu1 %v310_v42  ;;  %527 = vmatmul.bf16.gmra.mxu2 %v310_v42  ;;  %v4285_v42 = vld [vmem:[#allocation5 + $0x40] sm:$0xf] }
  0xc1   :  { %v211_v44 = vpop.f32.mrf.mxu0  ;;  %1250 = vmatpush.bf16.msrb.mxu0 %v4446_v40 }
  0xc2   :  { %v212_v45 = vadd.f32 %v5569_v14, %v211_v44 }
  0xc4   :  { %4182 = vmatmul.msk.bf16.gmra.mxu0 %vm134_vm1, %v124_v43  ;;  %v282_v48 = vmax.f32 %v212_v45, 0.0  ;;  %v5045_v43 = vld [vmem:[#allocation5 + $0x4c] sm:$0xf0] }
  0xc5   :  { %v4286_v44 = vor.u32 %v5045_v43, %v4285_v42 }
  0xc7   :  { %1163 = vmatpush.bf16.msra.mxu3 %v4286_v44 }
  0xc9   :  { %v213_v46 = vpop.f32.mrf.mxu0 }
  0xca   :  { %v214_v47 = vadd.f32 %v5569_v14, %v213_v46 }
  0xcc   :  { %v283_v49 = vmax.f32 %v214_v47, 0.0  ;;  %v4429_v47 = vld [vmem:[#allocation5 + $0x160] sm:$0xf] }
  0xce   :  { %v311_v52 = vpack.c.bf16 %v283_v49, %v282_v48  ;;  %v5081_v48 = vld [vmem:[#allocation5 + $0x16c] sm:$0xf0] }
  0xcf   :  { %v111_v49 = vld [vmem:[%s6897_s0 + $0xf0] sm:$0xff]  ;;  %v4430_v51 = vor.u32 %v5081_v48, %v4429_v47 }
  0xd0   :  { %443 = vmatmul.bf16.gmra.mxu1 %v311_v52  ;;  %532 = vmatmul.bf16.gmra.mxu2 %v311_v52 }
  0xd1   :  { %v216_v54 = vpop.f32.mrf.mxu0  ;;  %1251 = vmatpush.bf16.msrb.mxu0 %v4430_v51 }
  0xd2   :  { %v217_v55 = vadd.f32 %v5569_v14, %v216_v54  ;;  %v5041_v54 = vld [vmem:[#allocation5 + $0x2c] sm:$0xf0] }
  0xd4   :  { %4183 = vmatmul.msk.bf16.gmra.mxu0 %vm134_vm1, %v125_v53  ;;  %v284_v58 = vmax.f32 %v217_v55, 0.0  ;;  %v4269_v53 = vld [vmem:[#allocation5 + $0x20] sm:$0xf] }
  0xd5   :  { %v4270_v55 = vor.u32 %v5041_v54, %v4269_v53 }
  0xd7   :  { %1164 = vmatpush.bf16.msra.mxu3 %v4270_v55 }
  0xd9   :  { %v218_v56 = vpop.f32.mrf.mxu0 }
  0xda   :  { %v219_v57 = vadd.f32 %v5569_v14, %v218_v56  ;;  %v128_v56 = vpack.c.bf16 %v112_v50, %v111_v49 }
  0xdc   :  { %v285_v59 = vmax.f32 %v219_v57, 0.0  ;;  %v4413_v57 = vld [vmem:[#allocation5 + $0x140] sm:$0xf] }
  0xde   :  { %v312_v62 = vpack.c.bf16 %v285_v59, %v284_v58  ;;  %v5077_v58 = vld [vmem:[#allocation5 + $0x14c] sm:$0xf0] }
  0xdf   :  { %v4414_v60 = vor.u32 %v5077_v58, %v4413_v57 }
  0xe0   :  { %448 = vmatmul.bf16.gmra.mxu1 %v312_v62  ;;  %537 = vmatmul.bf16.gmra.mxu2 %v312_v62  ;;  %v5037_v62 = vld [vmem:[#allocation5 + $0xc] sm:$0xf0] }
  0xe1   :  { %v221_v0 = vpop.f32.mrf.mxu0  ;;  %1252 = vmatpush.bf16.msrb.mxu0 %v4414_v60 }
  0xe2   :  { %v222_v4 = vadd.f32 %v5569_v14, %v221_v0  ;;  %v4397_v0 = vld [vmem:[#allocation5 + $0x120] sm:$0xf] }
  0xe3   :  { %v4398_v2 = vor.u32 %v5073_v1, %v4397_v0 }
  0xe4   :  { %4184 = vmatmul.msk.bf16.gmra.mxu0 %vm134_vm1, %v126_v63  ;;  %v286_v10 = vmax.f32 %v222_v4, 0.0  ;;  %v4254_v63 = vor.u32 %v5037_v62, %v4253_v61  ;;  %v4381_v4 = vld [vmem:[#allocation5 + $0x100] sm:$0xf] }
  0xe5   :  { %1253 = vmatpush.bf16.msrb.mxu0 %v4398_v2 }
  0xe6   :  { %1165 = vmatpush.bf16.msra.mxu3 %v4254_v63 }
  0xe9   :  { %v223_v5 = vpop.f32.mrf.mxu0 }
  0xea   :  { %v224_v6 = vadd.f32 %v5569_v14, %v223_v5  ;;  %v5069_v5 = vld [vmem:[#allocation5 + $0x10c] sm:$0xf0] }
  0xeb   :  { %v4382_v7 = vor.u32 %v5069_v5, %v4381_v4 }
  0xec   :  { %v287_v11 = vmax.f32 %v224_v6, 0.0 }
  0xed   :  { %1254 = vmatpush.bf16.msrb.mxu0 %v4382_v7 }
  0xee   :  { %v313_v18 = vpack.c.bf16 %v287_v11, %v286_v10 }
  0xf0   :  { %453 = vmatmul.bf16.gmra.mxu1 %v313_v18  ;;  %542 = vmatmul.bf16.gmra.mxu2 %v313_v18 }
  0xf1   :  { %v226_v25 = vpop.f32.mrf.mxu0 }
  0xf2   :  { %v227_v36 = vadd.f32 %v5569_v14, %v226_v25 }
  0xf4   :  { %4185 = vmatmul.msk.bf16.gmra.mxu0 %vm134_vm1, %v127_v22  ;;  %v288_v45 = vmax.f32 %v227_v36, 0.0 }
  0xf9   :  { %v228_v39 = vpop.f32.mrf.mxu0 }
  0xfa   :  { %v229_v41 = vadd.f32 %v5569_v14, %v228_v39 }
  0xfc   :  { %v289_v46 = vmax.f32 %v229_v41, 0.0 }
  0xfe   :  { %v314_v52 = vpack.c.bf16 %v289_v46, %v288_v45 }
 0x100   :  { %458 = vmatmul.bf16.gmra.mxu1 %v314_v52  ;;  %547 = vmatmul.bf16.gmra.mxu2 %v314_v52 }
 0x101   :  { %v231_v59 = vpop.f32.mrf.mxu0 }
 0x102   :  { %v232_v3 = vadd.f32 %v5569_v14, %v231_v59 }
 0x104   :  { %4186 = vmatmul.msk.bf16.gmra.mxu0 %vm134_vm1, %v128_v56  ;;  %v290_v9 = vmax.f32 %v232_v3, 0.0  ;;  %vm2481_vm1 = vcmask 1045504  }
 0x109   :  { %v233_v6 = vpop.f32.mrf.mxu0 }
 0x10a   :  { %v234_v8 = vadd.f32 %v5569_v14, %v233_v6 }
 0x10c   :  { %v291_v10 = vmax.f32 %v234_v8, 0.0  ;;  %v4373_v8 = vld [vmem:[#allocation5 + $0xe8] sm:$0xf] }
 0x10e   :  { %v315_v11 = vpack.c.bf16 %v291_v10, %v290_v9  ;;  %v5066_v9 = vld [vmem:[#allocation5 + $0xf4] sm:$0xf0]  ;;  %v5095_v10 = vld [vmem:[#allocation5 + $0x1e4] sm:$0xf] }
 0x110   :  { %463 = vmatmul.bf16.gmra.mxu1 %v315_v11  ;;  %552 = vmatmul.bf16.gmra.mxu2 %v315_v11  ;;  %v4374_v11 = vor.u32 %v5066_v9, %v4373_v8 }
 0x111   :  { %v236_v12 = vpop.f32.mrf.mxu0 }
 0x112   :  { %v237_v13 = vadd.f32 %v5569_v14, %v236_v12  ;;  %v4495_v12 = vld [vmem:[#allocation5 + $0x1f0] sm:$0xf0]  ;;  %1514 = vmatpush.bf16.msrb.mxu3 %v4374_v11  ;;  %v5055_v11 = vld [vmem:[#allocation5 + $0xa4] sm:$0xf] }
 0x114   :  { %v292_v17 = vmax.f32 %v237_v13, 0.0  ;;  %v5063_v13 = vld [vmem:[#allocation5 + $0xe4] sm:$0xf] }
 0x119   :  { %v238_v15 = vpop.f32.mrf.mxu0 }
 0x11a   :  { %v239_v16 = vadd.f32 %v5569_v14, %v238_v15  ;;  %v4367_v15 = vld [vmem:[#allocation5 + $0xf0] sm:$0xf0] }
 0x11c   :  { %v293_v18 = vmax.f32 %v239_v16, 0.0  ;;  %v4498_v16 = vor.u32 %v5095_v10, %v4495_v12  ;;  %v4335_v12 = vld [vmem:[#allocation5 + $0xb0] sm:$0xf0] }
 0x11d   :  { %v429_v19 = vpop.f32.mrf.mxu1 }
 0x11e   :  { %v316_v20 = vpack.c.bf16 %v293_v18, %v292_v17  ;;  %v4370_v17 = vor.u32 %v5063_v13, %v4367_v15  ;;  %1425 = vmatpush.bf16.msrb.mxu2 %v4498_v16  ;;  %v4338_v16 = vor.u32 %v5055_v11, %v4335_v12 }
 0x120   :  { %468 = vmatmul.bf16.gmra.mxu1 %v316_v20  ;;  %557 = vmatmul.bf16.gmra.mxu2 %v316_v20 }
 0x121   :  { %v241_v21 = vpop.f32.mrf.mxu0  ;;  %1336 = vmatpush.bf16.msrb.mxu1 %v4370_v17  ;;  %v5087_v17 = vld [vmem:[#allocation5 + $0x1a4] sm:$0xf] }
 0x122   :  { %v242_v26 = vadd.f32 %v5569_v14, %v241_v21 }
 0x123   :  { %v518_v22 = vpop.f32.mrf.mxu2 }
 0x124   :  { %v294_v30 = vmax.f32 %v242_v26, 0.0 }
 0x125   :  { %v431_v23 = vpop.f32.mrf.mxu1 }
 0x126   :  { %v598_v24 = vmax.f32 %v429_v19, %v431_v23  ;;  %v5639_v25 = vpack.c.bf16 %v431_v23, %v429_v19 }
 0x128   :  { %1166 = vmatmul.bf16.vlgmr.msra.gmra.mxu3 %v5639_v25 }
 0x129   :  { %v243_v27 = vpop.f32.mrf.mxu0 }
 0x12a   :  { %v244_v28 = vadd.f32 %v5569_v14, %v243_v27 }
 0x12b   :  { %v520_v29 = vpop.f32.mrf.mxu2 }
 0x12c   :  { %v295_v31 = vmax.f32 %v244_v28, 0.0  ;;  %v607_v32 = vmax.f32 %v518_v22, %v520_v29  ;;  %v5644_v33 = vpack.c.bf16 %v520_v29, %v518_v22 }
 0x12d   :  { %v434_v34 = vpop.f32.mrf.mxu1 }
 0x12e   :  { %v599_v35 = vmax.f32 %v598_v24, %v434_v34  ;;  %1255 = vmatmul.bf16.vlgmr.msrb.gmra.mxu0 %v5644_v33  ;;  %v317_v36 = vpack.c.bf16 %v295_v31, %v294_v30 }
 0x130   :  { %473 = vmatmul.bf16.gmra.mxu1 %v317_v36  ;;  %562 = vmatmul.bf16.gmra.mxu2 %v317_v36 }
 0x131   :  { %v246_v37 = vpop.f32.mrf.mxu0 }
 0x132   :  { %v247_v43 = vadd.f32 %v5569_v14, %v246_v37 }
 0x133   :  { %v523_v38 = vpop.f32.mrf.mxu2 }
 0x134   :  { %v608_v39 = vmax.f32 %v607_v32, %v523_v38  ;;  %v296_v47 = vmax.f32 %v247_v43, 0.0 }
 0x135   :  { %v436_v40 = vpop.f32.mrf.mxu1 }
 0x136   :  { %v600_v41 = vmax.f32 %v599_v35, %v436_v40  ;;  %v5647_v42 = vpack.c.bf16 %v436_v40, %v434_v34 }
 0x138   :  { %1171 = vmatmul.bf16.gmra.mxu3 %v5647_v42  ;;  %v601_v59 = vrot.slane %v600_v41, 4 }
 0x139   :  { %v248_v44 = vpop.f32.mrf.mxu0 }
 0x13a   :  { %v249_v45 = vadd.f32 %v5569_v14, %v248_v44  ;;  %v602_v3 = vmax.f32 %v600_v41, %v601_v59  ;;  %v4351_v59 = vld [vmem:[#allocation5 + $0xd0] sm:$0xf0] }
 0x13b   :  { %v525_v46 = vpop.f32.mrf.mxu2 }
 0x13c   :  { %v297_v48 = vmax.f32 %v249_v45, 0.0  ;;  %v609_v49 = vmax.f32 %v608_v39, %v525_v46  ;;  %v5652_v50 = vpack.c.bf16 %v525_v46, %v523_v38  ;;  %v603_v18 = vrot.slane %v602_v3, 2 }
 0x13d   :  { %v439_v51 = vpop.f32.mrf.mxu1 }
 0x13e   :  { %1260 = vmatmul.bf16.gmra.mxu0 %v5652_v50  ;;  %v318_v52 = vpack.c.bf16 %v297_v48, %v296_v47  ;;  %v610_v4 = vrot.slane %v609_v49, 4  ;;  %v604_v23 = vmax.f32 %v602_v3, %v603_v18  ;;  %v4463_v18 = vld [vmem:[#allocation5 + $0x1b0] sm:$0xf0] }
 0x140   :  { %478 = vmatmul.bf16.gmra.mxu1 %v318_v52  ;;  %567 = vmatmul.bf16.gmra.mxu2 %v318_v52  ;;  %v611_v20 = vmax.f32 %v609_v49, %v610_v4  ;;  %v605_v31 = vrot.slane %v604_v23, 1 }
 0x141   :  { %v251_v53 = vpop.f32.mrf.mxu0 }
 0x142   :  { %v252_v58 = vadd.f32 %v5569_v14, %v251_v53  ;;  %v612_v28 = vrot.slane %v611_v20, 2  ;;  %v606_v44 = vmax.f32 %v604_v23, %v605_v31 }
 0x143   :  { %v528_v54 = vpop.f32.mrf.mxu2 }
 0x144   :  { %v298_v63 = vmax.f32 %v252_v58, 0.0  ;;  %v613_v36 = vmax.f32 %v611_v20, %v612_v28  ;;  %v1870_v53 = vpack.c.bf16 %v606_v44, %v606_v44  ;;  %v5059_v58 = vld [vmem:[#allocation5 + $0xc4] sm:$0xf]  ;;  %v4319_v28 = vld [vmem:[#allocation5 + $0x90] sm:$0xf0] }
 0x145   :  { %v441_v55 = vpop.f32.mrf.mxu1 }
 0x146   :  { %v616_v56 = vmax.f32 %v439_v51, %v441_v55  ;;  %v5655_v57 = vpack.c.bf16 %v441_v55, %v439_v51  ;;  %v614_v49 = vrot.slane %v613_v36, 1 }
 0x148   :  { %1176 = vmatmul.bf16.gmra.mxu3 %v5655_v57 }
 0x149   :  { %v253_v60 = vpop.f32.mrf.mxu0 }
 0x14a   :  { %v254_v61 = vadd.f32 %v5569_v14, %v253_v60  ;;  %v615_v60 = vmax.f32 %v613_v36, %v614_v49  ;;  %v5047_v49 = vld [vmem:[#allocation5 + $0x64] sm:$0xf] }
 0x14b   :  { %v530_v62 = vpop.f32.mrf.mxu2 }
 0x14c   :  { %v299_v0 = vmax.f32 %v254_v61, 0.0  ;;  %v625_v1 = vmax.f32 %v528_v54, %v530_v62  ;;  %v5660_v2 = vpack.c.bf16 %v530_v62, %v528_v54  ;;  %v4354_v62 = vor.u32 %v5059_v58, %v4351_v59  ;;  %v5043_v59 = vld [vmem:[#allocation5 + $0x44] sm:$0xf] }
 0x14d   :  { %v444_v5 = vpop.f32.mrf.mxu1  ;;  %v1871_v13 = vpack.c.bf16 %v615_v60, %v615_v60  ;;  %v4287_v60 = vld [vmem:[#allocation5 + $0x50] sm:$0xf0] }
 0x14e   :  { %v617_v6 = vmax.f32 %v616_v56, %v444_v5  ;;  %1265 = vmatmul.bf16.gmra.mxu0 %v5660_v2  ;;  %v319_v7 = vpack.c.bf16 %v299_v0, %v298_v63  ;;  %v5091_v63 = vld [vmem:[#allocation5 + $0x1c4] sm:$0xf]  ;;  %v4479_v0 = vld [vmem:[#allocation5 + $0x1d0] sm:$0xf0]  ;;  %1337 = vmatpush.bf16.msrb.mxu1 %v4354_v62 }
 0x14f   :  { %v4482_v4 = vor.u32 %v5091_v63, %v4479_v0  ;;  %v4290_v63 = vor.u32 %v5043_v59, %v4287_v60  ;;  %v4415_v0 = vld [vmem:[#allocation5 + $0x150] sm:$0xf0] }
 0x150   :  { %483 = vmatmul.bf16.gmra.mxu1 %v319_v7  ;;  %572 = vmatmul.bf16.gmra.mxu2 %v319_v7 }
 0x151   :  { %v256_v19 = vpop.f32.mrf.mxu0  ;;  %1426 = vmatpush.bf16.msrb.mxu2 %v4482_v4 }
 0x152   :  { %v257_v29 = vadd.f32 %v5569_v14, %v256_v19  ;;  %1338 = vmatpush.bf16.msrb.mxu1 %v4338_v16 }
 0x153   :  { %v533_v21 = vpop.f32.mrf.mxu2 }
 0x154   :  { %v626_v22 = vmax.f32 %v625_v1, %v533_v21  ;;  %v300_v37 = vmax.f32 %v257_v29, 0.0  ;;  %v5083_v29 = vld [vmem:[#allocation5 + $0x184] sm:$0xf] }
 0x155   :  { %v446_v24 = vpop.f32.mrf.mxu1 }
 0x156   :  { %v618_v26 = vmax.f32 %v617_v6, %v446_v24  ;;  %v5663_v27 = vpack.c.bf16 %v446_v24, %v444_v5  ;;  %v1976_v5 = vunpack.c.l.b16 %v1870_v53  ;;  %v5079_v53 = vld [vmem:[#allocation5 + $0x164] sm:$0xf] }
 0x158   :  { %v619_v30 = vrot.slane %v618_v26, 4  ;;  %1181 = vmatmul.bf16.gmra.mxu3 %v5663_v27 }
 0x159   :  { %v258_v32 = vpop.f32.mrf.mxu0 }
 0x15a   :  { %v620_v34 = vmax.f32 %v618_v26, %v619_v30  ;;  %v259_v35 = vadd.f32 %v5569_v14, %v258_v32  ;;  %v5051_v26 = vld [vmem:[#allocation5 + $0x84] sm:$0xf]  ;;  %v1977_v30 = vunpack.c.l.b16 %v1871_v13  ;;  %v4399_v13 = vld [vmem:[#allocation5 + $0x130] sm:$0xf0] }
 0x15b   :  { %v535_v38 = vpop.f32.mrf.mxu2 }
 0x15c   :  { %v621_v39 = vrot.slane %v620_v34, 2  ;;  %v301_v40 = vmax.f32 %v259_v35, 0.0  ;;  %v627_v41 = vmax.f32 %v626_v22, %v535_v38  ;;  %v5668_v43 = vpack.c.bf16 %v535_v38, %v533_v21  ;;  %v4447_v35 = vld [vmem:[#allocation5 + $0x190] sm:$0xf0] }
 0x15d   :  { %v5670_v45 = vpop.f32.mrf.mxu1  ;;  %v4466_v21 = vor.u32 %v5087_v17, %v4463_v18 }
 0x15e   :  { %v622_v46 = vmax.f32 %v620_v34, %v621_v39  ;;  %v628_v47 = vrot.slane %v627_v41, 4  ;;  %1270 = vmatmul.bf16.gmra.mxu0 %v5668_v43  ;;  %v320_v48 = vpack.c.bf16 %v301_v40, %v300_v37  ;;  %v4322_v34 = vor.u32 %v5051_v26, %v4319_v28 }
 0x15f   :  { %1427 = vmatpush.bf16.msrb.mxu2 %v4466_v21  ;;  %v5035_v21 = vld [vmem:[#allocation5 + $0x4] sm:$0xf] }
 0x160   :  { %v623_v51 = vrot.slane %v622_v46, 1  ;;  %v629_v52 = vmax.f32 %v627_v41, %v628_v47  ;;  %488 = vmatmul.bf16.gmra.mxu1 %v320_v48  ;;  %577 = vmatmul.bf16.gmra.mxu2 %v320_v48  ;;  %v4450_v41 = vor.u32 %v5083_v29, %v4447_v35  ;;  %v4357_v47 = vld [vmem:[#allocation5 + $0xc8] sm:$0xf]  ;;  %v5062_v48 = vld [vmem:[#allocation5 + $0xd4] sm:$0xf0] }
 0x161   :  { %v261_v54 = vpop.f32.mrf.mxu0  ;;  %1339 = vmatpush.bf16.msrb.mxu1 %v4322_v34  ;;  %v4383_v29 = vld [vmem:[#allocation5 + $0x110] sm:$0xf0] }
 0x162   :  { %v624_v55 = vmax.f32 %v622_v46, %v623_v51  ;;  %v630_v56 = vrot.slane %v629_v52, 2  ;;  %v262_v15 = vadd.f32 %v5569_v14, %v261_v54  ;;  %v4358_v51 = vor.u32 %v5062_v48, %v4357_v47  ;;  %v4431_v54 = vld [vmem:[#allocation5 + $0x170] sm:$0xf0] }
 0x163   :  { %v5673_v61 = vpop.f32.mrf.mxu2  ;;  %1428 = vmatpush.bf16.msrb.mxu2 %v4450_v41 }
 0x164   :  { %v1872_v1 = vpack.c.bf16 %v624_v55, %v624_v55  ;;  %v631_v3 = vmax.f32 %v629_v52, %v630_v56  ;;  %v302_v31 = vmax.f32 %v262_v15, 0.0  ;;  %v4303_v52 = vld [vmem:[#allocation5 + $0x70] sm:$0xf0]  ;;  %v4434_v56 = vor.u32 %v5079_v53, %v4431_v54  ;;  %1515 = vmatpush.bf16.msrb.mxu3 %v4358_v51 }
 0x165   :  { %v451_v6 = vpop.f32.mrf.mxu1  ;;  %v4306_v55 = vor.u32 %v5047_v49, %v4303_v52 }
 0x166   :  { %v1978_v7 = vunpack.c.l.b16 %v1872_v1  ;;  %v632_v8 = vrot.slane %v631_v3, 1  ;;  %v634_v9 = vmax.f32 %v5670_v45, %v451_v6  ;;  %v5677_v10 = vpack.c.bf16 %v451_v6, %v5670_v45 }
 0x167   :  { %1340 = vmatpush.bf16.msrb.mxu1 %v4306_v55  ;;  %1429 = vmatpush.bf16.msrb.mxu2 %v4434_v56 }
 0x168   :  { %v5681_v19 = vsel %vm1992_vm2, %v1978_v7, %v1976_v5  ;;  %v633_v20 = vmax.f32 %v631_v3, %v632_v8  ;;  %1186 = vmatmul.bf16.gmra.mxu3 %v5677_v10  ;;  %v5039_v7 = vld [vmem:[#allocation5 + $0x24] sm:$0xf]  ;;  %v4271_v8 = vld [vmem:[#allocation5 + $0x30] sm:$0xf0] }
 0x169   :  { %v263_v22 = vpop.f32.mrf.mxu0  ;;  %v4274_v12 = vor.u32 %v5039_v7, %v4271_v8 }
 0x16a   :  { %v1873_v23 = vpack.c.bf16 %v633_v20, %v633_v20  ;;  %v264_v24 = vadd.f32 %v5569_v14, %v263_v22  ;;  %v4255_v22 = vld [vmem:[#allocation5 + $0x10] sm:$0xf0] }
 0x16b   :  { %v540_v32 = vpop.f32.mrf.mxu2  ;;  %1341 = vmatpush.bf16.msrb.mxu1 %v4290_v63  ;;  %v4258_v28 = vor.u32 %v5035_v21, %v4255_v22 }
 0x16c   :  { %v1979_v36 = vunpack.c.l.b16 %v1873_v23  ;;  %v303_v37 = vmax.f32 %v264_v24, 0.0  ;;  %v643_v38 = vmax.f32 %v5673_v61, %v540_v32  ;;  %v5687_v39 = vpack.c.bf16 %v540_v32, %v5673_v61  ;;  %v5075_v61 = vld [vmem:[#allocation5 + $0x144] sm:$0xf] }
 0x16d   :  { %v454_v40 = vpop.f32.mrf.mxu1  ;;  %v4418_v3 = vor.u32 %v5075_v61, %v4415_v0  ;;  %v5067_v23 = vld [vmem:[#allocation5 + $0x104] sm:$0xf] }
 0x16e   :  { %v5690_v44 = vsel %vm1992_vm2, %v1979_v36, %v1977_v30  ;;  %v635_v45 = vmax.f32 %v634_v9, %v454_v40  ;;  %1275 = vmatmul.bf16.gmra.mxu0 %v5687_v39  ;;  %v321_v46 = vpack.c.bf16 %v303_v37, %v302_v31  ;;  %v5071_v9 = vld [vmem:[#allocation5 + $0x124] sm:$0xf]  ;;  %v4386_v36 = vor.u32 %v5067_v23, %v4383_v29 }
 0x16f   :  { %1430 = vmatpush.bf16.msrb.mxu2 %v4418_v3  ;;  %v4402_v16 = vor.u32 %v5071_v9, %v4399_v13  ;;  %1342 = vmatpush.bf16.msrb.mxu1 %v4274_v12  ;;  %v4341_v13 = vld [vmem:[#allocation5 + $0xa8] sm:$0xf] }
 0x170   :  { %493 = vmatmul.bf16.gmra.mxu1 %v321_v46  ;;  %582 = vmatmul.bf16.gmra.mxu2 %v321_v46 }
 0x171   :  { %v266_v58 = vpop.f32.mrf.mxu0 }
 0x172   :  { %v267_v11 = vadd.f32 %v5569_v14, %v266_v58 }
 0x173   :  { %v543_v62 = vpop.f32.mrf.mxu2  ;;  %1431 = vmatpush.bf16.msrb.mxu2 %v4402_v16  ;;  %1343 = vmatpush.bf16.msrb.mxu1 %v4258_v28 }
 0x174   :  { %v644_v1 = vmax.f32 %v643_v38, %v543_v62  ;;  %v304_v24 = vmax.f32 %v267_v11, 0.0 }
 0x175   :  { %v456_v4 = vpop.f32.mrf.mxu1 }
 0x176   :  { %v636_v5 = vmax.f32 %v635_v45, %v456_v4  ;;  %v5693_v6 = vpack.c.bf16 %v456_v4, %v454_v40 }
 0x177   :  { %1432 = vmatpush.bf16.msrb.mxu2 %v4386_v36 }
 0x178   :  { %v637_v15 = vrot.slane %v636_v5, 4  ;;  %1191 = vmatmul.bf16.gmra.mxu3 %v5693_v6 }
 0x179   :  { %v268_v17 = vpop.f32.mrf.mxu0 }
 0x17a   :  { %v638_v18 = vmax.f32 %v636_v5, %v637_v15  ;;  %v269_v20 = vadd.f32 %v5569_v14, %v268_v17  ;;  %v5058_v15 = vld [vmem:[#allocation5 + $0xb4] sm:$0xf0] }
 0x17b   :  { %v545_v26 = vpop.f32.mrf.mxu2  ;;  %v4342_v16 = vor.u32 %v5058_v15, %v4341_v13 }
 0x17c   :  { %v639_v30 = vrot.slane %v638_v18, 2  ;;  %v305_v31 = vmax.f32 %v269_v20, 0.0  ;;  %v645_v32 = vmax.f32 %v644_v1, %v545_v26  ;;  %v5698_v34 = vpack.c.bf16 %v545_v26, %v543_v62 }
 0x17d   :  { %v459_v35 = vpop.f32.mrf.mxu1  ;;  %1516 = vmatpush.bf16.msrb.mxu3 %v4342_v16 }
 0x17e   :  { %v640_v37 = vmax.f32 %v638_v18, %v639_v30  ;;  %v646_v38 = vrot.slane %v645_v32, 4  ;;  %1280 = vmatmul.bf16.gmra.mxu0 %v5698_v34  ;;  %v322_v40 = vpack.c.bf16 %v305_v31, %v304_v24 }
 0x180   :  { %v641_v41 = vrot.slane %v640_v37, 1  ;;  %v647_v45 = vmax.f32 %v645_v32, %v646_v38  ;;  %498 = vmatmul.bf16.gmra.mxu1 %v322_v40  ;;  %587 = vmatmul.bf16.gmra.mxu2 %v322_v40 }
 0x181   :  { %v271_v46 = vpop.f32.mrf.mxu0 }
 0x182   :  { %v642_v47 = vmax.f32 %v640_v37, %v641_v41  ;;  %v648_v48 = vrot.slane %v647_v45, 2  ;;  %v272_v59 = vadd.f32 %v5569_v14, %v271_v46 }
 0x183   :  { %v548_v49 = vpop.f32.mrf.mxu2 }
 0x184   :  { %v1874_v51 = vpack.c.bf16 %v642_v47, %v642_v47  ;;  %v649_v52 = vmax.f32 %v647_v45, %v648_v48  ;;  %v306_v1 = vmax.f32 %v272_v59, 0.0 }
 0x185   :  { %v461_v53 = vpop.f32.mrf.mxu1 }
 0x186   :  { %v1980_v54 = vunpack.c.l.b16 %v1874_v51  ;;  %v650_v55 = vrot.slane %v649_v52, 1  ;;  %v652_v56 = vmax.f32 %v459_v35, %v461_v53  ;;  %v5701_v58 = vpack.c.bf16 %v461_v53, %v459_v35 }
 0x188   :  { %v1995_v60 = vsel %vm1994_vm3, %v1980_v54, %v5681_v19  ;;  %v651_v61 = vmax.f32 %v649_v52, %v650_v55  ;;  %1196 = vmatmul.bf16.gmra.mxu3 %v5701_v58 }
 0x189   :  { %v273_v62 = vpop.f32.mrf.mxu0 }
 0x18a   :  { %v1875_v63 = vpack.c.bf16 %v651_v61, %v651_v61  ;;  %v274_v0 = vadd.f32 %v5569_v14, %v273_v62 }
 0x18b   :  { %v550_v3 = vpop.f32.mrf.mxu2 }
 0x18c   :  { %v1981_v4 = vunpack.c.l.b16 %v1875_v63  ;;  %v307_v5 = vmax.f32 %v274_v0, 0.0  ;;  %v661_v7 = vmax.f32 %v548_v49, %v550_v3  ;;  %v5708_v8 = vpack.c.bf16 %v550_v3, %v548_v49 }
 0x18d   :  { %v464_v9 = vpop.f32.mrf.mxu1 }
 0x18e   :  { %v2007_v11 = vsel %vm1994_vm3, %v1981_v4, %v5690_v44  ;;  %v653_v12 = vmax.f32 %v652_v56, %v464_v9  ;;  %1285 = vmatmul.bf16.gmra.mxu0 %v5708_v8  ;;  %v323_v19 = vpack.c.bf16 %v307_v5, %v306_v1  ;;  %v5054_v4 = vld [vmem:[#allocation5 + $0x94] sm:$0xf0] }
 0x190   :  { %503 = vmatmul.bf16.gmra.mxu1 %v323_v19  ;;  %592 = vmatmul.bf16.gmra.mxu2 %v323_v19 }
 0x193   :  { %v553_v14 = vpop.f32.mrf.mxu2 }
 0x194   :  { %v662_v17 = vmax.f32 %v661_v7, %v553_v14 }
 0x195   :  { %v466_v18 = vpop.f32.mrf.mxu1 }
 0x196   :  { %v654_v20 = vmax.f32 %v653_v12, %v466_v18  ;;  %v5713_v21 = vpack.c.bf16 %v466_v18, %v464_v9 }
 0x198   :  { %v655_v22 = vrot.slane %v654_v20, 4  ;;  %1201 = vmatmul.bf16.gmra.mxu3 %v5713_v21 }
 0x19a   :  { %v656_v44 = vmax.f32 %v654_v20, %v655_v22 }
 0x19b   :  { %v555_v23 = vpop.f32.mrf.mxu2 }
 0x19c   :  { %v657_v24 = vrot.slane %v656_v44, 2  ;;  %v663_v26 = vmax.f32 %v662_v17, %v555_v23  ;;  %v5716_v28 = vpack.c.bf16 %v555_v23, %v553_v14 }
 0x19d   :  { %v469_v29 = vpop.f32.mrf.mxu1 }
 0x19e   :  { %v658_v30 = vmax.f32 %v656_v44, %v657_v24  ;;  %v664_v31 = vrot.slane %v663_v26, 4  ;;  %1290 = vmatmul.bf16.gmra.mxu0 %v5716_v28 }
 0x1a0   :  { %v659_v32 = vrot.slane %v658_v30, 1  ;;  %v665_v35 = vmax.f32 %v663_v26, %v664_v31  ;;  %1344 = vmatmul.bf16.vlgmr.msrb.gmra.mxu1 %v5639_v25  ;;  %1433 = vmatmul.bf16.vlgmr.msrb.gmra.mxu2 %v5644_v33 }
 0x1a2   :  { %v660_v36 = vmax.f32 %v658_v30, %v659_v32  ;;  %v666_v37 = vrot.slane %v665_v35, 2 }
 0x1a3   :  { %v558_v38 = vpop.f32.mrf.mxu2 }
 0x1a4   :  { %v1876_v40 = vpack.c.bf16 %v660_v36, %v660_v36  ;;  %v667_v41 = vmax.f32 %v665_v35, %v666_v37 }
 0x1a5   :  { %v471_v45 = vpop.f32.mrf.mxu1 }
 0x1a6   :  { %v1982_v46 = vunpack.c.l.b16 %v1876_v40  ;;  %v668_v47 = vrot.slane %v667_v41, 1  ;;  %v670_v48 = vmax.f32 %v469_v29, %v471_v45  ;;  %v5721_v49 = vpack.c.bf16 %v471_v45, %v469_v29 }
 0x1a8   :  { %v1997_v51 = vsel %vm1996_vm4, %v1982_v46, %v1995_v60  ;;  %v669_v52 = vmax.f32 %v667_v41, %v668_v47  ;;  %1206 = vmatmul.bf16.gmra.mxu3 %v5721_v49  ;;  %v4325_v60 = vld [vmem:[#allocation5 + $0x88] sm:$0xf] }
 0x1a9   :  { %v4326_v5 = vor.u32 %v5054_v4, %v4325_v60 }
 0x1aa   :  { %v1877_v53 = vpack.c.bf16 %v669_v52, %v669_v52 }
 0x1ab   :  { %v560_v54 = vpop.f32.mrf.mxu2  ;;  %v1167_v55 = vpop.f32.mrf.mxu3  ;;  %1517 = vmatpush.bf16.msrb.mxu3 %v4326_v5 }
 0x1ac   :  { %v1983_v56 = vunpack.c.l.b16 %v1877_v53  ;;  %v679_v59 = vmax.f32 %v558_v38, %v560_v54  ;;  %v5725_v61 = vpack.c.bf16 %v560_v54, %v558_v38  ;;  %v1256_v62 = vpop.f32.mrf.mxu0 }
 0x1ad   :  { %v5727_v63 = vadd.f32 %v1256_v62, %v1167_v55  ;;  %v474_v0 = vpop.f32.mrf.mxu1 }
 0x1ae   :  { %v2008_v1 = vsel %vm1996_vm4, %v1983_v56, %v2007_v11  ;;  %v671_v3 = vmax.f32 %v670_v48, %v474_v0  ;;  %1295 = vmatmul.bf16.gmra.mxu0 %v5725_v61 }
 0x1b0   :  { %1349 = vmatmul.bf16.gmra.mxu1 %v5647_v42  ;;  %1438 = vmatmul.bf16.gmra.mxu2 %v5652_v50 }
 0x1b3   :  { %v563_v7 = vpop.f32.mrf.mxu2  ;;  %v1169_v9 = vpop.f32.mrf.mxu3 }
 0x1b4   :  { %v680_v12 = vmax.f32 %v679_v59, %v563_v7  ;;  %v1258_v19 = vpop.f32.mrf.mxu0 }
 0x1b5   :  { %v5733_v13 = vadd.f32 %v1258_v19, %v1169_v9  ;;  %v476_v15 = vpop.f32.mrf.mxu1 }
 0x1b6   :  { %v672_v16 = vmax.f32 %v671_v3, %v476_v15  ;;  %v5735_v11 = vpack.c.bf16 %v476_v15, %v474_v0 }
 0x1b7   :  { %6935 = vst [vmem:[#allocation12_spill] sm:$0xff] %v5733_v13 }
 0x1b8   :  { %v673_v14 = vrot.slane %v672_v16, 4  ;;  %1211 = vmatmul.bf16.gmra.mxu3 %v5735_v11 }
 0x1ba   :  { %v674_v17 = vmax.f32 %v672_v16, %v673_v14  ;;  %v5050_v16 = vld [vmem:[#allocation5 + $0x74] sm:$0xf0] }
 0x1bb   :  { %v565_v18 = vpop.f32.mrf.mxu2  ;;  %v1172_v20 = vpop.f32.mrf.mxu3 }
 0x1bc   :  { %v675_v22 = vrot.slane %v674_v17, 2  ;;  %v681_v44 = vmax.f32 %v680_v12, %v565_v18  ;;  %v5738_v23 = vpack.c.bf16 %v565_v18, %v563_v7  ;;  %v1261_v24 = vpop.f32.mrf.mxu0 }
 0x1bd   :  { %v5740_v26 = vadd.f32 %v1261_v24, %v1172_v20  ;;  %v479_v29 = vpop.f32.mrf.mxu1 }
 0x1be   :  { %v676_v30 = vmax.f32 %v674_v17, %v675_v22  ;;  %v682_v31 = vrot.slane %v681_v44, 4  ;;  %1300 = vmatmul.bf16.gmra.mxu0 %v5738_v23 }
 0x1bf   :  { %6936 = vst [vmem:[#allocation13_spill] sm:$0xff] %v5740_v26  ;;  %v5186_v26 = vld [vmem:[#allocation7 + $0xb4] sm:$0xf0] }
 0x1c0   :  { %v677_v32 = vrot.slane %v676_v30, 1  ;;  %v683_v35 = vmax.f32 %v681_v44, %v682_v31  ;;  %1354 = vmatmul.bf16.gmra.mxu1 %v5655_v57  ;;  %1443 = vmatmul.bf16.gmra.mxu2 %v5660_v2 }
 0x1c2   :  { %v678_v36 = vmax.f32 %v676_v30, %v677_v32  ;;  %v684_v37 = vrot.slane %v683_v35, 2 }
 0x1c3   :  { %v568_v38 = vpop.f32.mrf.mxu2  ;;  %v1174_v40 = vpop.f32.mrf.mxu3 }
 0x1c4   :  { %v1878_v41 = vpack.c.bf16 %v678_v36, %v678_v36  ;;  %v685_v45 = vmax.f32 %v683_v35, %v684_v37  ;;  %v1263_v46 = vpop.f32.mrf.mxu0 }
 0x1c5   :  { %v5745_v47 = vadd.f32 %v1263_v46, %v1174_v40  ;;  %v481_v48 = vpop.f32.mrf.mxu1 }
 0x1c6   :  { %v1984_v52 = vunpack.c.l.b16 %v1878_v41  ;;  %v686_v53 = vrot.slane %v685_v45, 1  ;;  %v688_v54 = vmax.f32 %v479_v29, %v481_v48  ;;  %v5747_v55 = vpack.c.bf16 %v481_v48, %v479_v29 }
 0x1c7   :  { %6937 = vst [vmem:[#allocation14_spill] sm:$0xff] %v5745_v47  ;;  %v5170_v47 = vld [vmem:[#allocation7 + $0x34] sm:$0xf0] }
 0x1c8   :  { %v1999_v56 = vsel %vm1998_vm5, %v1984_v52, %v1997_v51  ;;  %v687_v59 = vmax.f32 %v685_v45, %v686_v53  ;;  %1216 = vmatmul.bf16.gmra.mxu3 %v5747_v55  ;;  %v4309_v51 = vld [vmem:[#allocation5 + $0x68] sm:$0xf] }
 0x1c9   :  { %v4310_v14 = vor.u32 %v5050_v16, %v4309_v51 }
 0x1ca   :  { %v1879_v62 = vpack.c.bf16 %v687_v59, %v687_v59 }
 0x1cb   :  { %v570_v0 = vpop.f32.mrf.mxu2  ;;  %v1177_v3 = vpop.f32.mrf.mxu3  ;;  %1518 = vmatpush.bf16.msrb.mxu3 %v4310_v14 }
 0x1cc   :  { %v1985_v60 = vunpack.c.l.b16 %v1879_v62  ;;  %v697_v4 = vmax.f32 %v568_v38, %v570_v0  ;;  %v5751_v5 = vpack.c.bf16 %v570_v0, %v568_v38  ;;  %v1266_v7 = vpop.f32.mrf.mxu0 }
 0x1cd   :  { %v5753_v9 = vadd.f32 %v1266_v7, %v1177_v3  ;;  %v484_v12 = vpop.f32.mrf.mxu1 }
 0x1ce   :  { %v5756_v19 = vsel %vm1998_vm5, %v1985_v60, %v2008_v1  ;;  %v689_v15 = vmax.f32 %v688_v54, %v484_v12  ;;  %1305 = vmatmul.bf16.gmra.mxu0 %v5751_v5 }
 0x1cf   :  { %6938 = vst [vmem:[#allocation15_spill] sm:$0xff] %v5753_v9  ;;  %v5190_v9 = vld [vmem:[#allocation7 + $0xd4] sm:$0xf0] }
 0x1d0   :  { %1359 = vmatmul.bf16.gmra.mxu1 %v5663_v27  ;;  %1448 = vmatmul.bf16.gmra.mxu2 %v5668_v43 }
 0x1d3   :  { %v573_v17 = vpop.f32.mrf.mxu2  ;;  %v1179_v18 = vpop.f32.mrf.mxu3 }
 0x1d4   :  { %v698_v20 = vmax.f32 %v697_v4, %v573_v17  ;;  %v1268_v22 = vpop.f32.mrf.mxu0 }
 0x1d5   :  { %v5761_v44 = vadd.f32 %v1268_v22, %v1179_v18  ;;  %v486_v24 = vpop.f32.mrf.mxu1 }
 0x1d6   :  { %v690_v1 = vmax.f32 %v689_v15, %v486_v24  ;;  %v5763_v29 = vpack.c.bf16 %v486_v24, %v484_v12 }
 0x1d7   :  { %6939 = vst [vmem:[#allocation16_spill] sm:$0xff] %v5761_v44 }
 0x1d8   :  { %v691_v30 = vrot.slane %v690_v1, 4  ;;  %1221 = vmatmul.bf16.gmra.mxu3 %v5763_v29 }
 0x1da   :  { %v692_v31 = vmax.f32 %v690_v1, %v691_v30 }
 0x1db   :  { %v575_v32 = vpop.f32.mrf.mxu2  ;;  %v1182_v35 = vpop.f32.mrf.mxu3 }
 0x1dc   :  { %v693_v36 = vrot.slane %v692_v31, 2  ;;  %v699_v37 = vmax.f32 %v698_v20, %v575_v32  ;;  %v5766_v38 = vpack.c.bf16 %v575_v32, %v573_v17  ;;  %v1271_v40 = vpop.f32.mrf.mxu0 }
 0x1dd   :  { %v5768_v41 = vadd.f32 %v1271_v40, %v1182_v35  ;;  %v489_v45 = vpop.f32.mrf.mxu1  ;;  %v4293_v35 = vld [vmem:[#allocation5 + $0x48] sm:$0xf] }
 0x1de   :  { %v694_v46 = vmax.f32 %v692_v31, %v693_v36  ;;  %v700_v48 = vrot.slane %v699_v37, 4  ;;  %1310 = vmatmul.bf16.gmra.mxu0 %v5766_v38  ;;  %v5046_v36 = vld [vmem:[#allocation5 + $0x54] sm:$0xf0] }
 0x1df   :  { %6940 = vst [vmem:[#allocation17_spill] sm:$0xff] %v5768_v41  ;;  %v5125_v41 = vld [vmem:[#allocation2 + $0xcc] sm:$0xf0] }
 0x1e0   :  { %v695_v52 = vrot.slane %v694_v46, 1  ;;  %v701_v53 = vmax.f32 %v699_v37, %v700_v48  ;;  %1364 = vmatmul.bf16.gmra.mxu1 %v5677_v10  ;;  %1453 = vmatmul.bf16.gmra.mxu2 %v5687_v39 }
 0x1e2   :  { %v696_v54 = vmax.f32 %v694_v46, %v695_v52  ;;  %v702_v59 = vrot.slane %v701_v53, 2  ;;  %v4501_v46 = vld [vmem:[#allocation5 + $0x1e8] sm:$0xf] }
 0x1e3   :  { %v578_v62 = vpop.f32.mrf.mxu2  ;;  %v1184_v0 = vpop.f32.mrf.mxu3 }
 0x1e4   :  { %v1880_v3 = vpack.c.bf16 %v696_v54, %v696_v54  ;;  %v703_v60 = vmax.f32 %v701_v53, %v702_v59  ;;  %v1273_v4 = vpop.f32.mrf.mxu0  ;;  %v4485_v54 = vld [vmem:[#allocation5 + $0x1c8] sm:$0xf]  ;;  %v5094_v59 = vld [vmem:[#allocation5 + $0x1d4] sm:$0xf0] }
 0x1e5   :  { %v5773_v7 = vadd.f32 %v1273_v4, %v1184_v0  ;;  %v491_v12 = vpop.f32.mrf.mxu1 }
 0x1e6   :  { %v1986_v15 = vunpack.c.l.b16 %v1880_v3  ;;  %v704_v51 = vrot.slane %v703_v60, 1  ;;  %v706_v16 = vmax.f32 %v489_v45, %v491_v12  ;;  %v5775_v14 = vpack.c.bf16 %v491_v12, %v489_v45 }
 0x1e7   :  { %6941 = vst [vmem:[#allocation18_spill] sm:$0xff] %v5773_v7  ;;  %v4294_v45 = vor.u32 %v5046_v36, %v4293_v35  ;;  %v4605_v7 = vld [vmem:[#allocation2 + $0xc0] sm:$0xf] }
 0x1e8   :  { %v5778_v17 = vsel %vm2000_vm6, %v1986_v15, %v1999_v56  ;;  %v705_v18 = vmax.f32 %v703_v60, %v704_v51  ;;  %1226 = vmatmul.bf16.gmra.mxu3 %v5775_v14  ;;  %v5098_v56 = vld [vmem:[#allocation5 + $0x1f4] sm:$0xf0]  ;;  %v4469_v15 = vld [vmem:[#allocation5 + $0x1a8] sm:$0xf]  ;;  %v4606_v44 = vor.u32 %v5125_v41, %v4605_v7  ;;  %v5048_v41 = vld [vmem:[#allocation5 + $0x6c] sm:$0xf] }
 0x1e9   :  { %v4502_v53 = vor.u32 %v5098_v56, %v4501_v46  ;;  %1519 = vmatpush.bf16.msrb.mxu3 %v4294_v45  ;;  %v5090_v51 = vld [vmem:[#allocation5 + $0x1b4] sm:$0xf0]  ;;  %v4311_v7 = vld [vmem:[#allocation5 + $0x78] sm:$0xf0] }
 0x1ea   :  { %v1881_v20 = vpack.c.bf16 %v705_v18, %v705_v18 }
 0x1eb   :  { %v580_v22 = vpop.f32.mrf.mxu2  ;;  %v1187_v24 = vpop.f32.mrf.mxu3  ;;  %1603 = vmatpush.bf16.msra.mxu0 %v4502_v53 }
 0x1ec   :  { %v1987_v1 = vunpack.c.l.b16 %v1881_v20  ;;  %v715_v30 = vmax.f32 %v578_v62, %v580_v22  ;;  %v5781_v31 = vpack.c.bf16 %v580_v22, %v578_v62  ;;  %v1276_v32 = vpop.f32.mrf.mxu0  ;;  %v4486_v62 = vor.u32 %v5094_v59, %v4485_v54  ;;  %v5082_v59 = vld [vmem:[#allocation5 + $0x174] sm:$0xf0] }
 0x1ed   :  { %v5783_v37 = vadd.f32 %v1276_v32, %v1187_v24  ;;  %v494_v40 = vpop.f32.mrf.mxu1  ;;  %v4470_v20 = vor.u32 %v5090_v51, %v4469_v15  ;;  %v4453_v24 = vld [vmem:[#allocation5 + $0x188] sm:$0xf]  ;;  %v5042_v15 = vld [vmem:[#allocation5 + $0x34] sm:$0xf0] }
 0x1ee   :  { %v5787_v48 = vsel %vm2000_vm6, %v1987_v1, %v5756_v19  ;;  %v707_v52 = vmax.f32 %v706_v16, %v494_v40  ;;  %1315 = vmatmul.bf16.gmra.mxu0 %v5781_v31  ;;  %v5086_v1 = vld [vmem:[#allocation5 + $0x194] sm:$0xf0] }
 0x1ef   :  { %6942 = vst [vmem:[#allocation19_spill] sm:$0xff] %v5783_v37  ;;  %1604 = vmatpush.bf16.msra.mxu0 %v4486_v62  ;;  %v4454_v35 = vor.u32 %v5086_v1, %v4453_v24 }
 0x1f0   :  { %1369 = vmatmul.bf16.gmra.mxu1 %v5693_v6  ;;  %1458 = vmatmul.bf16.gmra.mxu2 %v5698_v34 }
 0x1f3   :  { %v583_v0 = vpop.f32.mrf.mxu2  ;;  %v1189_v3 = vpop.f32.mrf.mxu3  ;;  %1605 = vmatpush.bf16.msra.mxu0 %v4470_v20  ;;  %v5078_v20 = vld [vmem:[#allocation5 + $0x154] sm:$0xf0] }
 0x1f4   :  { %v716_v60 = vmax.f32 %v715_v30, %v583_v0  ;;  %v1278_v4 = vpop.f32.mrf.mxu0 }
 0x1f5   :  { %v5792_v12 = vadd.f32 %v1278_v4, %v1189_v3  ;;  %v496_v19 = vpop.f32.mrf.mxu1 }
 0x1f6   :  { %v708_v16 = vmax.f32 %v707_v52, %v496_v19  ;;  %v5794_v18 = vpack.c.bf16 %v496_v19, %v494_v40  ;;  %v4437_v52 = vld [vmem:[#allocation5 + $0x168] sm:$0xf] }
 0x1f7   :  { %6943 = vst [vmem:[#allocation20_spill] sm:$0xff] %v5792_v12  ;;  %1606 = vmatpush.bf16.msra.mxu0 %v4454_v35  ;;  %v4438_v4 = vor.u32 %v5082_v59, %v4437_v52  ;;  %v4277_v19 = vld [vmem:[#allocation5 + $0x28] sm:$0xf] }
 0x1f8   :  { %v709_v22 = vrot.slane %v708_v16, 4  ;;  %1231 = vmatmul.bf16.gmra.mxu3 %v5794_v18 }
 0x1fa   :  { %v710_v32 = vmax.f32 %v708_v16, %v709_v22 }
 0x1fb   :  { %v585_v30 = vpop.f32.mrf.mxu2  ;;  %v1192_v36 = vpop.f32.mrf.mxu3  ;;  %1607 = vmatpush.bf16.msra.mxu0 %v4438_v4  ;;  %v5074_v4 = vld [vmem:[#allocation5 + $0x134] sm:$0xf0] }
 0x1fc   :  { %v711_v45 = vrot.slane %v710_v32, 2  ;;  %v717_v46 = vmax.f32 %v716_v60, %v585_v30  ;;  %v5797_v56 = vpack.c.bf16 %v585_v30, %v583_v0  ;;  %v1281_v53 = vpop.f32.mrf.mxu0  ;;  %v4278_v0 = vor.u32 %v5042_v15, %v4277_v19  ;;  %v4421_v60 = vld [vmem:[#allocation5 + $0x148] sm:$0xf] }
 0x1fd   :  { %v5799_v54 = vadd.f32 %v1281_v53, %v1192_v36  ;;  %v499_v40 = vpop.f32.mrf.mxu1  ;;  %v4422_v1 = vor.u32 %v5078_v20, %v4421_v60  ;;  %v4261_v30 = vld [vmem:[#allocation5 + $0x8] sm:$0xf]  ;;  %v5038_v36 = vld [vmem:[#allocation5 + $0x14] sm:$0xf0] }
 0x1fe   :  { %v712_v62 = vmax.f32 %v710_v32, %v711_v45  ;;  %v718_v3 = vrot.slane %v717_v46, 4  ;;  %1320 = vmatmul.bf16.gmra.mxu0 %v5797_v56  ;;  %1520 = vmatpush.bf16.msrb.mxu3 %v4278_v0  ;;  %v4405_v19 = vld [vmem:[#allocation5 + $0x128] sm:$0xf] }
 0x1ff   :  { %6944 = vst [vmem:[#allocation21_spill] sm:$0xff] %v5799_v54  ;;  %1608 = vmatpush.bf16.msra.mxu0 %v4422_v1  ;;  %v4406_v60 = vor.u32 %v5074_v4, %v4405_v19 }
 0x200   :  { %v713_v51 = vrot.slane %v712_v62, 1  ;;  %v719_v16 = vmax.f32 %v717_v46, %v718_v3  ;;  %1374 = vmatmul.bf16.gmra.mxu1 %v5701_v58  ;;  %1463 = vmatmul.bf16.gmra.mxu2 %v5708_v8  ;;  %v4262_v46 = vor.u32 %v5038_v36, %v4261_v30 }
 0x202   :  { %v714_v22 = vmax.f32 %v712_v62, %v713_v51  ;;  %v720_v24 = vrot.slane %v719_v16, 2  ;;  %1521 = vmatpush.bf16.msrb.mxu3 %v4262_v46 }
 0x203   :  { %v588_v32 = vpop.f32.mrf.mxu2  ;;  %v1194_v35 = vpop.f32.mrf.mxu3  ;;  %1609 = vmatpush.bf16.msra.mxu0 %v4406_v60 }
 0x204   :  { %v1882_v45 = vpack.c.bf16 %v714_v22, %v714_v22  ;;  %v721_v53 = vmax.f32 %v719_v16, %v720_v24  ;;  %v1283_v52 = vpop.f32.mrf.mxu0  ;;  %v4389_v22 = vld [vmem:[#allocation5 + $0x108] sm:$0xf]  ;;  %v5070_v24 = vld [vmem:[#allocation5 + $0x114] sm:$0xf0] }
 0x205   :  { %v5804_v59 = vadd.f32 %v1283_v52, %v1194_v35  ;;  %v501_v3 = vpop.f32.mrf.mxu1  ;;  %v4390_v35 = vor.u32 %v5070_v24, %v4389_v22 }
 0x206   :  { %v1988_v15 = vunpack.c.l.b16 %v1882_v45  ;;  %v722_v62 = vrot.slane %v721_v53, 1  ;;  %v724_v51 = vmax.f32 %v499_v40, %v501_v3  ;;  %v5806_v0 = vpack.c.bf16 %v501_v3, %v499_v40 }
 0x207   :  { %6945 = vst [vmem:[#allocation22_spill] sm:$0xff] %v5804_v59  ;;  %1610 = vmatpush.bf16.msra.mxu0 %v4390_v35 }
 0x208   :  { %v723_v20 = vmax.f32 %v721_v53, %v722_v62  ;;  %1236 = vmatmul.bf16.gmra.mxu3 %v5806_v0  ;;  %v2003_v16 = vsel %vm2002_vm7, %v1988_v15, %v5778_v17 }
 0x20a   :  { %v1883_v1 = vpack.c.bf16 %v723_v20, %v723_v20 }
 0x20b   :  { %v590_v30 = vpop.f32.mrf.mxu2  ;;  %v1197_v36 = vpop.f32.mrf.mxu3 }
 0x20c   :  { %v1989_v45 = vunpack.c.l.b16 %v1883_v1  ;;  %v733_v52 = vmax.f32 %v588_v32, %v590_v30  ;;  %v5811_v59 = vpack.c.bf16 %v590_v30, %v588_v32  ;;  %v1286_v40 = vpop.f32.mrf.mxu0 }
 0x20d   :  { %v5813_v46 = vadd.f32 %v1286_v40, %v1197_v36  ;;  %v504_v53 = vpop.f32.mrf.mxu1 }
 0x20e   :  { %v725_v3 = vmax.f32 %v724_v51, %v504_v53  ;;  %1325 = vmatmul.bf16.gmra.mxu0 %v5811_v59  ;;  %v2011_v17 = vsel %vm2002_vm7, %v1989_v45, %v5787_v48 }
 0x20f   :  { %6946 = vst [vmem:[#allocation23_spill] sm:$0xff] %v5813_v46 }
 0x210   :  { %1379 = vmatmul.bf16.gmra.mxu1 %v5713_v21  ;;  %1468 = vmatmul.bf16.gmra.mxu2 %v5716_v28 }
 0x213   :  { %v593_v19 = vpop.f32.mrf.mxu2  ;;  %v1199_v4 = vpop.f32.mrf.mxu3 }
 0x214   :  { %v734_v15 = vmax.f32 %v733_v52, %v593_v19  ;;  %v1288_v32 = vpop.f32.mrf.mxu0 }
 0x215   :  { %v5820_v62 = vadd.f32 %v1288_v32, %v1199_v4  ;;  %v506_v60 = vpop.f32.mrf.mxu1 }
 0x216   :  { %v726_v20 = vmax.f32 %v725_v3, %v506_v60  ;;  %v5822_v22 = vpack.c.bf16 %v506_v60, %v504_v53 }
 0x217   :  { %6947 = vst [vmem:[#allocation24_spill] sm:$0xff] %v5820_v62 }
 0x218   :  { %v727_v51 = vrot.slane %v726_v20, 4  ;;  %1241 = vmatmul.bf16.gmra.mxu3 %v5822_v22 }
 0x21a   :  { %v728_v24 = vmax.f32 %v726_v20, %v727_v51 }
 0x21b   :  { %v595_v1 = vpop.f32.mrf.mxu2  ;;  %v1202_v48 = vpop.f32.mrf.mxu3 }
 0x21c   :  { %v729_v35 = vrot.slane %v728_v24, 2  ;;  %v735_v30 = vmax.f32 %v734_v15, %v595_v1  ;;  %v5825_v36 = vpack.c.bf16 %v595_v1, %v593_v19  ;;  %v1291_v45 = vpop.f32.mrf.mxu0 }
 0x21d   :  { %v5827_v40 = vadd.f32 %v1291_v45, %v1202_v48  ;;  %v1345_v52 = vpop.f32.mrf.mxu1 }
 0x21e   :  { %v730_v4 = vmax.f32 %v728_v24, %v729_v35  ;;  %v736_v32 = vrot.slane %v735_v30, 4  ;;  %1330 = vmatmul.bf16.gmra.mxu0 %v5825_v36 }
 0x21f   :  { %6948 = vst [vmem:[#allocation25_spill] sm:$0xff] %v5827_v40 }
 0x220   :  { %v731_v53 = vrot.slane %v730_v4, 1  ;;  %v737_v3 = vmax.f32 %v735_v30, %v736_v32  ;;  %1384 = vmatmul.bf16.gmra.mxu1 %v5721_v49  ;;  %1473 = vmatmul.bf16.gmra.mxu2 %v5725_v61 }
 0x222   :  { %v732_v60 = vmax.f32 %v730_v4, %v731_v53  ;;  %v738_v20 = vrot.slane %v737_v3, 2 }
 0x223   :  { %v1204_v51 = vpop.f32.mrf.mxu3  ;;  %v1434_v15 = vpop.f32.mrf.mxu2 }
 0x224   :  { %v1884_v19 = vpack.c.bf16 %v732_v60, %v732_v60  ;;  %v739_v1 = vmax.f32 %v737_v3, %v738_v20  ;;  %v1293_v62 = vpop.f32.mrf.mxu0  ;;  %v5832_v48 = vadd.f32 %v1434_v15, %v1345_v52 }
 0x225   :  { %v5834_v45 = vadd.f32 %v1293_v62, %v1204_v51  ;;  %v1347_v24 = vpop.f32.mrf.mxu1 }
 0x226   :  { %6949 = vst [vmem:[#allocation26_spill] sm:$0xff] %v5832_v48  ;;  %v1990_v35 = vunpack.c.l.b16 %v1884_v19  ;;  %v740_v40 = vrot.slane %v739_v1, 1  ;;  %v5220_v48 = vld [vmem:[#allocation7 + $0x1c4] sm:$0xf0] }
 0x227   :  { %6950 = vst [vmem:[#allocation27_spill] sm:$0xff] %v5834_v45 }
 0x228   :  { %v741_v30 = vmax.f32 %v739_v1, %v740_v40  ;;  %1522 = vmatmul.bf16.vlgmr.msrb.gmra.mxu3 %v5639_v25  ;;  %v5838_v32 = vsel %vm2004_vm8, %v1990_v35, %v2003_v16 }
 0x22a   :  { %v1885_v4 = vpack.c.bf16 %v741_v30, %v741_v30 }
 0x22b   :  { %v1207_v53 = vpop.f32.mrf.mxu3  ;;  %v1436_v46 = vpop.f32.mrf.mxu2 }
 0x22c   :  { %v1991_v60 = vunpack.c.l.b16 %v1885_v4  ;;  %v1296_v3 = vpop.f32.mrf.mxu0  ;;  %v5840_v20 = vadd.f32 %v1436_v46, %v1347_v24 }
 0x22d   :  { %v5842_v52 = vadd.f32 %v1296_v3, %v1207_v53  ;;  %v1350_v62 = vpop.f32.mrf.mxu1 }
 0x22e   :  { %6951 = vst [vmem:[#allocation28_spill] sm:$0xff] %v5840_v20  ;;  %1611 = vmatmul.bf16.vlgmr.msra.gmra.mxu0 %v5644_v33  ;;  %v5846_v51 = vsel %vm2004_vm8, %v1991_v60, %v2011_v17  ;;  %v5224_v20 = vld [vmem:[#allocation7 + $0x1e4] sm:$0xf0] }
 0x22f   :  { %6952 = vst [vmem:[#allocation29_spill] sm:$0xff] %v5842_v52 }
 0x230   :  { %1389 = vmatmul.bf16.gmra.mxu1 %v5735_v11  ;;  %1478 = vmatmul.bf16.gmra.mxu2 %v5738_v23 }
 0x233   :  { %v1209_v16 = vpop.f32.mrf.mxu3  ;;  %v1439_v40 = vpop.f32.mrf.mxu2 }
 0x234   :  { %v1298_v15 = vpop.f32.mrf.mxu0  ;;  %v5850_v19 = vadd.f32 %v1439_v40, %v1350_v62 }
 0x235   :  { %v5852_v1 = vadd.f32 %v1298_v15, %v1209_v16  ;;  %v1352_v46 = vpop.f32.mrf.mxu1 }
 0x236   :  { %6953 = vst [vmem:[#allocation30_spill] sm:$0xff] %v5850_v19  ;;  %v4727_v19 = vld [vmem:[#allocation2 + $0x1b8] sm:$0xf0] }
 0x237   :  { %6954 = vst [vmem:[#allocation31_spill] sm:$0xff] %v5852_v1 }
 0x238   :  { %1527 = vmatmul.bf16.gmra.mxu3 %v5647_v42 }
 0x23b   :  { %v1212_v24 = vpop.f32.mrf.mxu3  ;;  %v1441_v35 = vpop.f32.mrf.mxu2 }
 0x23c   :  { %v1301_v30 = vpop.f32.mrf.mxu0  ;;  %v5855_v4 = vadd.f32 %v1441_v35, %v1352_v46  ;;  %v4621_v46 = vld [vmem:[#allocation2 + $0xe0] sm:$0xf]  ;;  %v5096_v35 = vld [vmem:[#allocation5 + $0x1ec] sm:$0xf] }
 0x23d   :  { %v5857_v17 = vadd.f32 %v1301_v30, %v1212_v24  ;;  %v1355_v53 = vpop.f32.mrf.mxu1  ;;  %v5129_v24 = vld [vmem:[#allocation2 + $0xec] sm:$0xf0] }
 0x23e   :  { %6955 = vst [vmem:[#allocation32_spill] sm:$0xff] %v5855_v4  ;;  %1616 = vmatmul.bf16.gmra.mxu0 %v5652_v50  ;;  %v4622_v30 = vor.u32 %v5129_v24, %v4621_v46  ;;  %v5152_v4 = vld [vmem:[#allocation2 + $0x1ac] sm:$0xf] }
 0x23f   :  { %6956 = vst [vmem:[#allocation33_spill] sm:$0xff] %v5857_v17  ;;  %v4503_v17 = vld [vmem:[#allocation5 + $0x1f8] sm:$0xf0] }
 0x240   :  { %1394 = vmatmul.bf16.gmra.mxu1 %v5747_v55  ;;  %1483 = vmatmul.bf16.gmra.mxu2 %v5751_v5  ;;  %v4506_v1 = vor.u32 %v5096_v35, %v4503_v17 }
 0x241   :  { %2337 = vmatpush.bf16.msra.mxu3 %v4622_v30 }
 0x242   :  { %1781 = vmatpush.bf16.msra.mxu2 %v4506_v1 }
 0x243   :  { %v1214_v60 = vpop.f32.mrf.mxu3  ;;  %v1444_v3 = vpop.f32.mrf.mxu2 }
 0x244   :  { %v1303_v62 = vpop.f32.mrf.mxu0  ;;  %v5862_v16 = vadd.f32 %v1444_v3, %v1355_v53  ;;  %v5064_v3 = vld [vmem:[#allocation5 + $0xec] sm:$0xf] }
 0x245   :  { %v5864_v40 = vadd.f32 %v1303_v62, %v1214_v60  ;;  %v1357_v15 = vpop.f32.mrf.mxu1  ;;  %v4375_v62 = vld [vmem:[#allocation5 + $0xf8] sm:$0xf0]  ;;  %2338 = vmatpush.bf16.msra.mxu3 %v4606_v44  ;;  %v5080_v44 = vld [vmem:[#allocation5 + $0x16c] sm:$0xf] }
 0x246   :  { %6957 = vst [vmem:[#allocation34_spill] sm:$0xff] %v5862_v16  ;;  %v4471_v16 = vld [vmem:[#allocation5 + $0x1b8] sm:$0xf0] }
 0x247   :  { %6958 = vst [vmem:[#allocation35_spill] sm:$0xff] %v5864_v40  ;;  %v4378_v40 = vor.u32 %v5064_v3, %v4375_v62 }
 0x248   :  { %1532 = vmatmul.bf16.gmra.mxu3 %v5655_v57 }
 0x249   :  { %1692 = vmatpush.bf16.msra.mxu1 %v4378_v40 }
 0x24b   :  { %v1217_v52 = vpop.f32.mrf.mxu3  ;;  %v1446_v45 = vpop.f32.mrf.mxu2 }
 0x24c   :  { %v1306_v54 = vpop.f32.mrf.mxu0  ;;  %v5867_v12 = vadd.f32 %v1446_v45, %v1357_v15 }
 0x24d   :  { %v5869_v53 = vadd.f32 %v1306_v54, %v1217_v52  ;;  %v1360_v60 = vpop.f32.mrf.mxu1 }
 0x24e   :  { %6959 = vst [vmem:[#allocation36_spill] sm:$0xff] %v5867_v12  ;;  %1621 = vmatmul.bf16.gmra.mxu0 %v5660_v2 }
 0x24f   :  { %6960 = vst [vmem:[#allocation37_spill] sm:$0xff] %v5869_v53 }
 0x250   :  { %1399 = vmatmul.bf16.gmra.mxu1 %v5763_v29  ;;  %1488 = vmatmul.bf16.gmra.mxu2 %v5766_v38 }
 0x253   :  { %v1219_v17 = vpop.f32.mrf.mxu3  ;;  %v1449_v46 = vpop.f32.mrf.mxu2 }
 0x254   :  { %v1308_v24 = vpop.f32.mrf.mxu0  ;;  %v5874_v35 = vadd.f32 %v1449_v46, %v1360_v60  ;;  %v4359_v46 = vld [vmem:[#allocation5 + $0xd8] sm:$0xf0] }
 0x255   :  { %v5876_v45 = vadd.f32 %v1308_v24, %v1219_v17  ;;  %v1362_v54 = vpop.f32.mrf.mxu1  ;;  %v5060_v17 = vld [vmem:[#allocation5 + $0xcc] sm:$0xf] }
 0x256   :  { %6961 = vst [vmem:[#allocation38_spill] sm:$0xff] %v5874_v35  ;;  %v5092_v24 = vld [vmem:[#allocation5 + $0x1cc] sm:$0xf]  ;;  %v4362_v37 = vor.u32 %v5060_v17, %v4359_v46 }
 0x257   :  { %6962 = vst [vmem:[#allocation39_spill] sm:$0xff] %v5876_v45  ;;  %v5088_v35 = vld [vmem:[#allocation5 + $0x1ac] sm:$0xf] }
 0x258   :  { %1537 = vmatmul.bf16.gmra.mxu3 %v5663_v27  ;;  %1693 = vmatpush.bf16.msra.mxu1 %v4362_v37  ;;  %v5084_v37 = vld [vmem:[#allocation5 + $0x18c] sm:$0xf] }
 0x25b   :  { %v1222_v52 = vpop.f32.mrf.mxu3  ;;  %v1451_v1 = vpop.f32.mrf.mxu2 }
 0x25c   :  { %v1311_v15 = vpop.f32.mrf.mxu0  ;;  %v5879_v30 = vadd.f32 %v1451_v1, %v1362_v54  ;;  %v4487_v54 = vld [vmem:[#allocation5 + $0x1d8] sm:$0xf0] }
 0x25d   :  { %v5881_v3 = vadd.f32 %v1311_v15, %v1222_v52  ;;  %v1365_v62 = vpop.f32.mrf.mxu1  ;;  %v4490_v15 = vor.u32 %v5092_v24, %v4487_v54 }
 0x25e   :  { %6963 = vst [vmem:[#allocation40_spill] sm:$0xff] %v5879_v30  ;;  %1626 = vmatmul.bf16.gmra.mxu0 %v5668_v43  ;;  %v4343_v30 = vld [vmem:[#allocation5 + $0xb8] sm:$0xf0] }
 0x25f   :  { %6964 = vst [vmem:[#allocation41_spill] sm:$0xff] %v5881_v3  ;;  %1782 = vmatpush.bf16.msra.mxu2 %v4490_v15  ;;  %v5056_v3 = vld [vmem:[#allocation5 + $0xac] sm:$0xf]  ;;  %v4455_v15 = vld [vmem:[#allocation5 + $0x198] sm:$0xf0] }
 0x260   :  { %1404 = vmatmul.bf16.gmra.mxu1 %v5775_v14  ;;  %1493 = vmatmul.bf16.gmra.mxu2 %v5781_v31  ;;  %v4346_v12 = vor.u32 %v5056_v3, %v4343_v30  ;;  %v4458_v30 = vor.u32 %v5084_v37, %v4455_v15 }
 0x262   :  { %1694 = vmatpush.bf16.msra.mxu1 %v4346_v12  ;;  %v4314_v12 = vor.u32 %v5048_v41, %v4311_v7  ;;  %v5040_v41 = vld [vmem:[#allocation5 + $0x2c] sm:$0xf]  ;;  %v4279_v7 = vld [vmem:[#allocation5 + $0x38] sm:$0xf0] }
 0x263   :  { %v1224_v40 = vpop.f32.mrf.mxu3  ;;  %v1454_v60 = vpop.f32.mrf.mxu2 }
 0x264   :  { %v1313_v45 = vpop.f32.mrf.mxu0  ;;  %v5886_v53 = vadd.f32 %v1454_v60, %v1365_v62  ;;  %v4474_v62 = vor.u32 %v5088_v35, %v4471_v16  ;;  %v4439_v16 = vld [vmem:[#allocation5 + $0x178] sm:$0xf0] }
 0x265   :  { %v5888_v1 = vadd.f32 %v1313_v45, %v1224_v40  ;;  %v1367_v52 = vpop.f32.mrf.mxu1  ;;  %v5052_v45 = vld [vmem:[#allocation5 + $0x8c] sm:$0xf]  ;;  %v4327_v40 = vld [vmem:[#allocation5 + $0x98] sm:$0xf0]  ;;  %v4442_v35 = vor.u32 %v5080_v44, %v4439_v16 }
 0x266   :  { %6965 = vst [vmem:[#allocation42_spill] sm:$0xff] %v5886_v53  ;;  %1783 = vmatpush.bf16.msra.mxu2 %v4474_v62  ;;  %v4330_v54 = vor.u32 %v5052_v45, %v4327_v40  ;;  %v5044_v62 = vld [vmem:[#allocation5 + $0x4c] sm:$0xf]  ;;  %v4407_v16 = vld [vmem:[#allocation5 + $0x138] sm:$0xf0] }
 0x267   :  { %6966 = vst [vmem:[#allocation43_spill] sm:$0xff] %v5888_v1  ;;  %v5072_v44 = vld [vmem:[#allocation5 + $0x12c] sm:$0xf] }
 0x268   :  { %1542 = vmatmul.bf16.gmra.mxu3 %v5677_v10  ;;  %1695 = vmatpush.bf16.msra.mxu1 %v4330_v54 }
 0x26a   :  { %1784 = vmatpush.bf16.msra.mxu2 %v4458_v30 }
 0x26b   :  { %v1227_v60 = vpop.f32.mrf.mxu3  ;;  %v1456_v17 = vpop.f32.mrf.mxu2 }
 0x26c   :  { %v1316_v46 = vpop.f32.mrf.mxu0  ;;  %v5891_v24 = vadd.f32 %v1456_v17, %v1367_v52  ;;  %1696 = vmatpush.bf16.msra.mxu1 %v4314_v12  ;;  %v5076_v17 = vld [vmem:[#allocation5 + $0x14c] sm:$0xf]  ;;  %v4282_v12 = vor.u32 %v5040_v41, %v4279_v7 }
 0x26d   :  { %v5893_v1 = vadd.f32 %v1316_v46, %v1227_v60  ;;  %v1370_v53 = vpop.f32.mrf.mxu1  ;;  %v4295_v60 = vld [vmem:[#allocation5 + $0x58] sm:$0xf0] }
 0x26e   :  { %6967 = vst [vmem:[#allocation44_spill] sm:$0xff] %v5891_v24  ;;  %1631 = vmatmul.bf16.gmra.mxu0 %v5687_v39  ;;  %1785 = vmatpush.bf16.msra.mxu2 %v4442_v35  ;;  %v4298_v37 = vor.u32 %v5044_v62, %v4295_v60  ;;  %v4423_v46 = vld [vmem:[#allocation5 + $0x158] sm:$0xf0]  ;;  %v4410_v35 = vor.u32 %v5072_v44, %v4407_v16 }
 0x26f   :  { %6968 = vst [vmem:[#allocation45_spill] sm:$0xff] %v5893_v1  ;;  %v4426_v30 = vor.u32 %v5076_v17, %v4423_v46  ;;  %v4263_v62 = vld [vmem:[#allocation5 + $0x18] sm:$0xf0] }
 0x270   :  { %1409 = vmatmul.bf16.gmra.mxu1 %v5794_v18  ;;  %1498 = vmatmul.bf16.gmra.mxu2 %v5797_v56 }
 0x271   :  { %1697 = vmatpush.bf16.msra.mxu1 %v4298_v37  ;;  %v4391_v37 = vld [vmem:[#allocation5 + $0x118] sm:$0xf0] }
 0x272   :  { %1786 = vmatpush.bf16.msra.mxu2 %v4426_v30 }
 0x273   :  { %v1229_v3 = vpop.f32.mrf.mxu3  ;;  %v1459_v52 = vpop.f32.mrf.mxu2 }
 0x274   :  { %v1318_v45 = vpop.f32.mrf.mxu0  ;;  %v5898_v40 = vadd.f32 %v1459_v52, %v1370_v53  ;;  %v5036_v52 = vld [vmem:[#allocation5 + $0xc] sm:$0xf] }
 0x275   :  { %v5900_v54 = vadd.f32 %v1318_v45, %v1229_v3  ;;  %v1372_v15 = vpop.f32.mrf.mxu1  ;;  %1698 = vmatpush.bf16.msra.mxu1 %v4282_v12  ;;  %v5068_v3 = vld [vmem:[#allocation5 + $0x10c] sm:$0xf]  ;;  %v4266_v17 = vor.u32 %v5036_v52, %v4263_v62 }
 0x276   :  { %6969 = vst [vmem:[#allocation46_spill] sm:$0xff] %v5898_v40  ;;  %1787 = vmatpush.bf16.msra.mxu2 %v4410_v35  ;;  %v5121_v35 = vld [vmem:[#allocation2 + $0xac] sm:$0xf0]  ;;  %v4751_v40 = vld [vmem:[#allocation2 + $0x1f0] sm:$0xf0] }
 0x277   :  { %6970 = vst [vmem:[#allocation47_spill] sm:$0xff] %v5900_v54  ;;  %v4394_v54 = vor.u32 %v5068_v3, %v4391_v37 }
 0x278   :  { %1547 = vmatmul.bf16.gmra.mxu3 %v5693_v6 }
 0x279   :  { %1699 = vmatpush.bf16.msra.mxu1 %v4266_v17 }
 0x27a   :  { %1788 = vmatpush.bf16.msra.mxu2 %v4394_v54 }
 0x27b   :  { %v1232_v1 = vpop.f32.mrf.mxu3  ;;  %v1461_v53 = vpop.f32.mrf.mxu2 }
 0x27c   :  { %v1321_v60 = vpop.f32.mrf.mxu0  ;;  %v5903_v45 = vadd.f32 %v1461_v53, %v1372_v15 }
 0x27d   :  { %v5905_v46 = vadd.f32 %v1321_v60, %v1232_v1  ;;  %v1375_v30 = vpop.f32.mrf.mxu1  ;;  %v4589_v1 = vld [vmem:[#allocation2 + $0xa0] sm:$0xf] }
 0x27e   :  { %6971 = vst [vmem:[#allocation48_spill] sm:$0xff] %v5903_v45  ;;  %1636 = vmatmul.bf16.gmra.mxu0 %v5698_v34  ;;  %v4590_v53 = vor.u32 %v5121_v35, %v4589_v1  ;;  %v5159_v45 = vld [vmem:[#allocation2 + $0x1e4] sm:$0xf] }
 0x27f   :  { %6972 = vst [vmem:[#allocation49_spill] sm:$0xff] %v5905_v46 }
 0x280   :  { %1414 = vmatmul.bf16.gmra.mxu1 %v5806_v0  ;;  %1503 = vmatmul.bf16.gmra.mxu2 %v5811_v59 }
 0x281   :  { %2339 = vmatpush.bf16.msra.mxu3 %v4590_v53 }
 0x283   :  { %v1234_v41 = vpop.f32.mrf.mxu3  ;;  %v1464_v7 = vpop.f32.mrf.mxu2 }
 0x284   :  { %v1323_v44 = vpop.f32.mrf.mxu0  ;;  %v5910_v12 = vadd.f32 %v1464_v7, %v1375_v30 }
 0x285   :  { %v5912_v15 = vadd.f32 %v1323_v44, %v1234_v41  ;;  %v1377_v16 = vpop.f32.mrf.mxu1 }
 0x286   :  { %6973 = vst [vmem:[#allocation50_spill] sm:$0xff] %v5910_v12 }
 0x287   :  { %6974 = vst [vmem:[#allocation51_spill] sm:$0xff] %v5912_v15 }
 0x288   :  { %1552 = vmatmul.bf16.gmra.mxu3 %v5701_v58 }
 0x28b   :  { %v1237_v52 = vpop.f32.mrf.mxu3  ;;  %v1466_v62 = vpop.f32.mrf.mxu2 }
 0x28c   :  { %v1326_v54 = vpop.f32.mrf.mxu0  ;;  %v5915_v3 = vadd.f32 %v1466_v62, %v1377_v16 }
 0x28d   :  { %v5917_v60 = vadd.f32 %v1326_v54, %v1237_v52  ;;  %v1380_v17 = vpop.f32.mrf.mxu1 }
 0x28e   :  { %6975 = vst [vmem:[#allocation52_spill] sm:$0xff] %v5915_v3  ;;  %1641 = vmatmul.bf16.gmra.mxu0 %v5708_v8 }
 0x28f   :  { %6976 = vst [vmem:[#allocation53_spill] sm:$0xff] %v5917_v60 }
 0x290   :  { %1419 = vmatmul.bf16.gmra.mxu1 %v5822_v22  ;;  %1508 = vmatmul.bf16.gmra.mxu2 %v5825_v36 }
 0x293   :  { %v1239_v37 = vpop.f32.mrf.mxu3  ;;  %v1469_v30 = vpop.f32.mrf.mxu2 }
 0x294   :  { %v1328_v41 = vpop.f32.mrf.mxu0  ;;  %v5922_v7 = vadd.f32 %v1469_v30, %v1380_v17 }
 0x295   :  { %v5924_v44 = vadd.f32 %v1328_v41, %v1239_v37  ;;  %v1382_v1 = vpop.f32.mrf.mxu1 }
 0x296   :  { %6977 = vst [vmem:[#allocation54_spill] sm:$0xff] %v5922_v7 }
 0x297   :  { %6978 = vst [vmem:[#allocation55_spill] sm:$0xff] %v5924_v44 }
 0x298   :  { %1557 = vmatmul.bf16.gmra.mxu3 %v5713_v21 }
 0x29b   :  { %v1242_v16 = vpop.f32.mrf.mxu3  ;;  %v1471_v35 = vpop.f32.mrf.mxu2 }
 0x29c   :  { %v1331_v53 = vpop.f32.mrf.mxu0  ;;  %v5927_v52 = vadd.f32 %v1471_v35, %v1382_v1  ;;  %v4573_v1 = vld [vmem:[#allocation2 + $0x80] sm:$0xf] }
 0x29d   :  { %v5929_v62 = vadd.f32 %v1331_v53, %v1242_v16  ;;  %v1385_v54 = vpop.f32.mrf.mxu1  ;;  %v5117_v16 = vld [vmem:[#allocation2 + $0x8c] sm:$0xf0] }
 0x29e   :  { %6979 = vst [vmem:[#allocation56_spill] sm:$0xff] %v5927_v52  ;;  %1646 = vmatmul.bf16.gmra.mxu0 %v5716_v28  ;;  %v4574_v35 = vor.u32 %v5117_v16, %v4573_v1 }
 0x29f   :  { %6980 = vst [vmem:[#allocation57_spill] sm:$0xff] %v5929_v62 }
 0x2a0   :  { %1700 = vmatmul.bf16.vlgmr.msra.gmra.mxu1 %v5639_v25  ;;  %1789 = vmatmul.bf16.vlgmr.msra.gmra.mxu2 %v5644_v33 }
 0x2a1   :  { %2340 = vmatpush.bf16.msra.mxu3 %v4574_v35 }
 0x2a3   :  { %v1244_v17 = vpop.f32.mrf.mxu3  ;;  %v1474_v37 = vpop.f32.mrf.mxu2 }
 0x2a4   :  { %v1333_v30 = vpop.f32.mrf.mxu0  ;;  %v5934_v41 = vadd.f32 %v1474_v37, %v1385_v54 }
 0x2a5   :  { %v5936_v44 = vadd.f32 %v1333_v30, %v1244_v17  ;;  %v1387_v60 = vpop.f32.mrf.mxu1 }
 0x2a6   :  { %6981 = vst [vmem:[#allocation58_spill] sm:$0xff] %v5934_v41  ;;  %v4749_v41 = vld [vmem:[#allocation2 + $0x1e0] sm:$0xf] }
 0x2a7   :  { %6982 = vst [vmem:[#allocation59_spill] sm:$0xff] %v5936_v44 }
 0x2a8   :  { %1562 = vmatmul.bf16.gmra.mxu3 %v5721_v49 }
 0x2ab   :  { %v1476_v53 = vpop.f32.mrf.mxu2  ;;  %v1523_v62 = vpop.f32.mrf.mxu3 }
 0x2ac   :  { %v5939_v15 = vadd.f32 %v1476_v53, %v1387_v60  ;;  %v1612_v25 = vpop.f32.mrf.mxu0 }
 0x2ad   :  { %v5941_v33 = vadd.f32 %v1612_v25, %v1523_v62  ;;  %v1390_v46 = vpop.f32.mrf.mxu1 }
 0x2ae   :  { %6983 = vst [vmem:[#allocation60_spill] sm:$0xff] %v5939_v15  ;;  %1651 = vmatmul.bf16.gmra.mxu0 %v5725_v61 }
 0x2af   :  { %6984 = vst [vmem:[#allocation61_spill] sm:$0xff] %v5941_v33 }
 0x2b0   :  { %1705 = vmatmul.bf16.gmra.mxu1 %v5647_v42  ;;  %1794 = vmatmul.bf16.gmra.mxu2 %v5652_v50 }
 0x2b3   :  { %v1479_v54 = vpop.f32.mrf.mxu2  ;;  %v1525_v17 = vpop.f32.mrf.mxu3 }
 0x2b4   :  { %v5946_v37 = vadd.f32 %v1479_v54, %v1390_v46  ;;  %v1614_v30 = vpop.f32.mrf.mxu0 }
 0x2b5   :  { %v5948_v1 = vadd.f32 %v1614_v30, %v1525_v17  ;;  %v1392_v16 = vpop.f32.mrf.mxu1 }
 0x2b6   :  { %6985 = vst [vmem:[#allocation62_spill] sm:$0xff] %v5946_v37 }
 0x2b7   :  { %6986 = vst [vmem:[#allocation63_spill] sm:$0xff] %v5948_v1 }
 0x2b8   :  { %1567 = vmatmul.bf16.gmra.mxu3 %v5735_v11 }
 0x2bb   :  { %v1481_v60 = vpop.f32.mrf.mxu2  ;;  %v1528_v62 = vpop.f32.mrf.mxu3 }
 0x2bc   :  { %v5951_v35 = vadd.f32 %v1481_v60, %v1392_v16  ;;  %v1617_v53 = vpop.f32.mrf.mxu0  ;;  %v4557_v16 = vld [vmem:[#allocation2 + $0x60] sm:$0xf]  ;;  %v5113_v60 = vld [vmem:[#allocation2 + $0x6c] sm:$0xf0] }
 0x2bd   :  { %v5953_v25 = vadd.f32 %v1617_v53, %v1528_v62  ;;  %v1395_v42 = vpop.f32.mrf.mxu1  ;;  %v4558_v62 = vor.u32 %v5113_v60, %v4557_v16 }
 0x2be   :  { %6987 = vst [vmem:[#allocation64_spill] sm:$0xff] %v5951_v35  ;;  %1656 = vmatmul.bf16.gmra.mxu0 %v5738_v23 }
 0x2bf   :  { %6988 = vst [vmem:[#allocation65_spill] sm:$0xff] %v5953_v25  ;;  %2341 = vmatpush.bf16.msra.mxu3 %v4558_v62  ;;  %v4519_v25 = vld [vmem:[#allocation2 + $0x18] sm:$0xf0] }
 0x2c0   :  { %1710 = vmatmul.bf16.gmra.mxu1 %v5655_v57  ;;  %1799 = vmatmul.bf16.gmra.mxu2 %v5660_v2 }
 0x2c3   :  { %v1484_v50 = vpop.f32.mrf.mxu2  ;;  %v1530_v46 = vpop.f32.mrf.mxu3 }
 0x2c4   :  { %v5958_v54 = vadd.f32 %v1484_v50, %v1395_v42  ;;  %v1619_v17 = vpop.f32.mrf.mxu0 }
 0x2c5   :  { %v5960_v30 = vadd.f32 %v1619_v17, %v1530_v46  ;;  %v1397_v44 = vpop.f32.mrf.mxu1 }
 0x2c6   :  { %6989 = vst [vmem:[#allocation66_spill] sm:$0xff] %v5958_v54 }
 0x2c7   :  { %6990 = vst [vmem:[#allocation67_spill] sm:$0xff] %v5960_v30  ;;  %v5100_v30 = vld [vmem:[#allocation2 + $0xc] sm:$0xf] }
 0x2c8   :  { %1572 = vmatmul.bf16.gmra.mxu3 %v5747_v55 }
 0x2cb   :  { %v1486_v53 = vpop.f32.mrf.mxu2  ;;  %v1533_v35 = vpop.f32.mrf.mxu3 }
 0x2cc   :  { %v5963_v37 = vadd.f32 %v1486_v53, %v1397_v44  ;;  %v1622_v57 = vpop.f32.mrf.mxu0 }
 0x2cd   :  { %v5965_v2 = vadd.f32 %v1622_v57, %v1533_v35  ;;  %v1400_v15 = vpop.f32.mrf.mxu1 }
 0x2ce   :  { %6991 = vst [vmem:[#allocation68_spill] sm:$0xff] %v5963_v37  ;;  %1661 = vmatmul.bf16.gmra.mxu0 %v5751_v5 }
 0x2cf   :  { %6992 = vst [vmem:[#allocation69_spill] sm:$0xff] %v5965_v2 }
 0x2d0   :  { %1715 = vmatmul.bf16.gmra.mxu1 %v5663_v27  ;;  %1804 = vmatmul.bf16.gmra.mxu2 %v5668_v43  ;;  %v4541_v43 = vld [vmem:[#allocation2 + $0x40] sm:$0xf] }
 0x2d3   :  { %v1489_v42 = vpop.f32.mrf.mxu2  ;;  %v1535_v50 = vpop.f32.mrf.mxu3 }
 0x2d4   :  { %v5970_v46 = vadd.f32 %v1489_v42, %v1400_v15  ;;  %v1624_v17 = vpop.f32.mrf.mxu0  ;;  %v5109_v15 = vld [vmem:[#allocation2 + $0x4c] sm:$0xf0] }
 0x2d5   :  { %v5972_v16 = vadd.f32 %v1624_v17, %v1535_v50  ;;  %v1402_v60 = vpop.f32.mrf.mxu1  ;;  %v4542_v42 = vor.u32 %v5109_v15, %v4541_v43  ;;  %v5161_v43 = vld [vmem:[#allocation2 + $0x1ec] sm:$0xf0] }
 0x2d6   :  { %6993 = vst [vmem:[#allocation70_spill] sm:$0xff] %v5970_v46  ;;  %v4750_v15 = vor.u32 %v5161_v43, %v4749_v41  ;;  %v4717_v41 = vld [vmem:[#allocation2 + $0x1a0] sm:$0xf] }
 0x2d7   :  { %6994 = vst [vmem:[#allocation71_spill] sm:$0xff] %v5972_v16  ;;  %2342 = vmatpush.bf16.msra.mxu3 %v4542_v42 }
 0x2d8   :  { %1577 = vmatmul.bf16.gmra.mxu3 %v5763_v29 }
 0x2db   :  { %v1491_v44 = vpop.f32.mrf.mxu2  ;;  %v1538_v35 = vpop.f32.mrf.mxu3 }
 0x2dc   :  { %v5975_v62 = vadd.f32 %v1491_v44, %v1402_v60  ;;  %v1627_v53 = vpop.f32.mrf.mxu0  ;;  %v4525_v44 = vld [vmem:[#allocation2 + $0x20] sm:$0xf] }
 0x2dd   :  { %v5977_v57 = vadd.f32 %v1627_v53, %v1538_v35  ;;  %v1405_v27 = vpop.f32.mrf.mxu1 }
 0x2de   :  { %6995 = vst [vmem:[#allocation72_spill] sm:$0xff] %v5975_v62  ;;  %1666 = vmatmul.bf16.gmra.mxu0 %v5766_v38  ;;  %v5105_v62 = vld [vmem:[#allocation2 + $0x2c] sm:$0xf0] }
 0x2df   :  { %6996 = vst [vmem:[#allocation73_spill] sm:$0xff] %v5977_v57  ;;  %v4526_v37 = vor.u32 %v5105_v62, %v4525_v44  ;;  %v4733_v62 = vld [vmem:[#allocation2 + $0x1c0] sm:$0xf]  ;;  %v5143_v57 = vld [vmem:[#allocation2 + $0x164] sm:$0xf] }
 0x2e0   :  { %1720 = vmatmul.bf16.gmra.mxu1 %v5677_v10  ;;  %1809 = vmatmul.bf16.gmra.mxu2 %v5687_v39  ;;  %v4509_v10 = vld [vmem:[#allocation2] sm:$0xf]  ;;  %v5101_v39 = vld [vmem:[#allocation2 + $0xc] sm:$0xf0] }
 0x2e1   :  { %2343 = vmatpush.bf16.msra.mxu3 %v4526_v37  ;;  %v4510_v54 = vor.u32 %v5101_v39, %v4509_v10  ;;  %v5157_v37 = vld [vmem:[#allocation2 + $0x1cc] sm:$0xf0] }
 0x2e2   :  { %v4734_v44 = vor.u32 %v5157_v37, %v4733_v62  ;;  %v5153_v10 = vld [vmem:[#allocation2 + $0x1ac] sm:$0xf0] }
 0x2e3   :  { %v1494_v50 = vpop.f32.mrf.mxu2  ;;  %v1540_v17 = vpop.f32.mrf.mxu3 }
 0x2e4   :  { %v5982_v46 = vadd.f32 %v1494_v50, %v1405_v27  ;;  %v1629_v60 = vpop.f32.mrf.mxu0 }
 0x2e5   :  { %v5984_v35 = vadd.f32 %v1629_v60, %v1540_v17  ;;  %v1407_v53 = vpop.f32.mrf.mxu1  ;;  %2344 = vmatpush.bf16.msra.mxu3 %v4510_v54  ;;  %v4718_v54 = vor.u32 %v5153_v10, %v4717_v41 }
 0x2e6   :  { %6997 = vst [vmem:[#allocation74_spill] sm:$0xff] %v5982_v46  ;;  %v4591_v46 = vld [vmem:[#allocation2 + $0xb0] sm:$0xf0] }
 0x2e7   :  { %6998 = vst [vmem:[#allocation75_spill] sm:$0xff] %v5984_v35 }
 0x2e8   :  { %1582 = vmatmul.bf16.gmra.mxu3 %v5775_v14 }
 0x2e9   :  { %2350 = vmatpush.bf16.msrb.mxu3 %v4750_v15 }
 0x2eb   :  { %v1496_v52 = vpop.f32.mrf.mxu2  ;;  %v1543_v42 = vpop.f32.mrf.mxu3 }
 0x2ec   :  { %v5987_v27 = vadd.f32 %v1496_v52, %v1407_v53  ;;  %v1632_v50 = vpop.f32.mrf.mxu0 }
 0x2ed   :  { %v5989_v17 = vadd.f32 %v1632_v50, %v1543_v42  ;;  %v1410_v60 = vpop.f32.mrf.mxu1  ;;  %2351 = vmatpush.bf16.msrb.mxu3 %v4734_v44  ;;  %v4701_v42 = vld [vmem:[#allocation2 + $0x180] sm:$0xf]  ;;  %v5149_v50 = vld [vmem:[#allocation2 + $0x18c] sm:$0xf0] }
 0x2ee   :  { %6999 = vst [vmem:[#allocation76_spill] sm:$0xff] %v5987_v27  ;;  %1671 = vmatmul.bf16.gmra.mxu0 %v5781_v31  ;;  %v4702_v62 = vor.u32 %v5149_v50, %v4701_v42  ;;  %v4653_v50 = vld [vmem:[#allocation2 + $0x120] sm:$0xf] }
 0x2ef   :  { %7000 = vst [vmem:[#allocation77_spill] sm:$0xff] %v5989_v17  ;;  %v5210_v17 = vld [vmem:[#allocation7 + $0x174] sm:$0xf0] }
 0x2f0   :  { %1725 = vmatmul.bf16.gmra.mxu1 %v5693_v6  ;;  %1814 = vmatmul.bf16.gmra.mxu2 %v5698_v34  ;;  %v4685_v6 = vld [vmem:[#allocation2 + $0x160] sm:$0xf]  ;;  %v5145_v34 = vld [vmem:[#allocation2 + $0x16c] sm:$0xf0] }
 0x2f1   :  { %2352 = vmatpush.bf16.msrb.mxu3 %v4718_v54  ;;  %v4686_v37 = vor.u32 %v5145_v34, %v4685_v6  ;;  %v5141_v54 = vld [vmem:[#allocation2 + $0x14c] sm:$0xf0] }
 0x2f3   :  { %v1499_v52 = vpop.f32.mrf.mxu2  ;;  %v5994_v53 = vpop.f32.mrf.mxu3 }
 0x2f4   :  { %v5996_v39 = vadd.f32 %v1499_v52, %v1410_v60  ;;  %v5998_v43 = vpop.f32.mrf.mxu0 }
 0x2f5   :  { %v1412_v15 = vpop.f32.mrf.mxu1  ;;  %2353 = vmatpush.bf16.msrb.mxu3 %v4702_v62  ;;  %v5137_v62 = vld [vmem:[#allocation2 + $0x12c] sm:$0xf0] }
 0x2f6   :  { %7001 = vst [vmem:[#allocation78_spill] sm:$0xff] %v5996_v39  ;;  %v4669_v39 = vld [vmem:[#allocation2 + $0x140] sm:$0xf]  ;;  %v4654_v6 = vor.u32 %v5137_v62, %v4653_v50 }
 0x2f7   :  { %v4670_v42 = vor.u32 %v5141_v54, %v4669_v39 }
 0x2f8   :  { %1587 = vmatmul.bf16.gmra.mxu3 %v5794_v18 }
 0x2f9   :  { %2354 = vmatpush.bf16.msrb.mxu3 %v4686_v37 }
 0x2fb   :  { %v1501_v44 = vpop.f32.mrf.mxu2  ;;  %v1548_v41 = vpop.f32.mrf.mxu3 }
 0x2fc   :  { %v6001_v10 = vadd.f32 %v1501_v44, %v1412_v15  ;;  %v1637_v27 = vpop.f32.mrf.mxu0 }
 0x2fd   :  { %v6003_v60 = vadd.f32 %v1637_v27, %v1548_v41  ;;  %v1415_v52 = vpop.f32.mrf.mxu1  ;;  %2355 = vmatpush.bf16.msrb.mxu3 %v4670_v42  ;;  %v4637_v41 = vld [vmem:[#allocation2 + $0x100] sm:$0xf] }
 0x2fe   :  { %7002 = vst [vmem:[#allocation79_spill] sm:$0xff] %v6001_v10  ;;  %1676 = vmatmul.bf16.gmra.mxu0 %v5797_v56  ;;  %v5133_v10 = vld [vmem:[#allocation2 + $0x10c] sm:$0xf0] }
 0x2ff   :  { %7003 = vst [vmem:[#allocation80_spill] sm:$0xff] %v6003_v60  ;;  %v4638_v39 = vor.u32 %v5133_v10, %v4637_v41 }
 0x300   :  { %1730 = vmatmul.bf16.gmra.mxu1 %v5701_v58  ;;  %1819 = vmatmul.bf16.gmra.mxu2 %v5708_v8 }
 0x301   :  { %2356 = vmatpush.bf16.msrb.mxu3 %v4654_v6 }
 0x303   :  { %v1504_v15 = vpop.f32.mrf.mxu2  ;;  %v6008_v34 = vpop.f32.mrf.mxu3 }
 0x304   :  { %v6010_v27 = vadd.f32 %v1504_v15, %v1415_v52  ;;  %v6012_v44 = vpop.f32.mrf.mxu0 }
 0x305   :  { %v1417_v37 = vpop.f32.mrf.mxu1  ;;  %2357 = vmatpush.bf16.msrb.mxu3 %v4638_v39 }
 0x306   :  { %7004 = vst [vmem:[#allocation81_spill] sm:$0xff] %v6010_v27 }
 0x308   :  { %1592 = vmatmul.bf16.gmra.mxu3 %v5806_v0 }
 0x30b   :  { %v1506_v58 = vpop.f32.mrf.mxu2  ;;  %v1553_v8 = vpop.f32.mrf.mxu3 }
 0x30c   :  { %v6015_v54 = vadd.f32 %v1506_v58, %v1417_v37  ;;  %v1642_v42 = vpop.f32.mrf.mxu0 }
 0x30d   :  { %v6017_v50 = vadd.f32 %v1642_v42, %v1553_v8  ;;  %v1420_v62 = vpop.f32.mrf.mxu1 }
 0x30e   :  { %7005 = vst [vmem:[#allocation82_spill] sm:$0xff] %v6015_v54  ;;  %1681 = vmatmul.bf16.gmra.mxu0 %v5811_v59 }
 0x30f   :  { %7006 = vst [vmem:[#allocation83_spill] sm:$0xff] %v6017_v50 }
 0x310   :  { %1735 = vmatmul.bf16.gmra.mxu1 %v5713_v21  ;;  %1824 = vmatmul.bf16.gmra.mxu2 %v5716_v28  ;;  %v5127_v28 = vld [vmem:[#allocation2 + $0xe4] sm:$0xf] }
 0x313   :  { %v1509_v52 = vpop.f32.mrf.mxu2  ;;  %v6022_v6 = vpop.f32.mrf.mxu3 }
 0x314   :  { %v6024_v10 = vadd.f32 %v1509_v52, %v1420_v62  ;;  %v6026_v15 = vpop.f32.mrf.mxu0  ;;  %v4623_v62 = vld [vmem:[#allocation2 + $0xf0] sm:$0xf0] }
 0x315   :  { %v1422_v41 = vpop.f32.mrf.mxu1 }
 0x316   :  { %7007 = vst [vmem:[#allocation84_spill] sm:$0xff] %v6024_v10 }
 0x318   :  { %1597 = vmatmul.bf16.gmra.mxu3 %v5822_v22 }
 0x31b   :  { %v1511_v37 = vpop.f32.mrf.mxu2  ;;  %v1558_v39 = vpop.f32.mrf.mxu3 }
 0x31c   :  { %v6029_v58 = vadd.f32 %v1511_v37, %v1422_v41  ;;  %v1647_v8 = vpop.f32.mrf.mxu0  ;;  %v4626_v37 = vor.u32 %v5127_v28, %v4623_v62  ;;  %v4575_v62 = vld [vmem:[#allocation2 + $0x90] sm:$0xf0] }
 0x31d   :  { %v6031_v42 = vadd.f32 %v1647_v8, %v1558_v39  ;;  %v1701_v21 = vpop.f32.mrf.mxu1  ;;  %v6044_v39 = vpack.c.b16 %v5838_v32, %v5838_v32  ;;  %v5123_v8 = vld [vmem:[#allocation2 + $0xc4] sm:$0xf] }
 0x31e   :  { %7008 = vst [vmem:[#allocation85_spill] sm:$0xff] %v6029_v58  ;;  %1686 = vmatmul.bf16.gmra.mxu0 %v5825_v36  ;;  %v4607_v58 = vld [vmem:[#allocation2 + $0xd0] sm:$0xf0]  ;;  %v5115_v32 = vld [vmem:[#allocation2 + $0x84] sm:$0xf] }
 0x31f   :  { %7009 = vst [vmem:[#allocation86_spill] sm:$0xff] %v6031_v42 }
 0x320   :  { %1740 = vmatmul.bf16.gmra.mxu1 %v5721_v49  ;;  %1829 = vmatmul.bf16.gmra.mxu2 %v5725_v61  ;;  %v4610_v49 = vor.u32 %v5123_v8, %v4607_v58  ;;  %v5119_v61 = vld [vmem:[#allocation2 + $0xa4] sm:$0xf]  ;;  %v4578_v58 = vor.u32 %v5115_v32, %v4575_v62  ;;  %v4559_v8 = vld [vmem:[#allocation2 + $0x70] sm:$0xf0] }
 0x321   :  { %v4594_v28 = vor.u32 %v5119_v61, %v4591_v46  ;;  %v5103_v61 = vld [vmem:[#allocation2 + $0x24] sm:$0xf] }
 0x323   :  { %v6036_v52 = vpop.f32.mrf.mxu3  ;;  %v1790_v10 = vpop.f32.mrf.mxu2 }
 0x324   :  { %v6038_v54 = vpop.f32.mrf.mxu0  ;;  %v6040_v27 = vadd.f32 %v1790_v10, %v1701_v21 }
 0x325   :  { %v1703_v41 = vpop.f32.mrf.mxu1 }
 0x326   :  { %7010 = vst [vmem:[#allocation87_spill] sm:$0xff] %v6040_v27 }
 0x328   :  { %2345 = vmatmul.bf16.vlgmr.msra.gmra.mxu3 %v6044_v39 }
 0x329   :  { %2363 = vmatpush.bf16.msra.mxu3 %v4626_v37  ;;  %v5111_v37 = vld [vmem:[#allocation2 + $0x64] sm:$0xf] }
 0x32a   :  { %v4562_v46 = vor.u32 %v5111_v37, %v4559_v8  ;;  %v4511_v8 = vld [vmem:[#allocation2 + $0x10] sm:$0xf0] }
 0x32b   :  { %v1563_v42 = vpop.f32.mrf.mxu3  ;;  %v1792_v7 = vpop.f32.mrf.mxu2 }
 0x32c   :  { %v1652_v50 = vpop.f32.mrf.mxu0  ;;  %v6047_v3 = vadd.f32 %v1792_v7, %v1703_v41  ;;  %v6061_v41 = vpack.c.b16 %v5846_v51, %v5846_v51  ;;  %v5099_v51 = vld [vmem:[#allocation2 + $0x4] sm:$0xf] }
 0x32d   :  { %v6049_v10 = vadd.f32 %v1652_v50, %v1563_v42  ;;  %2364 = vmatpush.bf16.msra.mxu3 %v4610_v49  ;;  %v1706_v21 = vpop.f32.mrf.mxu1 }
 0x32e   :  { %7011 = vst [vmem:[#allocation88_spill] sm:$0xff] %v6047_v3 }
 0x32f   :  { %7012 = vst [vmem:[#allocation89_spill] sm:$0xff] %v6049_v10 }
 0x330   :  { %1745 = vmatmul.bf16.gmra.mxu1 %v5735_v11  ;;  %1834 = vmatmul.bf16.gmra.mxu2 %v5738_v23  ;;  %v5107_v11 = vld [vmem:[#allocation2 + $0x44] sm:$0xf]  ;;  %v4543_v23 = vld [vmem:[#allocation2 + $0x50] sm:$0xf0] }
 0x331   :  { %2365 = vmatpush.bf16.msra.mxu3 %v4594_v28  ;;  %v4546_v49 = vor.u32 %v5107_v11, %v4543_v23  ;;  %v4527_v28 = vld [vmem:[#allocation2 + $0x30] sm:$0xf0]  ;;  %v4754_v11 = vor.u32 %v5159_v45, %v4751_v40  ;;  %v5147_v40 = vld [vmem:[#allocation2 + $0x184] sm:$0xf] }
 0x332   :  { %v4530_v37 = vor.u32 %v5103_v61, %v4527_v28 }
 0x333   :  { %v6053_v12 = vpop.f32.mrf.mxu3  ;;  %v1795_v60 = vpop.f32.mrf.mxu2 }
 0x334   :  { %v6055_v7 = vpop.f32.mrf.mxu0  ;;  %v6057_v50 = vadd.f32 %v1795_v60, %v1706_v21 }
 0x335   :  { %2366 = vmatpush.bf16.msra.mxu3 %v4578_v58  ;;  %v1708_v42 = vpop.f32.mrf.mxu1 }
 0x336   :  { %7013 = vst [vmem:[#allocation90_spill] sm:$0xff] %v6057_v50  ;;  %v5172_v50 = vld [vmem:[#allocation7 + $0x44] sm:$0xf0] }
 0x338   :  { %2358 = vmatmul.bf16.vlgmr.msrb.gmra.mxu3 %v6061_v41 }
 0x339   :  { %2367 = vmatpush.bf16.msra.mxu3 %v4562_v46  ;;  %v4514_v46 = vor.u32 %v5099_v51, %v4511_v8  ;;  %v4703_v51 = vld [vmem:[#allocation2 + $0x190] sm:$0xf0]  ;;  %v4949_v8 = vld [vmem:[#allocation7 + $0x170] sm:$0xf] }
 0x33b   :  { %v1568_v32 = vpop.f32.mrf.mxu3  ;;  %v1797_v62 = vpop.f32.mrf.mxu2 }
 0x33c   :  { %v1657_v10 = vpop.f32.mrf.mxu0  ;;  %v6064_v60 = vadd.f32 %v1797_v62, %v1708_v42  ;;  %v5155_v62 = vld [vmem:[#allocation2 + $0x1c4] sm:$0xf] }
 0x33d   :  { %v6066_v21 = vadd.f32 %v1657_v10, %v1568_v32  ;;  %2368 = vmatpush.bf16.msra.mxu3 %v4546_v49  ;;  %v1711_v58 = vpop.f32.mrf.mxu1  ;;  %v4735_v10 = vld [vmem:[#allocation2 + $0x1d0] sm:$0xf0] }
 0x33e   :  { %7014 = vst [vmem:[#allocation91_spill] sm:$0xff] %v6064_v60  ;;  %v4738_v28 = vor.u32 %v5155_v62, %v4735_v10  ;;  %v5178_v62 = vld [vmem:[#allocation7 + $0x74] sm:$0xf0]  ;;  %v4706_v10 = vor.u32 %v5147_v40, %v4703_v51  ;;  %v4671_v40 = vld [vmem:[#allocation2 + $0x150] sm:$0xf0] }
 0x33f   :  { %7015 = vst [vmem:[#allocation92_spill] sm:$0xff] %v6066_v21  ;;  %v5151_v21 = vld [vmem:[#allocation2 + $0x1a4] sm:$0xf] }
 0x340   :  { %1750 = vmatmul.bf16.gmra.mxu1 %v5747_v55  ;;  %1839 = vmatmul.bf16.gmra.mxu2 %v5751_v5  ;;  %v4719_v55 = vld [vmem:[#allocation2 + $0x1b0] sm:$0xf0] }
 0x341   :  { %2369 = vmatpush.bf16.msra.mxu3 %v4530_v37  ;;  %v4722_v5 = vor.u32 %v5151_v21, %v4719_v55  ;;  %v4885_v55 = vld [vmem:[#allocation7 + $0xf0] sm:$0xf] }
 0x343   :  { %v6070_v23 = vpop.f32.mrf.mxu3  ;;  %v1800_v42 = vpop.f32.mrf.mxu2 }
 0x344   :  { %v6072_v32 = vpop.f32.mrf.mxu0  ;;  %v6074_v49 = vadd.f32 %v1800_v42, %v1711_v58  ;;  %v4950_v58 = vor.u32 %v5210_v17, %v4949_v8  ;;  %v4821_v42 = vld [vmem:[#allocation7 + $0x70] sm:$0xf] }
 0x345   :  { %2370 = vmatpush.bf16.msra.mxu3 %v4514_v46  ;;  %v1713_v61 = vpop.f32.mrf.mxu1  ;;  %v4822_v21 = vor.u32 %v5178_v62, %v4821_v42  ;;  %v4655_v42 = vld [vmem:[#allocation2 + $0x130] sm:$0xf0] }
 0x346   :  { %7016 = vst [vmem:[#allocation93_spill] sm:$0xff] %v6074_v49  ;;  %3441 = vmatpush.bf16.msrb.mxu2 %v4950_v58  ;;  %v5194_v49 = vld [vmem:[#allocation7 + $0xf4] sm:$0xf0] }
 0x347   :  { %3263 = vmatpush.bf16.msrb.mxu0 %v4822_v21 }
 0x348   :  { %2371 = vmatmul.bf16.vlgmr.msra.gmra.mxu3 %v6044_v39 }
 0x349   :  { %2376 = vmatpush.bf16.msrb.mxu3 %v4754_v11 }
 0x34b   :  { %v1573_v45 = vpop.f32.mrf.mxu3  ;;  %v1802_v37 = vpop.f32.mrf.mxu2 }
 0x34c   :  { %v1662_v24 = vpop.f32.mrf.mxu0  ;;  %v6077_v35 = vadd.f32 %v1802_v37, %v1713_v61  ;;  %v4886_v61 = vor.u32 %v5194_v49, %v4885_v55  ;;  %v4629_v55 = vld [vmem:[#allocation2 + $0xe8] sm:$0xf] }
 0x34d   :  { %2377 = vmatpush.bf16.msrb.mxu3 %v4738_v28  ;;  %v6079_v46 = vadd.f32 %v1662_v24, %v1573_v45  ;;  %v1716_v11 = vpop.f32.mrf.mxu1  ;;  %v4687_v28 = vld [vmem:[#allocation2 + $0x170] sm:$0xf0] }
 0x34e   :  { %7017 = vst [vmem:[#allocation94_spill] sm:$0xff] %v6077_v35  ;;  %v4690_v24 = vor.u32 %v5143_v57, %v4687_v28  ;;  %3352 = vmatpush.bf16.msrb.mxu1 %v4886_v61  ;;  %v5131_v57 = vld [vmem:[#allocation2 + $0x104] sm:$0xf]  ;;  %v5130_v61 = vld [vmem:[#allocation2 + $0xf4] sm:$0xf0] }
 0x34f   :  { %7018 = vst [vmem:[#allocation95_spill] sm:$0xff] %v6079_v46 }
 0x350   :  { %1755 = vmatmul.bf16.gmra.mxu1 %v5763_v29  ;;  %1844 = vmatmul.bf16.gmra.mxu2 %v5766_v38  ;;  %v5135_v29 = vld [vmem:[#allocation2 + $0x124] sm:$0xf] }
 0x351   :  { %2378 = vmatpush.bf16.msrb.mxu3 %v4722_v5  ;;  %v5139_v5 = vld [vmem:[#allocation2 + $0x144] sm:$0xf]  ;;  %v4658_v38 = vor.u32 %v5135_v29, %v4655_v42 }
 0x352   :  { %v4674_v58 = vor.u32 %v5139_v5, %v4671_v40  ;;  %v4613_v5 = vld [vmem:[#allocation2 + $0xc8] sm:$0xf]  ;;  %v5126_v40 = vld [vmem:[#allocation2 + $0xd4] sm:$0xf0] }
 0x353   :  { %v6083_v17 = vpop.f32.mrf.mxu3  ;;  %v1805_v45 = vpop.f32.mrf.mxu2  ;;  %v4614_v29 = vor.u32 %v5126_v40, %v4613_v5  ;;  %v4565_v40 = vld [vmem:[#allocation2 + $0x68] sm:$0xf] }
 0x354   :  { %v6085_v37 = vpop.f32.mrf.mxu0  ;;  %v6087_v51 = vadd.f32 %v1805_v45, %v1716_v11 }
 0x355   :  { %2379 = vmatpush.bf16.msrb.mxu3 %v4706_v10  ;;  %v1718_v8 = vpop.f32.mrf.mxu1  ;;  %v4639_v10 = vld [vmem:[#allocation2 + $0x110] sm:$0xf0] }
 0x356   :  { %7019 = vst [vmem:[#allocation96_spill] sm:$0xff] %v6087_v51  ;;  %v4642_v45 = vor.u32 %v5131_v57, %v4639_v10  ;;  %v5118_v10 = vld [vmem:[#allocation2 + $0x94] sm:$0xf0]  ;;  %v5192_v51 = vld [vmem:[#allocation7 + $0xe4] sm:$0xf0] }
 0x359   :  { %2380 = vmatpush.bf16.msrb.mxu3 %v4690_v24  ;;  %v4630_v24 = vor.u32 %v5130_v61, %v4629_v55  ;;  %v5208_v55 = vld [vmem:[#allocation7 + $0x164] sm:$0xf0] }
 0x35b   :  { %v1578_v49 = vpop.f32.mrf.mxu3  ;;  %v1807_v62 = vpop.f32.mrf.mxu2 }
 0x35c   :  { %v1667_v21 = vpop.f32.mrf.mxu0  ;;  %v6089_v28 = vadd.f32 %v1807_v62, %v1718_v8  ;;  %v4597_v62 = vld [vmem:[#allocation2 + $0xa8] sm:$0xf] }
 0x35d   :  { %2381 = vmatpush.bf16.msrb.mxu3 %v4674_v58  ;;  %v6091_v46 = vadd.f32 %v1667_v21, %v1578_v49  ;;  %v1721_v11 = vpop.f32.mrf.mxu1  ;;  %v4941_v21 = vld [vmem:[#allocation7 + $0x160] sm:$0xf] }
 0x35e   :  { %7020 = vst [vmem:[#allocation97_spill] sm:$0xff] %v6089_v28  ;;  %v4942_v61 = vor.u32 %v5208_v55, %v4941_v21  ;;  %v4813_v28 = vld [vmem:[#allocation7 + $0x60] sm:$0xf] }
 0x35f   :  { %7021 = vst [vmem:[#allocation98_spill] sm:$0xff] %v6091_v46 }
 0x360   :  { %1760 = vmatmul.bf16.gmra.mxu1 %v5775_v14  ;;  %1849 = vmatmul.bf16.gmra.mxu2 %v5781_v31  ;;  %v4581_v31 = vld [vmem:[#allocation2 + $0x88] sm:$0xf] }
 0x361   :  { %2382 = vmatpush.bf16.msrb.mxu3 %v4658_v38  ;;  %v5122_v38 = vld [vmem:[#allocation2 + $0xb4] sm:$0xf0]  ;;  %v4582_v5 = vor.u32 %v5118_v10, %v4581_v31  ;;  %3442 = vmatpush.bf16.msrb.mxu2 %v4942_v61 }
 0x362   :  { %v4598_v14 = vor.u32 %v5122_v38, %v4597_v62  ;;  %v4877_v62 = vld [vmem:[#allocation7 + $0xe0] sm:$0xf]  ;;  %v5110_v31 = vld [vmem:[#allocation2 + $0x54] sm:$0xf0] }
 0x363   :  { %v6095_v58 = vpop.f32.mrf.mxu3  ;;  %v1810_v8 = vpop.f32.mrf.mxu2  ;;  %v4878_v21 = vor.u32 %v5192_v51, %v4877_v62 }
 0x364   :  { %v6097_v42 = vpop.f32.mrf.mxu0  ;;  %v6099_v49 = vadd.f32 %v1810_v8, %v1721_v11  ;;  %v5114_v8 = vld [vmem:[#allocation2 + $0x74] sm:$0xf0] }
 0x365   :  { %2383 = vmatpush.bf16.msrb.mxu3 %v4642_v45  ;;  %v6102_v57 = vpop.f32.mrf.mxu1  ;;  %v4566_v35 = vor.u32 %v5114_v8, %v4565_v40  ;;  %3353 = vmatpush.bf16.msrb.mxu1 %v4878_v21  ;;  %v5102_v40 = vld [vmem:[#allocation2 + $0x14] sm:$0xf0]  ;;  %v4757_v8 = vld [vmem:[#allocation2 + $0x1e8] sm:$0xf] }
 0x366   :  { %7022 = vst [vmem:[#allocation99_spill] sm:$0xff] %v6099_v49 }
 0x368   :  { %2384 = vmatmul.bf16.vlgmr.msrb.gmra.mxu3 %v6061_v41 }
 0x369   :  { %2389 = vmatpush.bf16.msra.mxu3 %v4630_v24 }
 0x36b   :  { %v1583_v45 = vpop.f32.mrf.mxu3  ;;  %v6104_v24 = vpop.f32.mrf.mxu2 }
 0x36c   :  { %v1672_v11 = vpop.f32.mrf.mxu0 }
 0x36d   :  { %2390 = vmatpush.bf16.msra.mxu3 %v4614_v29  ;;  %v6106_v46 = vadd.f32 %v1672_v11, %v1583_v45  ;;  %v1726_v49 = vpop.f32.mrf.mxu1  ;;  %v5176_v29 = vld [vmem:[#allocation7 + $0x64] sm:$0xf0]  ;;  %v5106_v11 = vld [vmem:[#allocation2 + $0x34] sm:$0xf0] }
 0x36e   :  { %v4814_v38 = vor.u32 %v5176_v29, %v4813_v28  ;;  %v5162_v29 = vld [vmem:[#allocation2 + $0x1f4] sm:$0xf0] }
 0x36f   :  { %7023 = vst [vmem:[#allocation100_spill] sm:$0xff] %v6106_v46  ;;  %v5158_v46 = vld [vmem:[#allocation2 + $0x1d4] sm:$0xf0] }
 0x370   :  { %1765 = vmatmul.bf16.gmra.mxu1 %v5794_v18  ;;  %1854 = vmatmul.bf16.gmra.mxu2 %v5797_v56  ;;  %v4517_v56 = vld [vmem:[#allocation2 + $0x8] sm:$0xf] }
 0x371   :  { %2391 = vmatpush.bf16.msra.mxu3 %v4598_v14  ;;  %v4549_v14 = vld [vmem:[#allocation2 + $0x48] sm:$0xf]  ;;  %3264 = vmatpush.bf16.msrb.mxu0 %v4814_v38  ;;  %v4518_v38 = vor.u32 %v5102_v40, %v4517_v56 }
 0x372   :  { %v4550_v61 = vor.u32 %v5110_v31, %v4549_v14  ;;  %v4758_v14 = vor.u32 %v5162_v29, %v4757_v8 }
 0x373   :  { %v6110_v10 = vpop.f32.mrf.mxu3  ;;  %v1815_v55 = vpop.f32.mrf.mxu2 }
 0x374   :  { %v6112_v45 = vpop.f32.mrf.mxu0  ;;  %v6114_v28 = vadd.f32 %v1815_v55, %v1726_v49  ;;  %v4741_v55 = vld [vmem:[#allocation2 + $0x1c8] sm:$0xf] }
 0x375   :  { %2392 = vmatpush.bf16.msra.mxu3 %v4582_v5  ;;  %v4533_v5 = vld [vmem:[#allocation2 + $0x28] sm:$0xf]  ;;  %v6116_v51 = vpop.f32.mrf.mxu1 }
 0x376   :  { %7024 = vst [vmem:[#allocation101_spill] sm:$0xff] %v6114_v28  ;;  %v4534_v18 = vor.u32 %v5106_v11, %v4533_v5  ;;  %v4725_v5 = vld [vmem:[#allocation2 + $0x1a8] sm:$0xf]  ;;  %v5154_v11 = vld [vmem:[#allocation2 + $0x1b4] sm:$0xf0] }
 0x377   :  { %v4726_v29 = vor.u32 %v5154_v11, %v4725_v5 }
 0x379   :  { %2393 = vmatpush.bf16.msra.mxu3 %v4566_v35 }
 0x37b   :  { %v1588_v35 = vpop.f32.mrf.mxu3  ;;  %v6118_v62 = vpop.f32.mrf.mxu2 }
 0x37c   :  { %v1677_v21 = vpop.f32.mrf.mxu0 }
 0x37d   :  { %2394 = vmatpush.bf16.msra.mxu3 %v4550_v61  ;;  %v6120_v31 = vadd.f32 %v1677_v21, %v1588_v35  ;;  %v1731_v49 = vpop.f32.mrf.mxu1  ;;  %v4742_v61 = vor.u32 %v5158_v46, %v4741_v55  ;;  %v5146_v21 = vld [vmem:[#allocation2 + $0x174] sm:$0xf0] }
 0x37e   :  { %v5206_v55 = vld [vmem:[#allocation7 + $0x154] sm:$0xf0] }
 0x37f   :  { %7025 = vst [vmem:[#allocation102_spill] sm:$0xff] %v6120_v31 }
 0x380   :  { %1770 = vmatmul.bf16.gmra.mxu1 %v5806_v0  ;;  %1859 = vmatmul.bf16.gmra.mxu2 %v5811_v59  ;;  %v5150_v0 = vld [vmem:[#allocation2 + $0x194] sm:$0xf0]  ;;  %v4693_v59 = vld [vmem:[#allocation2 + $0x168] sm:$0xf] }
 0x381   :  { %2395 = vmatpush.bf16.msra.mxu3 %v4534_v18 }
 0x383   :  { %v6125_v18 = vpop.f32.mrf.mxu3  ;;  %v1820_v56 = vpop.f32.mrf.mxu2 }
 0x384   :  { %v6127_v40 = vpop.f32.mrf.mxu0  ;;  %v6129_v8 = vadd.f32 %v1820_v56, %v1731_v49  ;;  %v4694_v49 = vor.u32 %v5146_v21, %v4693_v59  ;;  %v4677_v56 = vld [vmem:[#allocation2 + $0x148] sm:$0xf]  ;;  %v5138_v59 = vld [vmem:[#allocation2 + $0x134] sm:$0xf0] }
 0x385   :  { %2396 = vmatpush.bf16.msra.mxu3 %v4518_v38  ;;  %v6131_v35 = vpop.f32.mrf.mxu1  ;;  %v4709_v38 = vld [vmem:[#allocation2 + $0x188] sm:$0xf] }
 0x386   :  { %7026 = vst [vmem:[#allocation103_spill] sm:$0xff] %v6129_v8  ;;  %v4710_v46 = vor.u32 %v5150_v0, %v4709_v38  ;;  %v4805_v8 = vld [vmem:[#allocation7 + $0x50] sm:$0xf] }
 0x387   :  { %v4869_v38 = vld [vmem:[#allocation7 + $0xd0] sm:$0xf] }
 0x388   :  { %2397 = vmatmul.bf16.vlgmr.msra.gmra.mxu3 %v6044_v39  ;;  %v4870_v60 = vor.u32 %v5190_v9, %v4869_v38 }
 0x389   :  { %2402 = vmatpush.bf16.msrb.mxu3 %v4758_v14  ;;  %v4933_v14 = vld [vmem:[#allocation7 + $0x150] sm:$0xf] }
 0x38a   :  { %v4934_v31 = vor.u32 %v5206_v55, %v4933_v14  ;;  %3354 = vmatpush.bf16.msrb.mxu1 %v4870_v60  ;;  %v4645_v55 = vld [vmem:[#allocation2 + $0x108] sm:$0xf]  ;;  %v4615_v60 = vld [vmem:[#allocation2 + $0xd8] sm:$0xf0] }
 0x38b   :  { %v1593_v28 = vpop.f32.mrf.mxu3  ;;  %v6133_v16 = vpop.f32.mrf.mxu2 }
 0x38c   :  { %v1682_v2 = vpop.f32.mrf.mxu0  ;;  %3443 = vmatpush.bf16.msrb.mxu2 %v4934_v31 }
 0x38d   :  { %2403 = vmatpush.bf16.msrb.mxu3 %v4742_v61  ;;  %v5142_v61 = vld [vmem:[#allocation2 + $0x154] sm:$0xf0]  ;;  %v6135_v5 = vadd.f32 %v1682_v2, %v1593_v28  ;;  %v1736_v11 = vpop.f32.mrf.mxu1 }
 0x38e   :  { %v4678_v14 = vor.u32 %v5142_v61, %v4677_v56  ;;  %v4631_v56 = vld [vmem:[#allocation2 + $0xf8] sm:$0xf0] }
 0x38f   :  { %7027 = vst [vmem:[#allocation104_spill] sm:$0xff] %v6135_v5 }
 0x390   :  { %1775 = vmatmul.bf16.gmra.mxu1 %v5822_v22  ;;  %1864 = vmatmul.bf16.gmra.mxu2 %v5825_v36  ;;  %v5134_v22 = vld [vmem:[#allocation2 + $0x114] sm:$0xf0] }
 0x391   :  { %2404 = vmatpush.bf16.msrb.mxu3 %v4726_v29  ;;  %v5174_v29 = vld [vmem:[#allocation7 + $0x54] sm:$0xf0]  ;;  %v4646_v36 = vor.u32 %v5134_v22, %v4645_v55  ;;  %v5116_v55 = vld [vmem:[#allocation2 + $0x8c] sm:$0xf]  ;;  %v4583_v22 = vld [vmem:[#allocation2 + $0x98] sm:$0xf0] }
 0x392   :  { %v4806_v0 = vor.u32 %v5174_v29, %v4805_v8  ;;  %v5124_v29 = vld [vmem:[#allocation2 + $0xcc] sm:$0xf] }
 0x393   :  { %v6139_v31 = vpop.f32.mrf.mxu3  ;;  %v1825_v2 = vpop.f32.mrf.mxu2 }
 0x394   :  { %3265 = vmatpush.bf16.msrb.mxu0 %v4806_v0  ;;  %7028 = vst [vmem:[#allocation105_spill] sm:$0xff] %v6139_v31  ;;  %v6141_v28 = vpop.f32.mrf.mxu0  ;;  %v6143_v21 = vadd.f32 %v1825_v2, %v1736_v11  ;;  %v4599_v2 = vld [vmem:[#allocation2 + $0xb8] sm:$0xf0]  ;;  %v4925_v31 = vld [vmem:[#allocation7 + $0x140] sm:$0xf] }
 0x395   :  { %2405 = vmatpush.bf16.msrb.mxu3 %v4710_v46  ;;  %v4661_v46 = vld [vmem:[#allocation2 + $0x128] sm:$0xf]  ;;  %7029 = vst [vmem:[#allocation106_spill] sm:$0xff] %v6141_v28  ;;  %v6145_v9 = vpop.f32.mrf.mxu1 }
 0x396   :  { %7030 = vst [vmem:[#allocation107_spill] sm:$0xff] %v6143_v21  ;;  %v4662_v8 = vor.u32 %v5138_v59, %v4661_v46  ;;  %v4618_v46 = vor.u32 %v5124_v29, %v4615_v60  ;;  %v5120_v59 = vld [vmem:[#allocation2 + $0xac] sm:$0xf] }
 0x397   :  { %v5108_v60 = vld [vmem:[#allocation2 + $0x4c] sm:$0xf] }
 0x399   :  { %2406 = vmatpush.bf16.msrb.mxu3 %v4694_v49  ;;  %v5128_v49 = vld [vmem:[#allocation2 + $0xec] sm:$0xf] }
 0x39a   :  { %v4634_v61 = vor.u32 %v5128_v49, %v4631_v56 }
 0x39b   :  { %v1598_v38 = vpop.f32.mrf.mxu3  ;;  %v6147_v0 = vpop.f32.mrf.mxu2 }
 0x39c   :  { %v1687_v5 = vpop.f32.mrf.mxu0 }
 0x39d   :  { %2407 = vmatpush.bf16.msrb.mxu3 %v4678_v14  ;;  %v6149_v11 = vadd.f32 %v1687_v5, %v1598_v38  ;;  %v1741_v14 = vpop.f32.mrf.mxu1  ;;  %v4586_v5 = vor.u32 %v5116_v55, %v4583_v22  ;;  %v4567_v38 = vld [vmem:[#allocation2 + $0x78] sm:$0xf0] }
 0x39e   :  { %v4535_v22 = vld [vmem:[#allocation2 + $0x38] sm:$0xf0] }
 0x39f   :  { %7031 = vst [vmem:[#allocation108_spill] sm:$0xff] %v6149_v11  ;;  %v4551_v11 = vld [vmem:[#allocation2 + $0x58] sm:$0xf0] }
 0x3a1   :  { %2408 = vmatpush.bf16.msrb.mxu3 %v4662_v8  ;;  %v4602_v8 = vor.u32 %v5120_v59, %v4599_v2 }
 0x3a3   :  { %v6152_v49 = vpop.f32.mrf.mxu3  ;;  %v1830_v56 = vpop.f32.mrf.mxu2 }
 0x3a4   :  { %7032 = vst [vmem:[#allocation109_spill] sm:$0xff] %v6152_v49  ;;  %v6154_v28 = vadd.f32 %v1830_v56, %v1741_v14  ;;  %v4797_v49 = vld [vmem:[#allocation7 + $0x40] sm:$0xf]  ;;  %v5104_v56 = vld [vmem:[#allocation2 + $0x2c] sm:$0xf] }
 0x3a5   :  { %2409 = vmatpush.bf16.msrb.mxu3 %v4646_v36  ;;  %v6156_v36 = vpop.f32.mrf.mxu1  ;;  %v4798_v55 = vor.u32 %v5172_v50, %v4797_v49 }
 0x3a6   :  { %7033 = vst [vmem:[#allocation110_spill] sm:$0xff] %v6154_v28  ;;  %v4861_v28 = vld [vmem:[#allocation7 + $0xc0] sm:$0xf] }
 0x3a7   :  { %3266 = vmatpush.bf16.msrb.mxu0 %v4798_v55  ;;  %v4743_v55 = vld [vmem:[#allocation2 + $0x1d8] sm:$0xf0] }
 0x3a8   :  { %2410 = vmatmul.bf16.vlgmr.msrb.gmra.mxu3 %v6061_v41 }
 0x3a9   :  { %2415 = vmatpush.bf16.msra.mxu3 %v4634_v61  ;;  %v5112_v61 = vld [vmem:[#allocation2 + $0x6c] sm:$0xf] }
 0x3aa   :  { %v4570_v29 = vor.u32 %v5112_v61, %v4567_v38  ;;  %v4538_v38 = vor.u32 %v5104_v56, %v4535_v22  ;;  %v5156_v56 = vld [vmem:[#allocation2 + $0x1cc] sm:$0xf] }
 0x3ab   :  { %v6158_v59 = vpop.f32.mrf.mxu2  ;;  %v2346_v2 = vpop.f32.mrf.mxu3 }
 0x3ad   :  { %2416 = vmatpush.bf16.msra.mxu3 %v4618_v46  ;;  %v5204_v46 = vld [vmem:[#allocation7 + $0x144] sm:$0xf0]  ;;  %v1746_v14 = vpop.f32.mrf.mxu1 }
 0x3ae   :  { %v4926_v21 = vor.u32 %v5204_v46, %v4925_v31  ;;  %v6163_v31 = vld [vmem:[%s6903_s6] sm:$0xf] }
 0x3af   :  { %v1952_v46 = vperm.slane %v6163_v31, 0 }
 0x3b0   :  { %3444 = vmatpush.bf16.msrb.mxu2 %v4926_v21  ;;  %v4759_v21 = vld [vmem:[#allocation2 + $0x1f8] sm:$0xf0] }
 0x3b1   :  { %2417 = vmatpush.bf16.msra.mxu3 %v4602_v8  ;;  %v4554_v8 = vor.u32 %v5108_v60, %v4551_v11  ;;  %v5160_v60 = vld [vmem:[#allocation2 + $0x1ec] sm:$0xf]  ;;  %v2347_v22 = vadd.f32 %v2346_v2, %v1952_v46  ;;  %v4695_v46 = vld [vmem:[#allocation2 + $0x178] sm:$0xf0] }
 0x3b3   :  { %v2348_v11 = vpop.f32.mrf.mxu3 }
 0x3b5   :  { %2418 = vmatpush.bf16.msra.mxu3 %v4586_v5  ;;  %v5188_v5 = vld [vmem:[#allocation7 + $0xc4] sm:$0xf0]  ;;  %v6167_v49 = vpop.f32.mrf.mxu1 }
 0x3b6   :  { %v4862_v61 = vor.u32 %v5188_v5, %v4861_v28  ;;  %v4522_v28 = vor.u32 %v5100_v30, %v4519_v25  ;;  %v4746_v5 = vor.u32 %v5156_v56, %v4743_v55  ;;  %v4730_v25 = vor.u32 %v5152_v4, %v4727_v19  ;;  %v5148_v30 = vld [vmem:[#allocation2 + $0x18c] sm:$0xf] }
 0x3b8   :  { %3355 = vmatpush.bf16.msrb.mxu1 %v4862_v61 }
 0x3b9   :  { %2419 = vmatpush.bf16.msra.mxu3 %v4570_v29  ;;  %v1835_v29 = vpop.f32.mrf.mxu2 }
 0x3ba   :  { %v6165_v50 = vadd.f32 %v1835_v29, %v1746_v14  ;;  %v4711_v29 = vld [vmem:[#allocation2 + $0x198] sm:$0xf0] }
 0x3bb   :  { %v2359_v11 = vpop.f32.mrf.mxu3 }
 0x3bc   :  { %7034 = vst [vmem:[#allocation111_spill] sm:$0xff] %v6165_v50  ;;  %v6172_v14 = vadd.f32 %v2359_v11, %v2347_v22  ;;  %v5140_v22 = vld [vmem:[#allocation2 + $0x14c] sm:$0xf]  ;;  %v4679_v11 = vld [vmem:[#allocation2 + $0x158] sm:$0xf0] }
 0x3bd   :  { %2420 = vmatpush.bf16.msra.mxu3 %v4554_v8  ;;  %v4762_v8 = vor.u32 %v5160_v60, %v4759_v21  ;;  %v4714_v60 = vor.u32 %v5148_v30, %v4711_v29  ;;  %v4917_v30 = vld [vmem:[#allocation7 + $0x130] sm:$0xf]  ;;  %v5202_v29 = vld [vmem:[#allocation7 + $0x134] sm:$0xf0] }
 0x3be   :  { %v4789_v50 = vld [vmem:[#allocation7 + $0x30] sm:$0xf] }
 0x3c1   :  { %2421 = vmatpush.bf16.msra.mxu3 %v4538_v38  ;;  %v6170_v61 = vpop.f32.mrf.mxu2  ;;  %v1751_v38 = vpop.f32.mrf.mxu1 }
 0x3c3   :  { %v2361_v2 = vpop.f32.mrf.mxu3 }
 0x3c4   :  { %v4918_v2 = vor.u32 %v5202_v29, %v4917_v30  ;;  %v5200_v29 = vld [vmem:[#allocation7 + $0x124] sm:$0xf0] }
 0x3c5   :  { %2422 = vmatpush.bf16.msra.mxu3 %v4522_v28  ;;  %v5144_v28 = vld [vmem:[#allocation2 + $0x16c] sm:$0xf] }
 0x3c6   :  { %v4698_v55 = vor.u32 %v5144_v28, %v4695_v46  ;;  %3445 = vmatpush.bf16.msrb.mxu2 %v4918_v2  ;;  %v5132_v46 = vld [vmem:[#allocation2 + $0x10c] sm:$0xf] }
 0x3c8   :  { %2423 = vmatmul.bf16.vlgmr.msra.gmra.mxu3 %v6044_v39  ;;  %v4682_v39 = vor.u32 %v5140_v22, %v4679_v11 }
 0x3c9   :  { %2428 = vmatpush.bf16.msrb.mxu3 %v4762_v8  ;;  %v1840_v21 = vpop.f32.mrf.mxu2  ;;  %v6177_v56 = vpop.f32.mrf.mxu1 }
 0x3ca   :  { %v6175_v8 = vadd.f32 %v1840_v21, %v1751_v38  ;;  %v4790_v21 = vor.u32 %v5170_v47, %v4789_v50 }
 0x3cb   :  { %v2372_v4 = vpop.f32.mrf.mxu3 }
 0x3cc   :  { %7035 = vst [vmem:[#allocation112_spill] sm:$0xff] %v6175_v8  ;;  %v4853_v8 = vld [vmem:[#allocation7 + $0xb0] sm:$0xf]  ;;  %3267 = vmatpush.bf16.msrb.mxu0 %v4790_v21 }
 0x3cd   :  { %2429 = vmatpush.bf16.msrb.mxu3 %v4746_v5  ;;  %v5136_v5 = vld [vmem:[#allocation2 + $0x12c] sm:$0xf]  ;;  %v4854_v28 = vor.u32 %v5186_v26, %v4853_v8  ;;  %v1953_v26 = vperm.slane %v6163_v31, 1 }
 0x3cf   :  { %3356 = vmatpush.bf16.msrb.mxu1 %v4854_v28 }
 0x3d1   :  { %2430 = vmatpush.bf16.msrb.mxu3 %v4730_v25  ;;  %v6179_v19 = vpop.f32.mrf.mxu2  ;;  %v4663_v25 = vld [vmem:[#allocation2 + $0x138] sm:$0xf0]  ;;  %v1756_v38 = vpop.f32.mrf.mxu1 }
 0x3d3   :  { %v2374_v3 = vpop.f32.mrf.mxu3 }
 0x3d4   :  { %v2373_v3 = vadd.f32 %v2372_v4, %v1953_v26 }
 0x3d5   :  { %2431 = vmatpush.bf16.msrb.mxu3 %v4714_v60  ;;  %v4666_v60 = vor.u32 %v5136_v5, %v4663_v25  ;;  %v4909_v25 = vld [vmem:[#allocation7 + $0x120] sm:$0xf] }
 0x3d6   :  { %v4910_v2 = vor.u32 %v5200_v29, %v4909_v25  ;;  %v5184_v25 = vld [vmem:[#allocation7 + $0xa4] sm:$0xf0] }
 0x3d8   :  { %3446 = vmatpush.bf16.msrb.mxu2 %v4910_v2 }
 0x3d9   :  { %2432 = vmatpush.bf16.msrb.mxu3 %v4698_v55  ;;  %v4647_v55 = vld [vmem:[#allocation2 + $0x118] sm:$0xf0]  ;;  %v1845_v11 = vpop.f32.mrf.mxu2  ;;  %v6183_v30 = vpop.f32.mrf.mxu1 }
 0x3da   :  { %v4650_v22 = vor.u32 %v5132_v46, %v4647_v55  ;;  %v6181_v27 = vadd.f32 %v1845_v11, %v1756_v38  ;;  %v4781_v46 = vld [vmem:[#allocation7 + $0x20] sm:$0xf]  ;;  %v5168_v55 = vld [vmem:[#allocation7 + $0x24] sm:$0xf0] }
 0x3dc   :  { %7036 = vst [vmem:[#allocation113_spill] sm:$0xff] %v6181_v27 }
 0x3dd   :  { %2433 = vmatpush.bf16.msrb.mxu3 %v4682_v39 }
 0x3e1   :  { %2434 = vmatpush.bf16.msrb.mxu3 %v4666_v60  ;;  %v6186_v47 = vpop.f32.mrf.mxu2  ;;  %v1761_v50 = vpop.f32.mrf.mxu1 }
 0x3e5   :  { %2435 = vmatpush.bf16.msrb.mxu3 %v4650_v22  ;;  %v4845_v22 = vld [vmem:[#allocation7 + $0xa0] sm:$0xf] }
 0x3e6   :  { %v4846_v29 = vor.u32 %v5184_v25, %v4845_v22  ;;  %v5198_v25 = vld [vmem:[#allocation7 + $0x114] sm:$0xf0] }
 0x3e8   :  { %2436 = vmatmul.bf16.vlgmr.msrb.gmra.mxu3 %v6061_v41  ;;  %3357 = vmatpush.bf16.msrb.mxu1 %v4846_v29  ;;  %v4773_v29 = vld [vmem:[#allocation7 + $0x10] sm:$0xf] }
 0x3e9   :  { %v1850_v8 = vpop.f32.mrf.mxu2  ;;  %v6191_v5 = vpop.f32.mrf.mxu1 }
 0x3ea   :  { %v6189_v39 = vadd.f32 %v1850_v8, %v1761_v50  ;;  %7038 = vst [vmem:[#allocation115_spill] sm:$0xff] %v6191_v5  ;;  %v4782_v8 = vor.u32 %v5168_v55, %v4781_v46 }
 0x3eb   :  { %v2385_v38 = vpop.f32.mrf.mxu3 }
 0x3ec   :  { %7037 = vst [vmem:[#allocation114_spill] sm:$0xff] %v6189_v39  ;;  %v2386_v21 = vadd.f32 %v2385_v38, %v2373_v3  ;;  %3268 = vmatpush.bf16.msrb.mxu0 %v4782_v8  ;;  %v4901_v8 = vld [vmem:[#allocation7 + $0x110] sm:$0xf] }
 0x3ee   :  { %v2445_v60 = vrot.slane %v2386_v21, 7 }
 0x3f0   :  { %v6197_v11 = vsel %vm2448_vm9, %v6172_v14, %v2445_v60  ;;  %v6201_v50 = vsel %vm1992_vm2, %v6172_v14, %v2445_v60  ;;  %v6205_v4 = vsel %vm1994_vm3, %v6172_v14, %v2445_v60  ;;  %v6209_v26 = vsel %vm1996_vm4, %v6172_v14, %v2445_v60 }
 0x3f1   :  { %v6193_v41 = vpop.f32.mrf.mxu2  ;;  %v1766_v28 = vpop.f32.mrf.mxu1  ;;  %v6217_v39 = vsel %vm1998_vm5, %v6172_v14, %v2445_v60  ;;  %v6223_v46 = vsel %vm2000_vm6, %v6172_v14, %v2445_v60 }
 0x3f2   :  { %7039 = vst [vmem:[#allocation116_spill] sm:$0xff] %v6193_v41 }
 0x3f3   :  { %v2387_v3 = vpop.f32.mrf.mxu3  ;;  %7042 = vst [vmem:[#allocation119_spill] sm:$0xff] %v6217_v39 }
 0x3f4   :  { %7044 = vst [vmem:[#allocation121_spill] sm:$0xff] %v6223_v46  ;;  %v4902_v3 = vor.u32 %v5198_v25, %v4901_v8  ;;  %v6241_v8 = vsel %vm2474_vm10, %v2445_v60, %v6172_v14  ;;  %v5180_v46 = vld [vmem:[#allocation7 + $0x84] sm:$0xf0] }
 0x3f5   :  { %7050 = vst [vmem:[#allocation127_spill] sm:$0xff] %v6241_v8  ;;  %v5222_v8 = vld [vmem:[#allocation7 + $0x1d4] sm:$0xf0] }
 0x3f6   :  { %3447 = vmatpush.bf16.msrb.mxu2 %v4902_v3  ;;  %v5164_v3 = vld [vmem:[#allocation7 + $0x4] sm:$0xf0] }
 0x3f9   :  { %v1855_v2 = vpop.f32.mrf.mxu2  ;;  %v6213_v21 = vpop.f32.mrf.mxu1 }
 0x3fa   :  { %v6211_v38 = vadd.f32 %v1855_v2, %v1766_v28  ;;  %7041 = vst [vmem:[#allocation118_spill] sm:$0xff] %v6213_v21  ;;  %v5166_v2 = vld [vmem:[#allocation7 + $0x14] sm:$0xf0] }
 0x3fb   :  { %v5182_v21 = vld [vmem:[#allocation7 + $0x94] sm:$0xf0]  ;;  %v4774_v39 = vor.u32 %v5166_v2, %v4773_v29  ;;  %v4765_v29 = vld [vmem:[#allocation7] sm:$0xf] }
 0x3fc   :  { %7040 = vst [vmem:[#allocation117_spill] sm:$0xff] %v6211_v38  ;;  %v4837_v38 = vld [vmem:[#allocation7 + $0x90] sm:$0xf] }
 0x3fd   :  { %v4838_v1 = vor.u32 %v5182_v21, %v4837_v38  ;;  %3269 = vmatpush.bf16.msrb.mxu0 %v4774_v39  ;;  %v4893_v38 = vld [vmem:[#allocation7 + $0x100] sm:$0xf]  ;;  %v5013_v21 = vld [vmem:[#allocation7 + $0x1f0] sm:$0xf] }
 0x3ff   :  { %3358 = vmatpush.bf16.msrb.mxu1 %v4838_v1  ;;  %v5226_v1 = vld [vmem:[#allocation7 + $0x1f4] sm:$0xf0] }
 0x400   :  { %v5014_v2 = vor.u32 %v5226_v1, %v5013_v21  ;;  %v4981_v1 = vld [vmem:[#allocation7 + $0x1b0] sm:$0xf] }
 0x401   :  { %v6219_v27 = vpop.f32.mrf.mxu2  ;;  %v1771_v41 = vpop.f32.mrf.mxu1 }
 0x402   :  { %7043 = vst [vmem:[#allocation120_spill] sm:$0xff] %v6219_v27  ;;  %3530 = vmatpush.bf16.msra.mxu3 %v5014_v2 }
 0x409   :  { %v1860_v5 = vpop.f32.mrf.mxu2  ;;  %v6229_v28 = vpop.f32.mrf.mxu1 }
 0x40a   :  { %v6225_v55 = vadd.f32 %v1860_v5, %v1771_v41  ;;  %7046 = vst [vmem:[#allocation123_spill] sm:$0xff] %v6229_v28  ;;  %v6235_v5 = vsel %vm2002_vm7, %v6172_v14, %v2445_v60  ;;  %v4997_v60 = vld [vmem:[#allocation7 + $0x1d0] sm:$0xf] }
 0x40b   :  { %v6227_v22 = vpop.f32.mrf.mxu3  ;;  %7048 = vst [vmem:[#allocation125_spill] sm:$0xff] %v6235_v5  ;;  %v4829_v5 = vld [vmem:[#allocation7 + $0x80] sm:$0xf] }
 0x40c   :  { %7045 = vst [vmem:[#allocation122_spill] sm:$0xff] %v6225_v55 }
 0x411   :  { %v6231_v27 = vpop.f32.mrf.mxu2  ;;  %v1776_v41 = vpop.f32.mrf.mxu1 }
 0x412   :  { %7047 = vst [vmem:[#allocation124_spill] sm:$0xff] %v6231_v27  ;;  %v4766_v27 = vor.u32 %v5164_v3, %v4765_v29  ;;  %v5218_v29 = vld [vmem:[#allocation7 + $0x1b4] sm:$0xf0] }
 0x413   :  { %v2400_v33 = vpop.f32.mrf.mxu3  ;;  %v4982_v3 = vor.u32 %v5218_v29, %v4981_v1  ;;  %v5225_v1 = vld [vmem:[#allocation7 + $0x1f4] sm:$0xf]  ;;  %v5015_v29 = vld [vmem:[#allocation7 + $0x1f8] sm:$0xf0] }
 0x414   :  { %v5196_v33 = vld [vmem:[#allocation7 + $0x104] sm:$0xf0]  ;;  %3270 = vmatpush.bf16.msrb.mxu0 %v4766_v27  ;;  %v5214_v27 = vld [vmem:[#allocation7 + $0x194] sm:$0xf0] }
 0x415   :  { %v4894_v39 = vor.u32 %v5196_v33, %v4893_v38  ;;  %v4998_v38 = vor.u32 %v5222_v8, %v4997_v60  ;;  %v4989_v33 = vld [vmem:[#allocation7 + $0x1c0] sm:$0xf]  ;;  %v5212_v8 = vld [vmem:[#allocation7 + $0x184] sm:$0xf0]  ;;  %v4951_v60 = vld [vmem:[#allocation7 + $0x178] sm:$0xf0] }
 0x416   :  { %v4990_v21 = vor.u32 %v5220_v48, %v4989_v33  ;;  %v5209_v48 = vld [vmem:[#allocation7 + $0x174] sm:$0xf] }
 0x417   :  { %3448 = vmatpush.bf16.msrb.mxu2 %v4894_v39  ;;  %v4973_v39 = vld [vmem:[#allocation7 + $0x1a0] sm:$0xf]  ;;  %v4954_v33 = vor.u32 %v5209_v48, %v4951_v60  ;;  %v7054_v48 = vld [vmem:[#allocation61_spill] sm:$0xff] }
 0x419   :  { %v1865_v55 = vpop.f32.mrf.mxu2 }
 0x41a   :  { %v6237_v28 = vadd.f32 %v1865_v55, %v1776_v41  ;;  %v5005_v55 = vld [vmem:[#allocation7 + $0x1e0] sm:$0xf] }
 0x41b   :  { %v5006_v14 = vor.u32 %v5224_v20, %v5005_v55  ;;  %v4965_v20 = vld [vmem:[#allocation7 + $0x190] sm:$0xf]  ;;  %v4957_v55 = vld [vmem:[#allocation7 + $0x180] sm:$0xf]  ;;  %3797 = vmatpush.bf16.msra.mxu2 %v4954_v33 }
 0x41c   :  { %7049 = vst [vmem:[#allocation126_spill] sm:$0xff] %v6237_v28  ;;  %v4830_v28 = vor.u32 %v5180_v46, %v4829_v5  ;;  %v5216_v46 = vld [vmem:[#allocation7 + $0x1a4] sm:$0xf0] }
 0x41d   :  { %3531 = vmatpush.bf16.msra.mxu3 %v5006_v14  ;;  %v4974_v5 = vor.u32 %v5216_v46, %v4973_v39  ;;  %v5018_v39 = vor.u32 %v5225_v1, %v5015_v29  ;;  %v5193_v46 = vld [vmem:[#allocation7 + $0xf4] sm:$0xf] }
 0x41e   :  { %3359 = vmatpush.bf16.msrb.mxu1 %v4830_v28  ;;  %v4966_v28 = vor.u32 %v5214_v27, %v4965_v20  ;;  %v1954_v20 = vperm.slane %v6163_v31, 2  ;;  %v1955_v27 = vperm.slane %v6163_v31, 3 }
 0x421   :  { %3532 = vmatpush.bf16.msra.mxu3 %v4998_v38  ;;  %v5177_v38 = vld [vmem:[#allocation7 + $0x74] sm:$0xf] }
 0x425   :  { %3533 = vmatpush.bf16.msra.mxu3 %v4990_v21  ;;  %v4823_v21 = vld [vmem:[#allocation7 + $0x78] sm:$0xf0] }
 0x429   :  { %3534 = vmatpush.bf16.msra.mxu3 %v4982_v3  ;;  %v4826_v3 = vor.u32 %v5177_v38, %v4823_v21  ;;  %v7055_v38 = vld [vmem:[#allocation63_spill] sm:$0xff]  ;;  %v7057_v21 = vld [vmem:[#allocation88_spill] sm:$0xff] }
 0x42b   :  { %v6243_v25 = vpop.f32.mrf.mxu3  ;;  %3619 = vmatpush.bf16.msra.mxu0 %v4826_v3 }
 0x42d   :  { %3535 = vmatpush.bf16.msra.mxu3 %v4974_v5  ;;  %v4887_v5 = vld [vmem:[#allocation7 + $0xf8] sm:$0xf0] }
 0x42e   :  { %v4890_v13 = vor.u32 %v5193_v46, %v4887_v5 }
 0x430   :  { %3708 = vmatpush.bf16.msra.mxu1 %v4890_v13  ;;  %v6263_v13 = vadd.f32 %v6038_v54, %v6036_v52  ;;  %v6283_v54 = vadd.f32 %v6104_v24, %v6102_v57  ;;  %v6295_v52 = vadd.f32 %v6127_v40, %v6125_v18 }
 0x431   :  { %3536 = vmatpush.bf16.msra.mxu3 %v4966_v28  ;;  %v2399_v28 = vadd.f32 %v6227_v22, %v1954_v20  ;;  %v6267_v22 = vadd.f32 %v6055_v7, %v6053_v12  ;;  %v6287_v12 = vadd.f32 %v6112_v45, %v6110_v10  ;;  %v6299_v7 = vadd.f32 %v6133_v16, %v6131_v35 }
 0x432   :  { %v6315_v16 = vadd.f32 %v6170_v61, %v6167_v49 }
 0x433   :  { %v2413_v41 = vpop.f32.mrf.mxu3 }
 0x434   :  { %v4958_v41 = vor.u32 %v5212_v8, %v4957_v55  ;;  %v6250_v55 = vadd.f32 %v5998_v43, %v5994_v53  ;;  %v2412_v8 = vadd.f32 %v6243_v25, %v2399_v28  ;;  %v6271_v53 = vadd.f32 %v6072_v32, %v6070_v23  ;;  %v7053_v25 = vld [vmem:[#allocation28_spill] sm:$0xff] }
 0x435   :  { %v6275_v43 = vadd.f32 %v6085_v37, %v6083_v17  ;;  %v6307_v17 = vadd.f32 %v6147_v0, %v6145_v9  ;;  %v6311_v37 = vadd.f32 %v6158_v59, %v6156_v36  ;;  %v6339_v36 = vadd.f32 %v6186_v47, %v6183_v30  ;;  %v7056_v30 = vld [vmem:[#allocation87_spill] sm:$0xff] }
 0x436   :  { %3537 = vmatpush.bf16.msra.mxu3 %v4958_v41  ;;  %v6255_v41 = vadd.f32 %v6012_v44, %v6008_v34  ;;  %v6279_v34 = vadd.f32 %v6097_v42, %v6095_v58  ;;  %v6301_v23 = vrot.slane %v2412_v8, 6  ;;  %v6319_v58 = vadd.f32 %v6179_v19, %v6177_v56 }
 0x43a   :  { %3886 = vmatpush.bf16.msrb.mxu3 %v5018_v39 }
 0x44b   :  { %v2424_v2 = vpop.f32.mrf.mxu3 }
 0x44c   :  { %v2425_v31 = vadd.f32 %v2424_v2, %v1955_v27 }
 0x453   :  { %v2426_v14 = vpop.f32.mrf.mxu3 }
 0x454   :  { %v6259_v14 = vadd.f32 %v6026_v15, %v6022_v6  ;;  %v6291_v6 = vadd.f32 %v6118_v62, %v6116_v51 }
 0x46b   :  { %v2437_v44 = vpop.f32.mrf.mxu3 }
 0x46c   :  { %v2438_v15 = vadd.f32 %v2437_v44, %v2425_v31  ;;  %v7060_v31 = vld [vmem:[#allocation13_spill] sm:$0xff] }
 0x46e   :  { %v6303_v32 = vrot.slane %v2438_v15, 5  ;;  %v7061_v15 = vld [vmem:[#allocation14_spill] sm:$0xff] }
 0x470   :  { %v2450_v42 = vsel %vm1994_vm3, %v6301_v23, %v6303_v32  ;;  %v2454_v57 = vsel %vm1996_vm4, %v6301_v23, %v6303_v32  ;;  %v2459_v24 = vsel %vm1998_vm5, %v6301_v23, %v6303_v32  ;;  %v2464_v10 = vsel %vm2000_vm6, %v6301_v23, %v6303_v32 }
 0x471   :  { %v2452_v45 = vsel %vm2451_vm11, %v6197_v11, %v2450_v42  ;;  %v2456_v51 = vsel %vm2455_vm12, %v6201_v50, %v2454_v57  ;;  %v2461_v62 = vsel %vm2460_vm13, %v6205_v4, %v2459_v24  ;;  %v2466_v18 = vsel %vm2465_vm14, %v6209_v26, %v2464_v10  ;;  %v7051_v11 = vld [vmem:[#allocation12_spill] sm:$0xff]  ;;  %v7052_v4 = vld [vmem:[#allocation26_spill] sm:$0xff] }
 0x472   :  { %v2489_v40 = vperm.slane %v2452_v45, 0  ;;  %v2490_v35 = vperm.slane %v2452_v45, 1  ;;  %v2491_v9 = vperm.slane %v2452_v45, 2  ;;  %v2492_v0 = vperm.slane %v2452_v45, 3  ;;  %v7064_v10 = vld [vmem:[#allocation30_spill] sm:$0xff] }
 0x473   :  { %v2439_v59 = vpop.f32.mrf.mxu3  ;;  %v2457_v49 = vrot.slane %v2456_v51, 1  ;;  %v6341_v61 = vrot.slane %v2461_v62, 2  ;;  %v6343_v56 = vrot.slane %v2466_v18, 3  ;;  %v7065_v51 = vld [vmem:[#allocation32_spill] sm:$0xff] }
 0x474   :  { %v2553_v19 = vadd.f32 %v2489_v40, %v5727_v63  ;;  %v2557_v50 = vadd.f32 %v2489_v40, %v7051_v11  ;;  %v2554_v26 = vadd.f32 %v2490_v35, %v7052_v4  ;;  %v2558_v2 = vadd.f32 %v2490_v35, %v7053_v25  ;;  %v7068_v25 = vld [vmem:[#allocation90_spill] sm:$0xff] }
 0x475   :  { %v2555_v60 = vadd.f32 %v2491_v9, %v7054_v48  ;;  %v2559_v33 = vadd.f32 %v2491_v9, %v7055_v38  ;;  %v2556_v47 = vadd.f32 %v2492_v0, %v7056_v30  ;;  %v2560_v1 = vadd.f32 %v2492_v0, %v7057_v21  ;;  %v7069_v48 = vld [vmem:[#allocation91_spill] sm:$0xff] }
 0x476   :  { %v2681_v29 = vmax.f32 %v2553_v19, 0.0  ;;  %v2685_v3 = vmax.f32 %v2557_v50, 0.0  ;;  %v2682_v39 = vmax.f32 %v2554_v26, 0.0  ;;  %v2686_v46 = vmax.f32 %v2558_v2, 0.0  ;;  %v7066_v19 = vld [vmem:[#allocation65_spill] sm:$0xff]  ;;  %v7067_v50 = vld [vmem:[#allocation67_spill] sm:$0xff] }
 0x477   :  { %v2683_v5 = vmax.f32 %v2555_v60, 0.0  ;;  %v2687_v63 = vmax.f32 %v2559_v33, 0.0  ;;  %v2684_v20 = vmax.f32 %v2556_v47, 0.0  ;;  %v2688_v27 = vmax.f32 %v2560_v1, 0.0 }
 0x478   :  { %v6353_v28 = vpack.c.bf16 %v2685_v3, %v2681_v29  ;;  %v6355_v8 = vpack.c.bf16 %v2686_v46, %v2682_v39  ;;  %v2561_v44 = vadd.f32 %v2489_v40, %v7060_v31  ;;  %v2565_v42 = vadd.f32 %v2489_v40, %v7061_v15  ;;  %v7073_v3 = vld [vmem:[#allocation15_spill] sm:$0xff]  ;;  %v7074_v46 = vld [vmem:[#allocation16_spill] sm:$0xff]  ;;  %v7076_v31 = vld [vmem:[#allocation34_spill] sm:$0xff] }
 0x479   :  { %v6359_v57 = vpack.c.bf16 %v2687_v63, %v2683_v5  ;;  %v6361_v24 = vpack.c.bf16 %v2688_v27, %v2684_v20  ;;  %v2562_v45 = vadd.f32 %v2490_v35, %v7064_v10  ;;  %v2566_v62 = vadd.f32 %v2490_v35, %v7065_v51  ;;  %v5207_v20 = vld [vmem:[#allocation7 + $0x164] sm:$0xf]  ;;  %v4943_v27 = vld [vmem:[#allocation7 + $0x168] sm:$0xf0]  ;;  %v7077_v15 = vld [vmem:[#allocation36_spill] sm:$0xff] }
 0x47a   :  { %7058 = vst [vmem:[#allocation12_spill] sm:$0xff] %v6353_v28  ;;  %3271 = vmatmul.bf16.vlgmr.msrb.gmra.mxu0 %v6353_v28  ;;  %3360 = vmatmul.bf16.vlgmr.msrb.gmra.mxu1 %v6355_v8  ;;  %v2689_v18 = vmax.f32 %v2561_v44, 0.0  ;;  %v2693_v59 = vmax.f32 %v2565_v42, 0.0  ;;  %v2563_v11 = vadd.f32 %v2491_v9, %v7066_v19  ;;  %v2567_v4 = vadd.f32 %v2491_v9, %v7067_v50  ;;  %v4815_v51 = vld [vmem:[#allocation7 + $0x68] sm:$0xf0] }
 0x47b   :  { %7059 = vst [vmem:[#allocation26_spill] sm:$0xff] %v6355_v8  ;;  %3449 = vmatmul.bf16.vlgmr.msrb.gmra.mxu2 %v6359_v57  ;;  %3538 = vmatmul.bf16.vlgmr.msra.gmra.mxu3 %v6361_v24  ;;  %v2690_v40 = vmax.f32 %v2562_v45, 0.0  ;;  %v2694_v26 = vmax.f32 %v2566_v62, 0.0  ;;  %v2564_v2 = vadd.f32 %v2492_v0, %v7068_v25  ;;  %v2568_v35 = vadd.f32 %v2492_v0, %v7069_v48  ;;  %v5175_v45 = vld [vmem:[#allocation7 + $0x64] sm:$0xf] }
 0x47c   :  { %7062 = vst [vmem:[#allocation28_spill] sm:$0xff] %v6359_v57  ;;  %v6373_v60 = vpack.c.bf16 %v2693_v59, %v2689_v18  ;;  %v2691_v38 = vmax.f32 %v2563_v11, 0.0  ;;  %v2695_v33 = vmax.f32 %v2567_v4, 0.0  ;;  %v2493_v30 = vperm.slane %v2457_v49, 0  ;;  %v7078_v59 = vld [vmem:[#allocation69_spill] sm:$0xff]  ;;  %v7079_v11 = vld [vmem:[#allocation71_spill] sm:$0xff] }
 0x47d   :  { %7063 = vst [vmem:[#allocation61_spill] sm:$0xff] %v6361_v24  ;;  %v6375_v47 = vpack.c.bf16 %v2694_v26, %v2690_v40  ;;  %v2692_v21 = vmax.f32 %v2564_v2, 0.0  ;;  %v2696_v1 = vmax.f32 %v2568_v35, 0.0  ;;  %v2494_v9 = vperm.slane %v2457_v49, 1  ;;  %v5223_v4 = vld [vmem:[#allocation7 + $0x1e4] sm:$0xf] }
 0x47e   :  { %7070 = vst [vmem:[#allocation63_spill] sm:$0xff] %v6373_v60  ;;  %v6377_v29 = vpack.c.bf16 %v2695_v33, %v2691_v38  ;;  %v2569_v39 = vadd.f32 %v2493_v30, %v7073_v3  ;;  %v2573_v5 = vadd.f32 %v2493_v30, %v7074_v46  ;;  %v2495_v63 = vperm.slane %v2457_v49, 2  ;;  %v5007_v40 = vld [vmem:[#allocation7 + $0x1e8] sm:$0xf0]  ;;  %v7080_v2 = vld [vmem:[#allocation93_spill] sm:$0xff]  ;;  %v7081_v35 = vld [vmem:[#allocation94_spill] sm:$0xff] }
 0x47f   :  { %7071 = vst [vmem:[#allocation87_spill] sm:$0xff] %v6375_v47  ;;  %v6381_v0 = vpack.c.bf16 %v2696_v1, %v2692_v21  ;;  %v2570_v44 = vadd.f32 %v2494_v9, %v7076_v31  ;;  %v2574_v42 = vadd.f32 %v2494_v9, %v7077_v15  ;;  %v2496_v10 = vperm.slane %v2457_v49, 3  ;;  %v5191_v33 = vld [vmem:[#allocation7 + $0xe4] sm:$0xf]  ;;  %v4879_v21 = vld [vmem:[#allocation7 + $0xe8] sm:$0xf0] }
 0x480   :  { %7072 = vst [vmem:[#allocation88_spill] sm:$0xff] %v6377_v29  ;;  %v2697_v62 = vmax.f32 %v2569_v39, 0.0  ;;  %v2701_v18 = vmax.f32 %v2573_v5, 0.0  ;;  %v2571_v19 = vadd.f32 %v2495_v63, %v7078_v59  ;;  %v2575_v50 = vadd.f32 %v2495_v63, %v7079_v11  ;;  %v7085_v11 = vld [vmem:[#allocation17_spill] sm:$0xff]  ;;  %v7158_v24 = vld [vmem:[#allocation72_spill] sm:$0xff] }
 0x481   :  { %7075 = vst [vmem:[#allocation13_spill] sm:$0xff] %v6381_v0  ;;  %v2698_v26 = vmax.f32 %v2570_v44, 0.0  ;;  %v2702_v25 = vmax.f32 %v2574_v42, 0.0  ;;  %v2572_v48 = vadd.f32 %v2496_v10, %v7080_v2  ;;  %v2576_v38 = vadd.f32 %v2496_v10, %v7081_v35 }
 0x482   :  { %v6389_v1 = vpack.c.bf16 %v2701_v18, %v2697_v62  ;;  %v2699_v49 = vmax.f32 %v2571_v19, 0.0  ;;  %v2703_v3 = vmax.f32 %v2575_v50, 0.0  ;;  %v4946_v39 = vor.u32 %v5207_v20, %v4943_v27  ;;  %v7087_v62 = vld [vmem:[#allocation18_spill] sm:$0xff]  ;;  %v7089_v20 = vld [vmem:[#allocation40_spill] sm:$0xff] }
 0x483   :  { %v6391_v46 = vpack.c.bf16 %v2702_v25, %v2698_v26  ;;  %v2700_v5 = vmax.f32 %v2572_v48, 0.0  ;;  %v2704_v31 = vmax.f32 %v2576_v38, 0.0  ;;  %v4818_v15 = vor.u32 %v5175_v45, %v4815_v51  ;;  %v7088_v19 = vld [vmem:[#allocation38_spill] sm:$0xff]  ;;  %v7090_v45 = vld [vmem:[#allocation73_spill] sm:$0xff]  ;;  %v7091_v25 = vld [vmem:[#allocation75_spill] sm:$0xff] }
 0x484   :  { %7082 = vst [vmem:[#allocation14_spill] sm:$0xff] %v6389_v1  ;;  %v6393_v59 = vpack.c.bf16 %v2703_v3, %v2699_v49  ;;  %3798 = vmatpush.bf16.msra.mxu2 %v4946_v39  ;;  %v5010_v44 = vor.u32 %v5223_v4, %v5007_v40  ;;  %v4882_v42 = vor.u32 %v5191_v33, %v4879_v21  ;;  %v7092_v4 = vld [vmem:[#allocation96_spill] sm:$0xff]  ;;  %v7093_v49 = vld [vmem:[#allocation97_spill] sm:$0xff] }
 0x485   :  { %7083 = vst [vmem:[#allocation30_spill] sm:$0xff] %v6391_v46  ;;  %v2577_v2 = vadd.f32 %v2493_v30, %v7085_v11  ;;  %v6396_v35 = vpack.c.bf16 %v2704_v31, %v2700_v5  ;;  %3620 = vmatpush.bf16.msra.mxu0 %v4818_v15  ;;  %v2581_v18 = vadd.f32 %v2493_v30, %v7087_v62  ;;  %v2497_v31 = vperm.slane %v6341_v61, 0  ;;  %v7097_v11 = vld [vmem:[#allocation19_spill] sm:$0xff] }
 0x486   :  { %7084 = vst [vmem:[#allocation32_spill] sm:$0xff] %v6393_v59  ;;  %v2578_v50 = vadd.f32 %v2494_v9, %v7088_v19  ;;  %v2582_v27 = vadd.f32 %v2494_v9, %v7089_v20  ;;  %3887 = vmatpush.bf16.msrb.mxu3 %v5010_v44  ;;  %3709 = vmatpush.bf16.msra.mxu1 %v4882_v42  ;;  %v2498_v42 = vperm.slane %v6341_v61, 1 }
 0x487   :  { %7086 = vst [vmem:[#allocation65_spill] sm:$0xff] %v6396_v35  ;;  %v2705_v26 = vmax.f32 %v2577_v2, 0.0  ;;  %v2579_v51 = vadd.f32 %v2495_v63, %v7090_v45  ;;  %v2583_v48 = vadd.f32 %v2495_v63, %v7091_v25  ;;  %v2580_v40 = vadd.f32 %v2496_v10, %v7092_v4  ;;  %v7098_v2 = vld [vmem:[#allocation20_spill] sm:$0xff] }
 0x488   :  { %v2709_v38 = vmax.f32 %v2581_v18, 0.0  ;;  %v2706_v33 = vmax.f32 %v2578_v50, 0.0  ;;  %v2710_v21 = vmax.f32 %v2582_v27, 0.0  ;;  %v2584_v3 = vadd.f32 %v2496_v10, %v7093_v49  ;;  %v7100_v50 = vld [vmem:[#allocation42_spill] sm:$0xff]  ;;  %v7101_v27 = vld [vmem:[#allocation44_spill] sm:$0xff] }
 0x489   :  { %v2707_v39 = vmax.f32 %v2579_v51, 0.0  ;;  %v2711_v30 = vmax.f32 %v2583_v48, 0.0  ;;  %v2708_v5 = vmax.f32 %v2580_v40, 0.0  ;;  %v2585_v10 = vadd.f32 %v2497_v31, %v7097_v11  ;;  %v7102_v48 = vld [vmem:[#allocation77_spill] sm:$0xff] }
 0x48a   :  { %v6406_v9 = vpack.c.bf16 %v2709_v38, %v2705_v26  ;;  %v6408_v15 = vpack.c.bf16 %v2710_v21, %v2706_v33  ;;  %v2712_v44 = vmax.f32 %v2584_v3, 0.0  ;;  %3276 = vmatmul.bf16.gmra.mxu0 %v6373_v60  ;;  %3365 = vmatmul.bf16.gmra.mxu1 %v6375_v47  ;;  %v2589_v62 = vadd.f32 %v2497_v31, %v7098_v2  ;;  %v7103_v21 = vld [vmem:[#allocation99_spill] sm:$0xff]  ;;  %v7157_v60 = vld [vmem:[#allocation70_spill] sm:$0xff] }
 0x48b   :  { %v6413_v63 = vpack.c.bf16 %v2711_v30, %v2707_v39  ;;  %v2499_v18 = vperm.slane %v6341_v61, 2  ;;  %3454 = vmatmul.bf16.gmra.mxu2 %v6377_v29  ;;  %3543 = vmatmul.bf16.gmra.mxu3 %v6381_v0  ;;  %v2586_v20 = vadd.f32 %v2498_v42, %v7100_v50  ;;  %v2590_v26 = vadd.f32 %v2498_v42, %v7101_v27  ;;  %v4871_v0 = vld [vmem:[#allocation7 + $0xd8] sm:$0xf0] }
 0x48c   :  { %7094 = vst [vmem:[#allocation67_spill] sm:$0xff] %v6406_v9  ;;  %v6420_v19 = vpack.c.bf16 %v2712_v44, %v2708_v5  ;;  %v2500_v45 = vperm.slane %v6341_v61, 3  ;;  %v2713_v51 = vmax.f32 %v2585_v10, 0.0  ;;  %v2717_v25 = vmax.f32 %v2589_v62, 0.0  ;;  %v7105_v44 = vld [vmem:[#allocation21_spill] sm:$0xff]  ;;  %v7107_v62 = vld [vmem:[#allocation22_spill] sm:$0xff] }
 0x48d   :  { %7095 = vst [vmem:[#allocation90_spill] sm:$0xff] %v6408_v15  ;;  %v2587_v4 = vadd.f32 %v2499_v18, %v7102_v48  ;;  %v2591_v40 = vadd.f32 %v2499_v18, %v6250_v55  ;;  %v2714_v38 = vmax.f32 %v2586_v20, 0.0  ;;  %v2718_v33 = vmax.f32 %v2590_v26, 0.0  ;;  %v7109_v20 = vld [vmem:[#allocation46_spill] sm:$0xff]  ;;  %v7110_v48 = vld [vmem:[#allocation48_spill] sm:$0xff] }
 0x48e   :  { %7096 = vst [vmem:[#allocation91_spill] sm:$0xff] %v6413_v63  ;;  %v2588_v49 = vadd.f32 %v2500_v45, %v7103_v21  ;;  %v2592_v3 = vadd.f32 %v2500_v45, %v6283_v54  ;;  %v6429_v39 = vpack.c.bf16 %v2717_v25, %v2713_v51  ;;  %v2593_v11 = vadd.f32 %v2497_v31, %v7105_v44  ;;  %v7112_v25 = vld [vmem:[#allocation80_spill] sm:$0xff] }
 0x48f   :  { %7099 = vst [vmem:[#allocation15_spill] sm:$0xff] %v6420_v19  ;;  %v2715_v30 = vmax.f32 %v2587_v4, 0.0  ;;  %v2719_v5 = vmax.f32 %v2591_v40, 0.0  ;;  %v6432_v2 = vpack.c.bf16 %v2718_v33, %v2714_v38  ;;  %v2597_v50 = vadd.f32 %v2497_v31, %v7107_v62 }
 0x490   :  { %7104 = vst [vmem:[#allocation16_spill] sm:$0xff] %v6429_v39  ;;  %v2716_v61 = vmax.f32 %v2588_v49, 0.0  ;;  %v2720_v10 = vmax.f32 %v2592_v3, 0.0  ;;  %v2721_v55 = vmax.f32 %v2593_v11, 0.0  ;;  %v2594_v26 = vadd.f32 %v2498_v42, %v7109_v20  ;;  %v7113_v49 = vld [vmem:[#allocation101_spill] sm:$0xff]  ;;  %v7118_v20 = vld [vmem:[#allocation24_spill] sm:$0xff] }
 0x491   :  { %7106 = vst [vmem:[#allocation34_spill] sm:$0xff] %v6432_v2  ;;  %v6435_v27 = vpack.c.bf16 %v2719_v5, %v2715_v30  ;;  %v2598_v21 = vadd.f32 %v2498_v42, %v7110_v48  ;;  %v2725_v51 = vmax.f32 %v2597_v50, 0.0  ;;  %v2595_v4 = vadd.f32 %v2499_v18, %v7112_v25 }
 0x492   :  { %v6439_v54 = vpack.c.bf16 %v2720_v10, %v2716_v61  ;;  %v2599_v40 = vadd.f32 %v2499_v18, %v6255_v41  ;;  %v2722_v38 = vmax.f32 %v2594_v26, 0.0  ;;  %v2596_v3 = vadd.f32 %v2500_v45, %v7113_v49  ;;  %v7117_v41 = vld [vmem:[#allocation23_spill] sm:$0xff] }
 0x493   :  { %7108 = vst [vmem:[#allocation36_spill] sm:$0xff] %v6435_v27  ;;  %v2726_v33 = vmax.f32 %v2598_v21, 0.0  ;;  %v2600_v31 = vadd.f32 %v2500_v45, %v6291_v6  ;;  %v6445_v30 = vpack.c.bf16 %v2725_v51, %v2721_v55  ;;  %v2723_v5 = vmax.f32 %v2595_v4, 0.0  ;;  %v7120_v55 = vld [vmem:[#allocation50_spill] sm:$0xff]  ;;  %v7121_v21 = vld [vmem:[#allocation52_spill] sm:$0xff] }
 0x494   :  { %7111 = vst [vmem:[#allocation69_spill] sm:$0xff] %v6439_v54  ;;  %v2727_v44 = vmax.f32 %v2599_v40, 0.0  ;;  %v2501_v11 = vperm.slane %v6343_v56, 0  ;;  %v2724_v61 = vmax.f32 %v2596_v3, 0.0  ;;  %v2502_v62 = vperm.slane %v6343_v56, 1 }
 0x495   :  { %7114 = vst [vmem:[#allocation71_spill] sm:$0xff] %v6445_v30  ;;  %v6448_v42 = vpack.c.bf16 %v2726_v33, %v2722_v38  ;;  %v2728_v10 = vmax.f32 %v2600_v31, 0.0  ;;  %v2503_v6 = vperm.slane %v6343_v56, 2  ;;  %v2504_v25 = vperm.slane %v6343_v56, 3  ;;  %v7122_v38 = vld [vmem:[#allocation83_spill] sm:$0xff] }
 0x496   :  { %v6451_v50 = vpack.c.bf16 %v2727_v44, %v2723_v5  ;;  %v2601_v18 = vadd.f32 %v2501_v11, %v7117_v41  ;;  %v2605_v26 = vadd.f32 %v2501_v11, %v7118_v20  ;;  %v2602_v48 = vadd.f32 %v2502_v62, %v7120_v55  ;;  %v7123_v5 = vld [vmem:[#allocation103_spill] sm:$0xff]  ;;  %v7124_v55 = vld [vmem:[#allocation25_spill] sm:$0xff] }
 0x497   :  { %7115 = vst [vmem:[#allocation93_spill] sm:$0xff] %v6448_v42  ;;  %v6456_v45 = vpack.c.bf16 %v2728_v10, %v2724_v61  ;;  %v2606_v51 = vadd.f32 %v2502_v62, %v7121_v21  ;;  %v2603_v33 = vadd.f32 %v2503_v6, %v7122_v38  ;;  %v2607_v49 = vadd.f32 %v2503_v6, %v6259_v14  ;;  %v7126_v38 = vld [vmem:[#allocation54_spill] sm:$0xff] }
 0x498   :  { %7116 = vst [vmem:[#allocation94_spill] sm:$0xff] %v6451_v50  ;;  %v2729_v4 = vmax.f32 %v2601_v18, 0.0  ;;  %v2733_v40 = vmax.f32 %v2605_v26, 0.0  ;;  %v2730_v3 = vmax.f32 %v2602_v48, 0.0  ;;  %v2604_v44 = vadd.f32 %v2504_v25, %v7123_v5  ;;  %v7125_v26 = vld [vmem:[#allocation27_spill] sm:$0xff] }
 0x499   :  { %7119 = vst [vmem:[#allocation17_spill] sm:$0xff] %v6456_v45  ;;  %v2734_v31 = vmax.f32 %v2606_v51, 0.0  ;;  %v2608_v41 = vadd.f32 %v2504_v25, %v6299_v7  ;;  %v2731_v10 = vmax.f32 %v2603_v33, 0.0  ;;  %v2735_v20 = vmax.f32 %v2607_v49, 0.0  ;;  %v5205_v7 = vld [vmem:[#allocation7 + $0x154] sm:$0xf] }
 0x49a   :  { %v6465_v61 = vpack.c.bf16 %v2733_v40, %v2729_v4  ;;  %v2609_v21 = vadd.f32 %v2501_v11, %v7124_v55  ;;  %3281 = vmatmul.bf16.gmra.mxu0 %v6389_v1  ;;  %3370 = vmatmul.bf16.gmra.mxu1 %v6391_v46  ;;  %v2732_v18 = vmax.f32 %v2604_v44, 0.0  ;;  %v2613_v48 = vadd.f32 %v2501_v11, %v7125_v26  ;;  %v4935_v51 = vld [vmem:[#allocation7 + $0x158] sm:$0xf0]  ;;  %v5173_v4 = vld [vmem:[#allocation7 + $0x54] sm:$0xf]  ;;  %v7128_v11 = vld [vmem:[#allocation86_spill] sm:$0xff] }
 0x49b   :  { %v6470_v56 = vpack.c.bf16 %v2734_v31, %v2730_v3  ;;  %v2736_v14 = vmax.f32 %v2608_v41, 0.0  ;;  %3459 = vmatmul.bf16.gmra.mxu2 %v6393_v59  ;;  %3548 = vmatmul.bf16.gmra.mxu3 %v6396_v35  ;;  %v6475_v40 = vpack.c.bf16 %v2735_v20, %v2731_v10  ;;  %v2610_v33 = vadd.f32 %v2502_v62, %v7126_v38  ;;  %v7127_v49 = vld [vmem:[#allocation56_spill] sm:$0xff]  ;;  %v4807_v3 = vld [vmem:[#allocation7 + $0x58] sm:$0xf0] }
 0x49c   :  { %v2614_v5 = vadd.f32 %v2502_v62, %v7127_v49  ;;  %v4938_v55 = vor.u32 %v5205_v7, %v4935_v51  ;;  %v5221_v31 = vld [vmem:[#allocation7 + $0x1d4] sm:$0xf]  ;;  %v4999_v44 = vld [vmem:[#allocation7 + $0x1d8] sm:$0xf0]  ;;  %v2611_v26 = vadd.f32 %v2503_v6, %v7128_v11  ;;  %v2615_v59 = vadd.f32 %v2503_v6, %v6263_v13 }
 0x49d   :  { %v6479_v41 = vpack.c.bf16 %v2736_v14, %v2732_v18  ;;  %v4810_v35 = vor.u32 %v5173_v4, %v4807_v3  ;;  %v5002_v46 = vor.u32 %v5221_v31, %v4999_v44  ;;  %v5189_v1 = vld [vmem:[#allocation7 + $0xd4] sm:$0xf]  ;;  %v2737_v10 = vmax.f32 %v2609_v21, 0.0  ;;  %v7129_v14 = vld [vmem:[#allocation107_spill] sm:$0xff] }
 0x49e   :  { %v2741_v20 = vmax.f32 %v2613_v48, 0.0  ;;  %3799 = vmatpush.bf16.msra.mxu2 %v4938_v55  ;;  %v4874_v38 = vor.u32 %v5189_v1, %v4871_v0  ;;  %v2738_v29 = vmax.f32 %v2610_v33, 0.0  ;;  %v2742_v62 = vmax.f32 %v2614_v5, 0.0  ;;  %v7132_v5 = vld [vmem:[#allocation125_spill] sm:$0xff] }
 0x49f   :  { %v2739_v7 = vmax.f32 %v2611_v26, 0.0  ;;  %3621 = vmatpush.bf16.msra.mxu0 %v4810_v35  ;;  %3888 = vmatpush.bf16.msrb.mxu3 %v5002_v46  ;;  %v2743_v18 = vmax.f32 %v2615_v59, 0.0  ;;  %v2612_v49 = vadd.f32 %v2504_v25, %v7129_v14  ;;  %v2616_v13 = vadd.f32 %v2504_v25, %v6307_v17  ;;  %v7130_v35 = vld [vmem:[#allocation119_spill] sm:$0xff]  ;;  %v7131_v25 = vld [vmem:[#allocation121_spill] sm:$0xff] }
 0x4a0   :  { %v6483_v51 = vpack.c.bf16 %v2741_v20, %v2737_v10  ;;  %3710 = vmatpush.bf16.msra.mxu1 %v4874_v38  ;;  %v6487_v6 = vpack.c.bf16 %v2742_v62, %v2738_v29  ;;  %v2469_v21 = vsel %vm2002_vm7, %v6301_v23, %v6303_v32  ;;  %v2475_v0 = vsel %vm2474_vm10, %v6303_v32, %v6301_v23  ;;  %v7133_v10 = vld [vmem:[#allocation115_spill] sm:$0xff]  ;;  %v7134_v20 = vld [vmem:[#allocation116_spill] sm:$0xff]  ;;  %v7135_v62 = vld [vmem:[#allocation118_spill] sm:$0xff] }
 0x4a1   :  { %v6495_v1 = vpack.c.bf16 %v2743_v18, %v2739_v7  ;;  %v2740_v46 = vmax.f32 %v2612_v49, 0.0  ;;  %v2744_v59 = vmax.f32 %v2616_v13, 0.0  ;;  %v2471_v48 = vsel %vm2470_vm15, %v7130_v35, %v2469_v21  ;;  %v7136_v7 = vld [vmem:[#allocation120_spill] sm:$0xff]  ;;  %v7137_v13 = vld [vmem:[#allocation29_spill] sm:$0xff] }
 0x4a2   :  { %v2472_v4 = vrot.slane %v2471_v48, 4  ;;  %v2480_v17 = vsel %vm2448_vm9, %v6301_v23, %v6303_v32  ;;  %v2477_v33 = vsel %vm2476_vm0, %v7131_v25, %v2475_v0  ;;  %v6508_v3 = vsel %vm1992_vm2, %v6301_v23, %v6303_v32  ;;  %v7138_v0 = vld [vmem:[#allocation31_spill] sm:$0xff]  ;;  %v7139_v32 = vld [vmem:[#allocation58_spill] sm:$0xff]  ;;  %v7141_v48 = vld [vmem:[#allocation89_spill] sm:$0xff] }
 0x4a3   :  { %v6501_v29 = vpack.c.bf16 %v2744_v59, %v2740_v46  ;;  %v2482_v55 = vsel %vm2481_vm1, %v2480_v17, %v7132_v5  ;;  %v6512_v38 = vadd.f32 %v7134_v20, %v7133_v10  ;;  %v6516_v18 = vadd.f32 %v7136_v7, %v7135_v62  ;;  %v7140_v59 = vld [vmem:[#allocation60_spill] sm:$0xff]  ;;  %v7142_v25 = vld [vmem:[#allocation110_spill] sm:$0xff] }
 0x4a4   :  { %v2505_v31 = vperm.slane %v2472_v4, 0  ;;  %v2506_v44 = vperm.slane %v2472_v4, 1  ;;  %v2507_v11 = vperm.slane %v2472_v4, 2  ;;  %v2508_v26 = vperm.slane %v2472_v4, 3 }
 0x4a5   :  { %v2478_v14 = vrot.slane %v2477_v33, 5  ;;  %v6518_v49 = vrot.slane %v2482_v55, 6  ;;  %vm2486_vm9 = vcmask 1046529  }
 0x4a6   :  { %v2617_v21 = vadd.f32 %v2505_v31, %v7137_v13  ;;  %v2621_v23 = vadd.f32 %v2505_v31, %v7138_v0  ;;  %v2618_v46 = vadd.f32 %v2506_v44, %v7139_v32  ;;  %v2622_v35 = vadd.f32 %v2506_v44, %v7140_v59 }
 0x4a7   :  { %v2619_v4 = vadd.f32 %v2507_v11, %v7141_v48  ;;  %v2623_v17 = vadd.f32 %v2507_v11, %v6267_v22  ;;  %v2620_v5 = vadd.f32 %v2508_v26, %v7142_v25  ;;  %v2624_v10 = vadd.f32 %v2508_v26, %v6311_v37  ;;  %v7143_v22 = vld [vmem:[#allocation33_spill] sm:$0xff] }
 0x4a8   :  { %v2745_v20 = vmax.f32 %v2617_v21, 0.0  ;;  %v2749_v33 = vmax.f32 %v2621_v23, 0.0  ;;  %v2746_v55 = vmax.f32 %v2618_v46, 0.0  ;;  %v2750_v62 = vmax.f32 %v2622_v35, 0.0  ;;  %v7144_v23 = vld [vmem:[#allocation35_spill] sm:$0xff] }
 0x4a9   :  { %v2747_v7 = vmax.f32 %v2619_v4, 0.0  ;;  %v2751_v13 = vmax.f32 %v2623_v17, 0.0  ;;  %v2748_v47 = vmax.f32 %v2620_v5, 0.0  ;;  %v2752_v0 = vmax.f32 %v2624_v10, 0.0  ;;  %v7145_v17 = vld [vmem:[#allocation62_spill] sm:$0xff]  ;;  %v7146_v10 = vld [vmem:[#allocation64_spill] sm:$0xff] }
 0x4aa   :  { %3286 = vmatmul.bf16.gmra.mxu0 %v6406_v9  ;;  %3375 = vmatmul.bf16.gmra.mxu1 %v6408_v15  ;;  %v6530_v32 = vpack.c.bf16 %v2749_v33, %v2745_v20  ;;  %v6532_v59 = vpack.c.bf16 %v2750_v62, %v2746_v55  ;;  %v2625_v48 = vadd.f32 %v2505_v31, %v7143_v22  ;;  %v2509_v25 = vperm.slane %v2478_v14, 0  ;;  %v7147_v33 = vld [vmem:[#allocation92_spill] sm:$0xff] }
 0x4ab   :  { %3464 = vmatmul.bf16.gmra.mxu2 %v6413_v63  ;;  %3553 = vmatmul.bf16.gmra.mxu3 %v6420_v19  ;;  %v6537_v37 = vpack.c.bf16 %v2751_v13, %v2747_v7  ;;  %v6539_v21 = vpack.c.bf16 %v2752_v0, %v2748_v47  ;;  %v2629_v46 = vadd.f32 %v2505_v31, %v7144_v23  ;;  %v2510_v35 = vperm.slane %v2478_v14, 1  ;;  %v7148_v63 = vld [vmem:[#allocation111_spill] sm:$0xff]  ;;  %v7149_v19 = vld [vmem:[#allocation37_spill] sm:$0xff] }
 0x4ac   :  { %v2753_v4 = vmax.f32 %v2625_v48, 0.0  ;;  %v2626_v5 = vadd.f32 %v2506_v44, %v7145_v17  ;;  %v2630_v20 = vadd.f32 %v2506_v44, %v7146_v10  ;;  %v2627_v55 = vadd.f32 %v2507_v11, %v7147_v33  ;;  %v7150_v10 = vld [vmem:[#allocation39_spill] sm:$0xff] }
 0x4ad   :  { %v2757_v62 = vmax.f32 %v2629_v46, 0.0  ;;  %v2631_v22 = vadd.f32 %v2507_v11, %v6271_v53  ;;  %v2628_v15 = vadd.f32 %v2508_v26, %v7148_v63  ;;  %v2632_v7 = vadd.f32 %v2508_v26, %v6315_v16  ;;  %v7151_v53 = vld [vmem:[#allocation66_spill] sm:$0xff]  ;;  %v7152_v26 = vld [vmem:[#allocation68_spill] sm:$0xff] }
 0x4ae   :  { %v2754_v13 = vmax.f32 %v2626_v5, 0.0  ;;  %v2758_v47 = vmax.f32 %v2630_v20, 0.0  ;;  %v2755_v0 = vmax.f32 %v2627_v55, 0.0  ;;  %v2633_v31 = vadd.f32 %v2509_v25, %v7149_v19 }
 0x4af   :  { %v6549_v23 = vpack.c.bf16 %v2757_v62, %v2753_v4  ;;  %v2759_v48 = vmax.f32 %v2631_v22, 0.0  ;;  %v2756_v17 = vmax.f32 %v2628_v15, 0.0  ;;  %v2760_v9 = vmax.f32 %v2632_v7, 0.0  ;;  %v7153_v62 = vld [vmem:[#allocation41_spill] sm:$0xff]  ;;  %v7154_v7 = vld [vmem:[#allocation95_spill] sm:$0xff] }
 0x4b0   :  { %v6551_v44 = vpack.c.bf16 %v2758_v47, %v2754_v13  ;;  %v2637_v46 = vadd.f32 %v2509_v25, %v7150_v10  ;;  %v2761_v33 = vmax.f32 %v2633_v31, 0.0  ;;  %v2634_v11 = vadd.f32 %v2510_v35, %v7151_v53  ;;  %v7155_v31 = vld [vmem:[#allocation43_spill] sm:$0xff] }
 0x4b1   :  { %v6555_v63 = vpack.c.bf16 %v2759_v48, %v2755_v0  ;;  %v6557_v16 = vpack.c.bf16 %v2760_v9, %v2756_v17  ;;  %v2638_v5 = vadd.f32 %v2510_v35, %v7152_v26  ;;  %v2511_v20 = vperm.slane %v2478_v14, 2  ;;  %v7156_v0 = vld [vmem:[#allocation112_spill] sm:$0xff] }
 0x4b2   :  { %v2765_v19 = vmax.f32 %v2637_v46, 0.0  ;;  %v2762_v4 = vmax.f32 %v2634_v11, 0.0  ;;  %v2512_v55 = vperm.slane %v2478_v14, 3  ;;  %v2641_v15 = vadd.f32 %v2509_v25, %v7153_v62 }
 0x4b3   :  { %v2766_v22 = vmax.f32 %v2638_v5, 0.0  ;;  %v2635_v13 = vadd.f32 %v2511_v20, %v7154_v7  ;;  %v2639_v47 = vadd.f32 %v2511_v20, %v6275_v43  ;;  %v2645_v10 = vadd.f32 %v2509_v25, %v7155_v31 }
 0x4b4   :  { %v6564_v53 = vpack.c.bf16 %v2765_v19, %v2761_v33  ;;  %v2636_v9 = vadd.f32 %v2512_v55, %v7156_v0  ;;  %v2640_v48 = vadd.f32 %v2512_v55, %v6319_v58  ;;  %v2769_v17 = vmax.f32 %v2641_v15, 0.0  ;;  %v7159_v33 = vld [vmem:[#allocation98_spill] sm:$0xff] }
 0x4b5   :  { %v6568_v26 = vpack.c.bf16 %v2766_v22, %v2762_v4  ;;  %v2763_v46 = vmax.f32 %v2635_v13, 0.0  ;;  %v2767_v14 = vmax.f32 %v2639_v47, 0.0  ;;  %v2773_v11 = vmax.f32 %v2645_v10, 0.0  ;;  %v7160_v13 = vld [vmem:[#allocation113_spill] sm:$0xff] }
 0x4b6   :  { %v2764_v62 = vmax.f32 %v2636_v9, 0.0  ;;  %v2768_v5 = vmax.f32 %v2640_v48, 0.0  ;;  %v2642_v7 = vadd.f32 %v2510_v35, %v7157_v60  ;;  %v2646_v43 = vadd.f32 %v2510_v35, %v7158_v24  ;;  %v5203_v9 = vld [vmem:[#allocation7 + $0x144] sm:$0xf] }
 0x4b7   :  { %v6572_v57 = vpack.c.bf16 %v2767_v14, %v2763_v46  ;;  %v6574_v25 = vpack.c.bf16 %v2773_v11, %v2769_v17  ;;  %v2643_v19 = vadd.f32 %v2511_v20, %v7159_v33  ;;  %v2647_v58 = vadd.f32 %v2511_v20, %v6279_v34  ;;  %v7161_v17 = vld [vmem:[#allocation45_spill] sm:$0xff]  ;;  %v7162_v14 = vld [vmem:[#allocation47_spill] sm:$0xff]  ;;  %v7163_v33 = vld [vmem:[#allocation74_spill] sm:$0xff] }
 0x4b8   :  { %v6578_v15 = vpack.c.bf16 %v2768_v5, %v2764_v62  ;;  %v2770_v4 = vmax.f32 %v2642_v7, 0.0  ;;  %v2774_v22 = vmax.f32 %v2646_v43, 0.0  ;;  %v2644_v47 = vadd.f32 %v2512_v55, %v7160_v13  ;;  %v4799_v5 = vld [vmem:[#allocation7 + $0x48] sm:$0xf0]  ;;  %v5219_v7 = vld [vmem:[#allocation7 + $0x1c4] sm:$0xf] }
 0x4b9   :  { %v2771_v31 = vmax.f32 %v2643_v19, 0.0  ;;  %v2775_v10 = vmax.f32 %v2647_v58, 0.0  ;;  %v2648_v60 = vadd.f32 %v2512_v55, %v6339_v36  ;;  %v2513_v24 = vperm.slane %v6518_v49, 0  ;;  %v4927_v36 = vld [vmem:[#allocation7 + $0x148] sm:$0xf0]  ;;  %v7164_v58 = vld [vmem:[#allocation76_spill] sm:$0xff] }
 0x4ba   :  { %3291 = vmatmul.bf16.gmra.mxu0 %v6429_v39  ;;  %3380 = vmatmul.bf16.gmra.mxu1 %v6432_v2  ;;  %v6585_v35 = vpack.c.bf16 %v2774_v22, %v2770_v4  ;;  %v2772_v0 = vmax.f32 %v2644_v47, 0.0  ;;  %v2514_v34 = vperm.slane %v6518_v49, 1  ;;  %v2515_v20 = vperm.slane %v6518_v49, 2  ;;  %v5171_v55 = vld [vmem:[#allocation7 + $0x44] sm:$0xf]  ;;  %v7165_v22 = vld [vmem:[#allocation100_spill] sm:$0xff] }
 0x4bb   :  { %3469 = vmatmul.bf16.gmra.mxu2 %v6435_v27  ;;  %3558 = vmatmul.bf16.gmra.mxu3 %v6439_v54  ;;  %v6591_v48 = vpack.c.bf16 %v2775_v10, %v2771_v31  ;;  %v2649_v46 = vadd.f32 %v2513_v24, %v7161_v17  ;;  %v2653_v11 = vadd.f32 %v2513_v24, %v7162_v14  ;;  %v4991_v43 = vld [vmem:[#allocation7 + $0x1c8] sm:$0xf0]  ;;  %v5187_v27 = vld [vmem:[#allocation7 + $0xc4] sm:$0xf]  ;;  %v2776_v31 = vmax.f32 %v2648_v60, 0.0  ;;  %v7167_v60 = vld [vmem:[#allocation49_spill] sm:$0xff] }
 0x4bc   :  { %v4930_v62 = vor.u32 %v5203_v9, %v4927_v36  ;;  %v2650_v19 = vadd.f32 %v2514_v34, %v7163_v33  ;;  %v2654_v4 = vadd.f32 %v2514_v34, %v7164_v58  ;;  %v2651_v13 = vadd.f32 %v2515_v20, %v7165_v22  ;;  %v4863_v2 = vld [vmem:[#allocation7 + $0xc8] sm:$0xf0] }
 0x4bd   :  { %v4802_v47 = vor.u32 %v5171_v55, %v4799_v5  ;;  %v4994_v54 = vor.u32 %v5219_v7, %v4991_v43  ;;  %v2777_v10 = vmax.f32 %v2649_v46, 0.0  ;;  %v4866_v17 = vor.u32 %v5187_v27, %v4863_v2  ;;  %v7168_v2 = vld [vmem:[#allocation51_spill] sm:$0xff] }
 0x4be   :  { %3800 = vmatpush.bf16.msra.mxu2 %v4930_v62  ;;  %v2781_v39 = vmax.f32 %v2653_v11, 0.0  ;;  %v2778_v14 = vmax.f32 %v2650_v19, 0.0  ;;  %v2782_v9 = vmax.f32 %v2654_v4, 0.0  ;;  %v6598_v36 = vpack.c.bf16 %v2776_v31, %v2772_v0  ;;  %v7169_v62 = vld [vmem:[#allocation114_spill] sm:$0xff]  ;;  %v7171_v4 = vld [vmem:[#allocation79_spill] sm:$0xff] }
 0x4bf   :  { %3622 = vmatpush.bf16.msra.mxu0 %v4802_v47  ;;  %3889 = vmatpush.bf16.msrb.mxu3 %v4994_v54  ;;  %v2655_v33 = vadd.f32 %v2515_v20, %v6287_v12  ;;  %v2779_v58 = vmax.f32 %v2651_v13, 0.0  ;;  %v2516_v22 = vperm.slane %v6518_v49, 3  ;;  %v2657_v46 = vadd.f32 %v2513_v24, %v7167_v60  ;;  %v7170_v0 = vld [vmem:[#allocation78_spill] sm:$0xff]  ;;  %v7175_v60 = vld [vmem:[#allocation117_spill] sm:$0xff] }
 0x4c0   :  { %3711 = vmatpush.bf16.msra.mxu1 %v4866_v17  ;;  %v6602_v55 = vpack.c.bf16 %v2781_v39, %v2777_v10  ;;  %v6604_v5 = vpack.c.bf16 %v2782_v9, %v2778_v14  ;;  %v2661_v27 = vadd.f32 %v2513_v24, %v7168_v2  ;;  %v2658_v43 = vadd.f32 %v2514_v34, %v7170_v0  ;;  %v7172_v13 = vld [vmem:[#allocation102_spill] sm:$0xff] }
 0x4c1   :  { %v2783_v11 = vmax.f32 %v2655_v33, 0.0  ;;  %v2652_v7 = vadd.f32 %v2516_v22, %v7169_v62  ;;  %v2656_v54 = vadd.f32 %v2516_v22, %v6512_v38  ;;  %v2785_v12 = vmax.f32 %v2657_v46, 0.0  ;;  %v7178_v0 = vld [vmem:[#allocation106_spill] sm:$0xff] }
 0x4c2   :  { %7166 = vst [vmem:[#allocation18_spill] sm:$0xff] %v6604_v5  ;;  %v2789_v19 = vmax.f32 %v2661_v27, 0.0  ;;  %v2662_v49 = vadd.f32 %v2514_v34, %v7171_v4  ;;  %v2659_v39 = vadd.f32 %v2515_v20, %v7172_v13  ;;  %v2786_v17 = vmax.f32 %v2658_v43, 0.0  ;;  %v7176_v34 = vld [vmem:[#allocation127_spill] sm:$0xff]  ;;  %v1689_v27 = vpop.f32.mrf.mxu0 }
 0x4c3   :  { %v6613_v47 = vpack.c.bf16 %v2783_v11, %v2779_v58  ;;  %v2780_v31 = vmax.f32 %v2652_v7, 0.0  ;;  %v2784_v10 = vmax.f32 %v2656_v54, 0.0  ;;  %v2663_v9 = vadd.f32 %v2515_v20, %v6295_v52  ;;  %v7177_v54 = vld [vmem:[#allocation105_spill] sm:$0xff]  ;;  %v7180_v13 = vld [vmem:[#allocation123_spill] sm:$0xff] }
 0x4c4   :  { %v6615_v14 = vpack.c.bf16 %v2789_v19, %v2785_v12  ;;  %v2790_v24 = vmax.f32 %v2662_v49, 0.0  ;;  %v2787_v33 = vmax.f32 %v2659_v39, 0.0  ;;  %v2660_v46 = vadd.f32 %v2516_v22, %v7175_v60  ;;  %v7181_v39 = vld [vmem:[#allocation124_spill] sm:$0xff] }
 0x4c5   :  { %7173 = vst [vmem:[#allocation38_spill] sm:$0xff] %v6613_v47  ;;  %v6618_v38 = vpack.c.bf16 %v2784_v10, %v2780_v31  ;;  %v2664_v2 = vadd.f32 %v2516_v22, %v6516_v18  ;;  %v2487_v58 = vsel %vm2486_vm9, %v6508_v3, %v7176_v34  ;;  %v2791_v62 = vmax.f32 %v2663_v9, 0.0  ;;  %v7179_v18 = vld [vmem:[#allocation109_spill] sm:$0xff]  ;;  %v1867_v31 = vpop.f32.mrf.mxu2  ;;  %v1778_v34 = vpop.f32.mrf.mxu1 }
 0x4c6   :  { %v6625_v11 = vpack.c.bf16 %v2790_v24, %v2786_v17  ;;  %v2488_v7 = vrot.slane %v2487_v58, 7  ;;  %v1685_v43 = vadd.f32 %v7178_v0, %v7177_v54  ;;  %v2788_v52 = vmax.f32 %v2660_v46, 0.0  ;;  %v7182_v24 = vld [vmem:[#allocation53_spill] sm:$0xff]  ;;  %v7185_v58 = vld [vmem:[#allocation82_spill] sm:$0xff] }
 0x4c7   :  { %7174 = vst [vmem:[#allocation40_spill] sm:$0xff] %v6618_v38  ;;  %v2792_v20 = vmax.f32 %v2664_v2, 0.0  ;;  %v6629_v12 = vpack.c.bf16 %v2791_v62, %v2787_v33  ;;  %v1690_v22 = vadd.f32 %v1689_v27, %v7179_v18  ;;  %v1863_v3 = vadd.f32 %v7181_v39, %v7180_v13  ;;  %v7183_v33 = vld [vmem:[#allocation55_spill] sm:$0xff]  ;;  %v7184_v46 = vld [vmem:[#allocation81_spill] sm:$0xff]  ;;  %v7186_v62 = vld [vmem:[#allocation104_spill] sm:$0xff] }
 0x4c8   :  { %v2517_v19 = vperm.slane %v2488_v7, 0  ;;  %v2518_v4 = vperm.slane %v2488_v7, 1  ;;  %v2519_v49 = vperm.slane %v2488_v7, 2  ;;  %v2520_v17 = vperm.slane %v2488_v7, 3 }
 0x4c9   :  { %v6634_v10 = vpack.c.bf16 %v2792_v20, %v2788_v52  ;;  %v1868_v0 = vadd.f32 %v1867_v31, %v1778_v34  ;;  %v7191_v31 = vld [vmem:[#allocation84_spill] sm:$0xff] }
 0x4ca   :  { %3296 = vmatmul.bf16.gmra.mxu0 %v6445_v30  ;;  %3385 = vmatmul.bf16.gmra.mxu1 %v6448_v42  ;;  %v2665_v9 = vadd.f32 %v2517_v19, %v7182_v24  ;;  %v2669_v60 = vadd.f32 %v2517_v19, %v7183_v33  ;;  %v2666_v2 = vadd.f32 %v2518_v4, %v7184_v46  ;;  %v7187_v33 = vld [vmem:[#allocation122_spill] sm:$0xff] }
 0x4cb   :  { %3474 = vmatmul.bf16.gmra.mxu2 %v6451_v50  ;;  %3563 = vmatmul.bf16.gmra.mxu3 %v6456_v45  ;;  %v2670_v27 = vadd.f32 %v2518_v4, %v7185_v58  ;;  %v2667_v54 = vadd.f32 %v2519_v49, %v7186_v62  ;;  %v2671_v7 = vadd.f32 %v2519_v49, %v1685_v43  ;;  %v7189_v50 = vld [vmem:[#allocation57_spill] sm:$0xff]  ;;  %v7190_v45 = vld [vmem:[#allocation59_spill] sm:$0xff] }
 0x4cc   :  { %v2793_v52 = vmax.f32 %v2665_v9, 0.0  ;;  %v2797_v20 = vmax.f32 %v2669_v60, 0.0  ;;  %v2794_v18 = vmax.f32 %v2666_v2, 0.0  ;;  %v2668_v42 = vadd.f32 %v2520_v17, %v7187_v33  ;;  %v7194_v33 = vld [vmem:[#allocation126_spill] sm:$0xff] }
 0x4cd   :  { %v2798_v13 = vmax.f32 %v2670_v27, 0.0  ;;  %v2795_v39 = vmax.f32 %v2667_v54, 0.0  ;;  %v2799_v24 = vmax.f32 %v2671_v7, 0.0  ;;  %v2672_v30 = vadd.f32 %v2520_v17, %v1863_v3  ;;  %v7192_v27 = vld [vmem:[#allocation85_spill] sm:$0xff] }
 0x4ce   :  { %v6646_v46 = vpack.c.bf16 %v2797_v20, %v2793_v52  ;;  %v2673_v8 = vadd.f32 %v2517_v19, %v7189_v50  ;;  %v2677_v28 = vadd.f32 %v2517_v19, %v7190_v45  ;;  %v2796_v43 = vmax.f32 %v2668_v42, 0.0  ;;  %v7193_v52 = vld [vmem:[#allocation108_spill] sm:$0xff] }
 0x4cf   :  { %v6650_v58 = vpack.c.bf16 %v2798_v13, %v2794_v18  ;;  %v6652_v62 = vpack.c.bf16 %v2799_v24, %v2795_v39  ;;  %v2674_v9 = vadd.f32 %v2518_v4, %v7191_v31  ;;  %v2800_v60 = vmax.f32 %v2672_v30, 0.0  ;;  %v4791_v24 = vld [vmem:[#allocation7 + $0x38] sm:$0xf0] }
 0x4d0   :  { %7188 = vst [vmem:[#allocation73_spill] sm:$0xff] %v6646_v46  ;;  %v2801_v2 = vmax.f32 %v2673_v8, 0.0  ;;  %v2805_v34 = vmax.f32 %v2677_v28, 0.0  ;;  %v2678_v54 = vadd.f32 %v2518_v4, %v7192_v27  ;;  %v2675_v20 = vadd.f32 %v2519_v49, %v7193_v52  ;;  %v4983_v31 = vld [vmem:[#allocation7 + $0x1b8] sm:$0xf0] }
 0x4d1   :  { %v2802_v7 = vmax.f32 %v2674_v9, 0.0  ;;  %v2679_v3 = vadd.f32 %v2519_v49, %v1690_v22  ;;  %v2676_v50 = vadd.f32 %v2520_v17, %v7194_v33  ;;  %v6658_v46 = vpack.c.bf16 %v2800_v60, %v2796_v43  ;;  %v5201_v49 = vld [vmem:[#allocation7 + $0x134] sm:$0xf]  ;;  %v4919_v22 = vld [vmem:[#allocation7 + $0x138] sm:$0xf0] }
 0x4d2   :  { %v6660_v45 = vpack.c.bf16 %v2805_v34, %v2801_v2  ;;  %v2806_v19 = vmax.f32 %v2678_v54, 0.0  ;;  %v2680_v18 = vadd.f32 %v2520_v17, %v1868_v0  ;;  %v2803_v42 = vmax.f32 %v2675_v20, 0.0  ;;  %v5169_v17 = vld [vmem:[#allocation7 + $0x34] sm:$0xf]  ;;  %v4855_v34 = vld [vmem:[#allocation7 + $0xb8] sm:$0xf0] }
 0x4d3   :  { %v2807_v13 = vmax.f32 %v2679_v3, 0.0  ;;  %v2804_v39 = vmax.f32 %v2676_v50, 0.0  ;;  %v4922_v0 = vor.u32 %v5201_v49, %v4919_v22  ;;  %v5217_v43 = vld [vmem:[#allocation7 + $0x1b4] sm:$0xf]  ;;  %v4794_v9 = vor.u32 %v5169_v17, %v4791_v24  ;;  %v6679_v54 = vld [vmem:[%s6905_s8] sm:$0x3] }
 0x4d4   :  { %v6662_v30 = vpack.c.bf16 %v2806_v19, %v2802_v7  ;;  %v2808_v28 = vmax.f32 %v2680_v18, 0.0  ;;  %v4986_v60 = vor.u32 %v5217_v43, %v4983_v31  ;;  %v5185_v2 = vld [vmem:[#allocation7 + $0xb4] sm:$0xf]  ;;  %v6682_v7 = vperm.slane %v6679_v54, 0  ;;  %v5199_v31 = vld [vmem:[#allocation7 + $0x124] sm:$0xf] }
 0x4d5   :  { %v6664_v8 = vpack.c.bf16 %v2807_v13, %v2803_v42  ;;  %3801 = vmatpush.bf16.msra.mxu2 %v4922_v0  ;;  %3623 = vmatpush.bf16.msra.mxu0 %v4794_v9  ;;  %v4858_v27 = vor.u32 %v5185_v2, %v4855_v34  ;;  %v4911_v9 = vld [vmem:[#allocation7 + $0x128] sm:$0xf0]  ;;  %s5345_s8 = smov [#allocation8]  }
 0x4d6   :  { %v6666_v4 = vpack.c.bf16 %v2808_v28, %v2804_v39  ;;  %3890 = vmatpush.bf16.msrb.mxu3 %v4986_v60  ;;  %v5167_v60 = vld [vmem:[#allocation7 + $0x24] sm:$0xf]  ;;  %v4914_v34 = vor.u32 %v5199_v31, %v4911_v9  ;;  %s4158_s10 = sshll.u32 %s5345_s8, 4  ;;  %s4159_s10 = int_to_ptr.vmem [resolvable:$true] %s4158_s10 }
 0x4d7   :  { %3712 = vmatpush.bf16.msra.mxu1 %v4858_v27  ;;  %v4783_v27 = vld [vmem:[#allocation7 + $0x28] sm:$0xf0] }
 0x4d9   :  { %3802 = vmatpush.bf16.msra.mxu2 %v4914_v34 }
 0x4da   :  { %3301 = vmatmul.bf16.gmra.mxu0 %v6465_v61  ;;  %3390 = vmatmul.bf16.gmra.mxu1 %v6470_v56 }
 0x4db   :  { %3479 = vmatmul.bf16.gmra.mxu2 %v6475_v40  ;;  %3568 = vmatmul.bf16.gmra.mxu3 %v6479_v41 }
 0x4ea   :  { %3306 = vmatmul.bf16.gmra.mxu0 %v6483_v51  ;;  %3395 = vmatmul.bf16.gmra.mxu1 %v6487_v6 }
 0x4eb   :  { %3484 = vmatmul.bf16.gmra.mxu2 %v6495_v1  ;;  %3573 = vmatmul.bf16.gmra.mxu3 %v6501_v29 }
 0x4f7   :  { %v3272_v52 = vpop.f32.mrf.mxu0  ;;  %v3361_v20 = vpop.f32.mrf.mxu1 }
 0x4f8   :  { %v3273_v3 = vadd.f32 %v3272_v52, %v6682_v7  ;;  %v5215_v52 = vld [vmem:[#allocation7 + $0x1a4] sm:$0xf] }
 0x4fa   :  { %v3362_v33 = vadd.f32 %v3361_v20, %v3273_v3  ;;  %3311 = vmatmul.bf16.gmra.mxu0 %v6530_v32  ;;  %3400 = vmatmul.bf16.gmra.mxu1 %v6532_v59  ;;  %v4975_v20 = vld [vmem:[#allocation7 + $0x1a8] sm:$0xf0] }
 0x4fb   :  { %3489 = vmatmul.bf16.gmra.mxu2 %v6537_v37  ;;  %3578 = vmatmul.bf16.gmra.mxu3 %v6539_v21 }
 0x4fe   :  { %v3450_v50 = vpop.f32.mrf.mxu2  ;;  %v3539_v19 = vpop.f32.mrf.mxu3 }
 0x4ff   :  { %v3451_v18 = vadd.f32 %v3450_v50, %v3362_v33  ;;  %v3274_v42 = vpop.f32.mrf.mxu0  ;;  %v3363_v13 = vpop.f32.mrf.mxu1  ;;  %v4786_v33 = vor.u32 %v5167_v60, %v4783_v27  ;;  %v4978_v50 = vor.u32 %v5215_v52, %v4975_v20 }
 0x500   :  { %v3275_v39 = vadd.f32 %v3274_v42, %v6682_v7  ;;  %v5183_v42 = vld [vmem:[#allocation7 + $0xa4] sm:$0xf] }
 0x501   :  { %v3540_v28 = vadd.f32 %v3539_v19, %v3451_v18  ;;  %v4847_v19 = vld [vmem:[#allocation7 + $0xa8] sm:$0xf0]  ;;  %3624 = vmatpush.bf16.msra.mxu0 %v4786_v33  ;;  %3891 = vmatpush.bf16.msrb.mxu3 %v4978_v50 }
 0x502   :  { %v3364_v49 = vadd.f32 %v3363_v13, %v3275_v39  ;;  %v4850_v13 = vor.u32 %v5183_v42, %v4847_v19 }
 0x504   :  { %3713 = vmatpush.bf16.msra.mxu1 %v4850_v13 }
 0x506   :  { %v3452_v22 = vpop.f32.mrf.mxu2  ;;  %v3541_v17 = vpop.f32.mrf.mxu3 }
 0x507   :  { %v3453_v0 = vadd.f32 %v3452_v22, %v3364_v49  ;;  %v3277_v24 = vpop.f32.mrf.mxu0  ;;  %v3366_v43 = vpop.f32.mrf.mxu1 }
 0x508   :  { %v3278_v2 = vadd.f32 %v3277_v24, %v6682_v7 }
 0x509   :  { %v3542_v3 = vadd.f32 %v3541_v17, %v3453_v0 }
 0x50a   :  { %v3367_v18 = vadd.f32 %v3366_v43, %v3278_v2  ;;  %3316 = vmatmul.bf16.gmra.mxu0 %v6549_v23  ;;  %3405 = vmatmul.bf16.gmra.mxu1 %v6551_v44 }
 0x50b   :  { %v3975_v39 = vmax.f32 %v3540_v28, %v3542_v3  ;;  %3494 = vmatmul.bf16.gmra.mxu2 %v6555_v63  ;;  %3583 = vmatmul.bf16.gmra.mxu3 %v6557_v16 }
 0x50e   :  { %v3455_v49 = vpop.f32.mrf.mxu2  ;;  %v3544_v22 = vpop.f32.mrf.mxu3 }
 0x50f   :  { %v3456_v17 = vadd.f32 %v3455_v49, %v3367_v18  ;;  %v3279_v0 = vpop.f32.mrf.mxu0  ;;  %v3368_v24 = vpop.f32.mrf.mxu1 }
 0x510   :  { %v3280_v43 = vadd.f32 %v3279_v0, %v6682_v7 }
 0x511   :  { %v3545_v31 = vadd.f32 %v3544_v22, %v3456_v17 }
 0x512   :  { %v3369_v9 = vadd.f32 %v3368_v24, %v3280_v43 }
 0x513   :  { %v3976_v60 = vmax.f32 %v3975_v39, %v3545_v31 }
 0x516   :  { %v3457_v2 = vpop.f32.mrf.mxu2  ;;  %v3546_v28 = vpop.f32.mrf.mxu3 }
 0x517   :  { %v3458_v27 = vadd.f32 %v3457_v2, %v3369_v9  ;;  %v3282_v52 = vpop.f32.mrf.mxu0  ;;  %v3371_v20 = vpop.f32.mrf.mxu1 }
 0x518   :  { %v3283_v34 = vadd.f32 %v3282_v52, %v6682_v7  ;;  %v5165_v52 = vld [vmem:[#allocation7 + $0x14] sm:$0xf] }
 0x519   :  { %v3547_v3 = vadd.f32 %v3546_v28, %v3458_v27  ;;  %v5197_v28 = vld [vmem:[#allocation7 + $0x114] sm:$0xf]  ;;  %v4903_v27 = vld [vmem:[#allocation7 + $0x118] sm:$0xf0] }
 0x51a   :  { %v3372_v33 = vadd.f32 %v3371_v20, %v3283_v34  ;;  %3321 = vmatmul.bf16.gmra.mxu0 %v6564_v53  ;;  %3410 = vmatmul.bf16.gmra.mxu1 %v6568_v26  ;;  %v4906_v34 = vor.u32 %v5197_v28, %v4903_v27 }
 0x51b   :  { %v3977_v50 = vmax.f32 %v3976_v60, %v3547_v3  ;;  %3499 = vmatmul.bf16.gmra.mxu2 %v6572_v57  ;;  %3588 = vmatmul.bf16.gmra.mxu3 %v6578_v15  ;;  %v4775_v3 = vld [vmem:[#allocation7 + $0x18] sm:$0xf0] }
 0x51c   :  { %3803 = vmatpush.bf16.msra.mxu2 %v4906_v34 }
 0x51d   :  { %v3978_v28 = vrot.slane %v3977_v50, 4 }
 0x51e   :  { %v3460_v42 = vpop.f32.mrf.mxu2  ;;  %v3549_v19 = vpop.f32.mrf.mxu3 }
 0x51f   :  { %v3461_v18 = vadd.f32 %v3460_v42, %v3372_v33  ;;  %v3284_v13 = vpop.f32.mrf.mxu0  ;;  %v3373_v39 = vpop.f32.mrf.mxu1  ;;  %v5213_v33 = vld [vmem:[#allocation7 + $0x194] sm:$0xf]  ;;  %v4967_v42 = vld [vmem:[#allocation7 + $0x198] sm:$0xf0] }
 0x520   :  { %v3285_v49 = vadd.f32 %v3284_v13, %v6682_v7  ;;  %v4970_v13 = vor.u32 %v5213_v33, %v4967_v42  ;;  %v3979_v33 = vmax.f32 %v3977_v50, %v3978_v28 }
 0x521   :  { %v3550_v22 = vadd.f32 %v3549_v19, %v3461_v18  ;;  %v4778_v18 = vor.u32 %v5165_v52, %v4775_v3 }
 0x522   :  { %v3374_v17 = vadd.f32 %v3373_v39, %v3285_v49  ;;  %v5181_v39 = vld [vmem:[#allocation7 + $0x94] sm:$0xf]  ;;  %v4839_v49 = vld [vmem:[#allocation7 + $0x98] sm:$0xf0]  ;;  %3892 = vmatpush.bf16.msrb.mxu3 %v4970_v13 }
 0x523   :  { %3625 = vmatpush.bf16.msra.mxu0 %v4778_v18 }
 0x526   :  { %v3462_v0 = vpop.f32.mrf.mxu2  ;;  %v3551_v24 = vpop.f32.mrf.mxu3 }
 0x527   :  { %v3463_v43 = vadd.f32 %v3462_v0, %v3374_v17  ;;  %v3287_v31 = vpop.f32.mrf.mxu0  ;;  %v3376_v9 = vpop.f32.mrf.mxu1  ;;  %v4842_v17 = vor.u32 %v5181_v39, %v4839_v49 }
 0x528   :  { %v3288_v60 = vadd.f32 %v3287_v31, %v6682_v7 }
 0x529   :  { %v3552_v2 = vadd.f32 %v3551_v24, %v3463_v43  ;;  %3714 = vmatpush.bf16.msra.mxu1 %v4842_v17 }
 0x52a   :  { %v3377_v20 = vadd.f32 %v3376_v9, %v3288_v60  ;;  %3326 = vmatmul.bf16.gmra.mxu0 %v6574_v25  ;;  %3415 = vmatmul.bf16.gmra.mxu1 %v6585_v35 }
 0x52b   :  { %v3993_v19 = vmax.f32 %v3550_v22, %v3552_v2  ;;  %3504 = vmatmul.bf16.gmra.mxu2 %v6591_v48  ;;  %3593 = vmatmul.bf16.gmra.mxu3 %v6598_v36 }
 0x52e   :  { %v3465_v0 = vpop.f32.mrf.mxu2  ;;  %v3554_v24 = vpop.f32.mrf.mxu3 }
 0x52f   :  { %v3466_v43 = vadd.f32 %v3465_v0, %v3377_v20  ;;  %v3289_v31 = vpop.f32.mrf.mxu0  ;;  %v3378_v9 = vpop.f32.mrf.mxu1  ;;  %v3980_v20 = vrot.slane %v3979_v33, 2 }
 0x530   :  { %v3290_v22 = vadd.f32 %v3289_v31, %v6682_v7 }
 0x531   :  { %v3555_v60 = vadd.f32 %v3554_v24, %v3466_v43  ;;  %v3981_v24 = vmax.f32 %v3979_v33, %v3980_v20 }
 0x532   :  { %v3379_v2 = vadd.f32 %v3378_v9, %v3290_v22 }
 0x533   :  { %v3994_v27 = vmax.f32 %v3993_v19, %v3555_v60 }
 0x536   :  { %v3467_v52 = vpop.f32.mrf.mxu2  ;;  %v3556_v3 = vpop.f32.mrf.mxu3 }
 0x537   :  { %v3468_v42 = vadd.f32 %v3467_v52, %v3379_v2  ;;  %v3292_v34 = vpop.f32.mrf.mxu0  ;;  %v3381_v39 = vpop.f32.mrf.mxu1 }
 0x538   :  { %v3293_v18 = vadd.f32 %v3292_v34, %v6682_v7 }
 0x539   :  { %v3557_v13 = vadd.f32 %v3556_v3, %v3468_v42  ;;  %v3982_v3 = vrot.slane %v3981_v24, 1 }
 0x53a   :  { %v3382_v49 = vadd.f32 %v3381_v39, %v3293_v18  ;;  %3331 = vmatmul.bf16.gmra.mxu0 %v6602_v55  ;;  %3420 = vmatmul.bf16.gmra.mxu1 %v6604_v5 }
 0x53b   :  { %v3995_v17 = vmax.f32 %v3994_v27, %v3557_v13  ;;  %3509 = vmatmul.bf16.gmra.mxu2 %v6613_v47  ;;  %3598 = vmatmul.bf16.gmra.mxu3 %v6618_v38  ;;  %v3983_v18 = vmax.f32 %v3981_v24, %v3982_v3  ;;  %v4767_v24 = vld [vmem:[#allocation7 + $0x8] sm:$0xf0] }
 0x53d   :  { %v3996_v19 = vrot.slane %v3995_v17, 4 }
 0x53e   :  { %v3470_v0 = vpop.f32.mrf.mxu2  ;;  %v3559_v50 = vpop.f32.mrf.mxu3 }
 0x53f   :  { %v3997_v43 = vmax.f32 %v3995_v17, %v3996_v19  ;;  %v3471_v31 = vadd.f32 %v3470_v0, %v3382_v49  ;;  %v3294_v9 = vpop.f32.mrf.mxu0  ;;  %v3383_v22 = vpop.f32.mrf.mxu1  ;;  %v5195_v17 = vld [vmem:[#allocation7 + $0x104] sm:$0xf]  ;;  %v4895_v19 = vld [vmem:[#allocation7 + $0x108] sm:$0xf0] }
 0x540   :  { %v3295_v60 = vadd.f32 %v3294_v9, %v6682_v7  ;;  %v5163_v0 = vld [vmem:[#allocation7 + $0x4] sm:$0xf]  ;;  %v4959_v9 = vld [vmem:[#allocation7 + $0x188] sm:$0xf0] }
 0x541   :  { %v3998_v2 = vrot.slane %v3997_v43, 2  ;;  %v3560_v28 = vadd.f32 %v3559_v50, %v3471_v31  ;;  %v5211_v31 = vld [vmem:[#allocation7 + $0x184] sm:$0xf] }
 0x542   :  { %v3384_v52 = vadd.f32 %v3383_v22, %v3295_v60  ;;  %v4962_v60 = vor.u32 %v5211_v31, %v4959_v9  ;;  %v7195_v9 = vld [vmem:[#allocation73_spill] sm:$0xff] }
 0x543   :  { %v3999_v42 = vmax.f32 %v3997_v43, %v3998_v2  ;;  %v4898_v43 = vor.u32 %v5195_v17, %v4895_v19  ;;  %v4831_v2 = vld [vmem:[#allocation7 + $0x88] sm:$0xf0] }
 0x544   :  { %3893 = vmatpush.bf16.msrb.mxu3 %v4962_v60 }
 0x545   :  { %v4000_v27 = vrot.slane %v3999_v42, 1  ;;  %3804 = vmatpush.bf16.msra.mxu2 %v4898_v43 }
 0x546   :  { %v3472_v34 = vpop.f32.mrf.mxu2  ;;  %v3561_v39 = vpop.f32.mrf.mxu3 }
 0x547   :  { %v4001_v13 = vmax.f32 %v3999_v42, %v4000_v27  ;;  %v3473_v38 = vadd.f32 %v3472_v34, %v3384_v52  ;;  %v3297_v47 = vpop.f32.mrf.mxu0  ;;  %v3386_v5 = vpop.f32.mrf.mxu1 }
 0x548   :  { %v3298_v33 = vadd.f32 %v3297_v47, %v6682_v7  ;;  %v4770_v47 = vor.u32 %v5163_v0, %v4767_v24 }
 0x549   :  { %v6716_v49 = vsel %vm1992_vm2, %v4001_v13, %v3983_v18  ;;  %v3562_v20 = vadd.f32 %v3561_v39, %v3473_v38  ;;  %v5179_v38 = vld [vmem:[#allocation7 + $0x84] sm:$0xf] }
 0x54a   :  { %v3387_v50 = vadd.f32 %v3386_v5, %v3298_v33  ;;  %3336 = vmatmul.bf16.gmra.mxu0 %v6615_v14  ;;  %3425 = vmatmul.bf16.gmra.mxu1 %v6625_v11  ;;  %v4834_v52 = vor.u32 %v5179_v38, %v4831_v2 }
 0x54b   :  { %v4011_v22 = vmax.f32 %v3560_v28, %v3562_v20  ;;  %3514 = vmatmul.bf16.gmra.mxu2 %v6629_v12  ;;  %3603 = vmatmul.bf16.gmra.mxu3 %v6634_v10 }
 0x54c   :  { %3626 = vmatpush.bf16.msra.mxu0 %v4770_v47  ;;  %3715 = vmatpush.bf16.msra.mxu1 %v4834_v52 }
 0x54e   :  { %v3475_v5 = vpop.f32.mrf.mxu2  ;;  %v3564_v3 = vpop.f32.mrf.mxu3 }
 0x54f   :  { %v3476_v42 = vadd.f32 %v3475_v5, %v3387_v50  ;;  %v3299_v27 = vpop.f32.mrf.mxu0  ;;  %v3388_v34 = vpop.f32.mrf.mxu1 }
 0x550   :  { %v3300_v28 = vadd.f32 %v3299_v27, %v6682_v7 }
 0x551   :  { %v3565_v39 = vadd.f32 %v3564_v3, %v3476_v42 }
 0x552   :  { %v3389_v18 = vadd.f32 %v3388_v34, %v3300_v28 }
 0x553   :  { %v4012_v13 = vmax.f32 %v4011_v22, %v3565_v39 }
 0x556   :  { %v3477_v33 = vpop.f32.mrf.mxu2  ;;  %v3566_v20 = vpop.f32.mrf.mxu3 }
 0x557   :  { %v3478_v17 = vadd.f32 %v3477_v33, %v3389_v18  ;;  %v3302_v19 = vpop.f32.mrf.mxu0  ;;  %v3391_v0 = vpop.f32.mrf.mxu1 }
 0x558   :  { %v3303_v43 = vadd.f32 %v3302_v19, %v6682_v7 }
 0x559   :  { %v3567_v24 = vadd.f32 %v3566_v20, %v3478_v17 }
 0x55a   :  { %v3392_v31 = vadd.f32 %v3391_v0, %v3303_v43  ;;  %3341 = vmatmul.bf16.gmra.mxu0 %v7195_v9  ;;  %3430 = vmatmul.bf16.gmra.mxu1 %v6650_v58 }
 0x55b   :  { %v4013_v50 = vmax.f32 %v4012_v13, %v3567_v24  ;;  %3519 = vmatmul.bf16.gmra.mxu2 %v6652_v62  ;;  %3608 = vmatmul.bf16.gmra.mxu3 %v6658_v46 }
 0x55d   :  { %v4014_v47 = vrot.slane %v4013_v50, 4 }
 0x55e   :  { %v3480_v22 = vpop.f32.mrf.mxu2  ;;  %v3569_v60 = vpop.f32.mrf.mxu3 }
 0x55f   :  { %v4015_v38 = vmax.f32 %v4013_v50, %v4014_v47  ;;  %v3481_v2 = vadd.f32 %v3480_v22, %v3392_v31  ;;  %v3304_v52 = vpop.f32.mrf.mxu0  ;;  %v3393_v5 = vpop.f32.mrf.mxu1 }
 0x560   :  { %v3305_v3 = vadd.f32 %v3304_v52, %v6682_v7 }
 0x561   :  { %v4016_v42 = vrot.slane %v4015_v38, 2  ;;  %v3570_v27 = vadd.f32 %v3569_v60, %v3481_v2 }
 0x562   :  { %v3394_v34 = vadd.f32 %v3393_v5, %v3305_v3 }
 0x563   :  { %v4017_v28 = vmax.f32 %v4015_v38, %v4016_v42 }
 0x565   :  { %v4018_v39 = vrot.slane %v4017_v28, 1 }
 0x566   :  { %v3482_v18 = vpop.f32.mrf.mxu2  ;;  %v3571_v13 = vpop.f32.mrf.mxu3 }
 0x567   :  { %v4019_v33 = vmax.f32 %v4017_v28, %v4018_v39  ;;  %v3483_v20 = vadd.f32 %v3482_v18, %v3394_v34  ;;  %v3307_v17 = vpop.f32.mrf.mxu0  ;;  %v3396_v19 = vpop.f32.mrf.mxu1 }
 0x568   :  { %v3308_v0 = vadd.f32 %v3307_v17, %v6682_v7  ;;  %v7197_v17 = vld [vmem:[#allocation26_spill] sm:$0xff] }
 0x569   :  { %v4136_v43 = vsel %vm1994_vm3, %v4019_v33, %v6716_v49  ;;  %v3572_v24 = vadd.f32 %v3571_v13, %v3483_v20  ;;  %v7196_v20 = vld [vmem:[#allocation12_spill] sm:$0xff] }
 0x56a   :  { %v3397_v31 = vadd.f32 %v3396_v19, %v3308_v0  ;;  %3346 = vmatmul.bf16.gmra.mxu0 %v6660_v45  ;;  %3435 = vmatmul.bf16.gmra.mxu1 %v6662_v30  ;;  %v7198_v0 = vld [vmem:[#allocation28_spill] sm:$0xff] }
 0x56b   :  { %v4029_v50 = vmax.f32 %v3570_v27, %v3572_v24  ;;  %3524 = vmatmul.bf16.gmra.mxu2 %v6664_v8  ;;  %3613 = vmatmul.bf16.gmra.mxu3 %v6666_v4  ;;  %v7199_v24 = vld [vmem:[#allocation61_spill] sm:$0xff] }
 0x56e   :  { %v3485_v47 = vpop.f32.mrf.mxu2  ;;  %v3574_v22 = vpop.f32.mrf.mxu3 }
 0x56f   :  { %v3486_v60 = vadd.f32 %v3485_v47, %v3397_v31  ;;  %v3309_v38 = vpop.f32.mrf.mxu0  ;;  %v3398_v2 = vpop.f32.mrf.mxu1 }
 0x570   :  { %v3310_v52 = vadd.f32 %v3309_v38, %v6682_v7 }
 0x571   :  { %v3575_v5 = vadd.f32 %v3574_v22, %v3486_v60 }
 0x572   :  { %v3399_v49 = vadd.f32 %v3398_v2, %v3310_v52 }
 0x573   :  { %v4030_v3 = vmax.f32 %v4029_v50, %v3575_v5 }
 0x576   :  { %v3487_v42 = vpop.f32.mrf.mxu2  ;;  %v3576_v34 = vpop.f32.mrf.mxu3 }
 0x577   :  { %v3488_v28 = vadd.f32 %v3487_v42, %v3399_v49  ;;  %v3312_v39 = vpop.f32.mrf.mxu0  ;;  %v3401_v18 = vpop.f32.mrf.mxu1 }
 0x578   :  { %v3313_v27 = vadd.f32 %v3312_v39, %v6682_v7 }
 0x579   :  { %v3577_v13 = vadd.f32 %v3576_v34, %v3488_v28 }
 0x57a   :  { %v3402_v33 = vadd.f32 %v3401_v18, %v3313_v27  ;;  %3627 = vmatmul.bf16.vlgmr.msra.gmra.mxu0 %v7196_v20  ;;  %3716 = vmatmul.bf16.vlgmr.msra.gmra.mxu1 %v7197_v17 }
 0x57b   :  { %v4031_v19 = vmax.f32 %v4030_v3, %v3577_v13  ;;  %3805 = vmatmul.bf16.vlgmr.msra.gmra.mxu2 %v7198_v0  ;;  %3894 = vmatmul.bf16.vlgmr.msrb.gmra.mxu3 %v7199_v24  ;;  %v7200_v24 = vld [vmem:[#allocation63_spill] sm:$0xff] }
 0x57d   :  { %v4032_v31 = vrot.slane %v4031_v19, 4 }
 0x57e   :  { %v3490_v50 = vpop.f32.mrf.mxu2  ;;  %v3579_v47 = vpop.f32.mrf.mxu3 }
 0x57f   :  { %v4033_v22 = vmax.f32 %v4031_v19, %v4032_v31  ;;  %v3491_v60 = vadd.f32 %v3490_v50, %v3402_v33  ;;  %v3314_v38 = vpop.f32.mrf.mxu0  ;;  %v3403_v2 = vpop.f32.mrf.mxu1  ;;  %v7201_v31 = vld [vmem:[#allocation87_spill] sm:$0xff] }
 0x580   :  { %v3315_v52 = vadd.f32 %v3314_v38, %v6682_v7 }
 0x581   :  { %v4034_v5 = vrot.slane %v4033_v22, 2  ;;  %v3580_v49 = vadd.f32 %v3579_v47, %v3491_v60  ;;  %v7202_v47 = vld [vmem:[#allocation88_spill] sm:$0xff] }
 0x582   :  { %v3404_v42 = vadd.f32 %v3403_v2, %v3315_v52 }
 0x583   :  { %v4035_v34 = vmax.f32 %v4033_v22, %v4034_v5  ;;  %v7203_v22 = vld [vmem:[#allocation13_spill] sm:$0xff] }
 0x585   :  { %v4036_v28 = vrot.slane %v4035_v34, 1 }
 0x586   :  { %v3492_v39 = vpop.f32.mrf.mxu2  ;;  %v3581_v3 = vpop.f32.mrf.mxu3 }
 0x587   :  { %v4037_v18 = vmax.f32 %v4035_v34, %v4036_v28  ;;  %v3493_v27 = vadd.f32 %v3492_v39, %v3404_v42  ;;  %v3317_v13 = vpop.f32.mrf.mxu0  ;;  %v3406_v20 = vpop.f32.mrf.mxu1 }
 0x588   :  { %v3318_v17 = vadd.f32 %v3317_v13, %v6682_v7 }
 0x589   :  { %v6745_v19 = vsel %vm1996_vm4, %v4037_v18, %v4136_v43  ;;  %v3582_v33 = vadd.f32 %v3581_v3, %v3493_v27 }
 0x58a   :  { %v3407_v0 = vadd.f32 %v3406_v20, %v3318_v17  ;;  %3632 = vmatmul.bf16.gmra.mxu0 %v7200_v24  ;;  %3721 = vmatmul.bf16.gmra.mxu1 %v7201_v31  ;;  %v7205_v24 = vld [vmem:[#allocation30_spill] sm:$0xff]  ;;  %v7206_v31 = vld [vmem:[#allocation32_spill] sm:$0xff] }
 0x58b   :  { %v4047_v50 = vmax.f32 %v3580_v49, %v3582_v33  ;;  %3810 = vmatmul.bf16.gmra.mxu2 %v7202_v47  ;;  %3899 = vmatmul.bf16.gmra.mxu3 %v7203_v22  ;;  %v7204_v33 = vld [vmem:[#allocation14_spill] sm:$0xff]  ;;  %v7207_v47 = vld [vmem:[#allocation65_spill] sm:$0xff] }
 0x58e   :  { %v3495_v60 = vpop.f32.mrf.mxu2  ;;  %v3584_v38 = vpop.f32.mrf.mxu3 }
 0x58f   :  { %v3496_v2 = vadd.f32 %v3495_v60, %v3407_v0  ;;  %v3319_v52 = vpop.f32.mrf.mxu0  ;;  %v3408_v5 = vpop.f32.mrf.mxu1 }
 0x590   :  { %v3320_v42 = vadd.f32 %v3319_v52, %v6682_v7 }
 0x591   :  { %v3585_v43 = vadd.f32 %v3584_v38, %v3496_v2 }
 0x592   :  { %v3409_v34 = vadd.f32 %v3408_v5, %v3320_v42 }
 0x593   :  { %v4048_v28 = vmax.f32 %v4047_v50, %v3585_v43 }
 0x596   :  { %v3497_v39 = vpop.f32.mrf.mxu2  ;;  %v3586_v3 = vpop.f32.mrf.mxu3 }
 0x597   :  { %v3498_v18 = vadd.f32 %v3497_v39, %v3409_v34  ;;  %v3322_v27 = vpop.f32.mrf.mxu0  ;;  %v3411_v13 = vpop.f32.mrf.mxu1 }
 0x598   :  { %v3323_v49 = vadd.f32 %v3322_v27, %v6682_v7 }
 0x599   :  { %v3587_v20 = vadd.f32 %v3586_v3, %v3498_v18 }
 0x59a   :  { %v3412_v17 = vadd.f32 %v3411_v13, %v3323_v49  ;;  %3637 = vmatmul.bf16.gmra.mxu0 %v7204_v33  ;;  %3726 = vmatmul.bf16.gmra.mxu1 %v7205_v24  ;;  %v7208_v49 = vld [vmem:[#allocation67_spill] sm:$0xff] }
 0x59b   :  { %v6755_v0 = vmax.f32 %v4048_v28, %v3587_v20  ;;  %3815 = vmatmul.bf16.gmra.mxu2 %v7206_v31  ;;  %3904 = vmatmul.bf16.gmra.mxu3 %v7207_v47  ;;  %v7209_v20 = vld [vmem:[#allocation90_spill] sm:$0xff]  ;;  %v7210_v33 = vld [vmem:[#allocation91_spill] sm:$0xff] }
 0x59c   :  { %v7211_v24 = vld [vmem:[#allocation15_spill] sm:$0xff] }
 0x59e   :  { %v3500_v50 = vpop.f32.mrf.mxu2  ;;  %v3589_v22 = vpop.f32.mrf.mxu3 }
 0x59f   :  { %v3501_v60 = vadd.f32 %v3500_v50, %v3412_v17  ;;  %v3324_v38 = vpop.f32.mrf.mxu0  ;;  %v3413_v2 = vpop.f32.mrf.mxu1 }
 0x5a0   :  { %v3325_v52 = vadd.f32 %v3324_v38, %v6682_v7 }
 0x5a1   :  { %v3590_v5 = vadd.f32 %v3589_v22, %v3501_v60 }
 0x5a2   :  { %v3414_v42 = vadd.f32 %v3413_v2, %v3325_v52 }
 0x5a6   :  { %v3502_v43 = vpop.f32.mrf.mxu2  ;;  %v3591_v34 = vpop.f32.mrf.mxu3 }
 0x5a7   :  { %v3503_v39 = vadd.f32 %v3502_v43, %v3414_v42  ;;  %v3327_v3 = vpop.f32.mrf.mxu0  ;;  %v3416_v18 = vpop.f32.mrf.mxu1 }
 0x5a8   :  { %v3328_v28 = vadd.f32 %v3327_v3, %v6682_v7 }
 0x5a9   :  { %v3592_v27 = vadd.f32 %v3591_v34, %v3503_v39 }
 0x5aa   :  { %v3417_v13 = vadd.f32 %v3416_v18, %v3328_v28  ;;  %3642 = vmatmul.bf16.gmra.mxu0 %v7208_v49  ;;  %3731 = vmatmul.bf16.gmra.mxu1 %v7209_v20  ;;  %v7212_v49 = vld [vmem:[#allocation16_spill] sm:$0xff]  ;;  %v7213_v20 = vld [vmem:[#allocation34_spill] sm:$0xff] }
 0x5ab   :  { %v4065_v17 = vmax.f32 %v3590_v5, %v3592_v27  ;;  %3820 = vmatmul.bf16.gmra.mxu2 %v7210_v33  ;;  %3909 = vmatmul.bf16.gmra.mxu3 %v7211_v24  ;;  %v7214_v33 = vld [vmem:[#allocation36_spill] sm:$0xff]  ;;  %v7215_v24 = vld [vmem:[#allocation69_spill] sm:$0xff] }
 0x5ae   :  { %v3505_v31 = vpop.f32.mrf.mxu2  ;;  %v3594_v47 = vpop.f32.mrf.mxu3 }
 0x5af   :  { %v3506_v50 = vadd.f32 %v3505_v31, %v3417_v13  ;;  %v3329_v22 = vpop.f32.mrf.mxu0  ;;  %v3418_v60 = vpop.f32.mrf.mxu1 }
 0x5b0   :  { %v3330_v38 = vadd.f32 %v3329_v22, %v6682_v7 }
 0x5b1   :  { %v3595_v2 = vadd.f32 %v3594_v47, %v3506_v50 }
 0x5b2   :  { %v3419_v52 = vadd.f32 %v3418_v60, %v3330_v38 }
 0x5b3   :  { %v4066_v42 = vmax.f32 %v4065_v17, %v3595_v2 }
 0x5b6   :  { %v3507_v43 = vpop.f32.mrf.mxu2  ;;  %v3596_v34 = vpop.f32.mrf.mxu3 }
 0x5b7   :  { %v3508_v39 = vadd.f32 %v3507_v43, %v3419_v52  ;;  %v3332_v3 = vpop.f32.mrf.mxu0  ;;  %v3421_v18 = vpop.f32.mrf.mxu1 }
 0x5b8   :  { %v3333_v5 = vadd.f32 %v3332_v3, %v6682_v7 }
 0x5b9   :  { %v3597_v28 = vadd.f32 %v3596_v34, %v3508_v39 }
 0x5ba   :  { %v3422_v27 = vadd.f32 %v3421_v18, %v3333_v5  ;;  %3647 = vmatmul.bf16.gmra.mxu0 %v7212_v49  ;;  %3736 = vmatmul.bf16.gmra.mxu1 %v7213_v20  ;;  %v7217_v49 = vld [vmem:[#allocation93_spill] sm:$0xff]  ;;  %v7218_v20 = vld [vmem:[#allocation94_spill] sm:$0xff] }
 0x5bb   :  { %v6769_v13 = vmax.f32 %v4066_v42, %v3597_v28  ;;  %3825 = vmatmul.bf16.gmra.mxu2 %v7214_v33  ;;  %3914 = vmatmul.bf16.gmra.mxu3 %v7215_v24  ;;  %v7216_v28 = vld [vmem:[#allocation71_spill] sm:$0xff]  ;;  %v7219_v33 = vld [vmem:[#allocation17_spill] sm:$0xff]  ;;  %v4050_v24 = vrot.slane %v6755_v0, 4 }
 0x5be   :  { %v3510_v17 = vpop.f32.mrf.mxu2  ;;  %v3599_v31 = vpop.f32.mrf.mxu3 }
 0x5bf   :  { %v3511_v47 = vadd.f32 %v3510_v17, %v3422_v27  ;;  %v3334_v50 = vpop.f32.mrf.mxu0  ;;  %v3423_v22 = vpop.f32.mrf.mxu1 }
 0x5c0   :  { %v3335_v60 = vadd.f32 %v3334_v50, %v6682_v7 }
 0x5c1   :  { %v3600_v38 = vadd.f32 %v3599_v31, %v3511_v47 }
 0x5c2   :  { %v3424_v2 = vadd.f32 %v3423_v22, %v3335_v60  ;;  %v4051_v60 = vmax.f32 %v6755_v0, %v4050_v24 }
 0x5c6   :  { %v3512_v52 = vpop.f32.mrf.mxu2  ;;  %v3601_v43 = vpop.f32.mrf.mxu3 }
 0x5c7   :  { %v3513_v34 = vadd.f32 %v3512_v52, %v3424_v2  ;;  %v3337_v39 = vpop.f32.mrf.mxu0  ;;  %v3426_v3 = vpop.f32.mrf.mxu1 }
 0x5c8   :  { %v3338_v42 = vadd.f32 %v3337_v39, %v6682_v7  ;;  %v4052_v39 = vrot.slane %v4051_v60, 2 }
 0x5c9   :  { %v3602_v18 = vadd.f32 %v3601_v43, %v3513_v34 }
 0x5ca   :  { %v3427_v5 = vadd.f32 %v3426_v3, %v3338_v42  ;;  %3652 = vmatmul.bf16.gmra.mxu0 %v7216_v28  ;;  %3741 = vmatmul.bf16.gmra.mxu1 %v7217_v49  ;;  %v4053_v49 = vmax.f32 %v4051_v60, %v4052_v39 }
 0x5cb   :  { %v4083_v27 = vmax.f32 %v3600_v38, %v3602_v18  ;;  %3830 = vmatmul.bf16.gmra.mxu2 %v7218_v20  ;;  %3919 = vmatmul.bf16.gmra.mxu3 %v7219_v33 }
 0x5ce   :  { %v3515_v17 = vpop.f32.mrf.mxu2  ;;  %v3604_v31 = vpop.f32.mrf.mxu3 }
 0x5cf   :  { %v3516_v47 = vadd.f32 %v3515_v17, %v3427_v5  ;;  %v3339_v50 = vpop.f32.mrf.mxu0  ;;  %v3428_v22 = vpop.f32.mrf.mxu1 }
 0x5d0   :  { %v3340_v2 = vadd.f32 %v3339_v50, %v6682_v7 }
 0x5d1   :  { %v3605_v52 = vadd.f32 %v3604_v31, %v3516_v47 }
 0x5d2   :  { %v3429_v43 = vadd.f32 %v3428_v22, %v3340_v2 }
 0x5d3   :  { %v4084_v34 = vmax.f32 %v4083_v27, %v3605_v52  ;;  %v4054_v27 = vrot.slane %v4053_v49, 1 }
 0x5d5   :  { %v4055_v22 = vmax.f32 %v4053_v49, %v4054_v27 }
 0x5d6   :  { %v3517_v38 = vpop.f32.mrf.mxu2  ;;  %v3606_v3 = vpop.f32.mrf.mxu3 }
 0x5d7   :  { %v3518_v42 = vadd.f32 %v3517_v38, %v3429_v43  ;;  %v3342_v18 = vpop.f32.mrf.mxu0  ;;  %v3431_v28 = vpop.f32.mrf.mxu1 }
 0x5d8   :  { %v3343_v20 = vadd.f32 %v3342_v18, %v6682_v7 }
 0x5d9   :  { %v3607_v33 = vadd.f32 %v3606_v3, %v3518_v42 }
 0x5da   :  { %v3432_v5 = vadd.f32 %v3431_v28, %v3343_v20  ;;  %3657 = vmatmul.bf16.gmra.mxu0 %v6465_v61  ;;  %3746 = vmatmul.bf16.gmra.mxu1 %v6470_v56  ;;  %v4138_v61 = vsel %vm1998_vm5, %v4055_v22, %v6745_v19  ;;  %v4068_v19 = vrot.slane %v6769_v13, 4 }
 0x5db   :  { %v6785_v0 = vmax.f32 %v4084_v34, %v3607_v33  ;;  %3835 = vmatmul.bf16.gmra.mxu2 %v6475_v40  ;;  %3924 = vmatmul.bf16.gmra.mxu3 %v6479_v41 }
 0x5de   :  { %v3520_v24 = vpop.f32.mrf.mxu2  ;;  %v3609_v17 = vpop.f32.mrf.mxu3 }
 0x5df   :  { %v3521_v31 = vadd.f32 %v3520_v24, %v3432_v5  ;;  %v3344_v47 = vpop.f32.mrf.mxu0  ;;  %v3433_v50 = vpop.f32.mrf.mxu1  ;;  %v4069_v5 = vmax.f32 %v6769_v13, %v4068_v19 }
 0x5e0   :  { %v3345_v60 = vadd.f32 %v3344_v47, %v6682_v7 }
 0x5e1   :  { %v3610_v2 = vadd.f32 %v3609_v17, %v3521_v31 }
 0x5e2   :  { %v3434_v52 = vadd.f32 %v3433_v50, %v3345_v60 }
 0x5e6   :  { %v3522_v56 = vpop.f32.mrf.mxu2  ;;  %v3611_v43 = vpop.f32.mrf.mxu3 }
 0x5e7   :  { %v3523_v34 = vadd.f32 %v3522_v56, %v3434_v52  ;;  %v3347_v40 = vpop.f32.mrf.mxu0  ;;  %v3436_v39 = vpop.f32.mrf.mxu1 }
 0x5e8   :  { %v3348_v41 = vadd.f32 %v3347_v40, %v6682_v7 }
 0x5e9   :  { %v3612_v38 = vadd.f32 %v3611_v43, %v3523_v34 }
 0x5ea   :  { %v3437_v3 = vadd.f32 %v3436_v39, %v3348_v41  ;;  %3662 = vmatmul.bf16.gmra.mxu0 %v6483_v51  ;;  %3751 = vmatmul.bf16.gmra.mxu1 %v6487_v6  ;;  %v4070_v51 = vrot.slane %v4069_v5, 2  ;;  %v6804_v6 = vperm.slane %v6679_v54, 1 }
 0x5eb   :  { %v4101_v42 = vmax.f32 %v3610_v2, %v3612_v38  ;;  %3840 = vmatmul.bf16.gmra.mxu2 %v6495_v1  ;;  %3929 = vmatmul.bf16.gmra.mxu3 %v6501_v29 }
 0x5ec   :  { %v4071_v47 = vmax.f32 %v4069_v5, %v4070_v51 }
 0x5ee   :  { %v3525_v18 = vpop.f32.mrf.mxu2  ;;  %v3614_v28 = vpop.f32.mrf.mxu3  ;;  %v4072_v54 = vrot.slane %v4071_v47, 1 }
 0x5ef   :  { %v3526_v49 = vadd.f32 %v3525_v18, %v3437_v3  ;;  %v3349_v20 = vpop.f32.mrf.mxu0  ;;  %v6798_v33 = vpop.f32.mrf.mxu1 }
 0x5f0   :  { %v4073_v43 = vmax.f32 %v4071_v47, %v4072_v54 }
 0x5f1   :  { %v3615_v27 = vadd.f32 %v3614_v28, %v3526_v49 }
 0x5f2   :  { %v4139_v41 = vsel %vm2000_vm6, %v4073_v43, %v4138_v61  ;;  %v4086_v61 = vrot.slane %v6785_v0, 4 }
 0x5f3   :  { %v6801_v24 = vmax.f32 %v4101_v42, %v3615_v27 }
 0x5f6   :  { %v6806_v1 = vpop.f32.mrf.mxu2  ;;  %v6808_v29 = vpop.f32.mrf.mxu3 }
 0x5f7   :  { %v3628_v17 = vpop.f32.mrf.mxu0  ;;  %v3717_v31 = vpop.f32.mrf.mxu1 }
 0x5f8   :  { %v3629_v50 = vadd.f32 %v3628_v17, %v6804_v6  ;;  %v4087_v17 = vmax.f32 %v6785_v0, %v4086_v61 }
 0x5fa   :  { %v3718_v22 = vadd.f32 %v3717_v31, %v3629_v50  ;;  %3667 = vmatmul.bf16.gmra.mxu0 %v6530_v32  ;;  %3756 = vmatmul.bf16.gmra.mxu1 %v6532_v59 }
 0x5fb   :  { %3845 = vmatmul.bf16.gmra.mxu2 %v6537_v37  ;;  %3934 = vmatmul.bf16.gmra.mxu3 %v6539_v21 }
 0x5fe   :  { %v3806_v13 = vpop.f32.mrf.mxu2  ;;  %v3895_v60 = vpop.f32.mrf.mxu3 }
 0x5ff   :  { %v3807_v2 = vadd.f32 %v3806_v13, %v3718_v22  ;;  %v3630_v52 = vpop.f32.mrf.mxu0  ;;  %v3719_v56 = vpop.f32.mrf.mxu1 }
 0x600   :  { %v3631_v34 = vadd.f32 %v3630_v52, %v6804_v6 }
 0x601   :  { %v3896_v40 = vadd.f32 %v3895_v60, %v3807_v2 }
 0x602   :  { %v3720_v39 = vadd.f32 %v3719_v56, %v3631_v34  ;;  %v3350_v56 = vadd.f32 %v3349_v20, %v6682_v7 }
 0x606   :  { %v3808_v32 = vpop.f32.mrf.mxu2  ;;  %v3897_v38 = vpop.f32.mrf.mxu3 }
 0x607   :  { %v3809_v59 = vadd.f32 %v3808_v32, %v3720_v39  ;;  %v3633_v3 = vpop.f32.mrf.mxu0  ;;  %v3722_v37 = vpop.f32.mrf.mxu1 }
 0x608   :  { %v3634_v21 = vadd.f32 %v3633_v3, %v6804_v6 }
 0x609   :  { %v3898_v42 = vadd.f32 %v3897_v38, %v3809_v59 }
 0x60a   :  { %v3723_v19 = vadd.f32 %v3722_v37, %v3634_v21  ;;  %3672 = vmatmul.bf16.gmra.mxu0 %v6549_v23  ;;  %3761 = vmatmul.bf16.gmra.mxu1 %v6551_v44  ;;  %v4088_v44 = vrot.slane %v4087_v17, 2 }
 0x60b   :  { %v3984_v18 = vmax.f32 %v3896_v40, %v3898_v42  ;;  %3850 = vmatmul.bf16.gmra.mxu2 %v6555_v63  ;;  %3939 = vmatmul.bf16.gmra.mxu3 %v6557_v16  ;;  %v3439_v40 = vadd.f32 %v6798_v33, %v3350_v56  ;;  %v7220_v56 = vld [vmem:[#allocation18_spill] sm:$0xff] }
 0x60c   :  { %v4089_v60 = vmax.f32 %v4087_v17, %v4088_v44 }
 0x60d   :  { %v3528_v7 = vadd.f32 %v6806_v1, %v3439_v40  ;;  %v7221_v40 = vld [vmem:[#allocation38_spill] sm:$0xff] }
 0x60e   :  { %v3811_v28 = vpop.f32.mrf.mxu2  ;;  %v3900_v49 = vpop.f32.mrf.mxu3  ;;  %v4090_v34 = vrot.slane %v4089_v60, 1 }
 0x60f   :  { %v3812_v5 = vadd.f32 %v3811_v28, %v3723_v19  ;;  %v3635_v27 = vpop.f32.mrf.mxu0  ;;  %v3724_v51 = vpop.f32.mrf.mxu1  ;;  %v3617_v21 = vadd.f32 %v6808_v29, %v3528_v7 }
 0x610   :  { %v3636_v31 = vadd.f32 %v3635_v27, %v6804_v6  ;;  %v4091_v37 = vmax.f32 %v4089_v60, %v4090_v34 }
 0x611   :  { %v3901_v47 = vadd.f32 %v3900_v49, %v3812_v5  ;;  %v4103_v61 = vmax.f32 %v6801_v24, %v3617_v21 }
 0x612   :  { %v3725_v23 = vadd.f32 %v3724_v51, %v3636_v31 }
 0x613   :  { %v3985_v50 = vmax.f32 %v3984_v18, %v3901_v47  ;;  %v4104_v29 = vrot.slane %v4103_v61, 4 }
 0x615   :  { %v4105_v24 = vmax.f32 %v4103_v61, %v4104_v29 }
 0x616   :  { %v3813_v22 = vpop.f32.mrf.mxu2  ;;  %v3902_v54 = vpop.f32.mrf.mxu3 }
 0x617   :  { %v3814_v63 = vadd.f32 %v3813_v22, %v3725_v23  ;;  %v3638_v13 = vpop.f32.mrf.mxu0  ;;  %v3727_v16 = vpop.f32.mrf.mxu1  ;;  %v4106_v22 = vrot.slane %v4105_v24, 2 }
 0x618   :  { %v3639_v2 = vadd.f32 %v3638_v13, %v6804_v6 }
 0x619   :  { %v3903_v52 = vadd.f32 %v3902_v54, %v3814_v63 }
 0x61a   :  { %v3728_v43 = vadd.f32 %v3727_v16, %v3639_v2  ;;  %3677 = vmatmul.bf16.gmra.mxu0 %v6564_v53  ;;  %3766 = vmatmul.bf16.gmra.mxu1 %v6568_v26  ;;  %v4107_v16 = vmax.f32 %v4105_v24, %v4106_v22 }
 0x61b   :  { %v3986_v0 = vmax.f32 %v3985_v50, %v3903_v52  ;;  %3855 = vmatmul.bf16.gmra.mxu2 %v6572_v57  ;;  %3944 = vmatmul.bf16.gmra.mxu3 %v6578_v15  ;;  %v4140_v57 = vsel %vm2002_vm7, %v4091_v37, %v4139_v41 }
 0x61d   :  { %v3987_v44 = vrot.slane %v3986_v0, 4 }
 0x61e   :  { %v3816_v39 = vpop.f32.mrf.mxu2  ;;  %v3905_v32 = vpop.f32.mrf.mxu3 }
 0x61f   :  { %v3817_v38 = vadd.f32 %v3816_v39, %v3728_v43  ;;  %v3640_v59 = vpop.f32.mrf.mxu0  ;;  %v3729_v3 = vpop.f32.mrf.mxu1  ;;  %v3988_v63 = vmax.f32 %v3986_v0, %v3987_v44  ;;  %v7222_v39 = vld [vmem:[#allocation40_spill] sm:$0xff] }
 0x620   :  { %v3641_v53 = vadd.f32 %v3640_v59, %v6804_v6 }
 0x621   :  { %v3906_v20 = vadd.f32 %v3905_v32, %v3817_v38  ;;  %v3989_v43 = vrot.slane %v3988_v63, 2  ;;  %v4108_v32 = vrot.slane %v4107_v16, 1 }
 0x622   :  { %v3730_v26 = vadd.f32 %v3729_v3, %v3641_v53 }
 0x623   :  { %v3990_v3 = vmax.f32 %v3988_v63, %v3989_v43 }
 0x626   :  { %v3818_v15 = vpop.f32.mrf.mxu2  ;;  %v3907_v42 = vpop.f32.mrf.mxu3 }
 0x627   :  { %v3819_v19 = vadd.f32 %v3818_v15, %v3730_v26  ;;  %v3643_v33 = vpop.f32.mrf.mxu0  ;;  %v3732_v18 = vpop.f32.mrf.mxu1  ;;  %v4109_v26 = vmax.f32 %v4107_v16, %v4108_v32 }
 0x628   :  { %v3644_v28 = vadd.f32 %v3643_v33, %v6804_v6 }
 0x629   :  { %v3908_v49 = vadd.f32 %v3907_v42, %v3819_v19  ;;  %v3991_v19 = vrot.slane %v3990_v3, 1 }
 0x62a   :  { %v3733_v5 = vadd.f32 %v3732_v18, %v3644_v28  ;;  %3682 = vmatmul.bf16.gmra.mxu0 %v6574_v25  ;;  %3771 = vmatmul.bf16.gmra.mxu1 %v6585_v35  ;;  %v4141_v18 = vsel %vm2004_vm8, %v4109_v26, %v4140_v57 }
 0x62b   :  { %v4002_v1 = vmax.f32 %v3906_v20, %v3908_v49  ;;  %3860 = vmatmul.bf16.gmra.mxu2 %v6591_v48  ;;  %3949 = vmatmul.bf16.gmra.mxu3 %v6598_v36  ;;  %4151 = vst [vmem:[#allocation8] sm:$0xff] %v4141_v18 }
 0x62e   :  { %v3821_v41 = vpop.f32.mrf.mxu2  ;;  %v3910_v27 = vpop.f32.mrf.mxu3 }
 0x62f   :  { %v3822_v51 = vadd.f32 %v3821_v41, %v3733_v5  ;;  %v3645_v17 = vpop.f32.mrf.mxu0  ;;  %v3734_v31 = vpop.f32.mrf.mxu1  ;;  %v3992_v5 = vmax.f32 %v3990_v3, %v3991_v19 }
 0x630   :  { %v3646_v47 = vadd.f32 %v3645_v17, %v6804_v6 }
 0x631   :  { %v3911_v23 = vadd.f32 %v3910_v27, %v3822_v51 }
 0x632   :  { %v3735_v50 = vadd.f32 %v3734_v31, %v3646_v47 }
 0x633   :  { %v4003_v25 = vmax.f32 %v4002_v1, %v3911_v23 }
 0x636   :  { %v3823_v35 = vpop.f32.mrf.mxu2  ;;  %v3912_v54 = vpop.f32.mrf.mxu3 }
 0x637   :  { %v3824_v48 = vadd.f32 %v3823_v35, %v3735_v50  ;;  %v3648_v13 = vpop.f32.mrf.mxu0  ;;  %v3737_v36 = vpop.f32.mrf.mxu1 }
 0x638   :  { %v3649_v60 = vadd.f32 %v3648_v13, %v6804_v6 }
 0x639   :  { %v3913_v2 = vadd.f32 %v3912_v54, %v3824_v48 }
 0x63a   :  { %v3738_v52 = vadd.f32 %v3737_v36, %v3649_v60  ;;  %3687 = vmatmul.bf16.gmra.mxu0 %v6602_v55  ;;  %3776 = vmatmul.bf16.gmra.mxu1 %v7220_v56 }
 0x63b   :  { %v4004_v34 = vmax.f32 %v4003_v25, %v3913_v2  ;;  %3865 = vmatmul.bf16.gmra.mxu2 %v7221_v40  ;;  %3954 = vmatmul.bf16.gmra.mxu3 %v7222_v39 }
 0x63d   :  { %v4005_v0 = vrot.slane %v4004_v34, 4 }
 0x63e   :  { %v3826_v38 = vpop.f32.mrf.mxu2  ;;  %v3915_v59 = vpop.f32.mrf.mxu3 }
 0x63f   :  { %v4006_v37 = vmax.f32 %v4004_v34, %v4005_v0  ;;  %v3827_v7 = vadd.f32 %v3826_v38, %v3738_v52  ;;  %v3650_v53 = vpop.f32.mrf.mxu0  ;;  %v3739_v20 = vpop.f32.mrf.mxu1 }
 0x640   :  { %v3651_v55 = vadd.f32 %v3650_v53, %v6804_v6 }
 0x641   :  { %v4007_v21 = vrot.slane %v4006_v37, 2  ;;  %v3916_v15 = vadd.f32 %v3915_v59, %v3827_v7 }
 0x642   :  { %v3740_v42 = vadd.f32 %v3739_v20, %v3651_v55 }
 0x643   :  { %v4008_v33 = vmax.f32 %v4006_v37, %v4007_v21 }
 0x645   :  { %v4009_v61 = vrot.slane %v4008_v33, 1 }
 0x646   :  { %v3828_v28 = vpop.f32.mrf.mxu2  ;;  %v3917_v49 = vpop.f32.mrf.mxu3 }
 0x647   :  { %v4010_v1 = vmax.f32 %v4008_v33, %v4009_v61  ;;  %v3829_v29 = vadd.f32 %v3828_v28, %v3740_v42  ;;  %v3653_v41 = vpop.f32.mrf.mxu0  ;;  %v3742_v27 = vpop.f32.mrf.mxu1 }
 0x648   :  { %v3654_v51 = vadd.f32 %v3653_v41, %v6804_v6 }
 0x649   :  { %v4142_v17 = vsel %vm1992_vm2, %v4010_v1, %v3992_v5  ;;  %v3918_v31 = vadd.f32 %v3917_v49, %v3829_v29 }
 0x64a   :  { %v3743_v24 = vadd.f32 %v3742_v27, %v3654_v51  ;;  %3692 = vmatmul.bf16.gmra.mxu0 %v6615_v14  ;;  %3781 = vmatmul.bf16.gmra.mxu1 %v6625_v11 }
 0x64b   :  { %v4020_v57 = vmax.f32 %v3916_v15, %v3918_v31  ;;  %3870 = vmatmul.bf16.gmra.mxu2 %v6629_v12  ;;  %3959 = vmatmul.bf16.gmra.mxu3 %v6634_v10 }
 0x64e   :  { %v3831_v47 = vpop.f32.mrf.mxu2  ;;  %v3920_v23 = vpop.f32.mrf.mxu3 }
 0x64f   :  { %v3832_v50 = vadd.f32 %v3831_v47, %v3743_v24  ;;  %v3655_v44 = vpop.f32.mrf.mxu0  ;;  %v3744_v25 = vpop.f32.mrf.mxu1 }
 0x650   :  { %v3656_v22 = vadd.f32 %v3655_v44, %v6804_v6 }
 0x651   :  { %v3921_v35 = vadd.f32 %v3920_v23, %v3832_v50 }
 0x652   :  { %v3745_v54 = vadd.f32 %v3744_v25, %v3656_v22 }
 0x653   :  { %v4021_v63 = vmax.f32 %v4020_v57, %v3921_v35 }
 0x656   :  { %v3833_v48 = vpop.f32.mrf.mxu2  ;;  %v3922_v13 = vpop.f32.mrf.mxu3 }
 0x657   :  { %v3834_v14 = vadd.f32 %v3833_v48, %v3745_v54  ;;  %v3658_v36 = vpop.f32.mrf.mxu0  ;;  %v3747_v11 = vpop.f32.mrf.mxu1 }
 0x658   :  { %v3659_v16 = vadd.f32 %v3658_v36, %v6804_v6 }
 0x659   :  { %v3923_v12 = vadd.f32 %v3922_v13, %v3834_v14 }
 0x65a   :  { %v3748_v60 = vadd.f32 %v3747_v11, %v3659_v16  ;;  %3697 = vmatmul.bf16.gmra.mxu0 %v7195_v9  ;;  %3786 = vmatmul.bf16.gmra.mxu1 %v6650_v58 }
 0x65b   :  { %v4022_v10 = vmax.f32 %v4021_v63, %v3923_v12  ;;  %3875 = vmatmul.bf16.gmra.mxu2 %v6652_v62  ;;  %3964 = vmatmul.bf16.gmra.mxu3 %v6658_v46 }
 0x65d   :  { %v4023_v2 = vrot.slane %v4022_v10, 4 }
 0x65e   :  { %v3836_v52 = vpop.f32.mrf.mxu2  ;;  %v3925_v56 = vpop.f32.mrf.mxu3 }
 0x65f   :  { %v4024_v43 = vmax.f32 %v4022_v10, %v4023_v2  ;;  %v3837_v34 = vadd.f32 %v3836_v52, %v3748_v60  ;;  %v3660_v40 = vpop.f32.mrf.mxu0  ;;  %v3749_v39 = vpop.f32.mrf.mxu1 }
 0x660   :  { %v3661_v32 = vadd.f32 %v3660_v40, %v6804_v6 }
 0x661   :  { %v4025_v0 = vrot.slane %v4024_v43, 2  ;;  %v3926_v38 = vadd.f32 %v3925_v56, %v3837_v34 }
 0x662   :  { %v3750_v59 = vadd.f32 %v3749_v39, %v3661_v32 }
 0x663   :  { %v4026_v9 = vmax.f32 %v4024_v43, %v4025_v0 }
 0x665   :  { %v4027_v3 = vrot.slane %v4026_v9, 1 }
 0x666   :  { %v3838_v58 = vpop.f32.mrf.mxu2  ;;  %v3927_v37 = vpop.f32.mrf.mxu3 }
 0x667   :  { %v4028_v7 = vmax.f32 %v4026_v9, %v4027_v3  ;;  %v3839_v62 = vadd.f32 %v3838_v58, %v3750_v59  ;;  %v3663_v53 = vpop.f32.mrf.mxu0  ;;  %v3752_v46 = vpop.f32.mrf.mxu1 }
 0x668   :  { %v3664_v20 = vadd.f32 %v3663_v53, %v6804_v6 }
 0x669   :  { %v4143_v26 = vsel %vm1994_vm3, %v4028_v7, %v4142_v17  ;;  %v3928_v55 = vadd.f32 %v3927_v37, %v3839_v62 }
 0x66a   :  { %v3753_v21 = vadd.f32 %v3752_v46, %v3664_v20  ;;  %3702 = vmatmul.bf16.gmra.mxu0 %v6660_v45  ;;  %3791 = vmatmul.bf16.gmra.mxu1 %v6662_v30 }
 0x66b   :  { %v4038_v15 = vmax.f32 %v3926_v38, %v3928_v55  ;;  %3880 = vmatmul.bf16.gmra.mxu2 %v6664_v8  ;;  %3969 = vmatmul.bf16.gmra.mxu3 %v6666_v4 }
 0x66e   :  { %v3841_v42 = vpop.f32.mrf.mxu2  ;;  %v3930_v19 = vpop.f32.mrf.mxu3 }
 0x66f   :  { %v3842_v33 = vadd.f32 %v3841_v42, %v3753_v21  ;;  %v3665_v18 = vpop.f32.mrf.mxu0  ;;  %v3754_v61 = vpop.f32.mrf.mxu1 }
 0x670   :  { %v3666_v28 = vadd.f32 %v3665_v18, %v6804_v6 }
 0x671   :  { %v3931_v49 = vadd.f32 %v3930_v19, %v3842_v33 }
 0x672   :  { %v3755_v5 = vadd.f32 %v3754_v61, %v3666_v28 }
 0x673   :  { %v4039_v1 = vmax.f32 %v4038_v15, %v3931_v49 }
 0x676   :  { %v3843_v29 = vpop.f32.mrf.mxu2  ;;  %v3932_v41 = vpop.f32.mrf.mxu3 }
 0x677   :  { %v3844_v45 = vadd.f32 %v3843_v29, %v3755_v5  ;;  %v3668_v27 = vpop.f32.mrf.mxu0  ;;  %v3757_v30 = vpop.f32.mrf.mxu1 }
 0x678   :  { %v3669_v51 = vadd.f32 %v3668_v27, %v6804_v6 }
 0x679   :  { %v3933_v8 = vadd.f32 %v3932_v41, %v3844_v45 }
 0x67a   :  { %v3758_v17 = vadd.f32 %v3757_v30, %v3669_v51 }
 0x67b   :  { %v4040_v4 = vmax.f32 %v4039_v1, %v3933_v8 }
 0x67d   :  { %v4041_v31 = vrot.slane %v4040_v4, 4 }
 0x67e   :  { %v3846_v24 = vpop.f32.mrf.mxu2  ;;  %v3935_v57 = vpop.f32.mrf.mxu3 }
 0x67f   :  { %v4042_v47 = vmax.f32 %v4040_v4, %v4041_v31  ;;  %v3847_v23 = vadd.f32 %v3846_v24, %v3758_v17  ;;  %v3670_v50 = vpop.f32.mrf.mxu0  ;;  %v3759_v44 = vpop.f32.mrf.mxu1 }
 0x680   :  { %v3671_v25 = vadd.f32 %v3670_v50, %v6804_v6 }
 0x681   :  { %v4043_v22 = vrot.slane %v4042_v47, 2  ;;  %v3936_v35 = vadd.f32 %v3935_v57, %v3847_v23 }
 0x682   :  { %v3760_v54 = vadd.f32 %v3759_v44, %v3671_v25 }
 0x683   :  { %v4044_v63 = vmax.f32 %v4042_v47, %v4043_v22 }
 0x685   :  { %v4045_v48 = vrot.slane %v4044_v63, 1 }
 0x686   :  { %v3848_v13 = vpop.f32.mrf.mxu2  ;;  %v3937_v14 = vpop.f32.mrf.mxu3 }
 0x687   :  { %v4046_v36 = vmax.f32 %v4044_v63, %v4045_v48  ;;  %v3849_v11 = vadd.f32 %v3848_v13, %v3760_v54  ;;  %v3673_v16 = vpop.f32.mrf.mxu0  ;;  %v3762_v12 = vpop.f32.mrf.mxu1 }
 0x688   :  { %v3674_v60 = vadd.f32 %v3673_v16, %v6804_v6 }
 0x689   :  { %v4144_v10 = vsel %vm1996_vm4, %v4046_v36, %v4143_v26  ;;  %v3938_v2 = vadd.f32 %v3937_v14, %v3849_v11 }
 0x68a   :  { %v3763_v52 = vadd.f32 %v3762_v12, %v3674_v60 }
 0x68b   :  { %v4056_v56 = vmax.f32 %v3936_v35, %v3938_v2 }
 0x68e   :  { %v3851_v43 = vpop.f32.mrf.mxu2  ;;  %v3940_v34 = vpop.f32.mrf.mxu3 }
 0x68f   :  { %v3852_v40 = vadd.f32 %v3851_v43, %v3763_v52  ;;  %v3675_v39 = vpop.f32.mrf.mxu0  ;;  %v3764_v32 = vpop.f32.mrf.mxu1 }
 0x690   :  { %v3676_v0 = vadd.f32 %v3675_v39, %v6804_v6 }
 0x691   :  { %v3941_v38 = vadd.f32 %v3940_v34, %v3852_v40 }
 0x692   :  { %v3765_v59 = vadd.f32 %v3764_v32, %v3676_v0 }
 0x693   :  { %v4057_v9 = vmax.f32 %v4056_v56, %v3941_v38 }
 0x696   :  { %v3853_v3 = vpop.f32.mrf.mxu2  ;;  %v3942_v58 = vpop.f32.mrf.mxu3 }
 0x697   :  { %v3854_v37 = vadd.f32 %v3853_v3, %v3765_v59  ;;  %v3678_v7 = vpop.f32.mrf.mxu0  ;;  %v3767_v62 = vpop.f32.mrf.mxu1 }
 0x698   :  { %v3679_v53 = vadd.f32 %v3678_v7, %v6804_v6 }
 0x699   :  { %v3943_v46 = vadd.f32 %v3942_v58, %v3854_v37 }
 0x69a   :  { %v3768_v20 = vadd.f32 %v3767_v62, %v3679_v53 }
 0x69b   :  { %v4058_v26 = vmax.f32 %v4057_v9, %v3943_v46 }
 0x69d   :  { %v4059_v55 = vrot.slane %v4058_v26, 4 }
 0x69e   :  { %v3856_v21 = vpop.f32.mrf.mxu2  ;;  %v3945_v15 = vpop.f32.mrf.mxu3 }
 0x69f   :  { %v4060_v42 = vmax.f32 %v4058_v26, %v4059_v55  ;;  %v3857_v19 = vadd.f32 %v3856_v21, %v3768_v20  ;;  %v3680_v33 = vpop.f32.mrf.mxu0  ;;  %v3769_v18 = vpop.f32.mrf.mxu1 }
 0x6a0   :  { %v3681_v61 = vadd.f32 %v3680_v33, %v6804_v6 }
 0x6a1   :  { %v4061_v28 = vrot.slane %v4060_v42, 2  ;;  %v3946_v49 = vadd.f32 %v3945_v15, %v3857_v19 }
 0x6a2   :  { %v3770_v5 = vadd.f32 %v3769_v18, %v3681_v61 }
 0x6a3   :  { %v4062_v1 = vmax.f32 %v4060_v42, %v4061_v28 }
 0x6a5   :  { %v4063_v29 = vrot.slane %v4062_v1, 1 }
 0x6a6   :  { %v3858_v41 = vpop.f32.mrf.mxu2  ;;  %v3947_v45 = vpop.f32.mrf.mxu3 }
 0x6a7   :  { %v4064_v27 = vmax.f32 %v4062_v1, %v4063_v29  ;;  %v3859_v30 = vadd.f32 %v3858_v41, %v3770_v5  ;;  %v3683_v51 = vpop.f32.mrf.mxu0  ;;  %v3772_v8 = vpop.f32.mrf.mxu1 }
 0x6a8   :  { %v3684_v17 = vadd.f32 %v3683_v51, %v6804_v6 }
 0x6a9   :  { %v6879_v4 = vsel %vm1998_vm5, %v4064_v27, %v4144_v10  ;;  %v3948_v31 = vadd.f32 %v3947_v45, %v3859_v30 }
 0x6aa   :  { %v3773_v24 = vadd.f32 %v3772_v8, %v3684_v17 }
 0x6ab   :  { %v4074_v57 = vmax.f32 %v3946_v49, %v3948_v31 }
 0x6ae   :  { %v3861_v47 = vpop.f32.mrf.mxu2  ;;  %v3950_v23 = vpop.f32.mrf.mxu3 }
 0x6af   :  { %v3862_v50 = vadd.f32 %v3861_v47, %v3773_v24  ;;  %v3685_v44 = vpop.f32.mrf.mxu0  ;;  %v3774_v25 = vpop.f32.mrf.mxu1 }
 0x6b0   :  { %v3686_v14 = vadd.f32 %v3685_v44, %v6804_v6 }
 0x6b1   :  { %v3951_v22 = vadd.f32 %v3950_v23, %v3862_v50 }
 0x6b2   :  { %v3775_v60 = vadd.f32 %v3774_v25, %v3686_v14 }
 0x6b3   :  { %v4075_v35 = vmax.f32 %v4074_v57, %v3951_v22 }
 0x6b6   :  { %v3863_v54 = vpop.f32.mrf.mxu2  ;;  %v3952_v63 = vpop.f32.mrf.mxu3 }
 0x6b7   :  { %v3688_v48 = vpop.f32.mrf.mxu0  ;;  %v3777_v13 = vpop.f32.mrf.mxu1  ;;  %v3864_v10 = vadd.f32 %v3863_v54, %v3775_v60 }
 0x6b8   :  { %v3689_v20 = vadd.f32 %v3688_v48, %v6804_v6 }
 0x6b9   :  { %v3953_v56 = vadd.f32 %v3952_v63, %v3864_v10 }
 0x6ba   :  { %v3778_v18 = vadd.f32 %v3777_v13, %v3689_v20 }
 0x6bb   :  { %v4076_v40 = vmax.f32 %v4075_v35, %v3953_v56 }
 0x6bd   :  { %v4077_v0 = vrot.slane %v4076_v40, 4 }
 0x6be   :  { %v3866_v36 = vpop.f32.mrf.mxu2  ;;  %v3955_v11 = vpop.f32.mrf.mxu3 }
 0x6bf   :  { %v3690_v16 = vpop.f32.mrf.mxu0  ;;  %v3779_v12 = vpop.f32.mrf.mxu1  ;;  %v4078_v9 = vmax.f32 %v4076_v40, %v4077_v0  ;;  %v3867_v5 = vadd.f32 %v3866_v36, %v3778_v18 }
 0x6c0   :  { %v3691_v53 = vadd.f32 %v3690_v16, %v6804_v6 }
 0x6c1   :  { %v4079_v37 = vrot.slane %v4078_v9, 2  ;;  %v3956_v30 = vadd.f32 %v3955_v11, %v3867_v5 }
 0x6c2   :  { %v3780_v55 = vadd.f32 %v3779_v12, %v3691_v53 }
 0x6c3   :  { %v4080_v46 = vmax.f32 %v4078_v9, %v4079_v37 }
 0x6c5   :  { %v4081_v19 = vrot.slane %v4080_v46, 1 }
 0x6c6   :  { %v3868_v2 = vpop.f32.mrf.mxu2  ;;  %v3957_v52 = vpop.f32.mrf.mxu3 }
 0x6c7   :  { %v3693_v43 = vpop.f32.mrf.mxu0  ;;  %v3782_v34 = vpop.f32.mrf.mxu1  ;;  %v3869_v61 = vadd.f32 %v3868_v2, %v3780_v55  ;;  %v4082_v41 = vmax.f32 %v4080_v46, %v4081_v19 }
 0x6c8   :  { %v3694_v26 = vadd.f32 %v3693_v43, %v6804_v6 }
 0x6c9   :  { %v3958_v45 = vadd.f32 %v3957_v52, %v3869_v61  ;;  %v4146_v24 = vsel %vm2000_vm6, %v4082_v41, %v6879_v4 }
 0x6ca   :  { %v3783_v28 = vadd.f32 %v3782_v34, %v3694_v26 }
 0x6cb   :  { %v4092_v57 = vmax.f32 %v3956_v30, %v3958_v45 }
 0x6ce   :  { %v3871_v39 = vpop.f32.mrf.mxu2  ;;  %v3960_v32 = vpop.f32.mrf.mxu3 }
 0x6cf   :  { %v3695_v38 = vpop.f32.mrf.mxu0  ;;  %v3784_v59 = vpop.f32.mrf.mxu1  ;;  %v3872_v1 = vadd.f32 %v3871_v39, %v3783_v28 }
 0x6d0   :  { %v3696_v21 = vadd.f32 %v3695_v38, %v6804_v6 }
 0x6d1   :  { %v3961_v51 = vadd.f32 %v3960_v32, %v3872_v1 }
 0x6d2   :  { %v3785_v29 = vadd.f32 %v3784_v59, %v3696_v21 }
 0x6d3   :  { %v4093_v50 = vmax.f32 %v4092_v57, %v3961_v51 }
 0x6d6   :  { %v3873_v3 = vpop.f32.mrf.mxu2  ;;  %v3962_v58 = vpop.f32.mrf.mxu3 }
 0x6d7   :  { %v3698_v7 = vpop.f32.mrf.mxu0  ;;  %v3787_v62 = vpop.f32.mrf.mxu1  ;;  %v3874_v27 = vadd.f32 %v3873_v3, %v3785_v29 }
 0x6d8   :  { %v3699_v25 = vadd.f32 %v3698_v7, %v6804_v6 }
 0x6d9   :  { %v3963_v47 = vadd.f32 %v3962_v58, %v3874_v27 }
 0x6da   :  { %v3788_v13 = vadd.f32 %v3787_v62, %v3699_v25 }
 0x6db   :  { %v4094_v35 = vmax.f32 %v4093_v50, %v3963_v47 }
 0x6dd   :  { %v4095_v16 = vrot.slane %v4094_v35, 4 }
 0x6de   :  { %v3876_v15 = vpop.f32.mrf.mxu2  ;;  %v3965_v42 = vpop.f32.mrf.mxu3 }
 0x6df   :  { %v3700_v33 = vpop.f32.mrf.mxu0  ;;  %v3789_v49 = vpop.f32.mrf.mxu1  ;;  %v3877_v4 = vadd.f32 %v3876_v15, %v3788_v13  ;;  %v4096_v2 = vmax.f32 %v4094_v35, %v4095_v16 }
 0x6e0   :  { %v3701_v23 = vadd.f32 %v3700_v33, %v6804_v6 }
 0x6e1   :  { %v3966_v56 = vadd.f32 %v3965_v42, %v3877_v4  ;;  %v4097_v0 = vrot.slane %v4096_v2, 2 }
 0x6e2   :  { %v3790_v54 = vadd.f32 %v3789_v49, %v3701_v23 }
 0x6e3   :  { %v4098_v58 = vmax.f32 %v4096_v2, %v4097_v0 }
 0x6e5   :  { %v4099_v62 = vrot.slane %v4098_v58, 1 }
 0x6e6   :  { %v3878_v8 = vpop.f32.mrf.mxu2  ;;  %v3967_v17 = vpop.f32.mrf.mxu3 }
 0x6e7   :  { %v3703_v31 = vpop.f32.mrf.mxu0  ;;  %v3792_v44 = vpop.f32.mrf.mxu1  ;;  %v3879_v14 = vadd.f32 %v3878_v8, %v3790_v54  ;;  %v4100_v46 = vmax.f32 %v4098_v58, %v4099_v62 }
 0x6e8   :  { %v3704_v22 = vadd.f32 %v3703_v31, %v6804_v6 }
 0x6e9   :  { %v3968_v10 = vadd.f32 %v3967_v17, %v3879_v14  ;;  %v4147_v55 = vsel %vm2002_vm7, %v4100_v46, %v4146_v24 }
 0x6ea   :  { %v3793_v36 = vadd.f32 %v3792_v44, %v3704_v22 }
 0x6eb   :  { %v4110_v39 = vmax.f32 %v3966_v56, %v3968_v10 }
 0x6ee   :  { %v3881_v63 = vpop.f32.mrf.mxu2  ;;  %v3970_v48 = vpop.f32.mrf.mxu3 }
 0x6ef   :  { %v3705_v11 = vpop.f32.mrf.mxu0  ;;  %v3882_v12 = vadd.f32 %v3881_v63, %v3793_v36  ;;  %v3794_v52 = vpop.f32.mrf.mxu1 }
 0x6f0   :  { %v3706_v60 = vadd.f32 %v3705_v11, %v6804_v6 }
 0x6f1   :  { %v3971_v43 = vadd.f32 %v3970_v48, %v3882_v12 }
 0x6f2   :  { %v3795_v34 = vadd.f32 %v3794_v52, %v3706_v60 }
 0x6f3   :  { %v4111_v59 = vmax.f32 %v4110_v39, %v3971_v43 }
 0x6f6   :  { %v3883_v40 = vpop.f32.mrf.mxu2  ;;  %v3972_v38 = vpop.f32.mrf.mxu3 }
 0x6f7   :  { %v3884_v32 = vadd.f32 %v3883_v40, %v3795_v34 }
 0x6f9   :  { %v3973_v9 = vadd.f32 %v3972_v38, %v3884_v32 }
 0x6fb   :  { %v4112_v3 = vmax.f32 %v4111_v59, %v3973_v9 }
 0x6fd   :  { %v4113_v37 = vrot.slane %v4112_v3, 4 }
 0x6ff   :  { %v4114_v7 = vmax.f32 %v4112_v3, %v4113_v37 }
 0x701   :  { %v4115_v53 = vrot.slane %v4114_v7, 2 }
 0x703   :  { %v4116_v6 = vmax.f32 %v4114_v7, %v4115_v53 }
 0x705   :  { %v4117_v20 = vrot.slane %v4116_v6, 1 }
 0x707   :  { %v4118_v26 = vmax.f32 %v4116_v6, %v4117_v20 }
 0x709   :  { %v4148_v21 = vsel %vm2004_vm8, %v4118_v26, %v4147_v55 }
 0x70a   :  { %4152 = vst [vmem:[#allocation8 + $0x8] sm:$0xff] %v4148_v21 }
 0x70b   :  { %4163 = dma.vmem_to_hbm [thread:$0]  %s4159_s10, 256, %s4161_s12, [#allocation4]  }
 0x70c   :  { %5336 = dma.done.wait [#allocation4], 256  }
 0x70d   :  { %5337 = vsyncadd [#allocation4], 4294967040 }
 0x70e   :  { %4168 = vsyncpa [#allocation3], 1 }
 0x70f   :  { %4169 = vsyncpa [#allocation6], 1 }
 0x710   :  { %4170 = vsyncpa [#allocation4], 1 }

</bundles_post_ra>
